<compile_context>
chip_gen: v7x
topology: tpu7x:2x2x1
jax: 0.10.0
libtpu: 0.0.40
codegen_flags: <defaults>
</compile_context>

<pallas_src>
import jax
import jax.numpy as jnp
from jax.experimental import pallas as pl
from jax.experimental.pallas import tpu as pltpu


# conv2 3x3 tap row offsets on the 28-wide conv1 row grid (tap t = ky*3 + kx).
_TAP_OFFSETS = tuple(ky * 28 + kx for ky in range(3) for kx in range(3))


# ---------------------------------------------------------------------------
# Host-side layout prep
# ---------------------------------------------------------------------------

def _conv1_im2col(x_nchw):
    """(B, 1, 28, 28) -> (B*784, 9) bf16 patches; row = b*784 + y*28 + x, col = ky*3+kx."""
    B = x_nchw.shape[0]
    xs = x_nchw.reshape(B, 28, 28)
    xp = jnp.pad(xs, ((0, 0), (0, 2), (0, 2)))      # taps past the edge are never used
    taps = [xp[:, ky:ky + 28, kx:kx + 28] for ky in range(3) for kx in range(3)]
    return jnp.stack(taps, axis=-1).reshape(B * 784, 9).astype(jnp.bfloat16)


# ---------------------------------------------------------------------------
# Kernels
# ---------------------------------------------------------------------------

def conv_pool_kernel(x9_ref, w1_ref, b1_ref, w2_ref, b2_ref, o_ref,
                     h1_ref, p_ref, h2_ref):
    # x9_ref : (BT*784, 9)    bf16  conv1 im2col patches, rows = (b, y, x) on 28x28
    # w1_ref : (9, 32)        bf16  conv1 weight (tap, cout)
    # b1_ref : (1, 32)        f32
    # w2_ref : (288, 64)      bf16  conv2 weight (tap*32 + cin, cout)
    # b2_ref : (1, 64)        f32
    # o_ref  : (BT*72, 128)   bf16  pooled activations, lane-dense:
    #                               row b*72+r, lanes [0,64)   = pooled pos p = r
    #                               row b*72+r, lanes [64,128) = pooled pos p = r + 72
    # h1_ref : (BT*784+64,32) f32   conv1+relu scratch (64 zero tail rows for shifts)
    # p_ref  : (BT*784, 288)  bf16  conv2 im2col of h1 (9 row-shifted copies on lanes)
    # h2_ref : (BT*784, 64)   f32   relu(conv2 + b2)
    n = x9_ref.shape[0]
    bt = n // 784

    # ---- conv1 (1 -> 32, 3x3, valid): one MXU matmul, bias + relu on the VPU.
    h1 = jnp.dot(x9_ref[...], w1_ref[...], preferred_element_type=jnp.float32)
    h1_ref[0:n, :] = jnp.maximum(h1 + b1_ref[...], 0.0)
    h1_ref[n:n + 64, :] = jnp.zeros((64, 32), jnp.float32)   # tail rows: never selected

    # ---- conv2 (32 -> 64, 3x3, valid): build the K=288 im2col operand once, then a
    #      single MXU matmul (replaces 9 K=32 matmuls + VPU accumulation).
    for t, k in enumerate(_TAP_OFFSETS):
        p_ref[:, 32 * t:32 * (t + 1)] = h1_ref[k:k + n, :].astype(jnp.bfloat16)
    acc = jnp.dot(p_ref[...], w2_ref[...], preferred_element_type=jnp.float32)
    # Rows with y > 23 or x > 23 are garbage-but-finite; they are never gathered below.
    h2_ref[...] = jnp.maximum(acc + b2_ref[...], 0.0)

    # ---- 2x2 (stride 2) max-pool + compaction: strided sublane gathers of the four
    #      window rows per pooled position (no selector matmul, no full-image pool).
    for b in range(bt):
        top, bot = [], []
        for ph in range(12):
            base = b * 784 + 56 * ph
            r00 = h2_ref[pl.ds(base + 0, 12, stride=2), :]    # (y=2ph,   x=2pw)
            r01 = h2_ref[pl.ds(base + 1, 12, stride=2), :]    # (y=2ph,   x=2pw+1)
            r10 = h2_ref[pl.ds(base + 28, 12, stride=2), :]   # (y=2ph+1, x=2pw)
            r11 = h2_ref[pl.ds(base + 29, 12, stride=2), :]   # (y=2ph+1, x=2pw+1)
            pooled = jnp.maximum(jnp.maximum(r00, r01), jnp.maximum(r10, r11))
            (top if ph < 6 else bot).append(pooled)           # (12, 64) each
        rows = slice(b * 72, (b + 1) * 72)
        o_ref[rows, 0:64] = jnp.concatenate(top, axis=0).astype(jnp.bfloat16)
        o_ref[rows, 64:128] = jnp.concatenate(bot, axis=0).astype(jnp.bfloat16)


def mlp_head_kernel(x_ref, w1_ref, b1_ref, w2_ref, b2_ref, o_ref):
    # x_ref : (BTH, 9216) bf16   flattened pooled activations (kernel's flat order)
    # w1_ref: (9216, 128) bf16   fc1 weight, rows pre-permuted to that order
    # w2_ref: (128, 128)  bf16   fc2 weight zero-padded to 128 lane-dense columns
    h = jnp.dot(x_ref[...], w1_ref[...], preferred_element_type=jnp.float32)
    h = jnp.maximum(h + b1_ref[...], 0.0).astype(jnp.bfloat16)            # fc1 + relu
    o_ref[...] = (jnp.dot(h, w2_ref[...], preferred_element_type=jnp.float32)
                  + b2_ref[...])


# ---------------------------------------------------------------------------
# Pallas wrappers
# ---------------------------------------------------------------------------

def _conv_batch_tile(batch):
    # Largest tile of {8,4,2,1} that divides the batch while keeping >=2 grid steps
    # (so v7x's two TensorCores both get work); falls back to a single step for B==1.
    for cand in (8, 4, 2, 1):
        if batch % cand == 0 and batch // cand >= 2:
            return cand
    return batch


def conv_pool(x9, w1, b1, w2, b2, batch):
    BT = _conv_batch_tile(batch)
    return pl.pallas_call(
        conv_pool_kernel,
        out_shape=jax.ShapeDtypeStruct((batch * 72, 128), jnp.bfloat16),
        grid=(batch // BT,),
        in_specs=[
            pl.BlockSpec((BT * 784, 9), lambda i: (i, 0)),
            pl.BlockSpec((9, 32), lambda i: (0, 0)),
            pl.BlockSpec((1, 32), lambda i: (0, 0)),
            pl.BlockSpec((288, 64), lambda i: (0, 0)),
            pl.BlockSpec((1, 64), lambda i: (0, 0)),
        ],
        out_specs=pl.BlockSpec((BT * 72, 128), lambda i: (i, 0)),
        scratch_shapes=[
            pltpu.VMEM((BT * 784 + 64, 32), jnp.float32),    # conv1+relu (+ zero tail)
            pltpu.VMEM((BT * 784, 288), jnp.bfloat16),       # conv2 im2col operand
            pltpu.VMEM((BT * 784, 64), jnp.float32),         # relu(conv2 + b2)
        ],
        compiler_params=pltpu.CompilerParams(
            dimension_semantics=("parallel",),
            vmem_limit_bytes=48 * 1024 * 1024),
    )(x9, w1, b1, w2, b2)


def _head_batch_tile(bp):
    if bp < 8:
        return bp
    bth = 8
    for cand in (128, 64, 32, 16, 8):
        if bp % cand == 0:
            bth = cand
            break
    if bp // bth < 2 and bth >= 16:     # >=2 grid steps when possible (v7x: 2 TCs)
        bth //= 2
    return bth


def mlp_head(flat, w1, b1, w2, b2):
    B = flat.shape[0]
    Bp = ((B + 7) // 8) * 8                       # pad batch to a sublane multiple
    if Bp != B:
        flat = jnp.concatenate(
            [flat, jnp.zeros((Bp - B, flat.shape[1]), flat.dtype)], axis=0)
    BTH = _head_batch_tile(Bp)                    # capped at 128 rows: fits v7x VMEM
    out = pl.pallas_call(
        mlp_head_kernel,
        out_shape=jax.ShapeDtypeStruct((Bp, 128), jnp.float32),
        grid=(Bp // BTH,),
        in_specs=[
            pl.BlockSpec((BTH, 9216), lambda i: (i, 0)),
            pl.BlockSpec((9216, 128), lambda i: (0, 0)),
            pl.BlockSpec((1, 128), lambda i: (0, 0)),
            pl.BlockSpec((128, 128), lambda i: (0, 0)),
            pl.BlockSpec((1, 128), lambda i: (0, 0)),
        ],
        out_specs=pl.BlockSpec((BTH, 128), lambda i: (i, 0)),
        compiler_params=pltpu.CompilerParams(
            dimension_semantics=("parallel",),
            vmem_limit_bytes=48 * 1024 * 1024),
    )(flat, w1, b1, w2, b2)
    return out[:B]


# ---------------------------------------------------------------------------
# Full forward
# ---------------------------------------------------------------------------

def net_forward(x_nchw, params):
    # x_nchw: (B, 1, 28, 28) float32 (PyTorch NCHW convention).
    B = x_nchw.shape[0]
    x9 = _conv1_im2col(x_nchw)                                   # (B*784, 9) bf16
    pooled = conv_pool(x9, params["w1"], params["b1"],
                       params["w2"], params["b2"], B)            # (B*72, 128) bf16
    # dropout1 (p=0.25) / dropout2 (p=0.5): identity at inference.
    flat = pooled.reshape(B, 9216)      # same memory order; fc1_w rows pre-permuted
    logits = mlp_head(flat, params["fc1_w"], params["fc1_b"],
                      params["fc2_w"], params["fc2_b"])          # (B, 128) lane-dense
    return logits[:, :10]


def init_params(key):
    # Deterministic synthetic parameters in PyTorch layouts, then converted to the
    # kernels' layouts (a real checkpoint would convert the same way).
    ks = jax.random.split(key, 6)
    conv1_w = jax.random.normal(ks[0], (32, 1, 3, 3), jnp.float32) * 0.10   # OIHW
    conv1_b = jax.random.normal(ks[1], (32,), jnp.float32) * 0.10
    conv2_w = jax.random.normal(ks[2], (64, 32, 3, 3), jnp.float32) * 0.05  # OIHW
    conv2_b = jax.random.normal(ks[3], (64,), jnp.float32) * 0.05
    fc1_w = jax.random.normal(ks[4], (128, 9216), jnp.float32) * 0.02       # (out, in)
    fc1_b = jnp.zeros((128,), jnp.float32)
    fc2_w = jax.random.normal(ks[5], (10, 128), jnp.float32) * 0.05         # (out, in)
    fc2_b = jnp.zeros((10,), jnp.float32)

    # conv1: OIHW -> (tap = ky*3+kx, cout)
    w1 = jnp.transpose(conv1_w.reshape(32, 9), (1, 0))                      # (9, 32)
    # conv2: OIHW -> (tap*32 + cin, cout) to match the in-kernel im2col lane order.
    w2 = jnp.transpose(conv2_w, (2, 3, 1, 0)).reshape(288, 64)
    # fc1: torch flatten order of a (64,12,12) map is c*144 + p (p = 12*ph + pw).
    # Kernel flat order is f = r*128 + half*64 + c with p = half*72 + r.
    fc1 = fc1_w.reshape(128, 64, 2, 72)                     # (out, c, half, r)
    fc1 = jnp.transpose(fc1, (3, 2, 1, 0)).reshape(9216, 128)
    # fc2: pad 10 -> 128 output columns for a lane-dense store; wrapper slices [:, :10].
    fc2 = jnp.zeros((128, 128), jnp.float32).at[:, :10].set(jnp.transpose(fc2_w))
    fc2_bp = jnp.zeros((1, 128), jnp.float32).at[:, :10].set(fc2_b[None, :])

    return {
        "w1": w1.astype(jnp.bfloat16),
        "b1": conv1_b.reshape(1, 32),
        "w2": w2.astype(jnp.bfloat16),
        "b2": conv2_b.reshape(1, 64),
        "fc1_w": fc1.astype(jnp.bfloat16),
        "fc1_b": fc1_b.reshape(1, 128),
        "fc2_w": fc2.astype(jnp.bfloat16),
        "fc2_b": fc2_bp,
    }


if __name__ == "__main__":
    key = jax.random.PRNGKey(0)
    k_x, k_p = jax.random.split(key)
    # Spatial size is fixed at 28x28 by fc1's 9216 = 64*12*12 input features.
    x = jax.random.normal(k_x, (2, 1, 28, 28), jnp.float32)
    params = init_params(k_p)

    fwd = jax.jit(net_forward)
    out = jax.block_until_ready(fwd(x, params))

    assert out.shape == (2, 10), out.shape
    assert bool(jnp.all(jnp.isfinite(out)))
    print("KERNEL_OK")
</pallas_src>

<mosaic_0001>
module attributes {stable_mosaic.version = 11 : i64} {
  func.func @conv_pool_kernel(%arg0: i32, %arg1: memref<784x9xbf16, #tpu.memory_space<vmem>>, %arg2: memref<9x32xbf16, #tpu.memory_space<vmem>>, %arg3: memref<1x32xf32, #tpu.memory_space<vmem>>, %arg4: memref<288x64xbf16, #tpu.memory_space<vmem>>, %arg5: memref<1x64xf32, #tpu.memory_space<vmem>>, %arg6: memref<72x128xbf16, #tpu.memory_space<vmem>>, %arg7: memref<848x32xf32, #tpu.memory_space<vmem>>, %arg8: memref<784x288xbf16, #tpu.memory_space<vmem>>, %arg9: memref<784x64xf32, #tpu.memory_space<vmem>>) attributes {dimension_semantics = [#tpu.dimension_semantics<parallel>], iteration_bounds = array<i64: 2>, scalar_prefetch = 0 : i64, scratch_operands = 3 : i64, tpu.core_type = #tpu.core_type<tc>, window_params = [{transform_indices = @transform_0, window_bounds = array<i64: 784, 9>}, {pipeline_mode = #tpu.pipeline_mode<synchronous>, transform_indices = @transform_1, window_bounds = array<i64: 9, 32>}, {pipeline_mode = #tpu.pipeline_mode<synchronous>, transform_indices = @transform_2, window_bounds = array<i64: 1, 32>}, {pipeline_mode = #tpu.pipeline_mode<synchronous>, transform_indices = @transform_3, window_bounds = array<i64: 288, 64>}, {pipeline_mode = #tpu.pipeline_mode<synchronous>, transform_indices = @transform_4, window_bounds = array<i64: 1, 64>}, {transform_indices = @transform_5, window_bounds = array<i64: 72, 128>}]} {
    %c0 = arith.constant 0 : index
    %c0_0 = arith.constant 0 : index
    %0 = vector.load %arg1[%c0, %c0_0] : memref<784x9xbf16, #tpu.memory_space<vmem>>, vector<784x9xbf16>
    %c0_1 = arith.constant 0 : index
    %c0_2 = arith.constant 0 : index
    %1 = vector.load %arg2[%c0_1, %c0_2] : memref<9x32xbf16, #tpu.memory_space<vmem>>, vector<9x32xbf16>
    %cst = arith.constant dense<0.000000e+00> : vector<784x32xf32>
    %2 = tpu.matmul %0, %1, %cst {dimension_numbers = #tpu.dot_dimension_numbers<[1], [0], [0], [1], [0, 0, 1, 1], [], []>} : vector<784x9xbf16>, vector<9x32xbf16>, vector<784x32xf32> -> vector<784x32xf32>
    %c0_3 = arith.constant 0 : index
    %c0_4 = arith.constant 0 : index
    %3 = vector.load %arg3[%c0_3, %c0_4] : memref<1x32xf32, #tpu.memory_space<vmem>>, vector<1x32xf32>
    %4 = vector.broadcast %3 : vector<1x32xf32> to vector<784x32xf32>
    %5 = arith.addf %2, %4 : vector<784x32xf32>
    %cst_5 = arith.constant 0.000000e+00 : f32
    %6 = vector.broadcast %cst_5 : f32 to vector<784x32xf32>
    %7 = arith.maximumf %5, %6 : vector<784x32xf32>
    %c0_6 = arith.constant 0 : index
    %c0_7 = arith.constant 0 : index
    %8 = vector.load %arg7[%c0_6, %c0_7] : memref<848x32xf32, #tpu.memory_space<vmem>>, vector<784x32xf32>
    tpu.vector_store %arg7[%c0_6, %c0_7], %7 {strides = array<i32>} : memref<848x32xf32, #tpu.memory_space<vmem>>, vector<784x32xf32>,
    %cst_8 = arith.constant 0.000000e+00 : f32
    %9 = vector.broadcast %cst_8 : f32 to vector<64x32xf32>
    %c784 = arith.constant 784 : index
    %c0_9 = arith.constant 0 : index
    %10 = vector.load %arg7[%c784, %c0_9] : memref<848x32xf32, #tpu.memory_space<vmem>>, vector<64x32xf32>
    tpu.vector_store %arg7[%c784, %c0_9], %9 {strides = array<i32>} : memref<848x32xf32, #tpu.memory_space<vmem>>, vector<64x32xf32>,
    %c0_10 = arith.constant 0 : index
    %c0_11 = arith.constant 0 : index
    %11 = vector.load %arg7[%c0_10, %c0_11] : memref<848x32xf32, #tpu.memory_space<vmem>>, vector<784x32xf32>
    %12 = arith.truncf %11 : vector<784x32xf32> to vector<784x32xbf16>
    %c0_12 = arith.constant 0 : index
    %c0_13 = arith.constant 0 : index
    %13 = vector.load %arg8[%c0_12, %c0_13] : memref<784x288xbf16, #tpu.memory_space<vmem>>, vector<784x32xbf16>
    tpu.vector_store %arg8[%c0_12, %c0_13], %12 {strides = array<i32>} : memref<784x288xbf16, #tpu.memory_space<vmem>>, vector<784x32xbf16>,
    %c1 = arith.constant 1 : index
    %c0_14 = arith.constant 0 : index
    %14 = vector.load %arg7[%c1, %c0_14] : memref<848x32xf32, #tpu.memory_space<vmem>>, vector<784x32xf32>
    %15 = arith.truncf %14 : vector<784x32xf32> to vector<784x32xbf16>
    %c0_15 = arith.constant 0 : index
    %c32 = arith.constant 32 : index
    %16 = vector.load %arg8[%c0_15, %c32] : memref<784x288xbf16, #tpu.memory_space<vmem>>, vector<784x32xbf16>
    tpu.vector_store %arg8[%c0_15, %c32], %15 {strides = array<i32>} : memref<784x288xbf16, #tpu.memory_space<vmem>>, vector<784x32xbf16>,
    %c2 = arith.constant 2 : index
    %c0_16 = arith.constant 0 : index
    %17 = vector.load %arg7[%c2, %c0_16] : memref<848x32xf32, #tpu.memory_space<vmem>>, vector<784x32xf32>
    %18 = arith.truncf %17 : vector<784x32xf32> to vector<784x32xbf16>
    %c0_17 = arith.constant 0 : index
    %c64 = arith.constant 64 : index
    %19 = vector.load %arg8[%c0_17, %c64] : memref<784x288xbf16, #tpu.memory_space<vmem>>, vector<784x32xbf16>
    tpu.vector_store %arg8[%c0_17, %c64], %18 {strides = array<i32>} : memref<784x288xbf16, #tpu.memory_space<vmem>>, vector<784x32xbf16>,
    %c28 = arith.constant 28 : index
    %c0_18 = arith.constant 0 : index
    %20 = vector.load %arg7[%c28, %c0_18] : memref<848x32xf32, #tpu.memory_space<vmem>>, vector<784x32xf32>
    %21 = arith.truncf %20 : vector<784x32xf32> to vector<784x32xbf16>
    %c0_19 = arith.constant 0 : index
    %c96 = arith.constant 96 : index
    %22 = vector.load %arg8[%c0_19, %c96] : memref<784x288xbf16, #tpu.memory_space<vmem>>, vector<784x32xbf16>
    tpu.vector_store %arg8[%c0_19, %c96], %21 {strides = array<i32>} : memref<784x288xbf16, #tpu.memory_space<vmem>>, vector<784x32xbf16>,
    %c29 = arith.constant 29 : index
    %c0_20 = arith.constant 0 : index
    %23 = vector.load %arg7[%c29, %c0_20] : memref<848x32xf32, #tpu.memory_space<vmem>>, vector<784x32xf32>
    %24 = arith.truncf %23 : vector<784x32xf32> to vector<784x32xbf16>
    %c0_21 = arith.constant 0 : index
    %c128 = arith.constant 128 : index
    %25 = vector.load %arg8[%c0_21, %c128] : memref<784x288xbf16, #tpu.memory_space<vmem>>, vector<784x32xbf16>
    tpu.vector_store %arg8[%c0_21, %c128], %24 {strides = array<i32>} : memref<784x288xbf16, #tpu.memory_space<vmem>>, vector<784x32xbf16>,
    %c30 = arith.constant 30 : index
    %c0_22 = arith.constant 0 : index
    %26 = vector.load %arg7[%c30, %c0_22] : memref<848x32xf32, #tpu.memory_space<vmem>>, vector<784x32xf32>
    %27 = arith.truncf %26 : vector<784x32xf32> to vector<784x32xbf16>
    %c0_23 = arith.constant 0 : index
    %c160 = arith.constant 160 : index
    %28 = vector.load %arg8[%c0_23, %c160] : memref<784x288xbf16, #tpu.memory_space<vmem>>, vector<784x32xbf16>
    tpu.vector_store %arg8[%c0_23, %c160], %27 {strides = array<i32>} : memref<784x288xbf16, #tpu.memory_space<vmem>>, vector<784x32xbf16>,
    %c56 = arith.constant 56 : index
    %c0_24 = arith.constant 0 : index
    %29 = vector.load %arg7[%c56, %c0_24] : memref<848x32xf32, #tpu.memory_space<vmem>>, vector<784x32xf32>
    %30 = arith.truncf %29 : vector<784x32xf32> to vector<784x32xbf16>
    %c0_25 = arith.constant 0 : index
    %c192 = arith.constant 192 : index
    %31 = vector.load %arg8[%c0_25, %c192] : memref<784x288xbf16, #tpu.memory_space<vmem>>, vector<784x32xbf16>
    tpu.vector_store %arg8[%c0_25, %c192], %30 {strides = array<i32>} : memref<784x288xbf16, #tpu.memory_space<vmem>>, vector<784x32xbf16>,
    %c57 = arith.constant 57 : index
    %c0_26 = arith.constant 0 : index
    %32 = vector.load %arg7[%c57, %c0_26] : memref<848x32xf32, #tpu.memory_space<vmem>>, vector<784x32xf32>
    %33 = arith.truncf %32 : vector<784x32xf32> to vector<784x32xbf16>
    %c0_27 = arith.constant 0 : index
    %c224 = arith.constant 224 : index
    %34 = vector.load %arg8[%c0_27, %c224] : memref<784x288xbf16, #tpu.memory_space<vmem>>, vector<784x32xbf16>
    tpu.vector_store %arg8[%c0_27, %c224], %33 {strides = array<i32>} : memref<784x288xbf16, #tpu.memory_space<vmem>>, vector<784x32xbf16>,
    %c58 = arith.constant 58 : index
    %c0_28 = arith.constant 0 : index
    %35 = vector.load %arg7[%c58, %c0_28] : memref<848x32xf32, #tpu.memory_space<vmem>>, vector<784x32xf32>
    %36 = arith.truncf %35 : vector<784x32xf32> to vector<784x32xbf16>
    %c0_29 = arith.constant 0 : index
    %c256 = arith.constant 256 : index
    %37 = vector.load %arg8[%c0_29, %c256] : memref<784x288xbf16, #tpu.memory_space<vmem>>, vector<784x32xbf16>
    tpu.vector_store %arg8[%c0_29, %c256], %36 {strides = array<i32>} : memref<784x288xbf16, #tpu.memory_space<vmem>>, vector<784x32xbf16>,
    %c0_30 = arith.constant 0 : index
    %c0_31 = arith.constant 0 : index
    %38 = vector.load %arg8[%c0_30, %c0_31] : memref<784x288xbf16, #tpu.memory_space<vmem>>, vector<784x288xbf16>
    %c0_32 = arith.constant 0 : index
    %c0_33 = arith.constant 0 : index
    %39 = vector.load %arg4[%c0_32, %c0_33] : memref<288x64xbf16, #tpu.memory_space<vmem>>, vector<288x64xbf16>
    %cst_34 = arith.constant dense<0.000000e+00> : vector<784x64xf32>
    %40 = tpu.matmul %38, %39, %cst_34 {dimension_numbers = #tpu.dot_dimension_numbers<[1], [0], [0], [1], [0, 0, 1, 1], [], []>} : vector<784x288xbf16>, vector<288x64xbf16>, vector<784x64xf32> -> vector<784x64xf32>
    %c0_35 = arith.constant 0 : index
    %c0_36 = arith.constant 0 : index
    %41 = vector.load %arg5[%c0_35, %c0_36] : memref<1x64xf32, #tpu.memory_space<vmem>>, vector<1x64xf32>
    %42 = vector.broadcast %41 : vector<1x64xf32> to vector<784x64xf32>
    %43 = arith.addf %40, %42 : vector<784x64xf32>
    %cst_37 = arith.constant 0.000000e+00 : f32
    %44 = vector.broadcast %cst_37 : f32 to vector<784x64xf32>
    %45 = arith.maximumf %43, %44 : vector<784x64xf32>
    %c0_38 = arith.constant 0 : index
    %c0_39 = arith.constant 0 : index
    %46 = vector.load %arg9[%c0_38, %c0_39] : memref<784x64xf32, #tpu.memory_space<vmem>>, vector<784x64xf32>
    tpu.vector_store %arg9[%c0_38, %c0_39], %45 {strides = array<i32>} : memref<784x64xf32, #tpu.memory_space<vmem>>, vector<784x64xf32>,
    %c0_40 = arith.constant 0 : index
    %c0_41 = arith.constant 0 : index
    %47 = tpu.strided_load %arg9[%c0_40, %c0_41] {strides = array<i32: 2, 1>} : memref<784x64xf32, #tpu.memory_space<vmem>>, vector<12x64xf32>
    %c1_42 = arith.constant 1 : index
    %c0_43 = arith.constant 0 : index
    %48 = tpu.strided_load %arg9[%c1_42, %c0_43] {strides = array<i32: 2, 1>} : memref<784x64xf32, #tpu.memory_space<vmem>>, vector<12x64xf32>
    %c28_44 = arith.constant 28 : index
    %c0_45 = arith.constant 0 : index
    %49 = tpu.strided_load %arg9[%c28_44, %c0_45] {strides = array<i32: 2, 1>} : memref<784x64xf32, #tpu.memory_space<vmem>>, vector<12x64xf32>
    %c29_46 = arith.constant 29 : index
    %c0_47 = arith.constant 0 : index
    %50 = tpu.strided_load %arg9[%c29_46, %c0_47] {strides = array<i32: 2, 1>} : memref<784x64xf32, #tpu.memory_space<vmem>>, vector<12x64xf32>
    %51 = arith.maximumf %47, %48 : vector<12x64xf32>
    %52 = arith.maximumf %49, %50 : vector<12x64xf32>
    %53 = arith.maximumf %51, %52 : vector<12x64xf32>
    %c56_48 = arith.constant 56 : index
    %c0_49 = arith.constant 0 : index
    %54 = tpu.strided_load %arg9[%c56_48, %c0_49] {strides = array<i32: 2, 1>} : memref<784x64xf32, #tpu.memory_space<vmem>>, vector<12x64xf32>
    %c57_50 = arith.constant 57 : index
    %c0_51 = arith.constant 0 : index
    %55 = tpu.strided_load %arg9[%c57_50, %c0_51] {strides = array<i32: 2, 1>} : memref<784x64xf32, #tpu.memory_space<vmem>>, vector<12x64xf32>
    %c84 = arith.constant 84 : index
    %c0_52 = arith.constant 0 : index
    %56 = tpu.strided_load %arg9[%c84, %c0_52] {strides = array<i32: 2, 1>} : memref<784x64xf32, #tpu.memory_space<vmem>>, vector<12x64xf32>
    %c85 = arith.constant 85 : index
    %c0_53 = arith.constant 0 : index
    %57 = tpu.strided_load %arg9[%c85, %c0_53] {strides = array<i32: 2, 1>} : memref<784x64xf32, #tpu.memory_space<vmem>>, vector<12x64xf32>
    %58 = arith.maximumf %54, %55 : vector<12x64xf32>
    %59 = arith.maximumf %56, %57 : vector<12x64xf32>
    %60 = arith.maximumf %58, %59 : vector<12x64xf32>
    %c112 = arith.constant 112 : index
    %c0_54 = arith.constant 0 : index
    %61 = tpu.strided_load %arg9[%c112, %c0_54] {strides = array<i32: 2, 1>} : memref<784x64xf32, #tpu.memory_space<vmem>>, vector<12x64xf32>
    %c113 = arith.constant 113 : index
    %c0_55 = arith.constant 0 : index
    %62 = tpu.strided_load %arg9[%c113, %c0_55] {strides = array<i32: 2, 1>} : memref<784x64xf32, #tpu.memory_space<vmem>>, vector<12x64xf32>
    %c140 = arith.constant 140 : index
    %c0_56 = arith.constant 0 : index
    %63 = tpu.strided_load %arg9[%c140, %c0_56] {strides = array<i32: 2, 1>} : memref<784x64xf32, #tpu.memory_space<vmem>>, vector<12x64xf32>
    %c141 = arith.constant 141 : index
    %c0_57 = arith.constant 0 : index
    %64 = tpu.strided_load %arg9[%c141, %c0_57] {strides = array<i32: 2, 1>} : memref<784x64xf32, #tpu.memory_space<vmem>>, vector<12x64xf32>
    %65 = arith.maximumf %61, %62 : vector<12x64xf32>
    %66 = arith.maximumf %63, %64 : vector<12x64xf32>
    %67 = arith.maximumf %65, %66 : vector<12x64xf32>
    %c168 = arith.constant 168 : index
    %c0_58 = arith.constant 0 : index
    %68 = tpu.strided_load %arg9[%c168, %c0_58] {strides = array<i32: 2, 1>} : memref<784x64xf32, #tpu.memory_space<vmem>>, vector<12x64xf32>
    %c169 = arith.constant 169 : index
    %c0_59 = arith.constant 0 : index
    %69 = tpu.strided_load %arg9[%c169, %c0_59] {strides = array<i32: 2, 1>} : memref<784x64xf32, #tpu.memory_space<vmem>>, vector<12x64xf32>
    %c196 = arith.constant 196 : index
    %c0_60 = arith.constant 0 : index
    %70 = tpu.strided_load %arg9[%c196, %c0_60] {strides = array<i32: 2, 1>} : memref<784x64xf32, #tpu.memory_space<vmem>>, vector<12x64xf32>
    %c197 = arith.constant 197 : index
    %c0_61 = arith.constant 0 : index
    %71 = tpu.strided_load %arg9[%c197, %c0_61] {strides = array<i32: 2, 1>} : memref<784x64xf32, #tpu.memory_space<vmem>>, vector<12x64xf32>
    %72 = arith.maximumf %68, %69 : vector<12x64xf32>
    %73 = arith.maximumf %70, %71 : vector<12x64xf32>
    %74 = arith.maximumf %72, %73 : vector<12x64xf32>
    %c224_62 = arith.constant 224 : index
    %c0_63 = arith.constant 0 : index
    %75 = tpu.strided_load %arg9[%c224_62, %c0_63] {strides = array<i32: 2, 1>} : memref<784x64xf32, #tpu.memory_space<vmem>>, vector<12x64xf32>
    %c225 = arith.constant 225 : index
    %c0_64 = arith.constant 0 : index
    %76 = tpu.strided_load %arg9[%c225, %c0_64] {strides = array<i32: 2, 1>} : memref<784x64xf32, #tpu.memory_space<vmem>>, vector<12x64xf32>
    %c252 = arith.constant 252 : index
    %c0_65 = arith.constant 0 : index
    %77 = tpu.strided_load %arg9[%c252, %c0_65] {strides = array<i32: 2, 1>} : memref<784x64xf32, #tpu.memory_space<vmem>>, vector<12x64xf32>
    %c253 = arith.constant 253 : index
    %c0_66 = arith.constant 0 : index
    %78 = tpu.strided_load %arg9[%c253, %c0_66] {strides = array<i32: 2, 1>} : memref<784x64xf32, #tpu.memory_space<vmem>>, vector<12x64xf32>
    %79 = arith.maximumf %75, %76 : vector<12x64xf32>
    %80 = arith.maximumf %77, %78 : vector<12x64xf32>
    %81 = arith.maximumf %79, %80 : vector<12x64xf32>
    %c280 = arith.constant 280 : index
    %c0_67 = arith.constant 0 : index
    %82 = tpu.strided_load %arg9[%c280, %c0_67] {strides = array<i32: 2, 1>} : memref<784x64xf32, #tpu.memory_space<vmem>>, vector<12x64xf32>
    %c281 = arith.constant 281 : index
    %c0_68 = arith.constant 0 : index
    %83 = tpu.strided_load %arg9[%c281, %c0_68] {strides = array<i32: 2, 1>} : memref<784x64xf32, #tpu.memory_space<vmem>>, vector<12x64xf32>
    %c308 = arith.constant 308 : index
    %c0_69 = arith.constant 0 : index
    %84 = tpu.strided_load %arg9[%c308, %c0_69] {strides = array<i32: 2, 1>} : memref<784x64xf32, #tpu.memory_space<vmem>>, vector<12x64xf32>
    %c309 = arith.constant 309 : index
    %c0_70 = arith.constant 0 : index
    %85 = tpu.strided_load %arg9[%c309, %c0_70] {strides = array<i32: 2, 1>} : memref<784x64xf32, #tpu.memory_space<vmem>>, vector<12x64xf32>
    %86 = arith.maximumf %82, %83 : vector<12x64xf32>
    %87 = arith.maximumf %84, %85 : vector<12x64xf32>
    %88 = arith.maximumf %86, %87 : vector<12x64xf32>
    %c336 = arith.constant 336 : index
    %c0_71 = arith.constant 0 : index
    %89 = tpu.strided_load %arg9[%c336, %c0_71] {strides = array<i32: 2, 1>} : memref<784x64xf32, #tpu.memory_space<vmem>>, vector<12x64xf32>
    %c337 = arith.constant 337 : index
    %c0_72 = arith.constant 0 : index
    %90 = tpu.strided_load %arg9[%c337, %c0_72] {strides = array<i32: 2, 1>} : memref<784x64xf32, #tpu.memory_space<vmem>>, vector<12x64xf32>
    %c364 = arith.constant 364 : index
    %c0_73 = arith.constant 0 : index
    %91 = tpu.strided_load %arg9[%c364, %c0_73] {strides = array<i32: 2, 1>} : memref<784x64xf32, #tpu.memory_space<vmem>>, vector<12x64xf32>
    %c365 = arith.constant 365 : index
    %c0_74 = arith.constant 0 : index
    %92 = tpu.strided_load %arg9[%c365, %c0_74] {strides = array<i32: 2, 1>} : memref<784x64xf32, #tpu.memory_space<vmem>>, vector<12x64xf32>
    %93 = arith.maximumf %89, %90 : vector<12x64xf32>
    %94 = arith.maximumf %91, %92 : vector<12x64xf32>
    %95 = arith.maximumf %93, %94 : vector<12x64xf32>
    %c392 = arith.constant 392 : index
    %c0_75 = arith.constant 0 : index
    %96 = tpu.strided_load %arg9[%c392, %c0_75] {strides = array<i32: 2, 1>} : memref<784x64xf32, #tpu.memory_space<vmem>>, vector<12x64xf32>
    %c393 = arith.constant 393 : index
    %c0_76 = arith.constant 0 : index
    %97 = tpu.strided_load %arg9[%c393, %c0_76] {strides = array<i32: 2, 1>} : memref<784x64xf32, #tpu.memory_space<vmem>>, vector<12x64xf32>
    %c420 = arith.constant 420 : index
    %c0_77 = arith.constant 0 : index
    %98 = tpu.strided_load %arg9[%c420, %c0_77] {strides = array<i32: 2, 1>} : memref<784x64xf32, #tpu.memory_space<vmem>>, vector<12x64xf32>
    %c421 = arith.constant 421 : index
    %c0_78 = arith.constant 0 : index
    %99 = tpu.strided_load %arg9[%c421, %c0_78] {strides = array<i32: 2, 1>} : memref<784x64xf32, #tpu.memory_space<vmem>>, vector<12x64xf32>
    %100 = arith.maximumf %96, %97 : vector<12x64xf32>
    %101 = arith.maximumf %98, %99 : vector<12x64xf32>
    %102 = arith.maximumf %100, %101 : vector<12x64xf32>
    %c448 = arith.constant 448 : index
    %c0_79 = arith.constant 0 : index
    %103 = tpu.strided_load %arg9[%c448, %c0_79] {strides = array<i32: 2, 1>} : memref<784x64xf32, #tpu.memory_space<vmem>>, vector<12x64xf32>
    %c449 = arith.constant 449 : index
    %c0_80 = arith.constant 0 : index
    %104 = tpu.strided_load %arg9[%c449, %c0_80] {strides = array<i32: 2, 1>} : memref<784x64xf32, #tpu.memory_space<vmem>>, vector<12x64xf32>
    %c476 = arith.constant 476 : index
    %c0_81 = arith.constant 0 : index
    %105 = tpu.strided_load %arg9[%c476, %c0_81] {strides = array<i32: 2, 1>} : memref<784x64xf32, #tpu.memory_space<vmem>>, vector<12x64xf32>
    %c477 = arith.constant 477 : index
    %c0_82 = arith.constant 0 : index
    %106 = tpu.strided_load %arg9[%c477, %c0_82] {strides = array<i32: 2, 1>} : memref<784x64xf32, #tpu.memory_space<vmem>>, vector<12x64xf32>
    %107 = arith.maximumf %103, %104 : vector<12x64xf32>
    %108 = arith.maximumf %105, %106 : vector<12x64xf32>
    %109 = arith.maximumf %107, %108 : vector<12x64xf32>
    %c504 = arith.constant 504 : index
    %c0_83 = arith.constant 0 : index
    %110 = tpu.strided_load %arg9[%c504, %c0_83] {strides = array<i32: 2, 1>} : memref<784x64xf32, #tpu.memory_space<vmem>>, vector<12x64xf32>
    %c505 = arith.constant 505 : index
    %c0_84 = arith.constant 0 : index
    %111 = tpu.strided_load %arg9[%c505, %c0_84] {strides = array<i32: 2, 1>} : memref<784x64xf32, #tpu.memory_space<vmem>>, vector<12x64xf32>
    %c532 = arith.constant 532 : index
    %c0_85 = arith.constant 0 : index
    %112 = tpu.strided_load %arg9[%c532, %c0_85] {strides = array<i32: 2, 1>} : memref<784x64xf32, #tpu.memory_space<vmem>>, vector<12x64xf32>
    %c533 = arith.constant 533 : index
    %c0_86 = arith.constant 0 : index
    %113 = tpu.strided_load %arg9[%c533, %c0_86] {strides = array<i32: 2, 1>} : memref<784x64xf32, #tpu.memory_space<vmem>>, vector<12x64xf32>
    %114 = arith.maximumf %110, %111 : vector<12x64xf32>
    %115 = arith.maximumf %112, %113 : vector<12x64xf32>
    %116 = arith.maximumf %114, %115 : vector<12x64xf32>
    %c560 = arith.constant 560 : index
    %c0_87 = arith.constant 0 : index
    %117 = tpu.strided_load %arg9[%c560, %c0_87] {strides = array<i32: 2, 1>} : memref<784x64xf32, #tpu.memory_space<vmem>>, vector<12x64xf32>
    %c561 = arith.constant 561 : index
    %c0_88 = arith.constant 0 : index
    %118 = tpu.strided_load %arg9[%c561, %c0_88] {strides = array<i32: 2, 1>} : memref<784x64xf32, #tpu.memory_space<vmem>>, vector<12x64xf32>
    %c588 = arith.constant 588 : index
    %c0_89 = arith.constant 0 : index
    %119 = tpu.strided_load %arg9[%c588, %c0_89] {strides = array<i32: 2, 1>} : memref<784x64xf32, #tpu.memory_space<vmem>>, vector<12x64xf32>
    %c589 = arith.constant 589 : index
    %c0_90 = arith.constant 0 : index
    %120 = tpu.strided_load %arg9[%c589, %c0_90] {strides = array<i32: 2, 1>} : memref<784x64xf32, #tpu.memory_space<vmem>>, vector<12x64xf32>
    %121 = arith.maximumf %117, %118 : vector<12x64xf32>
    %122 = arith.maximumf %119, %120 : vector<12x64xf32>
    %123 = arith.maximumf %121, %122 : vector<12x64xf32>
    %c616 = arith.constant 616 : index
    %c0_91 = arith.constant 0 : index
    %124 = tpu.strided_load %arg9[%c616, %c0_91] {strides = array<i32: 2, 1>} : memref<784x64xf32, #tpu.memory_space<vmem>>, vector<12x64xf32>
    %c617 = arith.constant 617 : index
    %c0_92 = arith.constant 0 : index
    %125 = tpu.strided_load %arg9[%c617, %c0_92] {strides = array<i32: 2, 1>} : memref<784x64xf32, #tpu.memory_space<vmem>>, vector<12x64xf32>
    %c644 = arith.constant 644 : index
    %c0_93 = arith.constant 0 : index
    %126 = tpu.strided_load %arg9[%c644, %c0_93] {strides = array<i32: 2, 1>} : memref<784x64xf32, #tpu.memory_space<vmem>>, vector<12x64xf32>
    %c645 = arith.constant 645 : index
    %c0_94 = arith.constant 0 : index
    %127 = tpu.strided_load %arg9[%c645, %c0_94] {strides = array<i32: 2, 1>} : memref<784x64xf32, #tpu.memory_space<vmem>>, vector<12x64xf32>
    %128 = arith.maximumf %124, %125 : vector<12x64xf32>
    %129 = arith.maximumf %126, %127 : vector<12x64xf32>
    %130 = arith.maximumf %128, %129 : vector<12x64xf32>
    %131 = tpu.concatenate %53, %60, %67, %74, %81, %88 in 0 : vector<12x64xf32>, vector<12x64xf32>, vector<12x64xf32>, vector<12x64xf32>, vector<12x64xf32>, vector<12x64xf32> -> vector<72x64xf32>
    %132 = arith.truncf %131 : vector<72x64xf32> to vector<72x64xbf16>
    %c0_95 = arith.constant 0 : index
    %c0_96 = arith.constant 0 : index
    %133 = vector.load %arg6[%c0_95, %c0_96] : memref<72x128xbf16, #tpu.memory_space<vmem>>, vector<72x64xbf16>
    tpu.vector_store %arg6[%c0_95, %c0_96], %132 {strides = array<i32>} : memref<72x128xbf16, #tpu.memory_space<vmem>>, vector<72x64xbf16>,
    %134 = tpu.concatenate %95, %102, %109, %116, %123, %130 in 0 : vector<12x64xf32>, vector<12x64xf32>, vector<12x64xf32>, vector<12x64xf32>, vector<12x64xf32>, vector<12x64xf32> -> vector<72x64xf32>
    %135 = arith.truncf %134 : vector<72x64xf32> to vector<72x64xbf16>
    %c0_97 = arith.constant 0 : index
    %c64_98 = arith.constant 64 : index
    %136 = vector.load %arg6[%c0_97, %c64_98] : memref<72x128xbf16, #tpu.memory_space<vmem>>, vector<72x64xbf16>
    tpu.vector_store %arg6[%c0_97, %c64_98], %135 {strides = array<i32>} : memref<72x128xbf16, #tpu.memory_space<vmem>>, vector<72x64xbf16>,
    return
  }
  func.func @transform_0(%arg0: i32) -> (i32, i32) {
    %c0_i32 = arith.constant 0 : i32
    %c0_i32_0 = arith.constant 0 : i32
    return %arg0, %c0_i32 : i32, i32
  }
  func.func @transform_1(%arg0: i32) -> (i32, i32) {
    %c0_i32 = arith.constant 0 : i32
    %c0_i32_0 = arith.constant 0 : i32
    %c0_i32_1 = arith.constant 0 : i32
    return %c0_i32, %c0_i32_0 : i32, i32
  }
  func.func @transform_2(%arg0: i32) -> (i32, i32) {
    %c0_i32 = arith.constant 0 : i32
    %c0_i32_0 = arith.constant 0 : i32
    %c0_i32_1 = arith.constant 0 : i32
    return %c0_i32, %c0_i32_0 : i32, i32
  }
  func.func @transform_3(%arg0: i32) -> (i32, i32) {
    %c0_i32 = arith.constant 0 : i32
    %c0_i32_0 = arith.constant 0 : i32
    %c0_i32_1 = arith.constant 0 : i32
    return %c0_i32, %c0_i32_0 : i32, i32
  }
  func.func @transform_4(%arg0: i32) -> (i32, i32) {
    %c0_i32 = arith.constant 0 : i32
    %c0_i32_0 = arith.constant 0 : i32
    %c0_i32_1 = arith.constant 0 : i32
    return %c0_i32, %c0_i32_0 : i32, i32
  }
  func.func @transform_5(%arg0: i32) -> (i32, i32) {
    %c0_i32 = arith.constant 0 : i32
    %c0_i32_0 = arith.constant 0 : i32
    return %arg0, %c0_i32 : i32, i32
  }
}

module attributes {stable_mosaic.version = 11 : i64} {
  func.func @mlp_head_kernel(%arg0: i32, %arg1: memref<8x9216xbf16, #tpu.memory_space<vmem>>, %arg2: memref<9216x128xbf16, #tpu.memory_space<vmem>>, %arg3: memref<1x128xf32, #tpu.memory_space<vmem>>, %arg4: memref<128x128xbf16, #tpu.memory_space<vmem>>, %arg5: memref<1x128xf32, #tpu.memory_space<vmem>>, %arg6: memref<8x128xf32, #tpu.memory_space<vmem>>) attributes {dimension_semantics = [#tpu.dimension_semantics<parallel>], iteration_bounds = array<i64: 1>, scalar_prefetch = 0 : i64, scratch_operands = 0 : i64, tpu.core_type = #tpu.core_type<tc>, window_params = [{transform_indices = @transform_0, window_bounds = array<i64: 8, 9216>}, {pipeline_mode = #tpu.pipeline_mode<synchronous>, transform_indices = @transform_1, window_bounds = array<i64: 9216, 128>}, {pipeline_mode = #tpu.pipeline_mode<synchronous>, transform_indices = @transform_2, window_bounds = array<i64: 1, 128>}, {pipeline_mode = #tpu.pipeline_mode<synchronous>, transform_indices = @transform_3, window_bounds = array<i64: 128, 128>}, {pipeline_mode = #tpu.pipeline_mode<synchronous>, transform_indices = @transform_4, window_bounds = array<i64: 1, 128>}, {transform_indices = @transform_5, window_bounds = array<i64: 8, 128>}]} {
    %c0 = arith.constant 0 : index
    %c0_0 = arith.constant 0 : index
    %0 = vector.load %arg1[%c0, %c0_0] : memref<8x9216xbf16, #tpu.memory_space<vmem>>, vector<8x9216xbf16>
    %c0_1 = arith.constant 0 : index
    %c0_2 = arith.constant 0 : index
    %1 = vector.load %arg2[%c0_1, %c0_2] : memref<9216x128xbf16, #tpu.memory_space<vmem>>, vector<9216x128xbf16>
    %cst = arith.constant dense<0.000000e+00> : vector<8x128xf32>
    %2 = tpu.matmul %0, %1, %cst {dimension_numbers = #tpu.dot_dimension_numbers<[1], [0], [0], [1], [0, 0, 1, 1], [], []>} : vector<8x9216xbf16>, vector<9216x128xbf16>, vector<8x128xf32> -> vector<8x128xf32>
    %c0_3 = arith.constant 0 : index
    %c0_4 = arith.constant 0 : index
    %3 = vector.load %arg3[%c0_3, %c0_4] : memref<1x128xf32, #tpu.memory_space<vmem>>, vector<1x128xf32>
    %4 = vector.broadcast %3 : vector<1x128xf32> to vector<8x128xf32>
    %5 = arith.addf %2, %4 : vector<8x128xf32>
    %cst_5 = arith.constant 0.000000e+00 : f32
    %6 = vector.broadcast %cst_5 : f32 to vector<8x128xf32>
    %7 = arith.maximumf %5, %6 : vector<8x128xf32>
    %8 = arith.truncf %7 : vector<8x128xf32> to vector<8x128xbf16>
    %c0_6 = arith.constant 0 : index
    %c0_7 = arith.constant 0 : index
    %9 = vector.load %arg4[%c0_6, %c0_7] : memref<128x128xbf16, #tpu.memory_space<vmem>>, vector<128x128xbf16>
    %cst_8 = arith.constant dense<0.000000e+00> : vector<8x128xf32>
    %10 = tpu.matmul %8, %9, %cst_8 {dimension_numbers = #tpu.dot_dimension_numbers<[1], [0], [0], [1], [0, 0, 1, 1], [], []>} : vector<8x128xbf16>, vector<128x128xbf16>, vector<8x128xf32> -> vector<8x128xf32>
    %c0_9 = arith.constant 0 : index
    %c0_10 = arith.constant 0 : index
    %11 = vector.load %arg5[%c0_9, %c0_10] : memref<1x128xf32, #tpu.memory_space<vmem>>, vector<1x128xf32>
    %12 = vector.broadcast %11 : vector<1x128xf32> to vector<8x128xf32>
    %13 = arith.addf %10, %12 : vector<8x128xf32>
    %c0_11 = arith.constant 0 : index
    %c0_12 = arith.constant 0 : index
    %14 = vector.load %arg6[%c0_11, %c0_12] : memref<8x128xf32, #tpu.memory_space<vmem>>, vector<8x128xf32>
    tpu.vector_store %arg6[%c0_11, %c0_12], %13 {strides = array<i32>} : memref<8x128xf32, #tpu.memory_space<vmem>>, vector<8x128xf32>,
    return
  }
  func.func @transform_0(%arg0: i32) -> (i32, i32) {
    %c0_i32 = arith.constant 0 : i32
    %c0_i32_0 = arith.constant 0 : i32
    return %arg0, %c0_i32 : i32, i32
  }
  func.func @transform_1(%arg0: i32) -> (i32, i32) {
    %c0_i32 = arith.constant 0 : i32
    %c0_i32_0 = arith.constant 0 : i32
    %c0_i32_1 = arith.constant 0 : i32
    return %c0_i32, %c0_i32_0 : i32, i32
  }
  func.func @transform_2(%arg0: i32) -> (i32, i32) {
    %c0_i32 = arith.constant 0 : i32
    %c0_i32_0 = arith.constant 0 : i32
    %c0_i32_1 = arith.constant 0 : i32
    return %c0_i32, %c0_i32_0 : i32, i32
  }
  func.func @transform_3(%arg0: i32) -> (i32, i32) {
    %c0_i32 = arith.constant 0 : i32
    %c0_i32_0 = arith.constant 0 : i32
    %c0_i32_1 = arith.constant 0 : i32
    return %c0_i32, %c0_i32_0 : i32, i32
  }
  func.func @transform_4(%arg0: i32) -> (i32, i32) {
    %c0_i32 = arith.constant 0 : i32
    %c0_i32_0 = arith.constant 0 : i32
    %c0_i32_1 = arith.constant 0 : i32
    return %c0_i32, %c0_i32_0 : i32, i32
  }
  func.func @transform_5(%arg0: i32) -> (i32, i32) {
    %c0_i32 = arith.constant 0 : i32
    %c0_i32_0 = arith.constant 0 : i32
    return %arg0, %c0_i32 : i32, i32
  }
}

</mosaic_0001>

<bundles_post_ra>
// kernel: net_forward.3
= control target key start
LH: loop header
LB: loop body
LE: loop exit
PB: predicated region body
PF: predicated region fallthrough
CT: control target
= control target key end

     0   :  { %10 = vsyncpa [#allocation3], 0  ;;  %s9007_s0 = inlined_call_operand.vmem [shape: bf16[8,9216], index: 0, kind: input, shape index: {}]   ;;  %s9008_s1 = inlined_call_operand.hbm [shape: bf16[9216,128], index: 1, kind: input, shape index: {}]   ;;  %s9009_s2 = inlined_call_operand.hbm [shape: f32[1,128], index: 2, kind: input, shape index: {}]   ;;  %s9010_s3 = inlined_call_operand.hbm [shape: bf16[128,128], index: 3, kind: input, shape index: {}]   ;;  %s9011_s4 = inlined_call_operand.hbm [shape: f32[1,128], index: 4, kind: input, shape index: {}]   ;;  %s9012_s5 = inlined_call_operand.vmem [shape: f32[8,128], index: 5, kind: output, shape index: {}]  }
   0x1   :  { %11 = vsyncpa [#allocation5], 0 }
   0x2   :  { %12 = vsyncpa [#allocation8], 0  ;;  %s8773_s18 = smov [#allocation4]   ;;  %s8774_s20 = smov [#allocation2]  }
   0x3   :  { %s33_s19 = sshll.u32 %s8773_s18, 4  ;;  %s20_s21 = sshll.u32 %s8774_s20, 4  ;;  %s34_s19 = int_to_ptr.vmem [resolvable:$true] %s33_s19  ;;  %s8811_s21 = int_to_ptr.vmem [resolvable:$true] %s20_s21 }
   0x4   :  { %s8679_s24 = scalar_lea.hbm %s9009_s2, 16 }
   0x5   :  { %p8680_p0 = scmp.ne.s32.totalorder %s9009_s2, %s8679_s24  ;;  %p8683_p1 = scmp.lt.u32.totalorder %s8679_s24, %s9009_s2 }
   0x7   :  { %p8685_p2 = pnand %p8683_p1, %p8680_p0 }
   0x9   :  { %8688 = shalt.err (!%p8685_p2)
}
   0xa   :  { %s8689_s29 = scalar_lea.vmem %s34_s19, 16  ;;  %s8693_s30 = scalar_lea.vmem %s34_s19, 32 }
   0xb   :  { %p8690_p3 = scmp.ne.s32.totalorder %s34_s19, %s8689_s29  ;;  %p8694_p4 = scmp.lt.s32.totalorder %s34_s19, %s34_s19 }
   0xc   :  { %p8695_p5 = scmp.lt.s32.totalorder %s8693_s30, %s8689_s29 }
   0xe   :  { %p8696_p6 = por %p8695_p5, %p8694_p4 }
  0x10   :  { %p8697_p7 = pnand %p8696_p6, %p8690_p3 }
  0x12   :  { %8700 = shalt.err (!%p8697_p7)
}
  0x13   :  { %36 = dma.hbm_to_vmem [thread:$0]  %s9009_s2, 16, %s34_s19, [#allocation5]  }
  0x14   :  { %s8701_s10 = scalar_lea.hbm %s9008_s1, 73728 }
  0x15   :  { %p8702_p8 = scmp.ne.s32.totalorder %s9008_s1, %s8701_s10  ;;  %p8705_p9 = scmp.lt.u32.totalorder %s8701_s10, %s9008_s1 }
  0x17   :  { %p8707_p10 = pnand %p8705_p9, %p8702_p8 }
  0x19   :  { %8710 = shalt.err (!%p8707_p10)
}
  0x1a   :  { %s8711_s15 = scalar_lea.vmem %s8811_s21, 73728  ;;  %p8716_p12 = scmp.lt.s32.totalorder %s8811_s21, %s8811_s21 }
  0x1b   :  { %p8712_p11 = scmp.ne.s32.totalorder %s8811_s21, %s8711_s15  ;;  %p8717_p13 = scmp.lt.s32.totalorder %s8711_s15, %s8711_s15 }
  0x1d   :  { %p8718_p0 = por %p8717_p13, %p8716_p12 }
  0x1f   :  { %p8719_p1 = pnand %p8718_p0, %p8712_p11 }
  0x21   :  { %8722 = shalt.err (!%p8719_p1)
}
  0x22   :  { %s8775_s2 = smov 64   ;;  %s8776_s16 = smov 4  }
  0x23   :  { %26 = dma.hbm_to_vmem [thread:$0]  %s9008_s1, 73728, %s8811_s21, [#allocation3], %s8775_s2, %s8775_s2, %s8776_s16  }
  0x24   :  { %s8777_s19 = smov [#allocation6]   ;;  %s8778_s22 = smov [#allocation7]  }
  0x25   :  { %s42_s20 = sshll.u32 %s8777_s19, 4  ;;  %s55_s23 = sshll.u32 %s8778_s22, 4  ;;  %s43_s20 = int_to_ptr.vmem [resolvable:$true] %s42_s20  ;;  %s56_s23 = int_to_ptr.vmem [resolvable:$true] %s55_s23 }
  0x26   :  { %s8723_s26 = scalar_lea.hbm %s9010_s3, 1024 }
  0x27   :  { %p8724_p2 = scmp.ne.s32.totalorder %s9010_s3, %s8723_s26  ;;  %p8727_p3 = scmp.lt.u32.totalorder %s8723_s26, %s9010_s3 }
  0x29   :  { %p8729_p4 = pnand %p8727_p3, %p8724_p2 }
  0x2b   :  { %8732 = shalt.err (!%p8729_p4)
}
  0x2c   :  { %s8733_s1 = scalar_lea.vmem %s43_s20, 1024  ;;  %p8738_p6 = scmp.lt.s32.totalorder %s43_s20, %s43_s20 }
  0x2d   :  { %p8734_p5 = scmp.ne.s32.totalorder %s43_s20, %s8733_s1  ;;  %p8739_p7 = scmp.lt.s32.totalorder %s8733_s1, %s8733_s1 }
  0x2f   :  { %p8740_p8 = por %p8739_p7, %p8738_p6 }
  0x31   :  { %p8741_p9 = pnand %p8740_p8, %p8734_p5 }
  0x33   :  { %8744 = shalt.err (!%p8741_p9)
}
  0x34   :  { %48 = dma.hbm_to_vmem [thread:$0]  %s9010_s3, 1024, %s43_s20, [#allocation5], %s8775_s2, %s8775_s2, %s8776_s16  }
  0x35   :  { %s8745_s9 = scalar_lea.hbm %s9011_s4, 16 }
  0x36   :  { %p8746_p10 = scmp.ne.s32.totalorder %s9011_s4, %s8745_s9  ;;  %p8749_p11 = scmp.lt.u32.totalorder %s8745_s9, %s9011_s4 }
  0x38   :  { %p8751_p12 = pnand %p8749_p11, %p8746_p10 }
  0x3a   :  { %8754 = shalt.err (!%p8751_p12)
}
  0x3b   :  { %s8755_s14 = scalar_lea.vmem %s56_s23, 16  ;;  %s8759_s15 = scalar_lea.vmem %s56_s23, 32 }
  0x3c   :  { %p8756_p13 = scmp.ne.s32.totalorder %s56_s23, %s8755_s14  ;;  %p8760_p0 = scmp.lt.s32.totalorder %s56_s23, %s56_s23 }
  0x3d   :  { %p8761_p1 = scmp.lt.s32.totalorder %s8759_s15, %s8755_s14 }
  0x3f   :  { %p8762_p2 = por %p8761_p1, %p8760_p0 }
  0x41   :  { %p8763_p3 = pnand %p8762_p2, %p8756_p13 }
  0x43   :  { %8766 = shalt.err (!%p8763_p3)
}
  0x44   :  { %58 = dma.hbm_to_vmem [thread:$0]  %s9011_s4, 16, %s56_s23, [#allocation8]  }
  0x45   :  { %8767 = dma.done.wait [#allocation3], 73728  }
  0x46   :  { %8768 = vsyncadd [#allocation3], 4294893568 }
  0x47   :  { %8769 = dma.done.wait [#allocation5], 1040  }
  0x48   :  { %8770 = vsyncadd [#allocation5], 4294966256 }
  0x49   :  { %8771 = dma.done.wait [#allocation8], 16  }
  0x4a   :  { %8772 = vsyncadd [#allocation8], 4294967280  ;;  %v8023_v0 = vld [vmem:[#allocation2 + $0x40] sm:$0xff]   ;;  %v8027_v4 = vld [vmem:[#allocation2 + $0x48] sm:$0xff]   ;;  %vm8780_vm0 = vmmov 0  }
  0x4b   :  { %v8024_v1 = vld [vmem:[#allocation2 + $0xc0] sm:$0xff]   ;;  %7194 = vmatprep.subr.bf16.mxu0 %v8023_v0  ;;  %v8028_v5 = vld [vmem:[#allocation2 + $0xc8] sm:$0xff]   ;;  %v8031_v8 = vld [vmem:[#allocation2 + $0x50] sm:$0xff]  }
  0x4c   :  { %v8025_v2 = vld [vmem:[#allocation2] sm:$0xff]   ;;  %7216 = vmatprep.subr.bf16.mxu1 %v8024_v1  ;;  %v8029_v6 = vld [vmem:[#allocation2 + $0x8] sm:$0xff]   ;;  %v8032_v9 = vld [vmem:[#allocation2 + $0xd0] sm:$0xff]  }
  0x4d   :  { %v8026_v3 = vld [vmem:[#allocation2 + $0x80] sm:$0xff]   ;;  %7195 = vmatpush3.bf16.msra.mxu0 %v8025_v2  ;;  %v8030_v7 = vld [vmem:[#allocation2 + $0x88] sm:$0xff]   ;;  %v8033_v10 = vld [vmem:[#allocation2 + $0x10] sm:$0xff]  }
  0x4e   :  { %7217 = vmatpush3.bf16.msra.mxu1 %v8026_v3  ;;  %7196 = vmatprep.subr.bf16.mxu0 %v8027_v4  ;;  %v8034_v11 = vld [vmem:[#allocation2 + $0x90] sm:$0xff]   ;;  %v8035_v12 = vld [vmem:[#allocation2 + $0x58] sm:$0xff]   ;;  %v8039_v16 = vld [vmem:[#allocation2 + $0x60] sm:$0xff]  }
  0x4f   :  { %7218 = vmatprep.subr.bf16.mxu1 %v8028_v5  ;;  %v8036_v13 = vld [vmem:[#allocation2 + $0xd8] sm:$0xff]   ;;  %v8040_v17 = vld [vmem:[#allocation2 + $0xe0] sm:$0xff]   ;;  %v8043_v20 = vld [vmem:[#allocation2 + $0x68] sm:$0xff]  }
  0x50   :  { %v8037_v14 = vld [vmem:[#allocation2 + $0x18] sm:$0xff]   ;;  %v8041_v18 = vld [vmem:[#allocation2 + $0x20] sm:$0xff]   ;;  %v8044_v21 = vld [vmem:[#allocation2 + $0xe8] sm:$0xff]  }
  0x51   :  { %7197 = vmatpush3.bf16.msra.mxu0 %v8029_v6  ;;  %v8038_v15 = vld [vmem:[#allocation2 + $0x98] sm:$0xff]   ;;  %v8042_v19 = vld [vmem:[#allocation2 + $0xa0] sm:$0xff]   ;;  %v8045_v22 = vld [vmem:[#allocation2 + $0x28] sm:$0xff]  }
  0x52   :  { %7219 = vmatpush3.bf16.msra.mxu1 %v8030_v7  ;;  %7198 = vmatprep.subr.bf16.mxu0 %v8031_v8  ;;  %v8046_v23 = vld [vmem:[#allocation2 + $0xa8] sm:$0xff]   ;;  %v8047_v24 = vld [vmem:[#allocation2 + $0x70] sm:$0xff]   ;;  %v8051_v28 = vld [vmem:[#allocation2 + $0x78] sm:$0xff]  }
  0x53   :  { %7220 = vmatprep.subr.bf16.mxu1 %v8032_v9  ;;  %v8048_v25 = vld [vmem:[#allocation2 + $0xf0] sm:$0xff]   ;;  %v8052_v29 = vld [vmem:[#allocation2 + $0xf8] sm:$0xff]   ;;  %v72_v32 = vld [vmem:[%s9007_s0] sm:$0xff] }
  0x54   :  { %v8049_v26 = vld [vmem:[#allocation2 + $0x30] sm:$0xff]   ;;  %v8053_v30 = vld [vmem:[#allocation2 + $0x38] sm:$0xff]   ;;  %v73_v33 = vld [vmem:[%s9007_s0 + $0x8] sm:$0xff]  ;;  %v6537_v34 = vcombine.low %v72_v32, %v72_v32  ;;  %v6538_v35 = vcombine.high %v72_v32, %v72_v32 }
  0x55   :  { %7199 = vmatpush3.bf16.msra.mxu0 %v8033_v10  ;;  %v8050_v27 = vld [vmem:[#allocation2 + $0xb0] sm:$0xff]   ;;  %v8054_v31 = vld [vmem:[#allocation2 + $0xb8] sm:$0xff]   ;;  %v6539_v36 = vcombine.low %v73_v33, %v73_v33  ;;  %v6540_v37 = vcombine.high %v73_v33, %v73_v33  ;;  %v8059_v38 = vld [vmem:[#allocation2 + $0x140] sm:$0xff]  }
  0x56   :  { %7221 = vmatpush3.bf16.msra.mxu1 %v8034_v11  ;;  %7200 = vmatprep.subr.bf16.mxu0 %v8035_v12  ;;  %v8060_v39 = vld [vmem:[#allocation2 + $0x1c0] sm:$0xff]   ;;  %v8063_v42 = vld [vmem:[#allocation2 + $0x148] sm:$0xff]   ;;  %v8067_v46 = vld [vmem:[#allocation2 + $0x150] sm:$0xff]  }
  0x57   :  { %7222 = vmatprep.subr.bf16.mxu1 %v8036_v13  ;;  %5007 = vmatprep.mubr.bf16.mxu0 %v6538_v35  ;;  %v8061_v40 = vld [vmem:[#allocation2 + $0x100] sm:$0xff]   ;;  %v8064_v43 = vld [vmem:[#allocation2 + $0x1c8] sm:$0xff]   ;;  %v8068_v47 = vld [vmem:[#allocation2 + $0x1d0] sm:$0xff]  }
  0x58   :  { %5047 = vmatprep.mubr.bf16.mxu1 %v6540_v37  ;;  %v8062_v41 = vld [vmem:[#allocation2 + $0x180] sm:$0xff]   ;;  %v8065_v44 = vld [vmem:[#allocation2 + $0x108] sm:$0xff]   ;;  %v8069_v48 = vld [vmem:[#allocation2 + $0x110] sm:$0xff]  }
  0x59   :  { %7201 = vmatpush3.bf16.msra.mxu0 %v8037_v14  ;;  %v8066_v45 = vld [vmem:[#allocation2 + $0x188] sm:$0xff]   ;;  %v8070_v49 = vld [vmem:[#allocation2 + $0x190] sm:$0xff]   ;;  %v8071_v50 = vld [vmem:[#allocation2 + $0x158] sm:$0xff]  }
  0x5a   :  { %7223 = vmatpush3.bf16.msra.mxu1 %v8038_v15  ;;  %7202 = vmatprep.subr.bf16.mxu0 %v8039_v16  ;;  %v8072_v51 = vld [vmem:[#allocation2 + $0x1d8] sm:$0xff]   ;;  %v8075_v54 = vld [vmem:[#allocation2 + $0x160] sm:$0xff]   ;;  %v8079_v58 = vld [vmem:[#allocation2 + $0x168] sm:$0xff]  }
  0x5b   :  { %7224 = vmatprep.subr.bf16.mxu1 %v8040_v17  ;;  %v8073_v52 = vld [vmem:[#allocation2 + $0x118] sm:$0xff]   ;;  %v8076_v55 = vld [vmem:[#allocation2 + $0x1e0] sm:$0xff]   ;;  %v8080_v59 = vld [vmem:[#allocation2 + $0x1e8] sm:$0xff]  }
  0x5c   :  { %v8074_v53 = vld [vmem:[#allocation2 + $0x198] sm:$0xff]   ;;  %v8077_v56 = vld [vmem:[#allocation2 + $0x120] sm:$0xff]   ;;  %v8081_v60 = vld [vmem:[#allocation2 + $0x128] sm:$0xff]  }
  0x5d   :  { %7203 = vmatpush3.bf16.msra.mxu0 %v8041_v18  ;;  %v8078_v57 = vld [vmem:[#allocation2 + $0x1a0] sm:$0xff]   ;;  %v8082_v61 = vld [vmem:[#allocation2 + $0x1a8] sm:$0xff]   ;;  %v8083_v62 = vld [vmem:[#allocation2 + $0x170] sm:$0xff]  }
  0x5e   :  { %7225 = vmatpush3.bf16.msra.mxu1 %v8042_v19  ;;  %7204 = vmatprep.subr.bf16.mxu0 %v8043_v20  ;;  %v8084_v63 = vld [vmem:[#allocation2 + $0x1f0] sm:$0xff]   ;;  %v8087_v2 = vld [vmem:[#allocation2 + $0x178] sm:$0xff]   ;;  %v8095_v12 = vld [vmem:[#allocation2 + $0x240] sm:$0xff]  }
  0x5f   :  { %7226 = vmatprep.subr.bf16.mxu1 %v8044_v21  ;;  %v8085_v0 = vld [vmem:[#allocation2 + $0x130] sm:$0xff]   ;;  %v8088_v3 = vld [vmem:[#allocation2 + $0x1f8] sm:$0xff]   ;;  %v8096_v13 = vld [vmem:[#allocation2 + $0x2c0] sm:$0xff]  }
  0x60   :  { %v8086_v1 = vld [vmem:[#allocation2 + $0x1b0] sm:$0xff]   ;;  %v8089_v4 = vld [vmem:[#allocation2 + $0x138] sm:$0xff]   ;;  %v8097_v14 = vld [vmem:[#allocation2 + $0x200] sm:$0xff]  }
  0x61   :  { %7205 = vmatpush3.bf16.msra.mxu0 %v8045_v22  ;;  %v8090_v5 = vld [vmem:[#allocation2 + $0x1b8] sm:$0xff]   ;;  %v74_v6 = vld [vmem:[%s9007_s0 + $0x10] sm:$0xff]  ;;  %v8098_v15 = vld [vmem:[#allocation2 + $0x280] sm:$0xff]  }
  0x62   :  { %7227 = vmatpush3.bf16.msra.mxu1 %v8046_v23  ;;  %7206 = vmatprep.subr.bf16.mxu0 %v8047_v24  ;;  %v6541_v7 = vcombine.low %v74_v6, %v74_v6  ;;  %v6542_v8 = vcombine.high %v74_v6, %v74_v6  ;;  %v75_v9 = vld [vmem:[%s9007_s0 + $0x18] sm:$0xff]  ;;  %v8099_v16 = vld [vmem:[#allocation2 + $0x248] sm:$0xff]   ;;  %v8103_v20 = vld [vmem:[#allocation2 + $0x250] sm:$0xff]  }
  0x63   :  { %7228 = vmatprep.subr.bf16.mxu1 %v8048_v25  ;;  %v6543_v10 = vcombine.low %v75_v9, %v75_v9  ;;  %v6544_v11 = vcombine.high %v75_v9, %v75_v9  ;;  %v8100_v17 = vld [vmem:[#allocation2 + $0x2c8] sm:$0xff]   ;;  %v8104_v21 = vld [vmem:[#allocation2 + $0x2d0] sm:$0xff]   ;;  %v8107_v24 = vld [vmem:[#allocation2 + $0x258] sm:$0xff]  }
  0x64   :  { %v8101_v18 = vld [vmem:[#allocation2 + $0x208] sm:$0xff]   ;;  %v8105_v22 = vld [vmem:[#allocation2 + $0x210] sm:$0xff]   ;;  %v8108_v25 = vld [vmem:[#allocation2 + $0x2d8] sm:$0xff]  }
  0x65   :  { %7207 = vmatpush3.bf16.msra.mxu0 %v8049_v26  ;;  %v8102_v19 = vld [vmem:[#allocation2 + $0x288] sm:$0xff]   ;;  %v8106_v23 = vld [vmem:[#allocation2 + $0x290] sm:$0xff]   ;;  %v8109_v26 = vld [vmem:[#allocation2 + $0x218] sm:$0xff]  }
  0x66   :  { %7229 = vmatpush3.bf16.msra.mxu1 %v8050_v27  ;;  %7208 = vmatprep.subr.bf16.mxu0 %v8051_v28  ;;  %v8110_v27 = vld [vmem:[#allocation2 + $0x298] sm:$0xff]   ;;  %v8111_v28 = vld [vmem:[#allocation2 + $0x260] sm:$0xff]   ;;  %v8115_v32 = vld [vmem:[#allocation2 + $0x268] sm:$0xff]  }
  0x67   :  { %7230 = vmatprep.subr.bf16.mxu1 %v8052_v29  ;;  %v8112_v29 = vld [vmem:[#allocation2 + $0x2e0] sm:$0xff]   ;;  %v8116_v33 = vld [vmem:[#allocation2 + $0x2e8] sm:$0xff]   ;;  %v8120_v37 = vld [vmem:[#allocation2 + $0x2f0] sm:$0xff]  }
  0x68   :  { %v8118_v35 = vld [vmem:[#allocation2 + $0x2a8] sm:$0xff]  }
  0x69   :  { %7209 = vmatpush3.bf16.msra.mxu0 %v8053_v30  ;;  %v8113_v30 = vld [vmem:[#allocation2 + $0x220] sm:$0xff]   ;;  %v8151_v6 = vld [vmem:[#allocation2 + $0x368] sm:$0xff]  }
  0x6a   :  { %7231 = vmatpush3.bf16.msra.mxu1 %v8054_v31  ;;  %7238 = vmatprep.subr.bf16.mxu0 %v8059_v38  ;;  %v8114_v31 = vld [vmem:[#allocation2 + $0x2a0] sm:$0xff]   ;;  %v8121_v38 = vld [vmem:[#allocation2 + $0x230] sm:$0xff]   ;;  %v8154_v9 = vld [vmem:[#allocation2 + $0x3a8] sm:$0xff]  }
  0x6b   :  { %7260 = vmatprep.subr.bf16.mxu1 %v8060_v39  ;;  %v8122_v39 = vld [vmem:[#allocation2 + $0x2b0] sm:$0xff]  }
  0x6c   :  { %5008 = vmatmul.mubr.bf16.vlgmr.msra.gmra.mrb[0].mxu0 %v6537_v34  ;;  %v8117_v34 = vld [vmem:[#allocation2 + $0x228] sm:$0xff]  }
  0x6d   :  { %5048 = vmatmul.mubr.bf16.vlgmr.msra.gmra.mrb[0].mxu1 %v6539_v36  ;;  %7239 = vmatpush3.bf16.msra.mxu0 %v8061_v40  ;;  %v8119_v36 = vld [vmem:[#allocation2 + $0x270] sm:$0xff]   ;;  %v8123_v40 = vld [vmem:[#allocation2 + $0x278] sm:$0xff]  }
  0x6e   :  { %7261 = vmatpush3.bf16.msra.mxu1 %v8062_v41  ;;  %7240 = vmatprep.subr.bf16.mxu0 %v8063_v42  ;;  %v8124_v41 = vld [vmem:[#allocation2 + $0x2f8] sm:$0xff]  }
  0x6f   :  { %7262 = vmatprep.subr.bf16.mxu1 %v8064_v43  ;;  %5087 = vmatprep.mubr.bf16.mxu0 %v6542_v8  ;;  %v8125_v42 = vld [vmem:[#allocation2 + $0x238] sm:$0xff]   ;;  %v8153_v8 = vld [vmem:[#allocation2 + $0x328] sm:$0xff]  }
  0x70   :  { %5127 = vmatprep.mubr.bf16.mxu1 %v6544_v11  ;;  %v8126_v43 = vld [vmem:[#allocation2 + $0x2b8] sm:$0xff]   ;;  %v8156_v11 = vld [vmem:[#allocation2 + $0x3f0] sm:$0xff]  }
  0x71   :  { %7241 = vmatpush3.bf16.msra.mxu0 %v8065_v44  ;;  %v76_v44 = vld [vmem:[%s9007_s0 + $0x20] sm:$0xff] }
  0x72   :  { %7263 = vmatpush3.bf16.msra.mxu1 %v8066_v45  ;;  %7242 = vmatprep.subr.bf16.mxu0 %v8067_v46  ;;  %v77_v45 = vld [vmem:[%s9007_s0 + $0x28] sm:$0xff]  ;;  %v6545_v46 = vcombine.low %v76_v44, %v76_v44 }
  0x73   :  { %7264 = vmatprep.subr.bf16.mxu1 %v8068_v47  ;;  %v6546_v47 = vcombine.high %v76_v44, %v76_v44  ;;  %v8187_v44 = vld [vmem:[#allocation2 + $0x468] sm:$0xff]  }
  0x75   :  { %7243 = vmatpush3.bf16.msra.mxu0 %v8069_v48  ;;  %v6547_v48 = vcombine.low %v77_v45, %v77_v45 }
  0x76   :  { %7265 = vmatpush3.bf16.msra.mxu1 %v8070_v49  ;;  %7244 = vmatprep.subr.bf16.mxu0 %v8071_v50  ;;  %v6548_v49 = vcombine.high %v77_v45, %v77_v45  ;;  %v8131_v50 = vld [vmem:[#allocation2 + $0x340] sm:$0xff]   ;;  %v8188_v45 = vld [vmem:[#allocation2 + $0x4e8] sm:$0xff]  }
  0x77   :  { %7266 = vmatprep.subr.bf16.mxu1 %v8072_v51  ;;  %v8132_v51 = vld [vmem:[#allocation2 + $0x3c0] sm:$0xff]  }
  0x79   :  { %7245 = vmatpush3.bf16.msra.mxu0 %v8073_v52  ;;  %v8133_v52 = vld [vmem:[#allocation2 + $0x300] sm:$0xff]  }
  0x7a   :  { %7267 = vmatpush3.bf16.msra.mxu1 %v8074_v53  ;;  %7246 = vmatprep.subr.bf16.mxu0 %v8075_v54  ;;  %v8134_v53 = vld [vmem:[#allocation2 + $0x380] sm:$0xff]   ;;  %v8135_v54 = vld [vmem:[#allocation2 + $0x348] sm:$0xff]  }
  0x7b   :  { %7268 = vmatprep.subr.bf16.mxu1 %v8076_v55  ;;  %v8136_v55 = vld [vmem:[#allocation2 + $0x3c8] sm:$0xff]  }
  0x7d   :  { %7247 = vmatpush3.bf16.msra.mxu0 %v8077_v56  ;;  %v8137_v56 = vld [vmem:[#allocation2 + $0x308] sm:$0xff]  }
  0x7e   :  { %7269 = vmatpush3.bf16.msra.mxu1 %v8078_v57  ;;  %7248 = vmatprep.subr.bf16.mxu0 %v8079_v58  ;;  %v8138_v57 = vld [vmem:[#allocation2 + $0x388] sm:$0xff]   ;;  %v8139_v58 = vld [vmem:[#allocation2 + $0x350] sm:$0xff]  }
  0x7f   :  { %7270 = vmatprep.subr.bf16.mxu1 %v8080_v59  ;;  %v8140_v59 = vld [vmem:[#allocation2 + $0x3d0] sm:$0xff]  }
  0x81   :  { %7249 = vmatpush3.bf16.msra.mxu0 %v8081_v60  ;;  %v8141_v60 = vld [vmem:[#allocation2 + $0x310] sm:$0xff]  }
  0x82   :  { %7271 = vmatpush3.bf16.msra.mxu1 %v8082_v61  ;;  %7250 = vmatprep.subr.bf16.mxu0 %v8083_v62  ;;  %v8142_v61 = vld [vmem:[#allocation2 + $0x390] sm:$0xff]   ;;  %v8143_v62 = vld [vmem:[#allocation2 + $0x358] sm:$0xff]  }
  0x83   :  { %7272 = vmatprep.subr.bf16.mxu1 %v8084_v63  ;;  %v8144_v63 = vld [vmem:[#allocation2 + $0x3d8] sm:$0xff]  }
  0x85   :  { %7251 = vmatpush3.bf16.msra.mxu0 %v8085_v0  ;;  %v8145_v0 = vld [vmem:[#allocation2 + $0x318] sm:$0xff]  }
  0x86   :  { %7273 = vmatpush3.bf16.msra.mxu1 %v8086_v1  ;;  %7252 = vmatprep.subr.bf16.mxu0 %v8087_v2  ;;  %v8146_v1 = vld [vmem:[#allocation2 + $0x398] sm:$0xff]   ;;  %v8147_v2 = vld [vmem:[#allocation2 + $0x360] sm:$0xff]  }
  0x87   :  { %7274 = vmatprep.subr.bf16.mxu1 %v8088_v3  ;;  %v8148_v3 = vld [vmem:[#allocation2 + $0x3e0] sm:$0xff]  }
  0x89   :  { %7253 = vmatpush3.bf16.msra.mxu0 %v8089_v4  ;;  %v8149_v4 = vld [vmem:[#allocation2 + $0x320] sm:$0xff]  }
  0x8a   :  { %7275 = vmatpush3.bf16.msra.mxu1 %v8090_v5  ;;  %7282 = vmatprep.subr.bf16.mxu0 %v8095_v12  ;;  %v8150_v5 = vld [vmem:[#allocation2 + $0x3a0] sm:$0xff]   ;;  %v8157_v12 = vld [vmem:[#allocation2 + $0x330] sm:$0xff]  }
  0x8b   :  { %7304 = vmatprep.subr.bf16.mxu1 %v8096_v13  ;;  %v8158_v13 = vld [vmem:[#allocation2 + $0x3b0] sm:$0xff]  }
  0x8c   :  { %5088 = vmatmul.mubr.bf16.vlgmr.msra.gmra.mrb[4].mxu0 %v6541_v7  ;;  %v8152_v7 = vld [vmem:[#allocation2 + $0x3e8] sm:$0xff]  }
  0x8d   :  { %5128 = vmatmul.mubr.bf16.vlgmr.msra.gmra.mrb[4].mxu1 %v6543_v10  ;;  %7283 = vmatpush3.bf16.msra.mxu0 %v8097_v14  ;;  %v8155_v10 = vld [vmem:[#allocation2 + $0x370] sm:$0xff]   ;;  %v8159_v14 = vld [vmem:[#allocation2 + $0x378] sm:$0xff]  }
  0x8e   :  { %7305 = vmatpush3.bf16.msra.mxu1 %v8098_v15  ;;  %7284 = vmatprep.subr.bf16.mxu0 %v8099_v16  ;;  %v8160_v15 = vld [vmem:[#allocation2 + $0x3f8] sm:$0xff]  }
  0x8f   :  { %7306 = vmatprep.subr.bf16.mxu1 %v8100_v17  ;;  %5167 = vmatprep.mubr.bf16.mxu0 %v6546_v47  ;;  %v8161_v16 = vld [vmem:[#allocation2 + $0x338] sm:$0xff]   ;;  %v8190_v47 = vld [vmem:[#allocation2 + $0x4a8] sm:$0xff]  }
  0x90   :  { %5207 = vmatprep.mubr.bf16.mxu1 %v6548_v49  ;;  %v8162_v17 = vld [vmem:[#allocation2 + $0x3b8] sm:$0xff]   ;;  %v8192_v49 = vld [vmem:[#allocation2 + $0x4f0] sm:$0xff]  }
  0x91   :  { %7285 = vmatpush3.bf16.msra.mxu0 %v8101_v18  ;;  %v78_v18 = vld [vmem:[%s9007_s0 + $0x30] sm:$0xff] }
  0x92   :  { %7307 = vmatpush3.bf16.msra.mxu1 %v8102_v19  ;;  %7286 = vmatprep.subr.bf16.mxu0 %v8103_v20  ;;  %v79_v19 = vld [vmem:[%s9007_s0 + $0x38] sm:$0xff]  ;;  %v6549_v20 = vcombine.low %v78_v18, %v78_v18 }
  0x93   :  { %7308 = vmatprep.subr.bf16.mxu1 %v8104_v21  ;;  %v6550_v21 = vcombine.high %v78_v18, %v78_v18  ;;  %v8223_v18 = vld [vmem:[#allocation2 + $0x568] sm:$0xff]  }
  0x95   :  { %7287 = vmatpush3.bf16.msra.mxu0 %v8105_v22  ;;  %v6551_v22 = vcombine.low %v79_v19, %v79_v19 }
  0x96   :  { %7309 = vmatpush3.bf16.msra.mxu1 %v8106_v23  ;;  %7288 = vmatprep.subr.bf16.mxu0 %v8107_v24  ;;  %v8167_v23 = vld [vmem:[#allocation2 + $0x440] sm:$0xff]   ;;  %v6552_v24 = vcombine.high %v79_v19, %v79_v19  ;;  %v8224_v19 = vld [vmem:[#allocation2 + $0x5e8] sm:$0xff]  }
  0x97   :  { %7310 = vmatprep.subr.bf16.mxu1 %v8108_v25  ;;  %v8168_v25 = vld [vmem:[#allocation2 + $0x4c0] sm:$0xff]  }
  0x99   :  { %7289 = vmatpush3.bf16.msra.mxu0 %v8109_v26  ;;  %v8169_v26 = vld [vmem:[#allocation2 + $0x400] sm:$0xff]  }
  0x9a   :  { %7311 = vmatpush3.bf16.msra.mxu1 %v8110_v27  ;;  %7290 = vmatprep.subr.bf16.mxu0 %v8111_v28  ;;  %v8170_v27 = vld [vmem:[#allocation2 + $0x480] sm:$0xff]   ;;  %v8171_v28 = vld [vmem:[#allocation2 + $0x448] sm:$0xff]  }
  0x9b   :  { %7312 = vmatprep.subr.bf16.mxu1 %v8112_v29  ;;  %v8172_v29 = vld [vmem:[#allocation2 + $0x4c8] sm:$0xff]  }
  0x9d   :  { %7291 = vmatpush3.bf16.msra.mxu0 %v8113_v30  ;;  %v8173_v30 = vld [vmem:[#allocation2 + $0x408] sm:$0xff]  }
  0x9e   :  { %7313 = vmatpush3.bf16.msra.mxu1 %v8114_v31  ;;  %7292 = vmatprep.subr.bf16.mxu0 %v8115_v32  ;;  %v8174_v31 = vld [vmem:[#allocation2 + $0x488] sm:$0xff]   ;;  %v8175_v32 = vld [vmem:[#allocation2 + $0x450] sm:$0xff]  }
  0x9f   :  { %7314 = vmatprep.subr.bf16.mxu1 %v8116_v33  ;;  %v8176_v33 = vld [vmem:[#allocation2 + $0x4d0] sm:$0xff]  }
  0xa1   :  { %7293 = vmatpush3.bf16.msra.mxu0 %v8117_v34  ;;  %v8177_v34 = vld [vmem:[#allocation2 + $0x410] sm:$0xff]  }
  0xa2   :  { %7315 = vmatpush3.bf16.msra.mxu1 %v8118_v35  ;;  %7294 = vmatprep.subr.bf16.mxu0 %v8119_v36  ;;  %v8178_v35 = vld [vmem:[#allocation2 + $0x490] sm:$0xff]   ;;  %v8179_v36 = vld [vmem:[#allocation2 + $0x458] sm:$0xff]  }
  0xa3   :  { %7316 = vmatprep.subr.bf16.mxu1 %v8120_v37  ;;  %v8180_v37 = vld [vmem:[#allocation2 + $0x4d8] sm:$0xff]  }
  0xa5   :  { %7295 = vmatpush3.bf16.msra.mxu0 %v8121_v38  ;;  %v8181_v38 = vld [vmem:[#allocation2 + $0x418] sm:$0xff]  }
  0xa6   :  { %7317 = vmatpush3.bf16.msra.mxu1 %v8122_v39  ;;  %7296 = vmatprep.subr.bf16.mxu0 %v8123_v40  ;;  %v8182_v39 = vld [vmem:[#allocation2 + $0x498] sm:$0xff]   ;;  %v8183_v40 = vld [vmem:[#allocation2 + $0x460] sm:$0xff]  }
  0xa7   :  { %7318 = vmatprep.subr.bf16.mxu1 %v8124_v41  ;;  %v8184_v41 = vld [vmem:[#allocation2 + $0x4e0] sm:$0xff]  }
  0xa9   :  { %7297 = vmatpush3.bf16.msra.mxu0 %v8125_v42  ;;  %v8185_v42 = vld [vmem:[#allocation2 + $0x420] sm:$0xff]  }
  0xaa   :  { %7319 = vmatpush3.bf16.msra.mxu1 %v8126_v43  ;;  %7326 = vmatprep.subr.bf16.mxu0 %v8131_v50  ;;  %v8186_v43 = vld [vmem:[#allocation2 + $0x4a0] sm:$0xff]   ;;  %v8193_v50 = vld [vmem:[#allocation2 + $0x430] sm:$0xff]  }
  0xab   :  { %7348 = vmatprep.subr.bf16.mxu1 %v8132_v51  ;;  %v8194_v51 = vld [vmem:[#allocation2 + $0x4b0] sm:$0xff]  }
  0xac   :  { %5168 = vmatmul.mubr.bf16.vlgmr.msra.gmra.mrb[8].mxu0 %v6545_v46  ;;  %v8189_v46 = vld [vmem:[#allocation2 + $0x428] sm:$0xff]  }
  0xad   :  { %5208 = vmatmul.mubr.bf16.vlgmr.msra.gmra.mrb[8].mxu1 %v6547_v48  ;;  %7327 = vmatpush3.bf16.msra.mxu0 %v8133_v52  ;;  %v8191_v48 = vld [vmem:[#allocation2 + $0x470] sm:$0xff]   ;;  %v8195_v52 = vld [vmem:[#allocation2 + $0x478] sm:$0xff]  }
  0xae   :  { %7349 = vmatpush3.bf16.msra.mxu1 %v8134_v53  ;;  %7328 = vmatprep.subr.bf16.mxu0 %v8135_v54  ;;  %v8196_v53 = vld [vmem:[#allocation2 + $0x4f8] sm:$0xff]  }
  0xaf   :  { %7350 = vmatprep.subr.bf16.mxu1 %v8136_v55  ;;  %5247 = vmatprep.mubr.bf16.mxu0 %v6550_v21  ;;  %v8197_v54 = vld [vmem:[#allocation2 + $0x438] sm:$0xff]   ;;  %v8226_v21 = vld [vmem:[#allocation2 + $0x5a8] sm:$0xff]  }
  0xb0   :  { %5287 = vmatprep.mubr.bf16.mxu1 %v6552_v24  ;;  %v8198_v55 = vld [vmem:[#allocation2 + $0x4b8] sm:$0xff]   ;;  %v8229_v24 = vld [vmem:[#allocation2 + $0x530] sm:$0xff]  }
  0xb1   :  { %7329 = vmatpush3.bf16.msra.mxu0 %v8137_v56  ;;  %v80_v56 = vld [vmem:[%s9007_s0 + $0x40] sm:$0xff] }
  0xb2   :  { %7351 = vmatpush3.bf16.msra.mxu1 %v8138_v57  ;;  %7330 = vmatprep.subr.bf16.mxu0 %v8139_v58  ;;  %v6553_v57 = vcombine.low %v80_v56, %v80_v56  ;;  %v6554_v58 = vcombine.high %v80_v56, %v80_v56  ;;  %v8259_v56 = vld [vmem:[#allocation2 + $0x668] sm:$0xff]  }
  0xb3   :  { %7352 = vmatprep.subr.bf16.mxu1 %v8140_v59  ;;  %v81_v59 = vld [vmem:[%s9007_s0 + $0x48] sm:$0xff] }
  0xb5   :  { %7331 = vmatpush3.bf16.msra.mxu0 %v8141_v60  ;;  %v6555_v60 = vcombine.low %v81_v59, %v81_v59 }
  0xb6   :  { %7353 = vmatpush3.bf16.msra.mxu1 %v8142_v61  ;;  %7332 = vmatprep.subr.bf16.mxu0 %v8143_v62  ;;  %v6556_v61 = vcombine.high %v81_v59, %v81_v59  ;;  %v8203_v62 = vld [vmem:[#allocation2 + $0x540] sm:$0xff]   ;;  %v8262_v59 = vld [vmem:[#allocation2 + $0x6a8] sm:$0xff]  }
  0xb7   :  { %7354 = vmatprep.subr.bf16.mxu1 %v8144_v63  ;;  %v8204_v63 = vld [vmem:[#allocation2 + $0x5c0] sm:$0xff]  }
  0xb9   :  { %7333 = vmatpush3.bf16.msra.mxu0 %v8145_v0  ;;  %v8205_v0 = vld [vmem:[#allocation2 + $0x500] sm:$0xff]  }
  0xba   :  { %7355 = vmatpush3.bf16.msra.mxu1 %v8146_v1  ;;  %7334 = vmatprep.subr.bf16.mxu0 %v8147_v2  ;;  %v8206_v1 = vld [vmem:[#allocation2 + $0x580] sm:$0xff]   ;;  %v8207_v2 = vld [vmem:[#allocation2 + $0x548] sm:$0xff]  }
  0xbb   :  { %7356 = vmatprep.subr.bf16.mxu1 %v8148_v3  ;;  %v8208_v3 = vld [vmem:[#allocation2 + $0x5c8] sm:$0xff]  }
  0xbd   :  { %7335 = vmatpush3.bf16.msra.mxu0 %v8149_v4  ;;  %v8209_v4 = vld [vmem:[#allocation2 + $0x508] sm:$0xff]  }
  0xbe   :  { %7357 = vmatpush3.bf16.msra.mxu1 %v8150_v5  ;;  %7336 = vmatprep.subr.bf16.mxu0 %v8151_v6  ;;  %v8210_v5 = vld [vmem:[#allocation2 + $0x588] sm:$0xff]   ;;  %v8211_v6 = vld [vmem:[#allocation2 + $0x550] sm:$0xff]  }
  0xbf   :  { %7358 = vmatprep.subr.bf16.mxu1 %v8152_v7  ;;  %v8212_v7 = vld [vmem:[#allocation2 + $0x5d0] sm:$0xff]  }
  0xc1   :  { %7337 = vmatpush3.bf16.msra.mxu0 %v8153_v8  ;;  %v8213_v8 = vld [vmem:[#allocation2 + $0x510] sm:$0xff]  }
  0xc2   :  { %7359 = vmatpush3.bf16.msra.mxu1 %v8154_v9  ;;  %7338 = vmatprep.subr.bf16.mxu0 %v8155_v10  ;;  %v8214_v9 = vld [vmem:[#allocation2 + $0x590] sm:$0xff]   ;;  %v8215_v10 = vld [vmem:[#allocation2 + $0x558] sm:$0xff]  }
  0xc3   :  { %7360 = vmatprep.subr.bf16.mxu1 %v8156_v11  ;;  %v8216_v11 = vld [vmem:[#allocation2 + $0x5d8] sm:$0xff]  }
  0xc5   :  { %7339 = vmatpush3.bf16.msra.mxu0 %v8157_v12  ;;  %v8217_v12 = vld [vmem:[#allocation2 + $0x518] sm:$0xff]  }
  0xc6   :  { %7361 = vmatpush3.bf16.msra.mxu1 %v8158_v13  ;;  %7340 = vmatprep.subr.bf16.mxu0 %v8159_v14  ;;  %v8218_v13 = vld [vmem:[#allocation2 + $0x598] sm:$0xff]   ;;  %v8219_v14 = vld [vmem:[#allocation2 + $0x560] sm:$0xff]  }
  0xc7   :  { %7362 = vmatprep.subr.bf16.mxu1 %v8160_v15  ;;  %v8220_v15 = vld [vmem:[#allocation2 + $0x5e0] sm:$0xff]  }
  0xc9   :  { %7341 = vmatpush3.bf16.msra.mxu0 %v8161_v16  ;;  %v8221_v16 = vld [vmem:[#allocation2 + $0x520] sm:$0xff]  }
  0xca   :  { %7363 = vmatpush3.bf16.msra.mxu1 %v8162_v17  ;;  %7370 = vmatprep.subr.bf16.mxu0 %v8167_v23  ;;  %v8222_v17 = vld [vmem:[#allocation2 + $0x5a0] sm:$0xff]   ;;  %v8228_v23 = vld [vmem:[#allocation2 + $0x5f0] sm:$0xff]  }
  0xcb   :  { %7392 = vmatprep.subr.bf16.mxu1 %v8168_v25  ;;  %v8230_v25 = vld [vmem:[#allocation2 + $0x5b0] sm:$0xff]  }
  0xcc   :  { %5248 = vmatmul.mubr.bf16.vlgmr.msra.gmra.mrb[12].mxu0 %v6549_v20  ;;  %v8225_v20 = vld [vmem:[#allocation2 + $0x528] sm:$0xff]  }
  0xcd   :  { %5288 = vmatmul.mubr.bf16.vlgmr.msra.gmra.mrb[12].mxu1 %v6551_v22  ;;  %7371 = vmatpush3.bf16.msra.mxu0 %v8169_v26  ;;  %v8227_v22 = vld [vmem:[#allocation2 + $0x570] sm:$0xff]   ;;  %v8231_v26 = vld [vmem:[#allocation2 + $0x578] sm:$0xff]  }
  0xce   :  { %7393 = vmatpush3.bf16.msra.mxu1 %v8170_v27  ;;  %7372 = vmatprep.subr.bf16.mxu0 %v8171_v28  ;;  %v8232_v27 = vld [vmem:[#allocation2 + $0x5f8] sm:$0xff]  }
  0xcf   :  { %7394 = vmatprep.subr.bf16.mxu1 %v8172_v29  ;;  %5327 = vmatprep.mubr.bf16.mxu0 %v6554_v58  ;;  %v8233_v28 = vld [vmem:[#allocation2 + $0x538] sm:$0xff]   ;;  %v8261_v58 = vld [vmem:[#allocation2 + $0x628] sm:$0xff]  }
  0xd0   :  { %5367 = vmatprep.mubr.bf16.mxu1 %v6556_v61  ;;  %v8234_v29 = vld [vmem:[#allocation2 + $0x5b8] sm:$0xff]   ;;  %v8264_v61 = vld [vmem:[#allocation2 + $0x6f0] sm:$0xff]  }
  0xd1   :  { %7373 = vmatpush3.bf16.msra.mxu0 %v8173_v30  ;;  %v82_v30 = vld [vmem:[%s9007_s0 + $0x50] sm:$0xff] }
  0xd2   :  { %7395 = vmatpush3.bf16.msra.mxu1 %v8174_v31  ;;  %7374 = vmatprep.subr.bf16.mxu0 %v8175_v32  ;;  %v83_v31 = vld [vmem:[%s9007_s0 + $0x58] sm:$0xff]  ;;  %v6557_v32 = vcombine.low %v82_v30, %v82_v30 }
  0xd3   :  { %7396 = vmatprep.subr.bf16.mxu1 %v8176_v33  ;;  %v6558_v33 = vcombine.high %v82_v30, %v82_v30  ;;  %v8294_v30 = vld [vmem:[#allocation2 + $0x7a0] sm:$0xff]  }
  0xd5   :  { %7375 = vmatpush3.bf16.msra.mxu0 %v8177_v34  ;;  %v6559_v34 = vcombine.low %v83_v31, %v83_v31 }
  0xd6   :  { %7397 = vmatpush3.bf16.msra.mxu1 %v8178_v35  ;;  %7376 = vmatprep.subr.bf16.mxu0 %v8179_v36  ;;  %v6560_v35 = vcombine.high %v83_v31, %v83_v31  ;;  %v8239_v36 = vld [vmem:[#allocation2 + $0x640] sm:$0xff]  }
  0xd7   :  { %7398 = vmatprep.subr.bf16.mxu1 %v8180_v37  ;;  %v8240_v37 = vld [vmem:[#allocation2 + $0x6c0] sm:$0xff]  }
  0xd9   :  { %7377 = vmatpush3.bf16.msra.mxu0 %v8181_v38  ;;  %v8241_v38 = vld [vmem:[#allocation2 + $0x600] sm:$0xff]  }
  0xda   :  { %7399 = vmatpush3.bf16.msra.mxu1 %v8182_v39  ;;  %7378 = vmatprep.subr.bf16.mxu0 %v8183_v40  ;;  %v8242_v39 = vld [vmem:[#allocation2 + $0x680] sm:$0xff]   ;;  %v8243_v40 = vld [vmem:[#allocation2 + $0x648] sm:$0xff]  }
  0xdb   :  { %7400 = vmatprep.subr.bf16.mxu1 %v8184_v41  ;;  %v8244_v41 = vld [vmem:[#allocation2 + $0x6c8] sm:$0xff]  }
  0xdd   :  { %7379 = vmatpush3.bf16.msra.mxu0 %v8185_v42  ;;  %v8245_v42 = vld [vmem:[#allocation2 + $0x608] sm:$0xff]  }
  0xde   :  { %7401 = vmatpush3.bf16.msra.mxu1 %v8186_v43  ;;  %7380 = vmatprep.subr.bf16.mxu0 %v8187_v44  ;;  %v8246_v43 = vld [vmem:[#allocation2 + $0x688] sm:$0xff]   ;;  %v8247_v44 = vld [vmem:[#allocation2 + $0x650] sm:$0xff]  }
  0xdf   :  { %7402 = vmatprep.subr.bf16.mxu1 %v8188_v45  ;;  %v8248_v45 = vld [vmem:[#allocation2 + $0x6d0] sm:$0xff]  }
  0xe1   :  { %7381 = vmatpush3.bf16.msra.mxu0 %v8189_v46  ;;  %v8249_v46 = vld [vmem:[#allocation2 + $0x610] sm:$0xff]  }
  0xe2   :  { %7403 = vmatpush3.bf16.msra.mxu1 %v8190_v47  ;;  %7382 = vmatprep.subr.bf16.mxu0 %v8191_v48  ;;  %v8250_v47 = vld [vmem:[#allocation2 + $0x690] sm:$0xff]   ;;  %v8251_v48 = vld [vmem:[#allocation2 + $0x658] sm:$0xff]  }
  0xe3   :  { %7404 = vmatprep.subr.bf16.mxu1 %v8192_v49  ;;  %v8252_v49 = vld [vmem:[#allocation2 + $0x6d8] sm:$0xff]  }
  0xe5   :  { %7383 = vmatpush3.bf16.msra.mxu0 %v8193_v50  ;;  %v8253_v50 = vld [vmem:[#allocation2 + $0x618] sm:$0xff]  }
  0xe6   :  { %7405 = vmatpush3.bf16.msra.mxu1 %v8194_v51  ;;  %7384 = vmatprep.subr.bf16.mxu0 %v8195_v52  ;;  %v8254_v51 = vld [vmem:[#allocation2 + $0x698] sm:$0xff]   ;;  %v8255_v52 = vld [vmem:[#allocation2 + $0x660] sm:$0xff]  }
  0xe7   :  { %7406 = vmatprep.subr.bf16.mxu1 %v8196_v53  ;;  %v8256_v53 = vld [vmem:[#allocation2 + $0x6e0] sm:$0xff]  }
  0xe9   :  { %7385 = vmatpush3.bf16.msra.mxu0 %v8197_v54  ;;  %v8257_v54 = vld [vmem:[#allocation2 + $0x620] sm:$0xff]  }
  0xea   :  { %7407 = vmatpush3.bf16.msra.mxu1 %v8198_v55  ;;  %7414 = vmatprep.subr.bf16.mxu0 %v8203_v62  ;;  %v8258_v55 = vld [vmem:[#allocation2 + $0x6a0] sm:$0xff]   ;;  %v8265_v62 = vld [vmem:[#allocation2 + $0x630] sm:$0xff]  }
  0xeb   :  { %7436 = vmatprep.subr.bf16.mxu1 %v8204_v63  ;;  %v8266_v63 = vld [vmem:[#allocation2 + $0x6b0] sm:$0xff]  }
  0xec   :  { %5328 = vmatmul.mubr.bf16.vlgmr.msra.gmra.mrb[16].mxu0 %v6553_v57  ;;  %v8260_v57 = vld [vmem:[#allocation2 + $0x6e8] sm:$0xff]  }
  0xed   :  { %5368 = vmatmul.mubr.bf16.vlgmr.msra.gmra.mrb[16].mxu1 %v6555_v60  ;;  %7415 = vmatpush3.bf16.msra.mxu0 %v8205_v0  ;;  %v8263_v60 = vld [vmem:[#allocation2 + $0x670] sm:$0xff]   ;;  %v8267_v0 = vld [vmem:[#allocation2 + $0x678] sm:$0xff]  }
  0xee   :  { %7437 = vmatpush3.bf16.msra.mxu1 %v8206_v1  ;;  %7416 = vmatprep.subr.bf16.mxu0 %v8207_v2  ;;  %v8268_v1 = vld [vmem:[#allocation2 + $0x6f8] sm:$0xff]  }
  0xef   :  { %7438 = vmatprep.subr.bf16.mxu1 %v8208_v3  ;;  %5407 = vmatprep.mubr.bf16.mxu0 %v6558_v33  ;;  %v8269_v2 = vld [vmem:[#allocation2 + $0x638] sm:$0xff]  }
  0xf0   :  { %5447 = vmatprep.mubr.bf16.mxu1 %v6560_v35  ;;  %v8270_v3 = vld [vmem:[#allocation2 + $0x6b8] sm:$0xff]  }
  0xf1   :  { %7417 = vmatpush3.bf16.msra.mxu0 %v8209_v4  ;;  %v84_v4 = vld [vmem:[%s9007_s0 + $0x60] sm:$0xff] }
  0xf2   :  { %7439 = vmatpush3.bf16.msra.mxu1 %v8210_v5  ;;  %7418 = vmatprep.subr.bf16.mxu0 %v8211_v6  ;;  %v85_v5 = vld [vmem:[%s9007_s0 + $0x68] sm:$0xff]  ;;  %v6561_v6 = vcombine.low %v84_v4, %v84_v4 }
  0xf3   :  { %7440 = vmatprep.subr.bf16.mxu1 %v8212_v7  ;;  %v6562_v7 = vcombine.high %v84_v4, %v84_v4  ;;  %v8318_v4 = vld [vmem:[#allocation2 + $0x888] sm:$0xff]  }
  0xf5   :  { %7419 = vmatpush3.bf16.msra.mxu0 %v8213_v8  ;;  %v6563_v8 = vcombine.low %v85_v5, %v85_v5 }
  0xf6   :  { %7441 = vmatpush3.bf16.msra.mxu1 %v8214_v9  ;;  %7420 = vmatprep.subr.bf16.mxu0 %v8215_v10  ;;  %v8275_v9 = vld [vmem:[#allocation2 + $0x740] sm:$0xff]   ;;  %v6564_v10 = vcombine.high %v85_v5, %v85_v5  ;;  %v8319_v5 = vld [vmem:[#allocation2 + $0x850] sm:$0xff]  }
  0xf7   :  { %7442 = vmatprep.subr.bf16.mxu1 %v8216_v11  ;;  %v8276_v11 = vld [vmem:[#allocation2 + $0x7c0] sm:$0xff]  }
  0xf9   :  { %7421 = vmatpush3.bf16.msra.mxu0 %v8217_v12  ;;  %v8277_v12 = vld [vmem:[#allocation2 + $0x700] sm:$0xff]  }
  0xfa   :  { %7443 = vmatpush3.bf16.msra.mxu1 %v8218_v13  ;;  %7422 = vmatprep.subr.bf16.mxu0 %v8219_v14  ;;  %v8278_v13 = vld [vmem:[#allocation2 + $0x780] sm:$0xff]   ;;  %v8279_v14 = vld [vmem:[#allocation2 + $0x748] sm:$0xff]  }
  0xfb   :  { %7444 = vmatprep.subr.bf16.mxu1 %v8220_v15  ;;  %v8280_v15 = vld [vmem:[#allocation2 + $0x7c8] sm:$0xff]  }
  0xfd   :  { %7423 = vmatpush3.bf16.msra.mxu0 %v8221_v16  ;;  %v8281_v16 = vld [vmem:[#allocation2 + $0x708] sm:$0xff]  }
  0xfe   :  { %7445 = vmatpush3.bf16.msra.mxu1 %v8222_v17  ;;  %7424 = vmatprep.subr.bf16.mxu0 %v8223_v18  ;;  %v8282_v17 = vld [vmem:[#allocation2 + $0x788] sm:$0xff]   ;;  %v8283_v18 = vld [vmem:[#allocation2 + $0x750] sm:$0xff]  }
  0xff   :  { %7446 = vmatprep.subr.bf16.mxu1 %v8224_v19  ;;  %v8284_v19 = vld [vmem:[#allocation2 + $0x7d0] sm:$0xff]  }
 0x101   :  { %7425 = vmatpush3.bf16.msra.mxu0 %v8225_v20  ;;  %v8285_v20 = vld [vmem:[#allocation2 + $0x710] sm:$0xff]  }
 0x102   :  { %7447 = vmatpush3.bf16.msra.mxu1 %v8226_v21  ;;  %7426 = vmatprep.subr.bf16.mxu0 %v8227_v22  ;;  %v8286_v21 = vld [vmem:[#allocation2 + $0x790] sm:$0xff]   ;;  %v8287_v22 = vld [vmem:[#allocation2 + $0x758] sm:$0xff]  }
 0x103   :  { %7448 = vmatprep.subr.bf16.mxu1 %v8228_v23  ;;  %v8288_v23 = vld [vmem:[#allocation2 + $0x7d8] sm:$0xff]  }
 0x105   :  { %7427 = vmatpush3.bf16.msra.mxu0 %v8229_v24  ;;  %v8289_v24 = vld [vmem:[#allocation2 + $0x718] sm:$0xff]  }
 0x106   :  { %7449 = vmatpush3.bf16.msra.mxu1 %v8230_v25  ;;  %7428 = vmatprep.subr.bf16.mxu0 %v8231_v26  ;;  %v8290_v25 = vld [vmem:[#allocation2 + $0x798] sm:$0xff]   ;;  %v8291_v26 = vld [vmem:[#allocation2 + $0x760] sm:$0xff]  }
 0x107   :  { %7450 = vmatprep.subr.bf16.mxu1 %v8232_v27  ;;  %v8292_v27 = vld [vmem:[#allocation2 + $0x7e0] sm:$0xff]  }
 0x109   :  { %7429 = vmatpush3.bf16.msra.mxu0 %v8233_v28  ;;  %v8293_v28 = vld [vmem:[#allocation2 + $0x720] sm:$0xff]  }
 0x10a   :  { %7451 = vmatpush3.bf16.msra.mxu1 %v8234_v29  ;;  %7458 = vmatprep.subr.bf16.mxu0 %v8239_v36 }
 0x10b   :  { %7480 = vmatprep.subr.bf16.mxu1 %v8240_v37  ;;  %v8295_v37 = vld [vmem:[#allocation2 + $0x768] sm:$0xff]  }
 0x10c   :  { %5408 = vmatmul.mubr.bf16.vlgmr.msra.gmra.mrb[20].mxu0 %v6557_v32  ;;  %v6536_v32 = vld [vmem:[#allocation4] ss:$0 sm:$0xff] }
 0x10d   :  { %5448 = vmatmul.mubr.bf16.vlgmr.msra.gmra.mrb[20].mxu1 %v6559_v34  ;;  %7459 = vmatpush3.bf16.msra.mxu0 %v8241_v38 }
 0x10e   :  { %7481 = vmatpush3.bf16.msra.mxu1 %v8242_v39  ;;  %7460 = vmatprep.subr.bf16.mxu0 %v8243_v40  ;;  %v8296_v39 = vld [vmem:[#allocation2 + $0x7e8] sm:$0xff]  }
 0x10f   :  { %7482 = vmatprep.subr.bf16.mxu1 %v8244_v41  ;;  %5487 = vmatprep.mubr.bf16.mxu0 %v6562_v7  ;;  %v8321_v7 = vld [vmem:[#allocation2 + $0x810] sm:$0xff]  }
 0x110   :  { %5527 = vmatprep.mubr.bf16.mxu1 %v6564_v10  ;;  %v8324_v10 = vld [vmem:[#allocation2 + $0x8d8] sm:$0xff]  }
 0x111   :  { %7461 = vmatpush3.bf16.msra.mxu0 %v8245_v42  ;;  %v8297_v42 = vld [vmem:[#allocation2 + $0x728] sm:$0xff]  }
 0x112   :  { %7483 = vmatpush3.bf16.msra.mxu1 %v8246_v43  ;;  %7462 = vmatprep.subr.bf16.mxu0 %v8247_v44  ;;  %v8298_v44 = vld [vmem:[#allocation2 + $0x7a8] sm:$0xff]  }
 0x113   :  { %7484 = vmatprep.subr.bf16.mxu1 %v8248_v45 }
 0x115   :  { %7463 = vmatpush3.bf16.msra.mxu0 %v8249_v46 }
 0x116   :  { %7485 = vmatpush3.bf16.msra.mxu1 %v8250_v47  ;;  %7464 = vmatprep.subr.bf16.mxu0 %v8251_v48  ;;  %v8299_v47 = vld [vmem:[#allocation2 + $0x770] sm:$0xff]  }
 0x117   :  { %7486 = vmatprep.subr.bf16.mxu1 %v8252_v49  ;;  %v8300_v48 = vld [vmem:[#allocation2 + $0x7f0] sm:$0xff]  }
 0x118   :  { %v8301_v49 = vld [vmem:[#allocation2 + $0x730] sm:$0xff]  }
 0x119   :  { %7465 = vmatpush3.bf16.msra.mxu0 %v8253_v50  ;;  %v8302_v50 = vld [vmem:[#allocation2 + $0x7b0] sm:$0xff]  }
 0x11a   :  { %7487 = vmatpush3.bf16.msra.mxu1 %v8254_v51  ;;  %7466 = vmatprep.subr.bf16.mxu0 %v8255_v52  ;;  %v8303_v51 = vld [vmem:[#allocation2 + $0x778] sm:$0xff]  }
 0x11b   :  { %7488 = vmatprep.subr.bf16.mxu1 %v8256_v53  ;;  %v8304_v52 = vld [vmem:[#allocation2 + $0x7f8] sm:$0xff]  }
 0x11c   :  { %v8305_v53 = vld [vmem:[#allocation2 + $0x738] sm:$0xff]  }
 0x11d   :  { %7467 = vmatpush3.bf16.msra.mxu0 %v8257_v54  ;;  %v8306_v54 = vld [vmem:[#allocation2 + $0x7b8] sm:$0xff]  }
 0x11e   :  { %7489 = vmatpush3.bf16.msra.mxu1 %v8258_v55  ;;  %7468 = vmatprep.subr.bf16.mxu0 %v8259_v56  ;;  %v86_v55 = vld [vmem:[%s9007_s0 + $0x70] sm:$0xff]  ;;  %v87_v56 = vld [vmem:[%s9007_s0 + $0x78] sm:$0xff] }
 0x11f   :  { %7490 = vmatprep.subr.bf16.mxu1 %v8260_v57  ;;  %v6565_v57 = vcombine.low %v86_v55, %v86_v55 }
 0x121   :  { %7469 = vmatpush3.bf16.msra.mxu0 %v8261_v58  ;;  %v6566_v58 = vcombine.high %v86_v55, %v86_v55  ;;  %v8355_v55 = vld [vmem:[#allocation2 + $0x950] sm:$0xff]  }
 0x122   :  { %7491 = vmatpush3.bf16.msra.mxu1 %v8262_v59  ;;  %7470 = vmatprep.subr.bf16.mxu0 %v8263_v60  ;;  %v6567_v59 = vcombine.low %v87_v56, %v87_v56  ;;  %v6568_v60 = vcombine.high %v87_v56, %v87_v56  ;;  %v8356_v56 = vld [vmem:[#allocation2 + $0x9d0] sm:$0xff]  }
 0x123   :  { %7492 = vmatprep.subr.bf16.mxu1 %v8264_v61  ;;  %v8311_v61 = vld [vmem:[#allocation2 + $0x840] sm:$0xff]  }
 0x125   :  { %7471 = vmatpush3.bf16.msra.mxu0 %v8265_v62  ;;  %v8312_v62 = vld [vmem:[#allocation2 + $0x8c0] sm:$0xff]  }
 0x126   :  { %7493 = vmatpush3.bf16.msra.mxu1 %v8266_v63  ;;  %7472 = vmatprep.subr.bf16.mxu0 %v8267_v0  ;;  %v8313_v63 = vld [vmem:[#allocation2 + $0x800] sm:$0xff]  }
 0x127   :  { %7494 = vmatprep.subr.bf16.mxu1 %v8268_v1  ;;  %v8314_v0 = vld [vmem:[#allocation2 + $0x880] sm:$0xff]   ;;  %v8315_v1 = vld [vmem:[#allocation2 + $0x848] sm:$0xff]  }
 0x129   :  { %7473 = vmatpush3.bf16.msra.mxu0 %v8269_v2  ;;  %v8316_v2 = vld [vmem:[#allocation2 + $0x8c8] sm:$0xff]  }
 0x12a   :  { %7495 = vmatpush3.bf16.msra.mxu1 %v8270_v3  ;;  %7502 = vmatprep.subr.bf16.mxu0 %v8275_v9  ;;  %v8317_v3 = vld [vmem:[#allocation2 + $0x808] sm:$0xff]   ;;  %v8323_v9 = vld [vmem:[#allocation2 + $0x858] sm:$0xff]  }
 0x12b   :  { %7524 = vmatprep.subr.bf16.mxu1 %v8276_v11  ;;  %v8325_v11 = vld [vmem:[#allocation2 + $0x818] sm:$0xff]  }
 0x12c   :  { %5488 = vmatmul.mubr.bf16.vlgmr.msra.gmra.mrb[24].mxu0 %v6561_v6  ;;  %v8320_v6 = vld [vmem:[#allocation2 + $0x8d0] sm:$0xff]  }
 0x12d   :  { %5528 = vmatmul.mubr.bf16.vlgmr.msra.gmra.mrb[24].mxu1 %v6563_v8  ;;  %7503 = vmatpush3.bf16.msra.mxu0 %v8277_v12  ;;  %v8322_v8 = vld [vmem:[#allocation2 + $0x890] sm:$0xff]   ;;  %v8326_v12 = vld [vmem:[#allocation2 + $0x898] sm:$0xff]  }
 0x12e   :  { %7525 = vmatpush3.bf16.msra.mxu1 %v8278_v13  ;;  %7504 = vmatprep.subr.bf16.mxu0 %v8279_v14  ;;  %v8327_v13 = vld [vmem:[#allocation2 + $0x860] sm:$0xff]  }
 0x12f   :  { %7526 = vmatprep.subr.bf16.mxu1 %v8280_v15  ;;  %5567 = vmatprep.mubr.bf16.mxu0 %v6566_v58  ;;  %v8328_v14 = vld [vmem:[#allocation2 + $0x8e0] sm:$0xff]   ;;  %v8358_v58 = vld [vmem:[#allocation2 + $0x990] sm:$0xff]  }
 0x130   :  { %5607 = vmatprep.mubr.bf16.mxu1 %v6568_v60  ;;  %v8329_v15 = vld [vmem:[#allocation2 + $0x820] sm:$0xff]   ;;  %v8360_v60 = vld [vmem:[#allocation2 + $0x9d8] sm:$0xff]  }
 0x131   :  { %7505 = vmatpush3.bf16.msra.mxu0 %v8281_v16 }
 0x132   :  { %7527 = vmatpush3.bf16.msra.mxu1 %v8282_v17  ;;  %7506 = vmatprep.subr.bf16.mxu0 %v8283_v18  ;;  %v8330_v17 = vld [vmem:[#allocation2 + $0x8a0] sm:$0xff]  }
 0x133   :  { %7528 = vmatprep.subr.bf16.mxu1 %v8284_v19 }
 0x135   :  { %7507 = vmatpush3.bf16.msra.mxu0 %v8285_v20 }
 0x136   :  { %7529 = vmatpush3.bf16.msra.mxu1 %v8286_v21  ;;  %7508 = vmatprep.subr.bf16.mxu0 %v8287_v22 }
 0x137   :  { %7530 = vmatprep.subr.bf16.mxu1 %v8288_v23  ;;  %v8331_v23 = vld [vmem:[#allocation2 + $0x868] sm:$0xff]  }
 0x139   :  { %7509 = vmatpush3.bf16.msra.mxu0 %v8289_v24 }
 0x13a   :  { %7531 = vmatpush3.bf16.msra.mxu1 %v8290_v25  ;;  %7510 = vmatprep.subr.bf16.mxu0 %v8291_v26  ;;  %v8332_v25 = vld [vmem:[#allocation2 + $0x8e8] sm:$0xff]  }
 0x13b   :  { %7532 = vmatprep.subr.bf16.mxu1 %v8292_v27 }
 0x13d   :  { %7511 = vmatpush3.bf16.msra.mxu0 %v8293_v28  ;;  %v8333_v28 = vld [vmem:[#allocation2 + $0x828] sm:$0xff]  }
 0x13e   :  { %7533 = vmatpush3.bf16.msra.mxu1 %v8294_v30  ;;  %7512 = vmatprep.subr.bf16.mxu0 %v8295_v37  ;;  %v8334_v30 = vld [vmem:[#allocation2 + $0x8a8] sm:$0xff]   ;;  %v8339_v37 = vld [vmem:[#allocation2 + $0x878] sm:$0xff]  }
 0x13f   :  { %v7210_v29 = vpop.f32.mrb[0].mxu0  ;;  %7534 = vmatprep.subr.bf16.mxu1 %v8296_v39  ;;  %v8341_v39 = vld [vmem:[#allocation2 + $0x838] sm:$0xff]  }
 0x140   :  { %v7232_v31 = vpop.f32.mrb[0].mxu1  ;;  %v7211_v33 = vpop.f32.mrb[1].mxu0 }
 0x141   :  { %v7233_v34 = vpop.f32.mrb[1].mxu1  ;;  %v7212_v35 = vadd.f32 %v7211_v33, %v7210_v29  ;;  %v7213_v38 = vpop.f32.mrb[2].mxu0  ;;  %7513 = vmatpush3.bf16.msra.mxu0 %v8297_v42  ;;  %v8335_v33 = vld [vmem:[#allocation2 + $0x870] sm:$0xff]   ;;  %v89_v42 = vld [vmem:[%s9007_s0 + $0x88] sm:$0xff] }
 0x142   :  { %v7234_v36 = vadd.f32 %v7233_v34, %v7232_v31  ;;  %v7235_v40 = vpop.f32.mrb[2].mxu1  ;;  %v7214_v43 = vpop.f32.mrb[3].mxu0  ;;  %7535 = vmatpush3.bf16.msra.mxu1 %v8298_v44  ;;  %7514 = vmatprep.subr.bf16.mxu0 %v8299_v47  ;;  %v8336_v34 = vld [vmem:[#allocation2 + $0x8f0] sm:$0xff]   ;;  %v8340_v38 = vld [vmem:[#allocation2 + $0x8f8] sm:$0xff]   ;;  %v8347_v47 = vld [vmem:[#allocation2 + $0x940] sm:$0xff]  }
 0x143   :  { %v5010_v41 = vadd.f32 %v7212_v35, %v6536_v32  ;;  %v7236_v45 = vpop.f32.mrb[3].mxu1  ;;  %7536 = vmatprep.subr.bf16.mxu1 %v8300_v48  ;;  %v8337_v35 = vld [vmem:[#allocation2 + $0x830] sm:$0xff]   ;;  %v8342_v40 = vld [vmem:[#allocation2 + $0x8b8] sm:$0xff]   ;;  %v8348_v48 = vld [vmem:[#allocation2 + $0x9c0] sm:$0xff]  }
 0x144   :  { %v6571_v45 = vcombine.low %v89_v42, %v89_v42 }
 0x145   :  { %v8908_v46 = vadd.f32 %v7234_v36, %v5010_v41  ;;  %7515 = vmatpush3.bf16.msra.mxu0 %v8301_v49  ;;  %v8338_v36 = vld [vmem:[#allocation2 + $0x8b0] sm:$0xff]   ;;  %v88_v41 = vld [vmem:[%s9007_s0 + $0x80] sm:$0xff] }
 0x146   :  { %7537 = vmatpush3.bf16.msra.mxu1 %v8302_v50  ;;  %7516 = vmatprep.subr.bf16.mxu0 %v8303_v51  ;;  %v6569_v43 = vcombine.low %v88_v41, %v88_v41  ;;  %v6570_v44 = vcombine.high %v88_v41, %v88_v41  ;;  %v8349_v49 = vld [vmem:[#allocation2 + $0x900] sm:$0xff]   ;;  %v8351_v51 = vld [vmem:[#allocation2 + $0x948] sm:$0xff]   ;;  %v8391_v41 = vld [vmem:[#allocation2 + $0xa50] sm:$0xff]  }
 0x147   :  { %7538 = vmatprep.subr.bf16.mxu1 %v8304_v52  ;;  %v8350_v50 = vld [vmem:[#allocation2 + $0x980] sm:$0xff]   ;;  %v8352_v52 = vld [vmem:[#allocation2 + $0x9c8] sm:$0xff]  }
 0x149   :  { %7517 = vmatpush3.bf16.msra.mxu0 %v8305_v53  ;;  %v8353_v53 = vld [vmem:[#allocation2 + $0x908] sm:$0xff]  }
 0x14a   :  { %7539 = vmatpush3.bf16.msra.mxu1 %v8306_v54  ;;  %7546 = vmatprep.subr.bf16.mxu0 %v8311_v61  ;;  %v8354_v54 = vld [vmem:[#allocation2 + $0x988] sm:$0xff]   ;;  %v8361_v61 = vld [vmem:[#allocation2 + $0x918] sm:$0xff]  }
 0x14b   :  { %7568 = vmatprep.subr.bf16.mxu1 %v8312_v62  ;;  %v8362_v62 = vld [vmem:[#allocation2 + $0x998] sm:$0xff]  }
 0x14c   :  { %5568 = vmatmul.mubr.bf16.vlgmr.msra.gmra.mrb[28].mxu0 %v6565_v57  ;;  %v8357_v57 = vld [vmem:[#allocation2 + $0x910] sm:$0xff]  }
 0x14d   :  { %5608 = vmatmul.mubr.bf16.vlgmr.msra.gmra.mrb[28].mxu1 %v6567_v59  ;;  %7547 = vmatpush3.bf16.msra.mxu0 %v8313_v63  ;;  %v8359_v59 = vld [vmem:[#allocation2 + $0x958] sm:$0xff]   ;;  %v8363_v63 = vld [vmem:[#allocation2 + $0x960] sm:$0xff]  }
 0x14e   :  { %7569 = vmatpush3.bf16.msra.mxu1 %v8314_v0  ;;  %7548 = vmatprep.subr.bf16.mxu0 %v8315_v1  ;;  %v8364_v0 = vld [vmem:[#allocation2 + $0x9e0] sm:$0xff]  }
 0x14f   :  { %7570 = vmatprep.subr.bf16.mxu1 %v8316_v2  ;;  %5647 = vmatprep.mubr.bf16.mxu0 %v6570_v44  ;;  %v8365_v2 = vld [vmem:[#allocation2 + $0x920] sm:$0xff]   ;;  %v8394_v44 = vld [vmem:[#allocation2 + $0xa90] sm:$0xff]  }
 0x151   :  { %7549 = vmatpush3.bf16.msra.mxu0 %v8317_v3 }
 0x152   :  { %7571 = vmatpush3.bf16.msra.mxu1 %v8318_v4  ;;  %7550 = vmatprep.subr.bf16.mxu0 %v8319_v5  ;;  %v8366_v4 = vld [vmem:[#allocation2 + $0x9a0] sm:$0xff]  }
 0x153   :  { %7572 = vmatprep.subr.bf16.mxu1 %v8320_v6 }
 0x155   :  { %7551 = vmatpush3.bf16.msra.mxu0 %v8321_v7 }
 0x156   :  { %7573 = vmatpush3.bf16.msra.mxu1 %v8322_v8  ;;  %7552 = vmatprep.subr.bf16.mxu0 %v8323_v9  ;;  %v8367_v8 = vld [vmem:[#allocation2 + $0x968] sm:$0xff]  }
 0x157   :  { %7574 = vmatprep.subr.bf16.mxu1 %v8324_v10  ;;  %v8368_v10 = vld [vmem:[#allocation2 + $0x9e8] sm:$0xff]  }
 0x159   :  { %7553 = vmatpush3.bf16.msra.mxu0 %v8325_v11 }
 0x15a   :  { %7575 = vmatpush3.bf16.msra.mxu1 %v8326_v12  ;;  %7554 = vmatprep.subr.bf16.mxu0 %v8327_v13 }
 0x15b   :  { %7576 = vmatprep.subr.bf16.mxu1 %v8328_v14  ;;  %v8369_v14 = vld [vmem:[#allocation2 + $0x928] sm:$0xff]  }
 0x15d   :  { %7555 = vmatpush3.bf16.msra.mxu0 %v8329_v15  ;;  %v8370_v15 = vld [vmem:[#allocation2 + $0x9a8] sm:$0xff]  }
 0x15e   :  { %7577 = vmatpush3.bf16.msra.mxu1 %v8330_v17  ;;  %7556 = vmatprep.subr.bf16.mxu0 %v8331_v23  ;;  %v8375_v23 = vld [vmem:[#allocation2 + $0x978] sm:$0xff]  }
 0x15f   :  { %v7254_v16 = vpop.f32.mrb[4].mxu0  ;;  %7578 = vmatprep.subr.bf16.mxu1 %v8332_v25  ;;  %v8377_v25 = vld [vmem:[#allocation2 + $0x938] sm:$0xff]  }
 0x160   :  { %v7276_v18 = vpop.f32.mrb[4].mxu1  ;;  %v7255_v19 = vpop.f32.mrb[5].mxu0 }
 0x161   :  { %v7277_v20 = vpop.f32.mrb[5].mxu1  ;;  %v7256_v21 = vadd.f32 %v7255_v19, %v7254_v16  ;;  %v7257_v24 = vpop.f32.mrb[6].mxu0  ;;  %7557 = vmatpush3.bf16.msra.mxu0 %v8333_v28  ;;  %v8371_v19 = vld [vmem:[#allocation2 + $0x970] sm:$0xff]   ;;  %v91_v28 = vld [vmem:[%s9007_s0 + $0x98] sm:$0xff] }
 0x162   :  { %v7278_v22 = vadd.f32 %v7277_v20, %v7276_v18  ;;  %v7279_v26 = vpop.f32.mrb[6].mxu1  ;;  %v7258_v29 = vpop.f32.mrb[7].mxu0  ;;  %7579 = vmatpush3.bf16.msra.mxu1 %v8334_v30  ;;  %7558 = vmatprep.subr.bf16.mxu0 %v8335_v33  ;;  %v8372_v20 = vld [vmem:[#allocation2 + $0x9f0] sm:$0xff]   ;;  %v8376_v24 = vld [vmem:[#allocation2 + $0x9f8] sm:$0xff]   ;;  %v6576_v33 = vcombine.high %v91_v28, %v91_v28 }
 0x163   :  { %v5090_v27 = vadd.f32 %v7256_v21, %v8908_v46  ;;  %v7280_v31 = vpop.f32.mrb[7].mxu1  ;;  %7580 = vmatprep.subr.bf16.mxu1 %v8336_v34  ;;  %v6572_v46 = vcombine.high %v89_v42, %v89_v42  ;;  %v8373_v21 = vld [vmem:[#allocation2 + $0x930] sm:$0xff]   ;;  %v8378_v26 = vld [vmem:[#allocation2 + $0x9b8] sm:$0xff]   ;;  %v8384_v34 = vld [vmem:[#allocation2 + $0xac0] sm:$0xff]  }
 0x164   :  { %v6575_v31 = vcombine.low %v91_v28, %v91_v28  ;;  %v8392_v42 = vld [vmem:[#allocation2 + $0xad0] sm:$0xff]  }
 0x165   :  { %v8917_v32 = vadd.f32 %v7278_v22, %v5090_v27  ;;  %7559 = vmatpush3.bf16.msra.mxu0 %v8337_v35  ;;  %5687 = vmatprep.mubr.bf16.mxu1 %v6572_v46  ;;  %v8374_v22 = vld [vmem:[#allocation2 + $0x9b0] sm:$0xff]   ;;  %v8385_v35 = vld [vmem:[#allocation2 + $0xa00] sm:$0xff]   ;;  %v8396_v46 = vld [vmem:[#allocation2 + $0xad8] sm:$0xff]  }
 0x166   :  { %7581 = vmatpush3.bf16.msra.mxu1 %v8338_v36  ;;  %7560 = vmatprep.subr.bf16.mxu0 %v8339_v37  ;;  %v90_v27 = vld [vmem:[%s9007_s0 + $0x90] sm:$0xff]  ;;  %v8386_v36 = vld [vmem:[#allocation2 + $0xa80] sm:$0xff]   ;;  %v8387_v37 = vld [vmem:[#allocation2 + $0xa48] sm:$0xff]  }
 0x167   :  { %7582 = vmatprep.subr.bf16.mxu1 %v8340_v38  ;;  %v6573_v29 = vcombine.low %v90_v27, %v90_v27  ;;  %v6574_v30 = vcombine.high %v90_v27, %v90_v27  ;;  %v8388_v38 = vld [vmem:[#allocation2 + $0xac8] sm:$0xff]   ;;  %v8427_v27 = vld [vmem:[#allocation2 + $0xb50] sm:$0xff]  }
 0x168   :  { %v8428_v28 = vld [vmem:[#allocation2 + $0xbd0] sm:$0xff]  }
 0x169   :  { %7561 = vmatpush3.bf16.msra.mxu0 %v8341_v39  ;;  %v8389_v39 = vld [vmem:[#allocation2 + $0xa08] sm:$0xff]  }
 0x16a   :  { %7583 = vmatpush3.bf16.msra.mxu1 %v8342_v40  ;;  %7590 = vmatprep.subr.bf16.mxu0 %v8347_v47  ;;  %v8390_v40 = vld [vmem:[#allocation2 + $0xa88] sm:$0xff]   ;;  %v8397_v47 = vld [vmem:[#allocation2 + $0xa18] sm:$0xff]  }
 0x16b   :  { %7612 = vmatprep.subr.bf16.mxu1 %v8348_v48  ;;  %v8398_v48 = vld [vmem:[#allocation2 + $0xa98] sm:$0xff]  }
 0x16c   :  { %5648 = vmatmul.mubr.bf16.vlgmr.msra.gmra.mrb[32].mxu0 %v6569_v43  ;;  %v8393_v43 = vld [vmem:[#allocation2 + $0xa10] sm:$0xff]  }
 0x16d   :  { %5688 = vmatmul.mubr.bf16.vlgmr.msra.gmra.mrb[32].mxu1 %v6571_v45  ;;  %7591 = vmatpush3.bf16.msra.mxu0 %v8349_v49  ;;  %v8395_v45 = vld [vmem:[#allocation2 + $0xa58] sm:$0xff]   ;;  %v8399_v49 = vld [vmem:[#allocation2 + $0xa60] sm:$0xff]  }
 0x16e   :  { %7613 = vmatpush3.bf16.msra.mxu1 %v8350_v50  ;;  %7592 = vmatprep.subr.bf16.mxu0 %v8351_v51  ;;  %v8400_v50 = vld [vmem:[#allocation2 + $0xae0] sm:$0xff]  }
 0x16f   :  { %7614 = vmatprep.subr.bf16.mxu1 %v8352_v52  ;;  %5727 = vmatprep.mubr.bf16.mxu0 %v6574_v30  ;;  %v8401_v52 = vld [vmem:[#allocation2 + $0xa20] sm:$0xff]   ;;  %v8430_v30 = vld [vmem:[#allocation2 + $0xb90] sm:$0xff]  }
 0x170   :  { %5767 = vmatprep.mubr.bf16.mxu1 %v6576_v33  ;;  %v8433_v33 = vld [vmem:[#allocation2 + $0xb18] sm:$0xff]  }
 0x171   :  { %7593 = vmatpush3.bf16.msra.mxu0 %v8353_v53 }
 0x172   :  { %7615 = vmatpush3.bf16.msra.mxu1 %v8354_v54  ;;  %7594 = vmatprep.subr.bf16.mxu0 %v8355_v55  ;;  %v8402_v54 = vld [vmem:[#allocation2 + $0xaa0] sm:$0xff]  }
 0x173   :  { %7616 = vmatprep.subr.bf16.mxu1 %v8356_v56 }
 0x175   :  { %7595 = vmatpush3.bf16.msra.mxu0 %v8357_v57  ;;  %v8403_v57 = vld [vmem:[#allocation2 + $0xa68] sm:$0xff]  }
 0x176   :  { %7617 = vmatpush3.bf16.msra.mxu1 %v8358_v58  ;;  %7596 = vmatprep.subr.bf16.mxu0 %v8359_v59 }
 0x177   :  { %7618 = vmatprep.subr.bf16.mxu1 %v8360_v60  ;;  %v8404_v60 = vld [vmem:[#allocation2 + $0xae8] sm:$0xff]  }
 0x179   :  { %7597 = vmatpush3.bf16.msra.mxu0 %v8361_v61 }
 0x17a   :  { %7619 = vmatpush3.bf16.msra.mxu1 %v8362_v62  ;;  %7598 = vmatprep.subr.bf16.mxu0 %v8363_v63  ;;  %v8405_v63 = vld [vmem:[#allocation2 + $0xa28] sm:$0xff]  }
 0x17b   :  { %7620 = vmatprep.subr.bf16.mxu1 %v8364_v0 }
 0x17d   :  { %7599 = vmatpush3.bf16.msra.mxu0 %v8365_v2 }
 0x17e   :  { %7621 = vmatpush3.bf16.msra.mxu1 %v8366_v4  ;;  %7600 = vmatprep.subr.bf16.mxu0 %v8367_v8  ;;  %v8407_v4 = vld [vmem:[#allocation2 + $0xa70] sm:$0xff]  }
 0x17f   :  { %v7298_v1 = vpop.f32.mrb[8].mxu0  ;;  %7622 = vmatprep.subr.bf16.mxu1 %v8368_v10  ;;  %v8410_v8 = vld [vmem:[#allocation2 + $0xab0] sm:$0xff]   ;;  %v8412_v10 = vld [vmem:[#allocation2 + $0xaf8] sm:$0xff]  }
 0x180   :  { %v7320_v3 = vpop.f32.mrb[8].mxu1  ;;  %v7299_v5 = vpop.f32.mrb[9].mxu0 }
 0x181   :  { %v7300_v6 = vadd.f32 %v7299_v5, %v7298_v1  ;;  %v7321_v7 = vpop.f32.mrb[9].mxu1  ;;  %v7301_v11 = vpop.f32.mrb[10].mxu0  ;;  %7601 = vmatpush3.bf16.msra.mxu0 %v8369_v14  ;;  %v8406_v1 = vld [vmem:[#allocation2 + $0xaa8] sm:$0xff]  }
 0x182   :  { %v7322_v9 = vadd.f32 %v7321_v7, %v7320_v3  ;;  %v7323_v13 = vpop.f32.mrb[10].mxu1  ;;  %v7302_v16 = vpop.f32.mrb[11].mxu0  ;;  %7623 = vmatpush3.bf16.msra.mxu1 %v8370_v15  ;;  %7602 = vmatprep.subr.bf16.mxu0 %v8371_v19  ;;  %v8409_v7 = vld [vmem:[#allocation2 + $0xa30] sm:$0xff]   ;;  %v8413_v11 = vld [vmem:[#allocation2 + $0xa38] sm:$0xff]   ;;  %v8419_v19 = vld [vmem:[#allocation2 + $0xb40] sm:$0xff]  }
 0x183   :  { %v5170_v12 = vadd.f32 %v7300_v6, %v8917_v32  ;;  %v7324_v18 = vpop.f32.mrb[11].mxu1  ;;  %7624 = vmatprep.subr.bf16.mxu1 %v8372_v20  ;;  %v8383_v32 = vld [vmem:[#allocation2 + $0xa40] sm:$0xff]   ;;  %v8408_v6 = vld [vmem:[#allocation2 + $0xaf0] sm:$0xff]   ;;  %v93_v16 = vld [vmem:[%s9007_s0 + $0xa8] sm:$0xff] }
 0x184   :  { %v92_v13 = vld [vmem:[%s9007_s0 + $0xa0] sm:$0xff]  ;;  %v6580_v18 = vcombine.high %v93_v16, %v93_v16 }
 0x185   :  { %v8926_v17 = vadd.f32 %v7322_v9, %v5170_v12  ;;  %7603 = vmatpush3.bf16.msra.mxu0 %v8373_v21  ;;  %v8411_v9 = vld [vmem:[#allocation2 + $0xa78] sm:$0xff]   ;;  %v6577_v14 = vcombine.low %v92_v13, %v92_v13  ;;  %v6578_v15 = vcombine.high %v92_v13, %v92_v13  ;;  %v8420_v20 = vld [vmem:[#allocation2 + $0xbc0] sm:$0xff]   ;;  %v8463_v13 = vld [vmem:[#allocation2 + $0xc50] sm:$0xff]  }
 0x186   :  { %7625 = vmatpush3.bf16.msra.mxu1 %v8374_v22  ;;  %7604 = vmatprep.subr.bf16.mxu0 %v8375_v23  ;;  %v8414_v12 = vld [vmem:[#allocation2 + $0xab8] sm:$0xff]   ;;  %v8421_v21 = vld [vmem:[#allocation2 + $0xb00] sm:$0xff]   ;;  %v8423_v23 = vld [vmem:[#allocation2 + $0xb48] sm:$0xff]  }
 0x187   :  { %7626 = vmatprep.subr.bf16.mxu1 %v8376_v24  ;;  %v8422_v22 = vld [vmem:[#allocation2 + $0xb80] sm:$0xff]   ;;  %v8424_v24 = vld [vmem:[#allocation2 + $0xbc8] sm:$0xff]  }
 0x189   :  { %7605 = vmatpush3.bf16.msra.mxu0 %v8377_v25  ;;  %v8425_v25 = vld [vmem:[#allocation2 + $0xb08] sm:$0xff]  }
 0x18a   :  { %7627 = vmatpush3.bf16.msra.mxu1 %v8378_v26  ;;  %7634 = vmatprep.subr.bf16.mxu0 %v8383_v32  ;;  %v8426_v26 = vld [vmem:[#allocation2 + $0xb88] sm:$0xff]   ;;  %v8432_v32 = vld [vmem:[#allocation2 + $0xbd8] sm:$0xff]  }
 0x18b   :  { %7656 = vmatprep.subr.bf16.mxu1 %v8384_v34  ;;  %v8434_v34 = vld [vmem:[#allocation2 + $0xb98] sm:$0xff]  }
 0x18c   :  { %5728 = vmatmul.mubr.bf16.vlgmr.msra.gmra.mrb[36].mxu0 %v6573_v29  ;;  %v8429_v29 = vld [vmem:[#allocation2 + $0xb10] sm:$0xff]  }
 0x18d   :  { %5768 = vmatmul.mubr.bf16.vlgmr.msra.gmra.mrb[36].mxu1 %v6575_v31  ;;  %7635 = vmatpush3.bf16.msra.mxu0 %v8385_v35  ;;  %v8431_v31 = vld [vmem:[#allocation2 + $0xb58] sm:$0xff]   ;;  %v8435_v35 = vld [vmem:[#allocation2 + $0xb60] sm:$0xff]  }
 0x18e   :  { %7657 = vmatpush3.bf16.msra.mxu1 %v8386_v36  ;;  %7636 = vmatprep.subr.bf16.mxu0 %v8387_v37  ;;  %v8436_v36 = vld [vmem:[#allocation2 + $0xbe0] sm:$0xff]  }
 0x18f   :  { %7658 = vmatprep.subr.bf16.mxu1 %v8388_v38  ;;  %5807 = vmatprep.mubr.bf16.mxu0 %v6578_v15  ;;  %v8437_v38 = vld [vmem:[#allocation2 + $0xb20] sm:$0xff]   ;;  %v8465_v15 = vld [vmem:[#allocation2 + $0xc10] sm:$0xff]  }
 0x190   :  { %5847 = vmatprep.mubr.bf16.mxu1 %v6580_v18  ;;  %v8468_v18 = vld [vmem:[#allocation2 + $0xcd8] sm:$0xff]  }
 0x191   :  { %7637 = vmatpush3.bf16.msra.mxu0 %v8389_v39 }
 0x192   :  { %7659 = vmatpush3.bf16.msra.mxu1 %v8390_v40  ;;  %7638 = vmatprep.subr.bf16.mxu0 %v8391_v41  ;;  %v8438_v40 = vld [vmem:[#allocation2 + $0xba0] sm:$0xff]  }
 0x193   :  { %7660 = vmatprep.subr.bf16.mxu1 %v8392_v42 }
 0x195   :  { %7639 = vmatpush3.bf16.msra.mxu0 %v8393_v43  ;;  %v8439_v43 = vld [vmem:[#allocation2 + $0xb68] sm:$0xff]  }
 0x196   :  { %7661 = vmatpush3.bf16.msra.mxu1 %v8394_v44  ;;  %7640 = vmatprep.subr.bf16.mxu0 %v8395_v45 }
 0x197   :  { %7662 = vmatprep.subr.bf16.mxu1 %v8396_v46  ;;  %v8440_v46 = vld [vmem:[#allocation2 + $0xbe8] sm:$0xff]  }
 0x199   :  { %7641 = vmatpush3.bf16.msra.mxu0 %v8397_v47 }
 0x19a   :  { %7663 = vmatpush3.bf16.msra.mxu1 %v8398_v48  ;;  %7642 = vmatprep.subr.bf16.mxu0 %v8399_v49  ;;  %v8441_v49 = vld [vmem:[#allocation2 + $0xb28] sm:$0xff]  }
 0x19b   :  { %7664 = vmatprep.subr.bf16.mxu1 %v8400_v50 }
 0x19d   :  { %7643 = vmatpush3.bf16.msra.mxu0 %v8401_v52 }
 0x19e   :  { %7665 = vmatpush3.bf16.msra.mxu1 %v8402_v54  ;;  %7644 = vmatprep.subr.bf16.mxu0 %v8403_v57  ;;  %v8443_v54 = vld [vmem:[#allocation2 + $0xb70] sm:$0xff]  }
 0x19f   :  { %v7342_v51 = vpop.f32.mrb[12].mxu0  ;;  %7666 = vmatprep.subr.bf16.mxu1 %v8404_v60  ;;  %v8445_v57 = vld [vmem:[#allocation2 + $0xb30] sm:$0xff]   ;;  %v8448_v60 = vld [vmem:[#allocation2 + $0xbf8] sm:$0xff]  }
 0x1a0   :  { %v7364_v53 = vpop.f32.mrb[12].mxu1  ;;  %v7343_v55 = vpop.f32.mrb[13].mxu0 }
 0x1a1   :  { %v7365_v56 = vpop.f32.mrb[13].mxu1  ;;  %v7344_v58 = vadd.f32 %v7343_v55, %v7342_v51  ;;  %v7345_v61 = vpop.f32.mrb[14].mxu0  ;;  %7645 = vmatpush3.bf16.msra.mxu0 %v8405_v63  ;;  %v8442_v51 = vld [vmem:[#allocation2 + $0xba8] sm:$0xff]   ;;  %v94_v63 = vld [vmem:[%s9007_s0 + $0xb0] sm:$0xff] }
 0x1a2   :  { %v7366_v59 = vadd.f32 %v7365_v56, %v7364_v53  ;;  %v7367_v62 = vpop.f32.mrb[14].mxu1  ;;  %v7346_v2 = vpop.f32.mrb[15].mxu0  ;;  %7667 = vmatpush3.bf16.msra.mxu1 %v8406_v1  ;;  %7646 = vmatprep.subr.bf16.mxu0 %v8407_v4  ;;  %v8444_v56 = vld [vmem:[#allocation2 + $0xbf0] sm:$0xff]   ;;  %v8449_v61 = vld [vmem:[#allocation2 + $0xb38] sm:$0xff]   ;;  %v6581_v1 = vcombine.low %v94_v63, %v94_v63 }
 0x1a3   :  { %v5250_v0 = vadd.f32 %v7344_v58, %v8926_v17  ;;  %v7368_v3 = vpop.f32.mrb[15].mxu1  ;;  %7668 = vmatprep.subr.bf16.mxu1 %v8408_v6  ;;  %v6579_v17 = vcombine.low %v93_v16, %v93_v16  ;;  %v8446_v58 = vld [vmem:[#allocation2 + $0xbb0] sm:$0xff]   ;;  %v8450_v62 = vld [vmem:[#allocation2 + $0xbb8] sm:$0xff]   ;;  %v6582_v2 = vcombine.high %v94_v63, %v94_v63  ;;  %v8456_v6 = vld [vmem:[#allocation2 + $0xcc0] sm:$0xff]  }
 0x1a4   :  { %v8466_v16 = vld [vmem:[#allocation2 + $0xc90] sm:$0xff]  }
 0x1a5   :  { %v8935_v5 = vadd.f32 %v7366_v59, %v5250_v0  ;;  %7647 = vmatpush3.bf16.msra.mxu0 %v8409_v7  ;;  %v8447_v59 = vld [vmem:[#allocation2 + $0xb78] sm:$0xff]   ;;  %v8457_v7 = vld [vmem:[#allocation2 + $0xc00] sm:$0xff]   ;;  %v8499_v63 = vld [vmem:[#allocation2 + $0xd50] sm:$0xff]  }
 0x1a6   :  { %7669 = vmatpush3.bf16.msra.mxu1 %v8410_v8  ;;  %7648 = vmatprep.subr.bf16.mxu0 %v8411_v9  ;;  %v95_v0 = vld [vmem:[%s9007_s0 + $0xb8] sm:$0xff]  ;;  %v8458_v8 = vld [vmem:[#allocation2 + $0xc80] sm:$0xff]   ;;  %v8459_v9 = vld [vmem:[#allocation2 + $0xc48] sm:$0xff]  }
 0x1a7   :  { %7670 = vmatprep.subr.bf16.mxu1 %v8412_v10  ;;  %v6583_v3 = vcombine.low %v95_v0, %v95_v0  ;;  %v6584_v4 = vcombine.high %v95_v0, %v95_v0  ;;  %v8460_v10 = vld [vmem:[#allocation2 + $0xcc8] sm:$0xff]   ;;  %v8500_v0 = vld [vmem:[#allocation2 + $0xdd0] sm:$0xff]  }
 0x1a9   :  { %7649 = vmatpush3.bf16.msra.mxu0 %v8413_v11  ;;  %v8461_v11 = vld [vmem:[#allocation2 + $0xc08] sm:$0xff]  }
 0x1aa   :  { %7671 = vmatpush3.bf16.msra.mxu1 %v8414_v12  ;;  %7678 = vmatprep.subr.bf16.mxu0 %v8419_v19  ;;  %v8462_v12 = vld [vmem:[#allocation2 + $0xc88] sm:$0xff]   ;;  %v8469_v19 = vld [vmem:[#allocation2 + $0xc18] sm:$0xff]  }
 0x1ab   :  { %7700 = vmatprep.subr.bf16.mxu1 %v8420_v20  ;;  %v8470_v20 = vld [vmem:[#allocation2 + $0xc98] sm:$0xff]  }
 0x1ac   :  { %5808 = vmatmul.mubr.bf16.vlgmr.msra.gmra.mrb[40].mxu0 %v6577_v14  ;;  %v8464_v14 = vld [vmem:[#allocation2 + $0xcd0] sm:$0xff]  }
 0x1ad   :  { %5848 = vmatmul.mubr.bf16.vlgmr.msra.gmra.mrb[40].mxu1 %v6579_v17  ;;  %7679 = vmatpush3.bf16.msra.mxu0 %v8421_v21  ;;  %v8467_v17 = vld [vmem:[#allocation2 + $0xc58] sm:$0xff]   ;;  %v8471_v21 = vld [vmem:[#allocation2 + $0xc60] sm:$0xff]  }
 0x1ae   :  { %7701 = vmatpush3.bf16.msra.mxu1 %v8422_v22  ;;  %7680 = vmatprep.subr.bf16.mxu0 %v8423_v23  ;;  %v8472_v22 = vld [vmem:[#allocation2 + $0xce0] sm:$0xff]  }
 0x1af   :  { %7702 = vmatprep.subr.bf16.mxu1 %v8424_v24  ;;  %5887 = vmatprep.mubr.bf16.mxu0 %v6582_v2  ;;  %v8473_v24 = vld [vmem:[#allocation2 + $0xc20] sm:$0xff]   ;;  %v8502_v2 = vld [vmem:[#allocation2 + $0xd90] sm:$0xff]  }
 0x1b0   :  { %5927 = vmatprep.mubr.bf16.mxu1 %v6584_v4  ;;  %v8504_v4 = vld [vmem:[#allocation2 + $0xdd8] sm:$0xff]  }
 0x1b1   :  { %7681 = vmatpush3.bf16.msra.mxu0 %v8425_v25 }
 0x1b2   :  { %7703 = vmatpush3.bf16.msra.mxu1 %v8426_v26  ;;  %7682 = vmatprep.subr.bf16.mxu0 %v8427_v27  ;;  %v8474_v26 = vld [vmem:[#allocation2 + $0xca0] sm:$0xff]  }
 0x1b3   :  { %7704 = vmatprep.subr.bf16.mxu1 %v8428_v28 }
 0x1b5   :  { %7683 = vmatpush3.bf16.msra.mxu0 %v8429_v29 }
 0x1b6   :  { %7705 = vmatpush3.bf16.msra.mxu1 %v8430_v30  ;;  %7684 = vmatprep.subr.bf16.mxu0 %v8431_v31  ;;  %v8475_v30 = vld [vmem:[#allocation2 + $0xc68] sm:$0xff]  }
 0x1b7   :  { %7706 = vmatprep.subr.bf16.mxu1 %v8432_v32  ;;  %v8476_v32 = vld [vmem:[#allocation2 + $0xce8] sm:$0xff]  }
 0x1b9   :  { %7685 = vmatpush3.bf16.msra.mxu0 %v8433_v33 }
 0x1ba   :  { %7707 = vmatpush3.bf16.msra.mxu1 %v8434_v34  ;;  %7686 = vmatprep.subr.bf16.mxu0 %v8435_v35 }
 0x1bb   :  { %7708 = vmatprep.subr.bf16.mxu1 %v8436_v36  ;;  %v8477_v36 = vld [vmem:[#allocation2 + $0xc28] sm:$0xff]  }
 0x1bd   :  { %7687 = vmatpush3.bf16.msra.mxu0 %v8437_v38 }
 0x1be   :  { %7709 = vmatpush3.bf16.msra.mxu1 %v8438_v40  ;;  %7688 = vmatprep.subr.bf16.mxu0 %v8439_v43  ;;  %v8481_v43 = vld [vmem:[#allocation2 + $0xc30] sm:$0xff]  }
 0x1bf   :  { %v7386_v37 = vpop.f32.mrb[16].mxu0  ;;  %7710 = vmatprep.subr.bf16.mxu1 %v8440_v46  ;;  %v8484_v46 = vld [vmem:[#allocation2 + $0xcf8] sm:$0xff]  }
 0x1c0   :  { %v7408_v39 = vpop.f32.mrb[16].mxu1  ;;  %v7387_v41 = vpop.f32.mrb[17].mxu0 }
 0x1c1   :  { %v7409_v42 = vpop.f32.mrb[17].mxu1  ;;  %v7388_v44 = vadd.f32 %v7387_v41, %v7386_v37  ;;  %v7389_v47 = vpop.f32.mrb[18].mxu0  ;;  %7689 = vmatpush3.bf16.msra.mxu0 %v8441_v49  ;;  %v8478_v37 = vld [vmem:[#allocation2 + $0xca8] sm:$0xff]   ;;  %v8479_v41 = vld [vmem:[#allocation2 + $0xc70] sm:$0xff]   ;;  %v96_v49 = vld [vmem:[%s9007_s0 + $0xc0] sm:$0xff] }
 0x1c2   :  { %v7410_v45 = vadd.f32 %v7409_v42, %v7408_v39  ;;  %v7411_v48 = vpop.f32.mrb[18].mxu1  ;;  %v7390_v52 = vpop.f32.mrb[19].mxu0  ;;  %7711 = vmatpush3.bf16.msra.mxu1 %v8442_v51  ;;  %7690 = vmatprep.subr.bf16.mxu0 %v8443_v54  ;;  %v8480_v42 = vld [vmem:[#allocation2 + $0xcf0] sm:$0xff]   ;;  %v8485_v47 = vld [vmem:[#allocation2 + $0xc38] sm:$0xff]   ;;  %v6585_v51 = vcombine.low %v96_v49, %v96_v49  ;;  %v8491_v54 = vld [vmem:[#allocation2 + $0xd40] sm:$0xff]  }
 0x1c3   :  { %v5330_v50 = vadd.f32 %v7388_v44, %v8935_v5  ;;  %v7412_v53 = vpop.f32.mrb[19].mxu1  ;;  %7712 = vmatprep.subr.bf16.mxu1 %v8444_v56  ;;  %v8455_v5 = vld [vmem:[#allocation2 + $0xc40] sm:$0xff]   ;;  %v8482_v44 = vld [vmem:[#allocation2 + $0xcb0] sm:$0xff]   ;;  %v8486_v48 = vld [vmem:[#allocation2 + $0xcb8] sm:$0xff]   ;;  %v6586_v52 = vcombine.high %v96_v49, %v96_v49 }
 0x1c4   :  { %v8492_v56 = vld [vmem:[#allocation2 + $0xdc0] sm:$0xff]   ;;  %v8535_v49 = vld [vmem:[#allocation2 + $0xe50] sm:$0xff]  }
 0x1c5   :  { %v8944_v55 = vadd.f32 %v7410_v45, %v5330_v50  ;;  %7691 = vmatpush3.bf16.msra.mxu0 %v8445_v57  ;;  %v8483_v45 = vld [vmem:[#allocation2 + $0xc78] sm:$0xff]   ;;  %v97_v50 = vld [vmem:[%s9007_s0 + $0xc8] sm:$0xff]  ;;  %v8493_v57 = vld [vmem:[#allocation2 + $0xd00] sm:$0xff]  }
 0x1c6   :  { %7713 = vmatpush3.bf16.msra.mxu1 %v8446_v58  ;;  %7692 = vmatprep.subr.bf16.mxu0 %v8447_v59  ;;  %v6587_v53 = vcombine.low %v97_v50, %v97_v50  ;;  %v8494_v58 = vld [vmem:[#allocation2 + $0xd80] sm:$0xff]   ;;  %v8495_v59 = vld [vmem:[#allocation2 + $0xd48] sm:$0xff]  }
 0x1c7   :  { %7714 = vmatprep.subr.bf16.mxu1 %v8448_v60  ;;  %v8496_v60 = vld [vmem:[#allocation2 + $0xdc8] sm:$0xff]  }
 0x1c9   :  { %7693 = vmatpush3.bf16.msra.mxu0 %v8449_v61  ;;  %v8497_v61 = vld [vmem:[#allocation2 + $0xd08] sm:$0xff]  }
 0x1ca   :  { %7715 = vmatpush3.bf16.msra.mxu1 %v8450_v62  ;;  %7722 = vmatprep.subr.bf16.mxu0 %v8455_v5  ;;  %v8498_v62 = vld [vmem:[#allocation2 + $0xd88] sm:$0xff]   ;;  %v8505_v5 = vld [vmem:[#allocation2 + $0xd18] sm:$0xff]  }
 0x1cb   :  { %7744 = vmatprep.subr.bf16.mxu1 %v8456_v6  ;;  %v8506_v6 = vld [vmem:[#allocation2 + $0xd98] sm:$0xff]  }
 0x1cc   :  { %5888 = vmatmul.mubr.bf16.vlgmr.msra.gmra.mrb[44].mxu0 %v6581_v1  ;;  %v8501_v1 = vld [vmem:[#allocation2 + $0xd10] sm:$0xff]  }
 0x1cd   :  { %5928 = vmatmul.mubr.bf16.vlgmr.msra.gmra.mrb[44].mxu1 %v6583_v3  ;;  %7723 = vmatpush3.bf16.msra.mxu0 %v8457_v7  ;;  %v8503_v3 = vld [vmem:[#allocation2 + $0xd58] sm:$0xff]   ;;  %v8507_v7 = vld [vmem:[#allocation2 + $0xd60] sm:$0xff]  }
 0x1ce   :  { %7745 = vmatpush3.bf16.msra.mxu1 %v8458_v8  ;;  %7724 = vmatprep.subr.bf16.mxu0 %v8459_v9  ;;  %v8508_v8 = vld [vmem:[#allocation2 + $0xde0] sm:$0xff]  }
 0x1cf   :  { %7746 = vmatprep.subr.bf16.mxu1 %v8460_v10  ;;  %5967 = vmatprep.mubr.bf16.mxu0 %v6586_v52  ;;  %v8509_v10 = vld [vmem:[#allocation2 + $0xd20] sm:$0xff]   ;;  %v8538_v52 = vld [vmem:[#allocation2 + $0xe90] sm:$0xff]  }
 0x1d1   :  { %7725 = vmatpush3.bf16.msra.mxu0 %v8461_v11 }
 0x1d2   :  { %7747 = vmatpush3.bf16.msra.mxu1 %v8462_v12  ;;  %7726 = vmatprep.subr.bf16.mxu0 %v8463_v13  ;;  %v8510_v12 = vld [vmem:[#allocation2 + $0xda0] sm:$0xff]  }
 0x1d3   :  { %7748 = vmatprep.subr.bf16.mxu1 %v8464_v14 }
 0x1d5   :  { %7727 = vmatpush3.bf16.msra.mxu0 %v8465_v15  ;;  %v8511_v15 = vld [vmem:[#allocation2 + $0xd68] sm:$0xff]  }
 0x1d6   :  { %7749 = vmatpush3.bf16.msra.mxu1 %v8466_v16  ;;  %7728 = vmatprep.subr.bf16.mxu0 %v8467_v17 }
 0x1d7   :  { %7750 = vmatprep.subr.bf16.mxu1 %v8468_v18  ;;  %v8512_v18 = vld [vmem:[#allocation2 + $0xde8] sm:$0xff]  }
 0x1d9   :  { %7729 = vmatpush3.bf16.msra.mxu0 %v8469_v19 }
 0x1da   :  { %7751 = vmatpush3.bf16.msra.mxu1 %v8470_v20  ;;  %7730 = vmatprep.subr.bf16.mxu0 %v8471_v21  ;;  %v8513_v21 = vld [vmem:[#allocation2 + $0xd28] sm:$0xff]  }
 0x1db   :  { %7752 = vmatprep.subr.bf16.mxu1 %v8472_v22 }
 0x1dd   :  { %7731 = vmatpush3.bf16.msra.mxu0 %v8473_v24 }
 0x1de   :  { %7753 = vmatpush3.bf16.msra.mxu1 %v8474_v26  ;;  %7732 = vmatprep.subr.bf16.mxu0 %v8475_v30  ;;  %v8515_v26 = vld [vmem:[#allocation2 + $0xd70] sm:$0xff]  }
 0x1df   :  { %v7430_v23 = vpop.f32.mrb[20].mxu0  ;;  %7754 = vmatprep.subr.bf16.mxu1 %v8476_v32  ;;  %v8518_v30 = vld [vmem:[#allocation2 + $0xdb0] sm:$0xff]   ;;  %v8520_v32 = vld [vmem:[#allocation2 + $0xdf8] sm:$0xff]  }
 0x1e0   :  { %v7452_v25 = vpop.f32.mrb[20].mxu1  ;;  %v7431_v27 = vpop.f32.mrb[21].mxu0 }
 0x1e1   :  { %v7432_v28 = vadd.f32 %v7431_v27, %v7430_v23  ;;  %v7453_v29 = vpop.f32.mrb[21].mxu1  ;;  %v7433_v33 = vpop.f32.mrb[22].mxu0  ;;  %7733 = vmatpush3.bf16.msra.mxu0 %v8477_v36  ;;  %v8514_v23 = vld [vmem:[#allocation2 + $0xda8] sm:$0xff]  }
 0x1e2   :  { %v7454_v31 = vadd.f32 %v7453_v29, %v7452_v25  ;;  %v7455_v35 = vpop.f32.mrb[22].mxu1  ;;  %v7434_v38 = vpop.f32.mrb[23].mxu0  ;;  %7755 = vmatpush3.bf16.msra.mxu1 %v8478_v37  ;;  %7734 = vmatprep.subr.bf16.mxu0 %v8479_v41  ;;  %v8517_v29 = vld [vmem:[#allocation2 + $0xd30] sm:$0xff]   ;;  %v8521_v33 = vld [vmem:[#allocation2 + $0xd38] sm:$0xff]   ;;  %v8527_v41 = vld [vmem:[#allocation2 + $0xe40] sm:$0xff]  }
 0x1e3   :  { %v5410_v34 = vadd.f32 %v7432_v28, %v8944_v55  ;;  %v7456_v40 = vpop.f32.mrb[23].mxu1  ;;  %7756 = vmatprep.subr.bf16.mxu1 %v8480_v42  ;;  %v6588_v55 = vcombine.high %v97_v50, %v97_v50  ;;  %v8516_v28 = vld [vmem:[#allocation2 + $0xdf0] sm:$0xff]   ;;  %v99_v38 = vld [vmem:[%s9007_s0 + $0xd8] sm:$0xff]  ;;  %v8528_v42 = vld [vmem:[#allocation2 + $0xec0] sm:$0xff]  }
 0x1e4   :  { %v98_v35 = vld [vmem:[%s9007_s0 + $0xd0] sm:$0xff]  ;;  %v6592_v40 = vcombine.high %v99_v38, %v99_v38 }
 0x1e5   :  { %v8953_v39 = vadd.f32 %v7454_v31, %v5410_v34  ;;  %7735 = vmatpush3.bf16.msra.mxu0 %v8481_v43  ;;  %6007 = vmatprep.mubr.bf16.mxu1 %v6588_v55  ;;  %v8519_v31 = vld [vmem:[#allocation2 + $0xd78] sm:$0xff]   ;;  %v6589_v36 = vcombine.low %v98_v35, %v98_v35  ;;  %v6590_v37 = vcombine.high %v98_v35, %v98_v35  ;;  %v8529_v43 = vld [vmem:[#allocation2 + $0xe00] sm:$0xff]   ;;  %v8536_v50 = vld [vmem:[#allocation2 + $0xed0] sm:$0xff]  }
 0x1e6   :  { %7757 = vmatpush3.bf16.msra.mxu1 %v8482_v44  ;;  %7736 = vmatprep.subr.bf16.mxu0 %v8483_v45  ;;  %v8522_v34 = vld [vmem:[#allocation2 + $0xdb8] sm:$0xff]   ;;  %v8530_v44 = vld [vmem:[#allocation2 + $0xe80] sm:$0xff]   ;;  %v8531_v45 = vld [vmem:[#allocation2 + $0xe48] sm:$0xff]  }
 0x1e7   :  { %7758 = vmatprep.subr.bf16.mxu1 %v8484_v46  ;;  %v8532_v46 = vld [vmem:[#allocation2 + $0xec8] sm:$0xff]   ;;  %v8541_v55 = vld [vmem:[#allocation2 + $0xe18] sm:$0xff]   ;;  %v8571_v35 = vld [vmem:[#allocation2 + $0xf50] sm:$0xff]  }
 0x1e9   :  { %7737 = vmatpush3.bf16.msra.mxu0 %v8485_v47  ;;  %v8533_v47 = vld [vmem:[#allocation2 + $0xe08] sm:$0xff]  }
 0x1ea   :  { %7759 = vmatpush3.bf16.msra.mxu1 %v8486_v48  ;;  %7766 = vmatprep.subr.bf16.mxu0 %v8491_v54  ;;  %v8534_v48 = vld [vmem:[#allocation2 + $0xe88] sm:$0xff]   ;;  %v8540_v54 = vld [vmem:[#allocation2 + $0xed8] sm:$0xff]  }
 0x1eb   :  { %7788 = vmatprep.subr.bf16.mxu1 %v8492_v56  ;;  %v8542_v56 = vld [vmem:[#allocation2 + $0xe98] sm:$0xff]  }
 0x1ec   :  { %5968 = vmatmul.mubr.bf16.vlgmr.msra.gmra.mrb[48].mxu0 %v6585_v51  ;;  %v8537_v51 = vld [vmem:[#allocation2 + $0xe10] sm:$0xff]  }
 0x1ed   :  { %6008 = vmatmul.mubr.bf16.vlgmr.msra.gmra.mrb[48].mxu1 %v6587_v53  ;;  %7767 = vmatpush3.bf16.msra.mxu0 %v8493_v57  ;;  %v8539_v53 = vld [vmem:[#allocation2 + $0xe58] sm:$0xff]   ;;  %v8543_v57 = vld [vmem:[#allocation2 + $0xe60] sm:$0xff]  }
 0x1ee   :  { %7789 = vmatpush3.bf16.msra.mxu1 %v8494_v58  ;;  %7768 = vmatprep.subr.bf16.mxu0 %v8495_v59  ;;  %v8544_v58 = vld [vmem:[#allocation2 + $0xee0] sm:$0xff]  }
 0x1ef   :  { %7790 = vmatprep.subr.bf16.mxu1 %v8496_v60  ;;  %6047 = vmatprep.mubr.bf16.mxu0 %v6590_v37  ;;  %v8545_v60 = vld [vmem:[#allocation2 + $0xe20] sm:$0xff]   ;;  %v8573_v37 = vld [vmem:[#allocation2 + $0xf10] sm:$0xff]  }
 0x1f0   :  { %6087 = vmatprep.mubr.bf16.mxu1 %v6592_v40  ;;  %v8576_v40 = vld [vmem:[#allocation2 + $0xfd8] sm:$0xff]  }
 0x1f1   :  { %7769 = vmatpush3.bf16.msra.mxu0 %v8497_v61 }
 0x1f2   :  { %7791 = vmatpush3.bf16.msra.mxu1 %v8498_v62  ;;  %7770 = vmatprep.subr.bf16.mxu0 %v8499_v63  ;;  %v8546_v62 = vld [vmem:[#allocation2 + $0xea0] sm:$0xff]  }
 0x1f3   :  { %7792 = vmatprep.subr.bf16.mxu1 %v8500_v0 }
 0x1f5   :  { %7771 = vmatpush3.bf16.msra.mxu0 %v8501_v1  ;;  %v8547_v1 = vld [vmem:[#allocation2 + $0xe68] sm:$0xff]  }
 0x1f6   :  { %7793 = vmatpush3.bf16.msra.mxu1 %v8502_v2  ;;  %7772 = vmatprep.subr.bf16.mxu0 %v8503_v3 }
 0x1f7   :  { %7794 = vmatprep.subr.bf16.mxu1 %v8504_v4  ;;  %v8548_v4 = vld [vmem:[#allocation2 + $0xee8] sm:$0xff]  }
 0x1f9   :  { %7773 = vmatpush3.bf16.msra.mxu0 %v8505_v5 }
 0x1fa   :  { %7795 = vmatpush3.bf16.msra.mxu1 %v8506_v6  ;;  %7774 = vmatprep.subr.bf16.mxu0 %v8507_v7  ;;  %v8549_v7 = vld [vmem:[#allocation2 + $0xe28] sm:$0xff]  }
 0x1fb   :  { %7796 = vmatprep.subr.bf16.mxu1 %v8508_v8 }
 0x1fd   :  { %7775 = vmatpush3.bf16.msra.mxu0 %v8509_v10 }
 0x1fe   :  { %7797 = vmatpush3.bf16.msra.mxu1 %v8510_v12  ;;  %7776 = vmatprep.subr.bf16.mxu0 %v8511_v15  ;;  %v8551_v12 = vld [vmem:[#allocation2 + $0xe70] sm:$0xff]  }
 0x1ff   :  { %v7474_v9 = vpop.f32.mrb[24].mxu0  ;;  %7798 = vmatprep.subr.bf16.mxu1 %v8512_v18  ;;  %v8553_v15 = vld [vmem:[#allocation2 + $0xe30] sm:$0xff]   ;;  %v8556_v18 = vld [vmem:[#allocation2 + $0xef8] sm:$0xff]  }
 0x200   :  { %v7496_v11 = vpop.f32.mrb[24].mxu1  ;;  %v7475_v13 = vpop.f32.mrb[25].mxu0 }
 0x201   :  { %v7497_v14 = vpop.f32.mrb[25].mxu1  ;;  %v7476_v16 = vadd.f32 %v7475_v13, %v7474_v9  ;;  %v7477_v19 = vpop.f32.mrb[26].mxu0  ;;  %7777 = vmatpush3.bf16.msra.mxu0 %v8513_v21  ;;  %v8550_v9 = vld [vmem:[#allocation2 + $0xea8] sm:$0xff]   ;;  %v100_v21 = vld [vmem:[%s9007_s0 + $0xe0] sm:$0xff] }
 0x202   :  { %v7498_v17 = vadd.f32 %v7497_v14, %v7496_v11  ;;  %v7499_v20 = vpop.f32.mrb[26].mxu1  ;;  %v7478_v24 = vpop.f32.mrb[27].mxu0  ;;  %7799 = vmatpush3.bf16.msra.mxu1 %v8514_v23  ;;  %7778 = vmatprep.subr.bf16.mxu0 %v8515_v26  ;;  %v8552_v14 = vld [vmem:[#allocation2 + $0xef0] sm:$0xff]   ;;  %v8557_v19 = vld [vmem:[#allocation2 + $0xe38] sm:$0xff]   ;;  %v6593_v23 = vcombine.low %v100_v21, %v100_v21 }
 0x203   :  { %v5490_v22 = vadd.f32 %v7476_v16, %v8953_v39  ;;  %v7500_v25 = vpop.f32.mrb[27].mxu1  ;;  %7800 = vmatprep.subr.bf16.mxu1 %v8516_v28  ;;  %v6591_v39 = vcombine.low %v99_v38, %v99_v38  ;;  %v8554_v16 = vld [vmem:[#allocation2 + $0xeb0] sm:$0xff]   ;;  %v8558_v20 = vld [vmem:[#allocation2 + $0xeb8] sm:$0xff]   ;;  %v6594_v24 = vcombine.high %v100_v21, %v100_v21  ;;  %v8564_v28 = vld [vmem:[#allocation2 + $0xfc0] sm:$0xff]  }
 0x204   :  { %v8574_v38 = vld [vmem:[#allocation2 + $0xf90] sm:$0xff]  }
 0x205   :  { %v8962_v27 = vadd.f32 %v7498_v17, %v5490_v22  ;;  %7779 = vmatpush3.bf16.msra.mxu0 %v8517_v29  ;;  %v8555_v17 = vld [vmem:[#allocation2 + $0xe78] sm:$0xff]   ;;  %v101_v22 = vld [vmem:[%s9007_s0 + $0xe8] sm:$0xff]  ;;  %v8565_v29 = vld [vmem:[#allocation2 + $0xf00] sm:$0xff]  }
 0x206   :  { %7801 = vmatpush3.bf16.msra.mxu1 %v8518_v30  ;;  %7780 = vmatprep.subr.bf16.mxu0 %v8519_v31  ;;  %v6595_v25 = vcombine.low %v101_v22, %v101_v22  ;;  %v6596_v26 = vcombine.high %v101_v22, %v101_v22  ;;  %v8566_v30 = vld [vmem:[#allocation2 + $0xf80] sm:$0xff]   ;;  %v8567_v31 = vld [vmem:[#allocation2 + $0xf48] sm:$0xff]   ;;  %v8607_v21 = vld [vmem:[#allocation2 + $0x1050] sm:$0xff]  }
 0x207   :  { %7802 = vmatprep.subr.bf16.mxu1 %v8520_v32  ;;  %v8568_v32 = vld [vmem:[#allocation2 + $0xfc8] sm:$0xff]   ;;  %v8608_v22 = vld [vmem:[#allocation2 + $0x10d0] sm:$0xff]  }
 0x209   :  { %7781 = vmatpush3.bf16.msra.mxu0 %v8521_v33  ;;  %v8569_v33 = vld [vmem:[#allocation2 + $0xf08] sm:$0xff]  }
 0x20a   :  { %7803 = vmatpush3.bf16.msra.mxu1 %v8522_v34  ;;  %7810 = vmatprep.subr.bf16.mxu0 %v8527_v41  ;;  %v8570_v34 = vld [vmem:[#allocation2 + $0xf88] sm:$0xff]   ;;  %v8577_v41 = vld [vmem:[#allocation2 + $0xf18] sm:$0xff]  }
 0x20b   :  { %7832 = vmatprep.subr.bf16.mxu1 %v8528_v42  ;;  %v8578_v42 = vld [vmem:[#allocation2 + $0xf98] sm:$0xff]  }
 0x20c   :  { %6048 = vmatmul.mubr.bf16.vlgmr.msra.gmra.mrb[52].mxu0 %v6589_v36  ;;  %v8572_v36 = vld [vmem:[#allocation2 + $0xfd0] sm:$0xff]  }
 0x20d   :  { %6088 = vmatmul.mubr.bf16.vlgmr.msra.gmra.mrb[52].mxu1 %v6591_v39  ;;  %7811 = vmatpush3.bf16.msra.mxu0 %v8529_v43  ;;  %v8575_v39 = vld [vmem:[#allocation2 + $0xf58] sm:$0xff]   ;;  %v8579_v43 = vld [vmem:[#allocation2 + $0xf60] sm:$0xff]  }
 0x20e   :  { %7833 = vmatpush3.bf16.msra.mxu1 %v8530_v44  ;;  %7812 = vmatprep.subr.bf16.mxu0 %v8531_v45  ;;  %v8580_v44 = vld [vmem:[#allocation2 + $0xfe0] sm:$0xff]  }
 0x20f   :  { %7834 = vmatprep.subr.bf16.mxu1 %v8532_v46  ;;  %6127 = vmatprep.mubr.bf16.mxu0 %v6594_v24  ;;  %v8581_v45 = vld [vmem:[#allocation2 + $0xf20] sm:$0xff]   ;;  %v8610_v24 = vld [vmem:[#allocation2 + $0x1090] sm:$0xff]  }
 0x210   :  { %6167 = vmatprep.mubr.bf16.mxu1 %v6596_v26  ;;  %v8612_v26 = vld [vmem:[#allocation2 + $0x10d8] sm:$0xff]  }
 0x211   :  { %7813 = vmatpush3.bf16.msra.mxu0 %v8533_v47  ;;  %v8582_v47 = vld [vmem:[#allocation2 + $0xfa0] sm:$0xff]  }
 0x212   :  { %7835 = vmatpush3.bf16.msra.mxu1 %v8534_v48  ;;  %7814 = vmatprep.subr.bf16.mxu0 %v8535_v49 }
 0x213   :  { %7836 = vmatprep.subr.bf16.mxu1 %v8536_v50 }
 0x215   :  { %7815 = vmatpush3.bf16.msra.mxu0 %v8537_v51 }
 0x216   :  { %7837 = vmatpush3.bf16.msra.mxu1 %v8538_v52  ;;  %7816 = vmatprep.subr.bf16.mxu0 %v8539_v53  ;;  %v8583_v53 = vld [vmem:[#allocation2 + $0xf68] sm:$0xff]  }
 0x217   :  { %7838 = vmatprep.subr.bf16.mxu1 %v8540_v54 }
 0x219   :  { %7817 = vmatpush3.bf16.msra.mxu0 %v8541_v55  ;;  %v8584_v55 = vld [vmem:[#allocation2 + $0xfe8] sm:$0xff]  }
 0x21a   :  { %7839 = vmatpush3.bf16.msra.mxu1 %v8542_v56  ;;  %7818 = vmatprep.subr.bf16.mxu0 %v8543_v57 }
 0x21b   :  { %7840 = vmatprep.subr.bf16.mxu1 %v8544_v58  ;;  %v8585_v58 = vld [vmem:[#allocation2 + $0xf28] sm:$0xff]  }
 0x21d   :  { %7819 = vmatpush3.bf16.msra.mxu0 %v8545_v60  ;;  %v8586_v60 = vld [vmem:[#allocation2 + $0xfa8] sm:$0xff]  }
 0x21e   :  { %7841 = vmatpush3.bf16.msra.mxu1 %v8546_v62  ;;  %7820 = vmatprep.subr.bf16.mxu0 %v8547_v1  ;;  %v8589_v1 = vld [vmem:[#allocation2 + $0xf30] sm:$0xff]  }
 0x21f   :  { %v7518_v59 = vpop.f32.mrb[28].mxu0  ;;  %7842 = vmatprep.subr.bf16.mxu1 %v8548_v4  ;;  %v8592_v4 = vld [vmem:[#allocation2 + $0xff8] sm:$0xff]  }
 0x220   :  { %v7540_v61 = vpop.f32.mrb[28].mxu1  ;;  %v7519_v63 = vpop.f32.mrb[29].mxu0 }
 0x221   :  { %v7541_v0 = vpop.f32.mrb[29].mxu1  ;;  %v7520_v2 = vadd.f32 %v7519_v63, %v7518_v59  ;;  %v7521_v5 = vpop.f32.mrb[30].mxu0  ;;  %7821 = vmatpush3.bf16.msra.mxu0 %v8549_v7  ;;  %v8587_v63 = vld [vmem:[#allocation2 + $0xf70] sm:$0xff]  }
 0x222   :  { %v7542_v3 = vadd.f32 %v7541_v0, %v7540_v61  ;;  %v7543_v6 = vpop.f32.mrb[30].mxu1  ;;  %v7522_v10 = vpop.f32.mrb[31].mxu0  ;;  %7843 = vmatpush3.bf16.msra.mxu1 %v8550_v9  ;;  %7822 = vmatprep.subr.bf16.mxu0 %v8551_v12  ;;  %v8588_v0 = vld [vmem:[#allocation2 + $0xff0] sm:$0xff]   ;;  %v8593_v5 = vld [vmem:[#allocation2 + $0xf38] sm:$0xff]  }
 0x223   :  { %v5570_v8 = vadd.f32 %v7520_v2, %v8962_v27  ;;  %v7544_v11 = vpop.f32.mrb[31].mxu1  ;;  %7844 = vmatprep.subr.bf16.mxu1 %v8552_v14  ;;  %v8563_v27 = vld [vmem:[#allocation2 + $0xf40] sm:$0xff]   ;;  %v8590_v2 = vld [vmem:[#allocation2 + $0xfb0] sm:$0xff]   ;;  %v8594_v6 = vld [vmem:[#allocation2 + $0xfb8] sm:$0xff]  }
 0x224   :  { %v102_v7 = vld [vmem:[%s9007_s0 + $0xf0] sm:$0xff]  ;;  %v8600_v14 = vld [vmem:[#allocation2 + $0x10c0] sm:$0xff]  }
 0x225   :  { %v8971_v13 = vadd.f32 %v7542_v3, %v5570_v8  ;;  %7823 = vmatpush3.bf16.msra.mxu0 %v8553_v15  ;;  %v8591_v3 = vld [vmem:[#allocation2 + $0xf78] sm:$0xff]   ;;  %v6597_v9 = vcombine.low %v102_v7, %v102_v7  ;;  %v6598_v10 = vcombine.high %v102_v7, %v102_v7  ;;  %v8601_v15 = vld [vmem:[#allocation2 + $0x1000] sm:$0xff]   ;;  %v8643_v7 = vld [vmem:[#allocation2 + $0x1150] sm:$0xff]  }
 0x226   :  { %7845 = vmatpush3.bf16.msra.mxu1 %v8554_v16  ;;  %7824 = vmatprep.subr.bf16.mxu0 %v8555_v17  ;;  %v103_v8 = vld [vmem:[%s9007_s0 + $0xf8] sm:$0xff]  ;;  %v8602_v16 = vld [vmem:[#allocation2 + $0x1080] sm:$0xff]   ;;  %v8603_v17 = vld [vmem:[#allocation2 + $0x1048] sm:$0xff]  }
 0x227   :  { %7846 = vmatprep.subr.bf16.mxu1 %v8556_v18  ;;  %v6599_v11 = vcombine.low %v103_v8, %v103_v8  ;;  %v6600_v12 = vcombine.high %v103_v8, %v103_v8  ;;  %v8604_v18 = vld [vmem:[#allocation2 + $0x10c8] sm:$0xff]   ;;  %v8644_v8 = vld [vmem:[#allocation2 + $0x11d0] sm:$0xff]  }
 0x229   :  { %7825 = vmatpush3.bf16.msra.mxu0 %v8557_v19  ;;  %v8605_v19 = vld [vmem:[#allocation2 + $0x1008] sm:$0xff]  }
 0x22a   :  { %7847 = vmatpush3.bf16.msra.mxu1 %v8558_v20  ;;  %7854 = vmatprep.subr.bf16.mxu0 %v8563_v27  ;;  %v8606_v20 = vld [vmem:[#allocation2 + $0x1088] sm:$0xff]   ;;  %v8613_v27 = vld [vmem:[#allocation2 + $0x1018] sm:$0xff]  }
 0x22b   :  { %7876 = vmatprep.subr.bf16.mxu1 %v8564_v28  ;;  %v8614_v28 = vld [vmem:[#allocation2 + $0x1098] sm:$0xff]  }
 0x22c   :  { %6128 = vmatmul.mubr.bf16.vlgmr.msra.gmra.mrb[56].mxu0 %v6593_v23  ;;  %v8609_v23 = vld [vmem:[#allocation2 + $0x1010] sm:$0xff]  }
 0x22d   :  { %6168 = vmatmul.mubr.bf16.vlgmr.msra.gmra.mrb[56].mxu1 %v6595_v25  ;;  %7855 = vmatpush3.bf16.msra.mxu0 %v8565_v29  ;;  %v8611_v25 = vld [vmem:[#allocation2 + $0x1058] sm:$0xff]   ;;  %v8615_v29 = vld [vmem:[#allocation2 + $0x1060] sm:$0xff]  }
 0x22e   :  { %7877 = vmatpush3.bf16.msra.mxu1 %v8566_v30  ;;  %7856 = vmatprep.subr.bf16.mxu0 %v8567_v31  ;;  %v8616_v30 = vld [vmem:[#allocation2 + $0x10e0] sm:$0xff]  }
 0x22f   :  { %7878 = vmatprep.subr.bf16.mxu1 %v8568_v32  ;;  %6207 = vmatprep.mubr.bf16.mxu0 %v6598_v10  ;;  %v8617_v31 = vld [vmem:[#allocation2 + $0x1020] sm:$0xff]   ;;  %v8646_v10 = vld [vmem:[#allocation2 + $0x1190] sm:$0xff]  }
 0x230   :  { %6247 = vmatprep.mubr.bf16.mxu1 %v6600_v12  ;;  %v8648_v12 = vld [vmem:[#allocation2 + $0x11d8] sm:$0xff]  }
 0x231   :  { %7857 = vmatpush3.bf16.msra.mxu0 %v8569_v33  ;;  %v8618_v33 = vld [vmem:[#allocation2 + $0x10a0] sm:$0xff]  }
 0x232   :  { %7879 = vmatpush3.bf16.msra.mxu1 %v8570_v34  ;;  %7858 = vmatprep.subr.bf16.mxu0 %v8571_v35 }
 0x233   :  { %7880 = vmatprep.subr.bf16.mxu1 %v8572_v36 }
 0x235   :  { %7859 = vmatpush3.bf16.msra.mxu0 %v8573_v37 }
 0x236   :  { %7881 = vmatpush3.bf16.msra.mxu1 %v8574_v38  ;;  %7860 = vmatprep.subr.bf16.mxu0 %v8575_v39  ;;  %v8619_v39 = vld [vmem:[#allocation2 + $0x1068] sm:$0xff]  }
 0x237   :  { %7882 = vmatprep.subr.bf16.mxu1 %v8576_v40 }
 0x239   :  { %7861 = vmatpush3.bf16.msra.mxu0 %v8577_v41  ;;  %v8620_v41 = vld [vmem:[#allocation2 + $0x10e8] sm:$0xff]  }
 0x23a   :  { %7883 = vmatpush3.bf16.msra.mxu1 %v8578_v42  ;;  %7862 = vmatprep.subr.bf16.mxu0 %v8579_v43 }
 0x23b   :  { %7884 = vmatprep.subr.bf16.mxu1 %v8580_v44  ;;  %v8621_v44 = vld [vmem:[#allocation2 + $0x1028] sm:$0xff]  }
 0x23d   :  { %7863 = vmatpush3.bf16.msra.mxu0 %v8581_v45 }
 0x23e   :  { %7885 = vmatpush3.bf16.msra.mxu1 %v8582_v47  ;;  %7864 = vmatprep.subr.bf16.mxu0 %v8583_v53  ;;  %v8627_v53 = vld [vmem:[#allocation2 + $0x1078] sm:$0xff]  }
 0x23f   :  { %v7562_v46 = vpop.f32.mrb[32].mxu0  ;;  %7886 = vmatprep.subr.bf16.mxu1 %v8584_v55  ;;  %v8629_v55 = vld [vmem:[#allocation2 + $0x1038] sm:$0xff]  }
 0x240   :  { %v7584_v48 = vpop.f32.mrb[32].mxu1  ;;  %v7563_v49 = vpop.f32.mrb[33].mxu0 }
 0x241   :  { %v7585_v50 = vpop.f32.mrb[33].mxu1  ;;  %v7564_v51 = vadd.f32 %v7563_v49, %v7562_v46  ;;  %v7565_v54 = vpop.f32.mrb[34].mxu0  ;;  %7865 = vmatpush3.bf16.msra.mxu0 %v8585_v58  ;;  %v8622_v46 = vld [vmem:[#allocation2 + $0x10a8] sm:$0xff]   ;;  %v8623_v49 = vld [vmem:[#allocation2 + $0x1070] sm:$0xff]  }
 0x242   :  { %v7586_v52 = vadd.f32 %v7585_v50, %v7584_v48  ;;  %v7587_v56 = vpop.f32.mrb[34].mxu1  ;;  %v7566_v59 = vpop.f32.mrb[35].mxu0  ;;  %7887 = vmatpush3.bf16.msra.mxu1 %v8586_v60  ;;  %7866 = vmatprep.subr.bf16.mxu0 %v8587_v63  ;;  %v8624_v50 = vld [vmem:[#allocation2 + $0x10f0] sm:$0xff]   ;;  %v8628_v54 = vld [vmem:[#allocation2 + $0x10f8] sm:$0xff]   ;;  %v105_v58 = vld [vmem:[%s9007_s0 + $0x108] sm:$0xff] }
 0x243   :  { %v5650_v57 = vadd.f32 %v7564_v51, %v8971_v13  ;;  %v7588_v61 = vpop.f32.mrb[35].mxu1  ;;  %7888 = vmatprep.subr.bf16.mxu1 %v8588_v0  ;;  %v8599_v13 = vld [vmem:[#allocation2 + $0x1040] sm:$0xff]   ;;  %v8625_v51 = vld [vmem:[#allocation2 + $0x1030] sm:$0xff]   ;;  %v8630_v56 = vld [vmem:[#allocation2 + $0x10b8] sm:$0xff]  }
 0x244   :  { %v6603_v61 = vcombine.low %v105_v58, %v105_v58  ;;  %v8635_v63 = vld [vmem:[#allocation2 + $0x1140] sm:$0xff]  }
 0x245   :  { %v8980_v62 = vadd.f32 %v7586_v52, %v5650_v57  ;;  %7867 = vmatpush3.bf16.msra.mxu0 %v8589_v1  ;;  %v8626_v52 = vld [vmem:[#allocation2 + $0x10b0] sm:$0xff]   ;;  %v104_v57 = vld [vmem:[%s9007_s0 + $0x100] sm:$0xff] }
 0x246   :  { %7889 = vmatpush3.bf16.msra.mxu1 %v8590_v2  ;;  %7868 = vmatprep.subr.bf16.mxu0 %v8591_v3  ;;  %v6601_v59 = vcombine.low %v104_v57, %v104_v57  ;;  %v6602_v60 = vcombine.high %v104_v57, %v104_v57  ;;  %v8636_v0 = vld [vmem:[#allocation2 + $0x11c0] sm:$0xff]   ;;  %v8639_v3 = vld [vmem:[#allocation2 + $0x1148] sm:$0xff]  }
 0x247   :  { %7890 = vmatprep.subr.bf16.mxu1 %v8592_v4  ;;  %v8637_v1 = vld [vmem:[#allocation2 + $0x1100] sm:$0xff]   ;;  %v8640_v4 = vld [vmem:[#allocation2 + $0x11c8] sm:$0xff]  }
 0x248   :  { %v8638_v2 = vld [vmem:[#allocation2 + $0x1180] sm:$0xff]  }
 0x249   :  { %7869 = vmatpush3.bf16.msra.mxu0 %v8593_v5  ;;  %v8641_v5 = vld [vmem:[#allocation2 + $0x1108] sm:$0xff]  }
 0x24a   :  { %7891 = vmatpush3.bf16.msra.mxu1 %v8594_v6  ;;  %7898 = vmatprep.subr.bf16.mxu0 %v8599_v13  ;;  %v8642_v6 = vld [vmem:[#allocation2 + $0x1188] sm:$0xff]   ;;  %v8649_v13 = vld [vmem:[#allocation2 + $0x1118] sm:$0xff]  }
 0x24b   :  { %7920 = vmatprep.subr.bf16.mxu1 %v8600_v14  ;;  %v8650_v14 = vld [vmem:[#allocation2 + $0x1198] sm:$0xff]  }
 0x24c   :  { %6208 = vmatmul.mubr.bf16.vlgmr.msra.gmra.mrb[60].mxu0 %v6597_v9  ;;  %v8645_v9 = vld [vmem:[#allocation2 + $0x1110] sm:$0xff]  }
 0x24d   :  { %6248 = vmatmul.mubr.bf16.vlgmr.msra.gmra.mrb[60].mxu1 %v6599_v11  ;;  %7899 = vmatpush3.bf16.msra.mxu0 %v8601_v15  ;;  %v8647_v11 = vld [vmem:[#allocation2 + $0x1158] sm:$0xff]   ;;  %v8651_v15 = vld [vmem:[#allocation2 + $0x1160] sm:$0xff]  }
 0x24e   :  { %7921 = vmatpush3.bf16.msra.mxu1 %v8602_v16  ;;  %7900 = vmatprep.subr.bf16.mxu0 %v8603_v17  ;;  %v8652_v16 = vld [vmem:[#allocation2 + $0x11e0] sm:$0xff]  }
 0x24f   :  { %7922 = vmatprep.subr.bf16.mxu1 %v8604_v18  ;;  %6287 = vmatprep.mubr.bf16.mxu0 %v6602_v60  ;;  %v8653_v17 = vld [vmem:[#allocation2 + $0x1120] sm:$0xff]  }
 0x251   :  { %7901 = vmatpush3.bf16.msra.mxu0 %v8605_v19  ;;  %v8654_v19 = vld [vmem:[#allocation2 + $0x11a0] sm:$0xff]  }
 0x252   :  { %7923 = vmatpush3.bf16.msra.mxu1 %v8606_v20  ;;  %7902 = vmatprep.subr.bf16.mxu0 %v8607_v21 }
 0x253   :  { %7924 = vmatprep.subr.bf16.mxu1 %v8608_v22 }
 0x255   :  { %7903 = vmatpush3.bf16.msra.mxu0 %v8609_v23 }
 0x256   :  { %7925 = vmatpush3.bf16.msra.mxu1 %v8610_v24  ;;  %7904 = vmatprep.subr.bf16.mxu0 %v8611_v25  ;;  %v8655_v25 = vld [vmem:[#allocation2 + $0x1168] sm:$0xff]  }
 0x257   :  { %7926 = vmatprep.subr.bf16.mxu1 %v8612_v26 }
 0x259   :  { %7905 = vmatpush3.bf16.msra.mxu0 %v8613_v27  ;;  %v8656_v27 = vld [vmem:[#allocation2 + $0x11e8] sm:$0xff]  }
 0x25a   :  { %7927 = vmatpush3.bf16.msra.mxu1 %v8614_v28  ;;  %7906 = vmatprep.subr.bf16.mxu0 %v8615_v29 }
 0x25b   :  { %7928 = vmatprep.subr.bf16.mxu1 %v8616_v30  ;;  %v8657_v30 = vld [vmem:[#allocation2 + $0x1128] sm:$0xff]  }
 0x25d   :  { %7907 = vmatpush3.bf16.msra.mxu0 %v8617_v31 }
 0x25e   :  { %7929 = vmatpush3.bf16.msra.mxu1 %v8618_v33  ;;  %7908 = vmatprep.subr.bf16.mxu0 %v8619_v39  ;;  %v8663_v39 = vld [vmem:[#allocation2 + $0x1178] sm:$0xff]  }
 0x25f   :  { %v7606_v32 = vpop.f32.mrb[36].mxu0  ;;  %7930 = vmatprep.subr.bf16.mxu1 %v8620_v41  ;;  %v8665_v41 = vld [vmem:[#allocation2 + $0x1138] sm:$0xff]  }
 0x260   :  { %v7628_v34 = vpop.f32.mrb[36].mxu1  ;;  %v7607_v35 = vpop.f32.mrb[37].mxu0 }
 0x261   :  { %v7629_v36 = vpop.f32.mrb[37].mxu1  ;;  %v7608_v37 = vadd.f32 %v7607_v35, %v7606_v32  ;;  %v7609_v40 = vpop.f32.mrb[38].mxu0  ;;  %7909 = vmatpush3.bf16.msra.mxu0 %v8621_v44  ;;  %v8658_v32 = vld [vmem:[#allocation2 + $0x11a8] sm:$0xff]   ;;  %v8659_v35 = vld [vmem:[#allocation2 + $0x1170] sm:$0xff]   ;;  %v107_v44 = vld [vmem:[%s9007_s0 + $0x118] sm:$0xff] }
 0x262   :  { %v7630_v38 = vadd.f32 %v7629_v36, %v7628_v34  ;;  %v7631_v42 = vpop.f32.mrb[38].mxu1  ;;  %v7610_v45 = vpop.f32.mrb[39].mxu0  ;;  %7931 = vmatpush3.bf16.msra.mxu1 %v8622_v46  ;;  %7910 = vmatprep.subr.bf16.mxu0 %v8623_v49  ;;  %v8660_v36 = vld [vmem:[#allocation2 + $0x11f0] sm:$0xff]   ;;  %v8664_v40 = vld [vmem:[#allocation2 + $0x11f8] sm:$0xff]  }
 0x263   :  { %v5730_v43 = vadd.f32 %v7608_v37, %v8980_v62  ;;  %v7632_v47 = vpop.f32.mrb[39].mxu1  ;;  %7932 = vmatprep.subr.bf16.mxu1 %v8624_v50  ;;  %v6604_v62 = vcombine.high %v105_v58, %v105_v58  ;;  %v8661_v37 = vld [vmem:[#allocation2 + $0x1130] sm:$0xff]   ;;  %v8666_v42 = vld [vmem:[#allocation2 + $0x11b8] sm:$0xff]  }
 0x264   :  { %v6607_v47 = vcombine.low %v107_v44, %v107_v44 }
 0x265   :  { %v8989_v48 = vadd.f32 %v7630_v38, %v5730_v43  ;;  %7911 = vmatpush3.bf16.msra.mxu0 %v8625_v51  ;;  %6327 = vmatprep.mubr.bf16.mxu1 %v6604_v62  ;;  %v8662_v38 = vld [vmem:[#allocation2 + $0x11b0] sm:$0xff]  }
 0x266   :  { %7933 = vmatpush3.bf16.msra.mxu1 %v8626_v52  ;;  %7912 = vmatprep.subr.bf16.mxu0 %v8627_v53  ;;  %v106_v43 = vld [vmem:[%s9007_s0 + $0x110] sm:$0xff] }
 0x267   :  { %7934 = vmatprep.subr.bf16.mxu1 %v8628_v54  ;;  %v6605_v45 = vcombine.low %v106_v43, %v106_v43  ;;  %v6606_v46 = vcombine.high %v106_v43, %v106_v43 }
 0x269   :  { %7913 = vmatpush3.bf16.msra.mxu0 %v8629_v55 }
 0x26a   :  { %7935 = vmatpush3.bf16.msra.mxu1 %v8630_v56  ;;  %7942 = vmatprep.subr.bf16.mxu0 %v8635_v63 }
 0x26b   :  { %7964 = vmatprep.subr.bf16.mxu1 %v8636_v0 }
 0x26c   :  { %6288 = vmatmul.mubr.bf16.vlgmr.msra.gmra.mrb[64].mxu0 %v6601_v59 }
 0x26d   :  { %6328 = vmatmul.mubr.bf16.vlgmr.msra.gmra.mrb[64].mxu1 %v6603_v61  ;;  %7943 = vmatpush3.bf16.msra.mxu0 %v8637_v1 }
 0x26e   :  { %7965 = vmatpush3.bf16.msra.mxu1 %v8638_v2  ;;  %7944 = vmatprep.subr.bf16.mxu0 %v8639_v3 }
 0x26f   :  { %7966 = vmatprep.subr.bf16.mxu1 %v8640_v4  ;;  %6367 = vmatprep.mubr.bf16.mxu0 %v6606_v46 }
 0x271   :  { %7945 = vmatpush3.bf16.msra.mxu0 %v8641_v5 }
 0x272   :  { %7967 = vmatpush3.bf16.msra.mxu1 %v8642_v6  ;;  %7946 = vmatprep.subr.bf16.mxu0 %v8643_v7 }
 0x273   :  { %7968 = vmatprep.subr.bf16.mxu1 %v8644_v8 }
 0x275   :  { %7947 = vmatpush3.bf16.msra.mxu0 %v8645_v9  ;;  %v8671_v9 = vld [vmem:[#allocation6] sm:$0xff]  }
 0x276   :  { %7969 = vmatpush3.bf16.msra.mxu1 %v8646_v10  ;;  %7948 = vmatprep.subr.bf16.mxu0 %v8647_v11  ;;  %v8779_v10 = vmov 0.0   ;;  %v8672_v11 = vld [vmem:[#allocation6 + $0x8] sm:$0xff]  }
 0x277   :  { %7970 = vmatprep.subr.bf16.mxu1 %v8648_v12  ;;  %v8673_v12 = vld [vmem:[#allocation6 + $0x10] sm:$0xff]  }
 0x279   :  { %7949 = vmatpush3.bf16.msra.mxu0 %v8649_v13  ;;  %v8674_v13 = vld [vmem:[#allocation6 + $0x18] sm:$0xff]  }
 0x27a   :  { %7971 = vmatpush3.bf16.msra.mxu1 %v8650_v14  ;;  %7950 = vmatprep.subr.bf16.mxu0 %v8651_v15  ;;  %v8675_v14 = vld [vmem:[#allocation6 + $0x20] sm:$0xff]  }
 0x27b   :  { %7972 = vmatprep.subr.bf16.mxu1 %v8652_v16 }
 0x27d   :  { %7951 = vmatpush3.bf16.msra.mxu0 %v8653_v17 }
 0x27e   :  { %7973 = vmatpush3.bf16.msra.mxu1 %v8654_v19  ;;  %7952 = vmatprep.subr.bf16.mxu0 %v8655_v25  ;;  %v8676_v25 = vld [vmem:[#allocation6 + $0x28] sm:$0xff]  }
 0x27f   :  { %v7650_v18 = vpop.f32.mrb[40].mxu0  ;;  %7974 = vmatprep.subr.bf16.mxu1 %v8656_v27 }
 0x280   :  { %v7672_v20 = vpop.f32.mrb[40].mxu1  ;;  %v7651_v21 = vpop.f32.mrb[41].mxu0 }
 0x281   :  { %v7673_v22 = vpop.f32.mrb[41].mxu1  ;;  %v7652_v23 = vadd.f32 %v7651_v21, %v7650_v18  ;;  %v7653_v26 = vpop.f32.mrb[42].mxu0  ;;  %7953 = vmatpush3.bf16.msra.mxu0 %v8657_v30 }
 0x282   :  { %v7674_v24 = vadd.f32 %v7673_v22, %v7672_v20  ;;  %v7675_v28 = vpop.f32.mrb[42].mxu1  ;;  %v7654_v31 = vpop.f32.mrb[43].mxu0  ;;  %7975 = vmatpush3.bf16.msra.mxu1 %v8658_v32  ;;  %7954 = vmatprep.subr.bf16.mxu0 %v8659_v35 }
 0x283   :  { %v5810_v29 = vadd.f32 %v7652_v23, %v8989_v48  ;;  %v7676_v33 = vpop.f32.mrb[43].mxu1  ;;  %7976 = vmatprep.subr.bf16.mxu1 %v8660_v36  ;;  %v6608_v48 = vcombine.high %v107_v44, %v107_v44  ;;  %v8677_v28 = vld [vmem:[#allocation6 + $0x30] sm:$0xff]  }
 0x285   :  { %v5850_v34 = vadd.f32 %v7674_v24, %v5810_v29  ;;  %7955 = vmatpush3.bf16.msra.mxu0 %v8661_v37  ;;  %6407 = vmatprep.mubr.bf16.mxu1 %v6608_v48  ;;  %v8678_v29 = vld [vmem:[#allocation6 + $0x38] sm:$0xff]  }
 0x286   :  { %7977 = vmatpush3.bf16.msra.mxu1 %v8662_v38  ;;  %7956 = vmatprep.subr.bf16.mxu0 %v8663_v39 }
 0x287   :  { %7978 = vmatprep.subr.bf16.mxu1 %v8664_v40 }
 0x289   :  { %7957 = vmatpush3.bf16.msra.mxu0 %v8665_v41 }
 0x28a   :  { %7979 = vmatpush3.bf16.msra.mxu1 %v8666_v42  ;;  %7995 = vmatprep.subr.bf16.mxu0 %v8779_v10 }
 0x28c   :  { %6368 = vmatmul.mubr.bf16.vlgmr.msra.gmra.mrb[68].mxu0 %v6605_v45 }
 0x28d   :  { %6408 = vmatmul.mubr.bf16.vlgmr.msra.gmra.mrb[68].mxu1 %v6607_v47  ;;  %7996 = vmatpush3.bf16.msra.mxu0 %v8671_v9 }
 0x28e   :  { %7997 = vmatprep.subr.bf16.mxu0 %v8779_v10  ;;  %8011 = vmatprep.mubr.msk.bf16.mxu0 %vm8780_vm0, %v8779_v10 }
 0x291   :  { %7998 = vmatpush3.bf16.msra.mxu0 %v8672_v11 }
 0x292   :  { %7999 = vmatprep.subr.bf16.mxu0 %v8779_v10 }
 0x295   :  { %8000 = vmatpush3.bf16.msra.mxu0 %v8673_v12 }
 0x296   :  { %8001 = vmatprep.subr.bf16.mxu0 %v8779_v10 }
 0x299   :  { %8002 = vmatpush3.bf16.msra.mxu0 %v8674_v13 }
 0x29a   :  { %8003 = vmatprep.subr.bf16.mxu0 %v8779_v10 }
 0x29d   :  { %8004 = vmatpush3.bf16.msra.mxu0 %v8675_v14 }
 0x29e   :  { %8005 = vmatprep.subr.bf16.mxu0 %v8779_v10 }
 0x29f   :  { %v7694_v49 = vpop.f32.mrb[44].mxu0 }
 0x2a0   :  { %v7716_v50 = vpop.f32.mrb[44].mxu1  ;;  %v7695_v51 = vpop.f32.mrb[45].mxu0 }
 0x2a1   :  { %v7696_v52 = vadd.f32 %v7695_v51, %v7694_v49  ;;  %v7717_v53 = vpop.f32.mrb[45].mxu1  ;;  %v7697_v54 = vpop.f32.mrb[46].mxu0  ;;  %8006 = vmatpush3.bf16.msra.mxu0 %v8676_v25 }
 0x2a2   :  { %v7718_v55 = vadd.f32 %v7717_v53, %v7716_v50  ;;  %v7719_v56 = vpop.f32.mrb[46].mxu1  ;;  %v7698_v57 = vpop.f32.mrb[47].mxu0  ;;  %8007 = vmatprep.subr.bf16.mxu0 %v8779_v10 }
 0x2a3   :  { %v5890_v58 = vadd.f32 %v7696_v52, %v5850_v34  ;;  %v7720_v59 = vpop.f32.mrb[47].mxu1 }
 0x2a5   :  { %v5930_v60 = vadd.f32 %v7718_v55, %v5890_v58  ;;  %8008 = vmatpush3.bf16.msra.mxu0 %v8677_v28 }
 0x2a6   :  { %8009 = vmatprep.subr.bf16.mxu0 %v8779_v10 }
 0x2a9   :  { %8010 = vmatpush3.bf16.msra.mxu0 %v8678_v29 }
 0x2bf   :  { %v7738_v61 = vpop.f32.mrb[48].mxu0 }
 0x2c0   :  { %v7760_v62 = vpop.f32.mrb[48].mxu1  ;;  %v7739_v63 = vpop.f32.mrb[49].mxu0 }
 0x2c1   :  { %v7740_v0 = vadd.f32 %v7739_v63, %v7738_v61  ;;  %v7761_v1 = vpop.f32.mrb[49].mxu1  ;;  %v7741_v2 = vpop.f32.mrb[50].mxu0 }
 0x2c2   :  { %v7762_v3 = vadd.f32 %v7761_v1, %v7760_v62  ;;  %v7763_v4 = vpop.f32.mrb[50].mxu1  ;;  %v7742_v5 = vpop.f32.mrb[51].mxu0 }
 0x2c3   :  { %v5970_v6 = vadd.f32 %v7740_v0, %v5930_v60  ;;  %v7764_v7 = vpop.f32.mrb[51].mxu1 }
 0x2c5   :  { %v6010_v8 = vadd.f32 %v7762_v3, %v5970_v6 }
 0x2df   :  { %v7782_v15 = vpop.f32.mrb[52].mxu0 }
 0x2e0   :  { %v7804_v16 = vpop.f32.mrb[52].mxu1  ;;  %v7783_v17 = vpop.f32.mrb[53].mxu0 }
 0x2e1   :  { %v7805_v18 = vpop.f32.mrb[53].mxu1  ;;  %v7784_v19 = vadd.f32 %v7783_v17, %v7782_v15  ;;  %v7785_v21 = vpop.f32.mrb[54].mxu0 }
 0x2e2   :  { %v7806_v20 = vadd.f32 %v7805_v18, %v7804_v16  ;;  %v7807_v22 = vpop.f32.mrb[54].mxu1  ;;  %v7786_v23 = vpop.f32.mrb[55].mxu0  ;;  %v7185_v16 = vld [vmem:[#allocation7] ss:$0 sm:$0xff] }
 0x2e3   :  { %v7808_v24 = vpop.f32.mrb[55].mxu1  ;;  %v6050_v26 = vadd.f32 %v7784_v19, %v6010_v8 }
 0x2e5   :  { %v6090_v27 = vadd.f32 %v7806_v20, %v6050_v26 }
 0x2ff   :  { %v7826_v30 = vpop.f32.mrb[56].mxu0 }
 0x300   :  { %v7848_v31 = vpop.f32.mrb[56].mxu1  ;;  %v7827_v32 = vpop.f32.mrb[57].mxu0 }
 0x301   :  { %v7828_v33 = vadd.f32 %v7827_v32, %v7826_v30  ;;  %v7849_v34 = vpop.f32.mrb[57].mxu1  ;;  %v7829_v35 = vpop.f32.mrb[58].mxu0 }
 0x302   :  { %v7850_v36 = vadd.f32 %v7849_v34, %v7848_v31  ;;  %v7851_v37 = vpop.f32.mrb[58].mxu1  ;;  %v7830_v38 = vpop.f32.mrb[59].mxu0 }
 0x303   :  { %v6130_v39 = vadd.f32 %v7828_v33, %v6090_v27  ;;  %v7852_v40 = vpop.f32.mrb[59].mxu1 }
 0x305   :  { %v6170_v41 = vadd.f32 %v7850_v36, %v6130_v39 }
 0x31f   :  { %v7870_v42 = vpop.f32.mrb[60].mxu0 }
 0x320   :  { %v7892_v43 = vpop.f32.mrb[60].mxu1  ;;  %v7871_v44 = vpop.f32.mrb[61].mxu0 }
 0x321   :  { %v7872_v45 = vadd.f32 %v7871_v44, %v7870_v42  ;;  %v7893_v46 = vpop.f32.mrb[61].mxu1  ;;  %v7873_v47 = vpop.f32.mrb[62].mxu0 }
 0x322   :  { %v7894_v48 = vadd.f32 %v7893_v46, %v7892_v43  ;;  %v7895_v49 = vpop.f32.mrb[62].mxu1  ;;  %v7874_v50 = vpop.f32.mrb[63].mxu0 }
 0x323   :  { %v6210_v51 = vadd.f32 %v7872_v45, %v6170_v41  ;;  %v7896_v52 = vpop.f32.mrb[63].mxu1 }
 0x325   :  { %v6250_v53 = vadd.f32 %v7894_v48, %v6210_v51 }
 0x33f   :  { %v7914_v54 = vpop.f32.mrb[64].mxu0 }
 0x340   :  { %v7936_v55 = vpop.f32.mrb[64].mxu1  ;;  %v7915_v56 = vpop.f32.mrb[65].mxu0 }
 0x341   :  { %v7916_v57 = vadd.f32 %v7915_v56, %v7914_v54  ;;  %v7937_v58 = vpop.f32.mrb[65].mxu1  ;;  %v7917_v59 = vpop.f32.mrb[66].mxu0 }
 0x342   :  { %v7938_v60 = vadd.f32 %v7937_v58, %v7936_v55  ;;  %v7939_v61 = vpop.f32.mrb[66].mxu1  ;;  %v7918_v62 = vpop.f32.mrb[67].mxu0 }
 0x343   :  { %v6290_v63 = vadd.f32 %v7916_v57, %v6250_v53  ;;  %v7940_v0 = vpop.f32.mrb[67].mxu1 }
 0x345   :  { %v6330_v1 = vadd.f32 %v7938_v60, %v6290_v63 }
 0x35f   :  { %v7958_v2 = vpop.f32.mrb[68].mxu0 }
 0x360   :  { %v7980_v3 = vpop.f32.mrb[68].mxu1  ;;  %v7959_v4 = vpop.f32.mrb[69].mxu0 }
 0x361   :  { %v7960_v5 = vadd.f32 %v7959_v4, %v7958_v2  ;;  %v7981_v6 = vpop.f32.mrb[69].mxu1  ;;  %v7961_v7 = vpop.f32.mrb[70].mxu0 }
 0x362   :  { %v7982_v8 = vadd.f32 %v7981_v6, %v7980_v3  ;;  %v7983_v9 = vpop.f32.mrb[70].mxu1  ;;  %v7962_v10 = vpop.f32.mrb[71].mxu0 }
 0x363   :  { %v6370_v11 = vadd.f32 %v7960_v5, %v6330_v1  ;;  %v7984_v12 = vpop.f32.mrb[71].mxu1 }
 0x365   :  { %v6410_v13 = vadd.f32 %v7982_v8, %v6370_v11 }
 0x367   :  { %v6415_v14 = vmax.f32 %v6410_v13, 0.0 }
 0x369   :  { %v6416_v15 = vpack.c.bf16 %v6415_v14, %v6415_v14 }
 0x36b   :  { %8012 = vmatmul.mubr.bf16.vlgmr.msra.gmra.mrb[72].mxu0 %v6416_v15 }
 0x43e   :  { %v6522_v17 = vpop.f32.mrb[72].mxu0 }
 0x43f   :  { %v6523_v18 = vadd.f32 %v7185_v16, %v6522_v17  ;;  %v8013_v19 = vpop.f32.mrb[73].mxu0 }
 0x440   :  { %v6525_v20 = vpop.f32.mrb[74].mxu0 }
 0x441   :  { %6528 = vst [vmem:[%s9012_s5] sm:$0xff] %v6523_v18  ;;  %v8014_v21 = vpop.f32.mrb[75].mxu0 }
 0x442   :  { %6533 = vsyncpa [#allocation3], 1 }
 0x443   :  { %6534 = vsyncpa [#allocation5], 1 }
 0x444   :  { %6535 = vsyncpa [#allocation8], 1 }

// kernel: net_forward.2
= control target key start
LH: loop header
LB: loop body
LE: loop exit
PB: predicated region body
PF: predicated region fallthrough
CT: control target
= control target key end

     0   :  { %10 = vsyncpa [#allocation6], 0  ;;  %s9983_s0 = inlined_call_operand.vmem [shape: bf16[1568,9], index: 0, kind: input, shape index: {}]   ;;  %s9984_s1 = inlined_call_operand.hbm [shape: bf16[9,32], index: 1, kind: input, shape index: {}]   ;;  %s9985_s2 = inlined_call_operand.hbm [shape: f32[1,32], index: 2, kind: input, shape index: {}]   ;;  %s9986_s3 = inlined_call_operand.vmem [shape: bf16[288,64], index: 3, kind: input, shape index: {}]   ;;  %s9987_s4 = inlined_call_operand.hbm [shape: f32[1,64], index: 4, kind: input, shape index: {}]   ;;  %s9988_s5 = inlined_call_operand.vmem [shape: bf16[144,128], index: 5, kind: output, shape index: {}]  }
   0x1   :  { %11 = vsyncpa [#allocation8], 0  ;;  %s7606_s18 = smov 0  }
   0x2 LB: > { %s7564_s19 = smov [#allocation7]   ;;  %s7612_s21 = sadd.s32 4294967295, %s7562_s18   ;;  %s7562_s18 = sphi %s7606_s18, %s17_s18  }
   0x3   : > { %s184_s20 = sshll.u32 %s7564_s19, 4  ;;  %p6358_p0 = scmp.ge.s32.totalorder %s7562_s18, 1  ;;  %s185_s20 = int_to_ptr.vmem [resolvable:$true] %s184_s20 }
   0x4   : > { %p158_p1 = scmp.lt.s32.totalorder %s7562_s18, 3  ;;  %p9989_p2 = scmp.eq.s32.totalorder %s7612_s21, 0 }
   0x5   : > { %s7565_s23 = smov [#allocation5]   ;;  %s7566_s26 = smov [#allocation9]  }
   0x6   : > { %p7617_p3 = pnand %p6358_p0, %p158_p1  ;;  %s170_s24 = sshll.u32 %s7565_s23, 4  ;;  %s7629_s24 = int_to_ptr.vmem [resolvable:$true] %s170_s24 }
   0x7   : > { %s198_s27 = sshll.u32 %s7566_s26, 4  ;;  %s7464_s30 = scalar_lea.hbm %s9985_s2, 16  ;;  %s7631_s27 = int_to_ptr.vmem [resolvable:$true] %s198_s27 }
   0x8   : > { %s9991_s22 = scalar_select %p7617_p3, 1, 0 }
   0x9   : > { %p7356_p4 = pneg %p7617_p3  ;;  %p7465_p6 = scmp.ne.s32.totalorder %s9985_s2, %s7464_s30 }
   0xa   : > { %p7471_p10 = scmp.lt.u32.totalorder %s7464_s30, %s9985_s2 }
   0xb   : > { %p7625_p5 = pnand %p9989_p2, %p7356_p4 }
   0xd   : > { %p7641_p7 = pneg %p7625_p5 }
   0xf   : > { %p7467_p8 = pnand %p7641_p7, %p7465_p6 }
  0x11   : > { %p7468_p9 = pneg %p7467_p8 }
  0x13   : > { %p7473_p11 = pnand %p7471_p10, %p7468_p9 }
  0x15   : > { %7476 = shalt.err (!%p7473_p11)
}
  0x16   : > { %s7477_s11 = scalar_lea.vmem %s185_s20, 16  ;;  %s7484_s12 = scalar_lea.vmem %s185_s20, 32 }
  0x17   : > { %p7478_p12 = scmp.ne.s32.totalorder %s185_s20, %s7477_s11  ;;  %p7485_p1 = scmp.lt.s32.totalorder %s185_s20, %s185_s20 }
  0x18   : > { %p7486_p4 = scmp.lt.s32.totalorder %s7484_s12, %s7477_s11 }
  0x19   : > { %p7480_p13 = pnand %p7478_p12, %p7641_p7 }
  0x1a   : > { %p7487_p2 = por %p7486_p4, %p7485_p1 }
  0x1b   : > { %p7481_p0 = pneg %p7480_p13 }
  0x1d   : > { %p7488_p3 = pnand %p7487_p2, %p7481_p0 }
  0x1f   : > { %7491 = shalt.err (!%p7488_p3)
}
  0x20   : > { %7362 = dma.hbm_to_vmem [thread:$0]  (!%p7625_p5), %s9985_s2, 16, %s185_s20, [#allocation8]  }
  0x21   : > { %s7492_s17 = scalar_lea.hbm %s9984_s1, 128 }
  0x22   : > { %p7493_p6 = scmp.ne.s32.totalorder %s9984_s1, %s7492_s17  ;;  %p7499_p2 = scmp.lt.u32.totalorder %s7492_s17, %s9984_s1 }
  0x24   : > { %p7495_p8 = pnand %p7493_p6, %p7641_p7 }
  0x26   : > { %p7496_p9 = pneg %p7495_p8 }
  0x28   : > { %p7501_p3 = pnand %p7499_p2, %p7496_p9 }
  0x2a   : > { %7504 = shalt.err (!%p7501_p3)
}
  0x2b   : > { %s7505_s20 = scalar_lea.vmem %s7629_s24, 128  ;;  %p7513_p13 = scmp.lt.s32.totalorder %s7629_s24, %s7629_s24 }
  0x2c   : > { %p7506_p10 = scmp.ne.s32.totalorder %s7629_s24, %s7505_s20  ;;  %p7514_p0 = scmp.lt.s32.totalorder %s7505_s20, %s7505_s20 }
  0x2e   : > { %p7508_p11 = pnand %p7506_p10, %p7641_p7  ;;  %p7515_p1 = por %p7514_p0, %p7513_p13 }
  0x30   : > { %p7509_p12 = pneg %p7508_p11 }
  0x32   : > { %p7516_p4 = pnand %p7515_p1, %p7509_p12 }
  0x34   : > { %7519 = shalt.err (!%p7516_p4)
}
  0x35   : > { %s7567_s29 = smov 64   ;;  %s7568_s30 = smov 4  }
  0x36   : > { %7359 = dma.hbm_to_vmem [thread:$0]  (!%p7625_p5), %s9984_s1, 128, %s7629_s24, [#allocation6], %s7567_s29, %s7567_s29, %s7568_s30  }
  0x37   : > { %s7520_s11 = scalar_lea.hbm %s9987_s4, 16 }
  0x38   : > { %p7521_p6 = scmp.ne.s32.totalorder %s9987_s4, %s7520_s11  ;;  %p7527_p2 = scmp.lt.u32.totalorder %s7520_s11, %s9987_s4 }
  0x3a   : > { %p7523_p8 = pnand %p7521_p6, %p7641_p7 }
  0x3c   : > { %p7524_p9 = pneg %p7523_p8 }
  0x3e   : > { %p7529_p3 = pnand %p7527_p2, %p7524_p9 }
  0x40   : > { %7532 = shalt.err (!%p7529_p3)
}
  0x41   : > { %s7533_s24 = scalar_lea.vmem %s7631_s27, 16  ;;  %s7540_s16 = scalar_lea.vmem %s7631_s27, 32 }
  0x42   : > { %p7534_p10 = scmp.ne.s32.totalorder %s7631_s27, %s7533_s24  ;;  %p7541_p13 = scmp.lt.s32.totalorder %s7631_s27, %s7631_s27 }
  0x43   : > { %p7542_p0 = scmp.lt.s32.totalorder %s7540_s16, %s7533_s24 }
  0x44   : > { %p7536_p11 = pnand %p7534_p10, %p7641_p7 }
  0x45   : > { %p7543_p1 = por %p7542_p0, %p7541_p13 }
  0x46   : > { %p7537_p12 = pneg %p7536_p11 }
  0x48   : > { %p7544_p4 = pnand %p7543_p1, %p7537_p12 }
  0x4a   : > { %7547 = shalt.err (!%p7544_p4)
}
  0x4b   : > { %7365 = dma.hbm_to_vmem [thread:$0]  (!%p7625_p5), %s9987_s4, 16, %s7631_s27, [#allocation8]  }
  0x4c   : > { %p9994_p6 = scmp.ne.s32.totalorder %s9991_s22, 0 }
  0x4d   : > { %p9995_p7 = scmp.eq.s32.totalorder (!%p9994_p6), %s7612_s21, 0 }
  0x4e   : > { %220 = sbr.rel (%p9994_p6) target bundleno = 1634 (0x662), region = 40 }
  0x55   : > { %7553 = dma.done.wait (%p9995_p7), [#allocation6], 128   ;;  %p9996_p8 = pmov %p9995_p7 }
  0x56   : > { %p9997_p9 = pmov %p9995_p7 }
  0x57   : > { %7555 = vsyncadd (%p9996_p8), [#allocation6], 4294967168 }
  0x58   : > { %7557 = dma.done.wait (%p9997_p9), [#allocation8], 32   ;;  %p9998_p2 = pmov %p9995_p7 }
  0x59   : > { %vm774_vm0 = vcmask 1043456   ;;  %v7569_v0 = vmov 0.0   ;;  %s256_s25 = smul.u32 98, %s7612_s21  ;;  %vm7570_vm1 = vmmov 0   ;;  %vm775_vm2 = vcmask 1044480   ;;  %s7572_s26 = smov 64  }
  0x5a   : > { %7559 = vsyncadd (%p9998_p2), [#allocation8], 4294967264  ;;  %6676 = vmatprep.subr.bf16.mxu0 %v7569_v0  ;;  %6678 = vmatprep.mubr.msk.bf16.mxu0 %vm7570_vm1, %v7569_v0  ;;  %v7571_v1 = vmov 65535   ;;  %v7392_v4 = vld [vmem:[#allocation5] sm:$0x1f]   ;;  %vm626_vm3 = vcmask 72704  }
  0x5b   : > { %v776_v2 = vsel %vm774_vm0, 4294967295, %v7571_v1  ;;  %p257_p5 = scmp.lt.s32.totalorder %s256_s25, 195  ;;  %vm1304_vm4 = vcmask 261120   ;;  %v7846_v33 = vld [vmem:[#allocation7] ss:$0 sm:$0xff]  ;;  %s7573_s28 = smov 96  }
  0x5c   : > { %v777_v3 = vsel %vm775_vm2, %v776_v2, 0  ;;  %1403 = vst.msk [vmem:[#allocation2 + $0x310] sm:$0xff] %vm1304_vm4, %v7569_v0  ;;  %1404 = vst.msk [vmem:[#allocation2 + $0x318] sm:$0xff] %vm1304_vm4, %v7569_v0  ;;  %s7575_s27 = smov 32   ;;  %vm1950_vm5 = vcmask 523520   ;;  %vm2343_vm6 = vcmask 785920  }
  0x5d   : > { %s10000_s25 = smov (!%p257_p5, %s256_s25), 195  ;;  %v779_v5 = vand.u32 %v7392_v4, %v777_v3  ;;  %1405 = vst.msk [vmem:[#allocation2 + $0x320] sm:$0xff] %vm1304_vm4, %v7569_v0  ;;  %1406 = vst.msk [vmem:[#allocation2 + $0x328] sm:$0xff] %vm1304_vm4, %v7569_v0  ;;  %vm2736_vm7 = vcmask 1048320   ;;  %vm5747_vm8 = vcmask 523264   ;;  %vm6170_vm9 = vcmask 519168  }
  0x5e   : > { %s6367_s22 = sshll.u32 %s10000_s25, 2  ;;  %1407 = vst.msk [vmem:[#allocation2 + $0x330] sm:$0xff] %vm1304_vm4, %v7569_v0  ;;  %1408 = vst.msk [vmem:[#allocation2 + $0x338] sm:$0xff] %vm1304_vm4, %v7569_v0  ;;  %vm6259_vm10 = vcmask 1043968  }
  0x5f   : > { %s7722_s23 = scalar_lea.vmem %s9983_s0, %s6367_s22  ;;  %6677 = vmatpush3.bf16.msra.mxu0 %v779_v5  ;;  %1409 = vst.msk [vmem:[#allocation2 + $0x340] sm:$0xff] %vm1304_vm4, %v7569_v0  ;;  %1410 = vst.msk [vmem:[#allocation2 + $0x348] sm:$0xff] %vm1304_vm4, %v7569_v0 }
  0x60   : > { %v7393_v6 = vld [vmem:[%s7722_s23] sm:$0xff]   ;;  %v7394_v7 = vld [vmem:[%s7722_s23 + $0x8] sm:$0xff]   ;;  %v7395_v8 = vld [vmem:[%s7722_s23 + $0x10] sm:$0xff]  }
  0x61   : > { %v7396_v9 = vld [vmem:[%s7722_s23 + $0x18] sm:$0xff]   ;;  %v7397_v10 = vld [vmem:[%s7722_s23 + $0x20] sm:$0xff]   ;;  %v7398_v11 = vld [vmem:[%s7722_s23 + $0x28] sm:$0xff]  }
  0x62   : > { %6679 = vmatmul.mubr.msk.bf16.vlgmr.msra.gmra.mrb[0].mxu0 %vm626_vm3, %v7393_v6  ;;  %v7399_v12 = vld [vmem:[%s7722_s23 + $0x30] sm:$0xff]   ;;  %v7400_v13 = vld [vmem:[%s7722_s23 + $0x38] sm:$0xff]   ;;  %v7401_v14 = vld [vmem:[%s7722_s23 + $0x40] sm:$0xff]  }
  0x63   : > { %6682 = vmatprep.mubr.msk.bf16.mxu0 %vm7570_vm1, %v7569_v0  ;;  %v7402_v15 = vld [vmem:[%s7722_s23 + $0x48] sm:$0xff]   ;;  %v7403_v16 = vld [vmem:[%s7722_s23 + $0x50] sm:$0xff]   ;;  %v7404_v17 = vld [vmem:[%s7722_s23 + $0x58] sm:$0xff]  }
  0x64   : > { %v7405_v18 = vld [vmem:[%s7722_s23 + $0x60] sm:$0xff]   ;;  %v7406_v19 = vld [vmem:[%s7722_s23 + $0x68] sm:$0xff]   ;;  %v7407_v20 = vld [vmem:[%s7722_s23 + $0x70] sm:$0xff]  }
  0x65   : > { %v7408_v21 = vld [vmem:[%s7722_s23 + $0x78] sm:$0xff]   ;;  %v7409_v22 = vld [vmem:[%s7722_s23 + $0x80] sm:$0xff]   ;;  %v7410_v23 = vld [vmem:[%s7722_s23 + $0x88] sm:$0xff]  }
  0x66   : > { %v7411_v24 = vld [vmem:[%s7722_s23 + $0x90] sm:$0xff]   ;;  %v7412_v25 = vld [vmem:[%s7722_s23 + $0x98] sm:$0xff]   ;;  %v7413_v26 = vld [vmem:[%s7722_s23 + $0xa0] sm:$0xff]  }
  0x67   : > { %v7414_v27 = vld [vmem:[%s7722_s23 + $0xa8] sm:$0xff]   ;;  %v7415_v28 = vld [vmem:[%s7722_s23 + $0xb0] sm:$0xff]   ;;  %v7416_v29 = vld [vmem:[%s7722_s23 + $0xb8] sm:$0xff]  }
  0x68   : > { %v7417_v30 = vld [vmem:[%s7722_s23 + $0xc0] sm:$0xff]   ;;  %v7418_v31 = vld [vmem:[%s7722_s23 + $0xc8] sm:$0xff]   ;;  %v7419_v32 = vld [vmem:[%s7722_s23 + $0xd0] sm:$0xff]  }
  0x69   : > { %v7420_v37 = vld [vmem:[%s7722_s23 + $0xd8] sm:$0xff]   ;;  %v7421_v46 = vld [vmem:[%s7722_s23 + $0xe0] sm:$0xff]   ;;  %v7422_v58 = vld [vmem:[%s7722_s23 + $0xe8] sm:$0xff]  }
  0x6a   : > { %6683 = vmatmul.mubr.msk.bf16.gmra.mrb[4].mxu0 %vm626_vm3, %v7394_v7  ;;  %v7423_v7 = vld [vmem:[%s7722_s23 + $0xf0] sm:$0xff]  }
  0x6b   : > { %6686 = vmatprep.mubr.msk.bf16.mxu0 %vm7570_vm1, %v7569_v0 }
  0x72   : > { %6687 = vmatmul.mubr.msk.bf16.gmra.mrb[8].mxu0 %vm626_vm3, %v7395_v8 }
  0x73   : > { %6690 = vmatprep.mubr.msk.bf16.mxu0 %vm7570_vm1, %v7569_v0 }
  0x7a   : > { %6691 = vmatmul.mubr.msk.bf16.gmra.mrb[12].mxu0 %vm626_vm3, %v7396_v9 }
  0x7b   : > { %6694 = vmatprep.mubr.msk.bf16.mxu0 %vm7570_vm1, %v7569_v0 }
  0x82   : > { %6695 = vmatmul.mubr.msk.bf16.gmra.mrb[16].mxu0 %vm626_vm3, %v7397_v10 }
  0x83   : > { %6698 = vmatprep.mubr.msk.bf16.mxu0 %vm7570_vm1, %v7569_v0 }
  0x8a   : > { %6699 = vmatmul.mubr.msk.bf16.gmra.mrb[20].mxu0 %vm626_vm3, %v7398_v11 }
  0x8b   : > { %6702 = vmatprep.mubr.msk.bf16.mxu0 %vm7570_vm1, %v7569_v0 }
  0x92   : > { %6703 = vmatmul.mubr.msk.bf16.gmra.mrb[24].mxu0 %vm626_vm3, %v7399_v12 }
  0x93   : > { %6706 = vmatprep.mubr.msk.bf16.mxu0 %vm7570_vm1, %v7569_v0 }
  0x9a   : > { %6707 = vmatmul.mubr.msk.bf16.gmra.mrb[28].mxu0 %vm626_vm3, %v7400_v13 }
  0x9b   : > { %6710 = vmatprep.mubr.msk.bf16.mxu0 %vm7570_vm1, %v7569_v0 }
  0xa2   : > { %6711 = vmatmul.mubr.msk.bf16.gmra.mrb[32].mxu0 %vm626_vm3, %v7401_v14 }
  0xa3   : > { %6714 = vmatprep.mubr.msk.bf16.mxu0 %vm7570_vm1, %v7569_v0 }
  0xaa   : > { %6715 = vmatmul.mubr.msk.bf16.gmra.mrb[36].mxu0 %vm626_vm3, %v7402_v15 }
  0xab   : > { %6718 = vmatprep.mubr.msk.bf16.mxu0 %vm7570_vm1, %v7569_v0 }
  0xb2   : > { %6719 = vmatmul.mubr.msk.bf16.gmra.mrb[40].mxu0 %vm626_vm3, %v7403_v16 }
  0xb3   : > { %6722 = vmatprep.mubr.msk.bf16.mxu0 %vm7570_vm1, %v7569_v0 }
  0xba   : > { %6723 = vmatmul.mubr.msk.bf16.gmra.mrb[44].mxu0 %vm626_vm3, %v7404_v17 }
  0xbb   : > { %6726 = vmatprep.mubr.msk.bf16.mxu0 %vm7570_vm1, %v7569_v0 }
  0xc2   : > { %6727 = vmatmul.mubr.msk.bf16.gmra.mrb[48].mxu0 %vm626_vm3, %v7405_v18 }
  0xc3   : > { %6730 = vmatprep.mubr.msk.bf16.mxu0 %vm7570_vm1, %v7569_v0 }
  0xca   : > { %6731 = vmatmul.mubr.msk.bf16.gmra.mrb[52].mxu0 %vm626_vm3, %v7406_v19 }
  0xcb   : > { %6734 = vmatprep.mubr.msk.bf16.mxu0 %vm7570_vm1, %v7569_v0 }
  0xd2   : > { %6735 = vmatmul.mubr.msk.bf16.gmra.mrb[56].mxu0 %vm626_vm3, %v7407_v20 }
  0xd3   : > { %6738 = vmatprep.mubr.msk.bf16.mxu0 %vm7570_vm1, %v7569_v0 }
  0xda   : > { %6739 = vmatmul.mubr.msk.bf16.gmra.mrb[60].mxu0 %vm626_vm3, %v7408_v21 }
  0xdb   : > { %6742 = vmatprep.mubr.msk.bf16.mxu0 %vm7570_vm1, %v7569_v0 }
  0xe2   : > { %6743 = vmatmul.mubr.msk.bf16.gmra.mrb[64].mxu0 %vm626_vm3, %v7409_v22  ;;  %v7424_v22 = vld [vmem:[%s7722_s23 + $0xf8] sm:$0xff]  }
  0xe3   : > { %6746 = vmatprep.mubr.msk.bf16.mxu0 %vm7570_vm1, %v7569_v0 }
  0xea   : > { %6747 = vmatmul.mubr.msk.bf16.gmra.mrb[68].mxu0 %vm626_vm3, %v7410_v23 }
  0xeb   : > { %6750 = vmatprep.mubr.msk.bf16.mxu0 %vm7570_vm1, %v7569_v0 }
  0xf2   : > { %6751 = vmatmul.mubr.msk.bf16.gmra.mrb[72].mxu0 %vm626_vm3, %v7411_v24 }
  0xf3   : > { %6754 = vmatprep.mubr.msk.bf16.mxu0 %vm7570_vm1, %v7569_v0 }
  0xfa   : > { %6755 = vmatmul.mubr.msk.bf16.gmra.mrb[76].mxu0 %vm626_vm3, %v7412_v25 }
  0xfb   : > { %6758 = vmatprep.mubr.msk.bf16.mxu0 %vm7570_vm1, %v7569_v0 }
 0x102   : > { %6759 = vmatmul.mubr.msk.bf16.gmra.mrb[80].mxu0 %vm626_vm3, %v7413_v26 }
 0x103   : > { %6762 = vmatprep.mubr.msk.bf16.mxu0 %vm7570_vm1, %v7569_v0 }
 0x10a   : > { %6763 = vmatmul.mubr.msk.bf16.gmra.mrb[84].mxu0 %vm626_vm3, %v7414_v27 }
 0x10b   : > { %6766 = vmatprep.mubr.msk.bf16.mxu0 %vm7570_vm1, %v7569_v0 }
 0x112   : > { %6767 = vmatmul.mubr.msk.bf16.gmra.mrb[88].mxu0 %vm626_vm3, %v7415_v28 }
 0x113   : > { %6770 = vmatprep.mubr.msk.bf16.mxu0 %vm7570_vm1, %v7569_v0 }
 0x11a   : > { %6771 = vmatmul.mubr.msk.bf16.gmra.mrb[92].mxu0 %vm626_vm3, %v7416_v29 }
 0x11b   : > { %6774 = vmatprep.mubr.msk.bf16.mxu0 %vm7570_vm1, %v7569_v0 }
 0x122   : > { %6775 = vmatmul.mubr.msk.bf16.gmra.mrb[96].mxu0 %vm626_vm3, %v7417_v30 }
 0x123   : > { %6778 = vmatprep.mubr.msk.bf16.mxu0 %vm7570_vm1, %v7569_v0 }
 0x12a   : > { %6779 = vmatmul.mubr.msk.bf16.gmra.mrb[100].mxu0 %vm626_vm3, %v7418_v31 }
 0x12b   : > { %6782 = vmatprep.mubr.msk.bf16.mxu0 %vm7570_vm1, %v7569_v0 }
 0x132   : > { %6783 = vmatmul.mubr.msk.bf16.gmra.mrb[104].mxu0 %vm626_vm3, %v7419_v32 }
 0x133   : > { %6786 = vmatprep.mubr.msk.bf16.mxu0 %vm7570_vm1, %v7569_v0 }
 0x135   : > { %v815_v34 = vpop.f32.mrb[0].mxu0 }
 0x136   : > { %v816_v35 = vadd.f32 %v7846_v33, %v815_v34  ;;  %v6680_v36 = vpop.f32.mrb[1].mxu0 }
 0x137   : > { %v818_v38 = vpop.f32.mrb[2].mxu0 }
 0x138   : > { %v1206_v39 = vmax.f32 %v816_v35, 0.0  ;;  %v819_v40 = vadd.f32 %v7846_v33, %v818_v38  ;;  %v6681_v41 = vpop.f32.mrb[3].mxu0 }
 0x13a   : > { %1305 = vst.msk [vmem:[#allocation2] sm:$0xff] %vm1304_vm4, %v1206_v39  ;;  %v1207_v42 = vmax.f32 %v819_v40, 0.0  ;;  %6787 = vmatmul.mubr.msk.bf16.gmra.mrb[108].mxu0 %vm626_vm3, %v7420_v37  ;;  %v7425_v37 = vld [vmem:[%s7722_s23 + $0x100] sm:$0xff]  }
 0x13b   : > { %6790 = vmatprep.mubr.msk.bf16.mxu0 %vm7570_vm1, %v7569_v0 }
 0x13c   : > { %1306 = vst.msk [vmem:[#allocation2 + $0x8] sm:$0xff] %vm1304_vm4, %v1207_v42 }
 0x13d   : > { %v823_v43 = vpop.f32.mrb[4].mxu0 }
 0x13e   : > { %v824_v44 = vadd.f32 %v7846_v33, %v823_v43  ;;  %v6684_v45 = vpop.f32.mrb[5].mxu0 }
 0x13f   : > { %v826_v47 = vpop.f32.mrb[6].mxu0 }
 0x140   : > { %v1208_v48 = vmax.f32 %v824_v44, 0.0  ;;  %v827_v49 = vadd.f32 %v7846_v33, %v826_v47  ;;  %v6685_v50 = vpop.f32.mrb[7].mxu0 }
 0x141   : > { %v1411_v52 = vld [vmem:[#allocation2] sm:$0xff] }
 0x142   : > { %1307 = vst.msk [vmem:[#allocation2 + $0x10] sm:$0xff] %vm1304_vm4, %v1208_v48  ;;  %v1209_v51 = vmax.f32 %v827_v49, 0.0  ;;  %6791 = vmatmul.mubr.msk.bf16.gmra.mrb[112].mxu0 %vm626_vm3, %v7421_v46 }
 0x143   : > { %6794 = vmatprep.mubr.msk.bf16.mxu0 %vm7570_vm1, %v7569_v0  ;;  %v1412_v53 = vld [vmem:[#allocation2 + $0x8] sm:$0xff] }
 0x144   : > { %1308 = vst.msk [vmem:[#allocation2 + $0x18] sm:$0xff] %vm1304_vm4, %v1209_v51  ;;  %v1509_v54 = vpack.c.bf16 %v1412_v53, %v1411_v52  ;;  %v7426_v52 = vld [vmem:[%s7722_s23 + $0x108] sm:$0xff]  }
 0x145   : > { %v831_v55 = vpop.f32.mrb[8].mxu0 }
 0x146   : > { %v832_v56 = vadd.f32 %v7846_v33, %v831_v55  ;;  %v6688_v57 = vpop.f32.mrb[9].mxu0  ;;  %1558 = vst.msk [vmem:[#allocation3] sm:$0xff] %vm1304_vm4, %v1509_v54 }
 0x147   : > { %v834_v59 = vpop.f32.mrb[10].mxu0 }
 0x148   : > { %v1210_v60 = vmax.f32 %v832_v56, 0.0  ;;  %v835_v61 = vadd.f32 %v7846_v33, %v834_v59  ;;  %v6689_v62 = vpop.f32.mrb[11].mxu0 }
 0x149   : > { %v1413_v1 = vld [vmem:[#allocation2 + $0x10] sm:$0xff] }
 0x14a   : > { %1309 = vst.msk [vmem:[#allocation2 + $0x20] sm:$0xff] %vm1304_vm4, %v1210_v60  ;;  %v1211_v63 = vmax.f32 %v835_v61, 0.0  ;;  %6795 = vmatmul.mubr.msk.bf16.gmra.mrb[116].mxu0 %vm626_vm3, %v7422_v58 }
 0x14b   : > { %6798 = vmatprep.mubr.msk.bf16.mxu0 %vm7570_vm1, %v7569_v0  ;;  %v1414_v2 = vld [vmem:[#allocation2 + $0x18] sm:$0xff] }
 0x14c   : > { %1310 = vst.msk [vmem:[#allocation2 + $0x28] sm:$0xff] %vm1304_vm4, %v1211_v63  ;;  %v1510_v3 = vpack.c.bf16 %v1414_v2, %v1413_v1 }
 0x14d   : > { %v839_v4 = vpop.f32.mrb[12].mxu0 }
 0x14e   : > { %v840_v5 = vadd.f32 %v7846_v33, %v839_v4  ;;  %v6692_v6 = vpop.f32.mrb[13].mxu0  ;;  %1559 = vst.msk [vmem:[#allocation3 + $0x18] sm:$0xff] %vm1304_vm4, %v1510_v3  ;;  %v7427_v3 = vld [vmem:[%s7722_s23 + $0x110] sm:$0xff]  }
 0x14f   : > { %v842_v8 = vpop.f32.mrb[14].mxu0 }
 0x150   : > { %v1212_v9 = vmax.f32 %v840_v5, 0.0  ;;  %v843_v10 = vadd.f32 %v7846_v33, %v842_v8  ;;  %v6693_v11 = vpop.f32.mrb[15].mxu0 }
 0x151   : > { %v2786_v13 = vld [vmem:[#allocation2 + $0x1d] sm:$0xff] }
 0x152   : > { %1311 = vst.msk [vmem:[#allocation2 + $0x30] sm:$0xff] %vm1304_vm4, %v1212_v9  ;;  %v1213_v12 = vmax.f32 %v843_v10, 0.0  ;;  %6799 = vmatmul.mubr.msk.bf16.gmra.mrb[120].mxu0 %vm626_vm3, %v7423_v7  ;;  %v1415_v15 = vld [vmem:[#allocation2 + $0x20] sm:$0xff] }
 0x153   : > { %6802 = vmatprep.mubr.msk.bf16.mxu0 %vm7570_vm1, %v7569_v0  ;;  %v2787_v14 = vld [vmem:[#allocation2 + $0x25] sm:$0xff] }
 0x154   : > { %1312 = vst.msk [vmem:[#allocation2 + $0x38] sm:$0xff] %vm1304_vm4, %v1213_v12  ;;  %v1416_v16 = vld [vmem:[#allocation2 + $0x28] sm:$0xff]  ;;  %v2884_v18 = vpack.c.bf16 %v2787_v14, %v2786_v13 }
 0x155   : > { %v847_v17 = vpop.f32.mrb[16].mxu0  ;;  %v1511_v19 = vpack.c.bf16 %v1416_v16, %v1415_v15 }
 0x156   : > { %v848_v20 = vadd.f32 %v7846_v33, %v847_v17  ;;  %v6696_v21 = vpop.f32.mrb[17].mxu0  ;;  %2933 = vst.msk [vmem:[#allocation3 + $0x8] sm:$0xff] %vm1304_vm4, %v2884_v18 }
 0x157   : > { %v850_v23 = vpop.f32.mrb[18].mxu0  ;;  %1560 = vst.msk [vmem:[#allocation3 + $0x30] sm:$0xff] %vm1304_vm4, %v1511_v19 }
 0x158   : > { %v1214_v24 = vmax.f32 %v848_v20, 0.0  ;;  %v851_v25 = vadd.f32 %v7846_v33, %v850_v23  ;;  %v6697_v26 = vpop.f32.mrb[19].mxu0 }
 0x159   : > { %v2788_v28 = vld [vmem:[#allocation2 + $0x2d] sm:$0xff] }
 0x15a   : > { %1313 = vst.msk [vmem:[#allocation2 + $0x40] sm:$0xff] %vm1304_vm4, %v1214_v24  ;;  %v1215_v27 = vmax.f32 %v851_v25, 0.0  ;;  %6803 = vmatmul.mubr.msk.bf16.gmra.mrb[124].mxu0 %vm626_vm3, %v7424_v22  ;;  %v1417_v32 = vld [vmem:[#allocation2 + $0x30] sm:$0xff]  ;;  %v7428_v25 = vld [vmem:[%s7722_s23 + $0x118] sm:$0xff]  }
 0x15b   : > { %6806 = vmatprep.mubr.msk.bf16.mxu0 %vm7570_vm1, %v7569_v0  ;;  %v2789_v29 = vld [vmem:[#allocation2 + $0x35] sm:$0xff] }
 0x15c   : > { %1314 = vst.msk [vmem:[#allocation2 + $0x48] sm:$0xff] %vm1304_vm4, %v1215_v27  ;;  %v2885_v31 = vpack.c.bf16 %v2789_v29, %v2788_v28  ;;  %v1418_v34 = vld [vmem:[#allocation2 + $0x38] sm:$0xff] }
 0x15d   : > { %v855_v30 = vpop.f32.mrb[20].mxu0  ;;  %v1512_v38 = vpack.c.bf16 %v1418_v34, %v1417_v32 }
 0x15e   : > { %v856_v35 = vadd.f32 %v7846_v33, %v855_v30  ;;  %v6700_v36 = vpop.f32.mrb[21].mxu0  ;;  %2934 = vst.msk [vmem:[#allocation3 + $0x20] sm:$0xff] %vm1304_vm4, %v2885_v31 }
 0x15f   : > { %v858_v39 = vpop.f32.mrb[22].mxu0  ;;  %1561 = vst.msk [vmem:[#allocation3 + $0x48] sm:$0xff] %vm1304_vm4, %v1512_v38 }
 0x160   : > { %v1216_v40 = vmax.f32 %v856_v35, 0.0  ;;  %v859_v41 = vadd.f32 %v7846_v33, %v858_v39  ;;  %v6701_v42 = vpop.f32.mrb[23].mxu0 }
 0x161   : > { %v4158_v44 = vld [vmem:[#allocation2 + $0x3a] sm:$0xff] }
 0x162   : > { %1315 = vst.msk [vmem:[#allocation2 + $0x50] sm:$0xff] %vm1304_vm4, %v1216_v40  ;;  %v1217_v43 = vmax.f32 %v859_v41, 0.0  ;;  %6807 = vmatmul.mubr.msk.bf16.gmra.mrb[128].mxu0 %vm626_vm3, %v7425_v37  ;;  %v2790_v48 = vld [vmem:[#allocation2 + $0x3d] sm:$0xff] }
 0x163   : > { %v4159_v45 = vld [vmem:[#allocation2 + $0x42] sm:$0xff]  ;;  %6810 = vmatprep.mubr.msk.bf16.mxu0 %vm7570_vm1, %v7569_v0 }
 0x164   : > { %v4256_v46 = vpack.c.bf16 %v4159_v45, %v4158_v44  ;;  %1316 = vst.msk [vmem:[#allocation2 + $0x58] sm:$0xff] %vm1304_vm4, %v1217_v43  ;;  %v2791_v49 = vld [vmem:[#allocation2 + $0x45] sm:$0xff] }
 0x165   : > { %v863_v47 = vpop.f32.mrb[24].mxu0  ;;  %v2886_v53 = vpack.c.bf16 %v2791_v49, %v2790_v48  ;;  %v1419_v54 = vld [vmem:[#allocation2 + $0x40] sm:$0xff]  ;;  %v1420_v55 = vld [vmem:[#allocation2 + $0x48] sm:$0xff] }
 0x166   : > { %4305 = vst.msk [vmem:[#allocation3 + $0x10] sm:$0xff] %vm1304_vm4, %v4256_v46  ;;  %v864_v50 = vadd.f32 %v7846_v33, %v863_v47  ;;  %v6704_v51 = vpop.f32.mrb[25].mxu0  ;;  %v1513_v57 = vpack.c.bf16 %v1420_v55, %v1419_v54  ;;  %v7429_v40 = vld [vmem:[%s7722_s23 + $0x120] sm:$0xff]  }
 0x167   : > { %v866_v56 = vpop.f32.mrb[26].mxu0  ;;  %2935 = vst.msk [vmem:[#allocation3 + $0x38] sm:$0xff] %vm1304_vm4, %v2886_v53 }
 0x168   : > { %v1218_v58 = vmax.f32 %v864_v50, 0.0  ;;  %v867_v59 = vadd.f32 %v7846_v33, %v866_v56  ;;  %v6705_v60 = vpop.f32.mrb[27].mxu0  ;;  %1562 = vst.msk [vmem:[#allocation3 + $0x60] sm:$0xff] %vm1304_vm4, %v1513_v57 }
 0x169   : > { %v4160_v62 = vld [vmem:[#allocation2 + $0x4a] sm:$0xff] }
 0x16a   : > { %1317 = vst.msk [vmem:[#allocation2 + $0x60] sm:$0xff] %vm1304_vm4, %v1218_v58  ;;  %v1219_v61 = vmax.f32 %v867_v59, 0.0  ;;  %6811 = vmatmul.mubr.msk.bf16.gmra.mrb[132].mxu0 %vm626_vm3, %v7426_v52  ;;  %v2792_v4 = vld [vmem:[#allocation2 + $0x4d] sm:$0xff] }
 0x16b   : > { %v4161_v63 = vld [vmem:[#allocation2 + $0x52] sm:$0xff]  ;;  %6814 = vmatprep.mubr.msk.bf16.mxu0 %vm7570_vm1, %v7569_v0  ;;  %v7430_v58 = vld [vmem:[%s7722_s23 + $0x128] sm:$0xff]  }
 0x16c   : > { %1318 = vst.msk [vmem:[#allocation2 + $0x68] sm:$0xff] %vm1304_vm4, %v1219_v61  ;;  %v4257_v1 = vpack.c.bf16 %v4161_v63, %v4160_v62  ;;  %v2793_v7 = vld [vmem:[#allocation2 + $0x55] sm:$0xff] }
 0x16d   : > { %v871_v2 = vpop.f32.mrb[28].mxu0  ;;  %v1421_v8 = vld [vmem:[#allocation2 + $0x50] sm:$0xff]  ;;  %v1422_v9 = vld [vmem:[#allocation2 + $0x58] sm:$0xff]  ;;  %v2887_v11 = vpack.c.bf16 %v2793_v7, %v2792_v4 }
 0x16e   : > { %v872_v5 = vadd.f32 %v7846_v33, %v871_v2  ;;  %v6708_v6 = vpop.f32.mrb[29].mxu0  ;;  %4306 = vst.msk [vmem:[#allocation3 + $0x28] sm:$0xff] %vm1304_vm4, %v4257_v1  ;;  %v1514_v12 = vpack.c.bf16 %v1422_v9, %v1421_v8 }
 0x16f   : > { %v874_v10 = vpop.f32.mrb[30].mxu0  ;;  %2936 = vst.msk [vmem:[#allocation3 + $0x50] sm:$0xff] %vm1304_vm4, %v2887_v11 }
 0x170   : > { %v1220_v13 = vmax.f32 %v872_v5, 0.0  ;;  %v875_v14 = vadd.f32 %v7846_v33, %v874_v10  ;;  %v6709_v15 = vpop.f32.mrb[31].mxu0  ;;  %1563 = vst.msk [vmem:[#allocation3 + $0x78] sm:$0xff] %vm1304_vm4, %v1514_v12 }
 0x171   : > { %v4162_v17 = vld [vmem:[#allocation2 + $0x5a] sm:$0xff] }
 0x172   : > { %1319 = vst.msk [vmem:[#allocation2 + $0x70] sm:$0xff] %vm1304_vm4, %v1220_v13  ;;  %v1221_v16 = vmax.f32 %v875_v14, 0.0  ;;  %6815 = vmatmul.mubr.msk.bf16.gmra.mrb[136].mxu0 %vm626_vm3, %v7427_v3  ;;  %v2794_v21 = vld [vmem:[#allocation2 + $0x5d] sm:$0xff] }
 0x173   : > { %v4163_v18 = vld [vmem:[#allocation2 + $0x62] sm:$0xff]  ;;  %6818 = vmatprep.mubr.msk.bf16.mxu0 %vm7570_vm1, %v7569_v0 }
 0x174   : > { %1320 = vst.msk [vmem:[#allocation2 + $0x78] sm:$0xff] %vm1304_vm4, %v1221_v16  ;;  %v4258_v19 = vpack.c.bf16 %v4163_v18, %v4162_v17  ;;  %v2795_v22 = vld [vmem:[#allocation2 + $0x65] sm:$0xff]  ;;  %v7431_v17 = vld [vmem:[%s7722_s23 + $0x130] sm:$0xff]  }
 0x175   : > { %v879_v20 = vpop.f32.mrb[32].mxu0  ;;  %v2888_v26 = vpack.c.bf16 %v2795_v22, %v2794_v21  ;;  %v1423_v27 = vld [vmem:[#allocation2 + $0x60] sm:$0xff]  ;;  %v1424_v28 = vld [vmem:[#allocation2 + $0x68] sm:$0xff] }
 0x176   : > { %v880_v23 = vadd.f32 %v7846_v33, %v879_v20  ;;  %v6712_v24 = vpop.f32.mrb[33].mxu0  ;;  %4307 = vst.msk [vmem:[#allocation3 + $0x40] sm:$0xff] %vm1304_vm4, %v4258_v19  ;;  %v1515_v30 = vpack.c.bf16 %v1424_v28, %v1423_v27 }
 0x177   : > { %v882_v29 = vpop.f32.mrb[34].mxu0  ;;  %2937 = vst.msk [vmem:[#allocation3 + $0x68] sm:$0xff] %vm1304_vm4, %v2888_v26 }
 0x178   : > { %v1222_v31 = vmax.f32 %v880_v23, 0.0  ;;  %v883_v32 = vadd.f32 %v7846_v33, %v882_v29  ;;  %v6713_v34 = vpop.f32.mrb[35].mxu0  ;;  %1564 = vst.msk [vmem:[#allocation3 + $0x90] sm:$0xff] %vm1304_vm4, %v1515_v30 }
 0x179   : > { %v4164_v36 = vld [vmem:[#allocation2 + $0x6a] sm:$0xff] }
 0x17a   : > { %1321 = vst.msk [vmem:[#allocation2 + $0x80] sm:$0xff] %vm1304_vm4, %v1222_v31  ;;  %v1223_v35 = vmax.f32 %v883_v32, 0.0  ;;  %6819 = vmatmul.mubr.msk.bf16.gmra.mrb[140].mxu0 %vm626_vm3, %v7428_v25  ;;  %v2796_v41 = vld [vmem:[#allocation2 + $0x6d] sm:$0xff]  ;;  %v7432_v31 = vld [vmem:[%s7722_s23 + $0x138] sm:$0xff]  }
 0x17b   : > { %v4165_v37 = vld [vmem:[#allocation2 + $0x72] sm:$0xff]  ;;  %6822 = vmatprep.mubr.msk.bf16.mxu0 %vm7570_vm1, %v7569_v0 }
 0x17c   : > { %1322 = vst.msk [vmem:[#allocation2 + $0x88] sm:$0xff] %vm1304_vm4, %v1223_v35  ;;  %v4259_v38 = vpack.c.bf16 %v4165_v37, %v4164_v36  ;;  %v2797_v44 = vld [vmem:[#allocation2 + $0x75] sm:$0xff] }
 0x17d   : > { %v887_v39 = vpop.f32.mrb[36].mxu0  ;;  %v1425_v45 = vld [vmem:[#allocation2 + $0x70] sm:$0xff]  ;;  %v1426_v46 = vld [vmem:[#allocation2 + $0x78] sm:$0xff]  ;;  %v2889_v48 = vpack.c.bf16 %v2797_v44, %v2796_v41 }
 0x17e   : > { %v888_v42 = vadd.f32 %v7846_v33, %v887_v39  ;;  %v6716_v43 = vpop.f32.mrb[37].mxu0  ;;  %4308 = vst.msk [vmem:[#allocation3 + $0x58] sm:$0xff] %vm1304_vm4, %v4259_v38  ;;  %v1516_v49 = vpack.c.bf16 %v1426_v46, %v1425_v45 }
 0x17f   : > { %v890_v47 = vpop.f32.mrb[38].mxu0  ;;  %2938 = vst.msk [vmem:[#allocation3 + $0x80] sm:$0xff] %vm1304_vm4, %v2889_v48 }
 0x180   : > { %v1224_v50 = vmax.f32 %v888_v42, 0.0  ;;  %v891_v51 = vadd.f32 %v7846_v33, %v890_v47  ;;  %v6717_v52 = vpop.f32.mrb[39].mxu0  ;;  %1565 = vst.msk [vmem:[#allocation3 + $0xa8] sm:$0xff] %vm1304_vm4, %v1516_v49 }
 0x181   : > { %v4166_v54 = vld [vmem:[#allocation2 + $0x7a] sm:$0xff] }
 0x182   : > { %1323 = vst.msk [vmem:[#allocation2 + $0x90] sm:$0xff] %vm1304_vm4, %v1224_v50  ;;  %v1225_v53 = vmax.f32 %v891_v51, 0.0  ;;  %6823 = vmatmul.mubr.msk.bf16.gmra.mrb[144].mxu0 %vm626_vm3, %v7429_v40  ;;  %v2798_v59 = vld [vmem:[#allocation2 + $0x7d] sm:$0xff] }
 0x183   : > { %v4167_v55 = vld [vmem:[#allocation2 + $0x82] sm:$0xff]  ;;  %6826 = vmatprep.mubr.msk.bf16.mxu0 %vm7570_vm1, %v7569_v0  ;;  %v3466_v50 = vld [vmem:[#allocation2 + $0x318] sm:$0xff] }
 0x184   : > { %1324 = vst.msk [vmem:[#allocation2 + $0x98] sm:$0xff] %vm1304_vm4, %v1225_v53  ;;  %v4260_v56 = vpack.c.bf16 %v4167_v55, %v4166_v54  ;;  %v2799_v62 = vld [vmem:[#allocation2 + $0x85] sm:$0xff] }
 0x185   : > { %v895_v57 = vpop.f32.mrb[40].mxu0  ;;  %v1427_v63 = vld [vmem:[#allocation2 + $0x80] sm:$0xff]  ;;  %v1428_v1 = vld [vmem:[#allocation2 + $0x88] sm:$0xff]  ;;  %v2890_v3 = vpack.c.bf16 %v2799_v62, %v2798_v59 }
 0x186   : > { %v896_v60 = vadd.f32 %v7846_v33, %v895_v57  ;;  %v6720_v61 = vpop.f32.mrb[41].mxu0  ;;  %4309 = vst.msk [vmem:[#allocation3 + $0x70] sm:$0xff] %vm1304_vm4, %v4260_v56  ;;  %v1517_v4 = vpack.c.bf16 %v1428_v1, %v1427_v63  ;;  %v3467_v51 = vld [vmem:[#allocation2 + $0x320] sm:$0xff] }
 0x187   : > { %v898_v2 = vpop.f32.mrb[42].mxu0  ;;  %2939 = vst.msk [vmem:[#allocation3 + $0x98] sm:$0xff] %vm1304_vm4, %v2890_v3  ;;  %v7433_v54 = vld [vmem:[%s7722_s23 + $0x140] sm:$0xff]   ;;  %v3518_v55 = vpack.c.bf16 %v3467_v51, %v3466_v50 }
 0x188   : > { %v1226_v5 = vmax.f32 %v896_v60, 0.0  ;;  %v899_v6 = vadd.f32 %v7846_v33, %v898_v2  ;;  %v6721_v7 = vpop.f32.mrb[43].mxu0  ;;  %1566 = vst.msk [vmem:[#allocation3 + $0xc0] sm:$0xff] %vm1304_vm4, %v1517_v4  ;;  %v3858_v3 = vld [vmem:[#allocation2 + $0x319] sm:$0xff]  ;;  %v3859_v4 = vld [vmem:[#allocation2 + $0x321] sm:$0xff] }
 0x189   : > { %v4168_v9 = vld [vmem:[#allocation2 + $0x8a] sm:$0xff]  ;;  %3662 = vrot.lane.b32.xlu0 %v3518_v55, %s7572_s26  ;;  %v7436_v55 = vld [vmem:[%s7722_s23 + $0x158] sm:$0xff]  }
 0x18a   : > { %1325 = vst.msk [vmem:[#allocation2 + $0xa0] sm:$0xff] %vm1304_vm4, %v1226_v5  ;;  %v1227_v8 = vmax.f32 %v899_v6, 0.0  ;;  %6827 = vmatmul.mubr.msk.bf16.gmra.mrb[148].mxu0 %vm626_vm3, %v7430_v58  ;;  %v2800_v13 = vld [vmem:[#allocation2 + $0x8d] sm:$0xff]  ;;  %v3910_v6 = vpack.c.bf16 %v3859_v4, %v3858_v3 }
 0x18b   : > { %v4169_v10 = vld [vmem:[#allocation2 + $0x92] sm:$0xff]  ;;  %6830 = vmatprep.mubr.msk.bf16.mxu0 %vm7570_vm1, %v7569_v0 }
 0x18c   : > { %1326 = vst.msk [vmem:[#allocation2 + $0xa8] sm:$0xff] %vm1304_vm4, %v1227_v8  ;;  %v4261_v11 = vpack.c.bf16 %v4169_v10, %v4168_v9  ;;  %v2801_v14 = vld [vmem:[#allocation2 + $0x95] sm:$0xff] }
 0x18d   : > { %v903_v12 = vpop.f32.mrb[44].mxu0  ;;  %v2891_v18 = vpack.c.bf16 %v2801_v14, %v2800_v13  ;;  %v1429_v19 = vld [vmem:[#allocation2 + $0x90] sm:$0xff]  ;;  %v1430_v20 = vld [vmem:[#allocation2 + $0x98] sm:$0xff]  ;;  %4054 = vrot.lane.b32.xlu0 %v3910_v6, %s7573_s28 }
 0x18e   : > { %v904_v15 = vadd.f32 %v7846_v33, %v903_v12  ;;  %v6724_v16 = vpop.f32.mrb[45].mxu0  ;;  %4310 = vst.msk [vmem:[#allocation3 + $0x88] sm:$0xff] %vm1304_vm4, %v4261_v11  ;;  %v1518_v22 = vpack.c.bf16 %v1430_v20, %v1429_v19  ;;  %v3468_v11 = vld [vmem:[#allocation2 + $0x328] sm:$0xff]  ;;  %v3469_v12 = vld [vmem:[#allocation2 + $0x330] sm:$0xff] }
 0x18f   : > { %v906_v21 = vpop.f32.mrb[46].mxu0  ;;  %2940 = vst.msk [vmem:[#allocation3 + $0xb0] sm:$0xff] %vm1304_vm4, %v2891_v18  ;;  %v3519_v16 = vpack.c.bf16 %v3469_v12, %v3468_v11 }
 0x190   : > { %v1228_v23 = vmax.f32 %v904_v15, 0.0  ;;  %v907_v24 = vadd.f32 %v7846_v33, %v906_v21  ;;  %v6725_v25 = vpop.f32.mrb[47].mxu0  ;;  %1567 = vst.msk [vmem:[#allocation3 + $0xd8] sm:$0xff] %vm1304_vm4, %v1518_v22  ;;  %v7434_v15 = vld [vmem:[%s7722_s23 + $0x148] sm:$0xff]  }
 0x191   : > { %v4170_v27 = vld [vmem:[#allocation2 + $0x9a] sm:$0xff]  ;;  %3664 = vrot.lane.b32.xlu0 %v3519_v16, %s7572_s26 }
 0x192   : > { %1327 = vst.msk [vmem:[#allocation2 + $0xb0] sm:$0xff] %vm1304_vm4, %v1228_v23  ;;  %v1229_v26 = vmax.f32 %v907_v24, 0.0  ;;  %6831 = vmatmul.mubr.msk.bf16.gmra.mrb[152].mxu0 %vm626_vm3, %v7431_v17  ;;  %v2802_v32 = vld [vmem:[#allocation2 + $0x9d] sm:$0xff] }
 0x193   : > { %v4171_v28 = vld [vmem:[#allocation2 + $0xa2] sm:$0xff]  ;;  %6834 = vmatprep.mubr.msk.bf16.mxu0 %vm7570_vm1, %v7569_v0 }
 0x194   : > { %1328 = vst.msk [vmem:[#allocation2 + $0xb8] sm:$0xff] %vm1304_vm4, %v1229_v26  ;;  %v4262_v29 = vpack.c.bf16 %v4171_v28, %v4170_v27  ;;  %v2803_v36 = vld [vmem:[#allocation2 + $0xa5] sm:$0xff] }
 0x195   : > { %v911_v30 = vpop.f32.mrb[48].mxu0  ;;  %v1431_v37 = vld [vmem:[#allocation2 + $0xa0] sm:$0xff]  ;;  %v1432_v38 = vld [vmem:[#allocation2 + $0xa8] sm:$0xff]  ;;  %v2892_v40 = vpack.c.bf16 %v2803_v36, %v2802_v32 }
 0x196   : > { %v912_v34 = vadd.f32 %v7846_v33, %v911_v30  ;;  %v6728_v35 = vpop.f32.mrb[49].mxu0  ;;  %4311 = vst.msk [vmem:[#allocation3 + $0xa0] sm:$0xff] %vm1304_vm4, %v4262_v29  ;;  %v1519_v41 = vpack.c.bf16 %v1432_v38, %v1431_v37  ;;  %v7435_v37 = vld [vmem:[%s7722_s23 + $0x150] sm:$0xff]  }
 0x197   : > { %v914_v39 = vpop.f32.mrb[50].mxu0  ;;  %2941 = vst.msk [vmem:[#allocation3 + $0xc8] sm:$0xff] %vm1304_vm4, %v2892_v40 }
 0x198   : > { %v1230_v42 = vmax.f32 %v912_v34, 0.0  ;;  %v915_v43 = vadd.f32 %v7846_v33, %v914_v39  ;;  %v6729_v44 = vpop.f32.mrb[51].mxu0  ;;  %1568 = vst.msk [vmem:[#allocation3 + $0xf0] sm:$0xff] %vm1304_vm4, %v1519_v41 }
 0x199   : > { %v4172_v46 = vld [vmem:[#allocation2 + $0xaa] sm:$0xff] }
 0x19a   : > { %1329 = vst.msk [vmem:[#allocation2 + $0xc0] sm:$0xff] %vm1304_vm4, %v1230_v42  ;;  %v1231_v45 = vmax.f32 %v915_v43, 0.0  ;;  %6835 = vmatmul.mubr.msk.bf16.gmra.mrb[156].mxu0 %vm626_vm3, %v7432_v31  ;;  %v2804_v56 = vld [vmem:[#allocation2 + $0xad] sm:$0xff] }
 0x19b   : > { %v4173_v47 = vld [vmem:[#allocation2 + $0xb2] sm:$0xff]  ;;  %6838 = vmatprep.mubr.msk.bf16.mxu0 %vm7570_vm1, %v7569_v0 }
 0x19c   : > { %1330 = vst.msk [vmem:[#allocation2 + $0xc8] sm:$0xff] %vm1304_vm4, %v1231_v45  ;;  %v4263_v48 = vpack.c.bf16 %v4173_v47, %v4172_v46  ;;  %v2805_v57 = vld [vmem:[#allocation2 + $0xb5] sm:$0xff] }
 0x19d   : > { %v919_v49 = vpop.f32.mrb[52].mxu0  ;;  %v2893_v59 = vpack.c.bf16 %v2805_v57, %v2804_v56  ;;  %v1433_v60 = vld [vmem:[#allocation2 + $0xb0] sm:$0xff]  ;;  %v1434_v61 = vld [vmem:[#allocation2 + $0xb8] sm:$0xff] }
 0x19e   : > { %v920_v52 = vadd.f32 %v7846_v33, %v919_v49  ;;  %v6732_v53 = vpop.f32.mrb[53].mxu0  ;;  %4312 = vst.msk [vmem:[#allocation3 + $0xb8] sm:$0xff] %vm1304_vm4, %v4263_v48  ;;  %v1520_v2 = vpack.c.bf16 %v1434_v61, %v1433_v60 }
 0x19f   : > { %v922_v58 = vpop.f32.mrb[54].mxu0  ;;  %2942 = vst.msk [vmem:[#allocation3 + $0xe0] sm:$0xff] %vm1304_vm4, %v2893_v59 }
 0x1a0   : > { %v1232_v62 = vmax.f32 %v920_v52, 0.0  ;;  %v923_v63 = vadd.f32 %v7846_v33, %v922_v58  ;;  %v6733_v1 = vpop.f32.mrb[55].mxu0  ;;  %1569 = vst.msk [vmem:[#allocation3 + $0x108] sm:$0xff] %vm1304_vm4, %v1520_v2 }
 0x1a1   : > { %v4174_v7 = vld [vmem:[#allocation2 + $0xba] sm:$0xff] }
 0x1a2   : > { %1331 = vst.msk [vmem:[#allocation2 + $0xd0] sm:$0xff] %vm1304_vm4, %v1232_v62  ;;  %v1233_v5 = vmax.f32 %v923_v63, 0.0  ;;  %6839 = vmatmul.mubr.msk.bf16.gmra.mrb[160].mxu0 %vm626_vm3, %v7433_v54  ;;  %v2806_v17 = vld [vmem:[#allocation2 + $0xbd] sm:$0xff] }
 0x1a3   : > { %v4175_v8 = vld [vmem:[#allocation2 + $0xc2] sm:$0xff]  ;;  %6842 = vmatprep.mubr.msk.bf16.mxu0 %vm7570_vm1, %v7569_v0 }
 0x1a4   : > { %1332 = vst.msk [vmem:[#allocation2 + $0xd8] sm:$0xff] %vm1304_vm4, %v1233_v5  ;;  %v4264_v9 = vpack.c.bf16 %v4175_v8, %v4174_v7  ;;  %v2807_v19 = vld [vmem:[#allocation2 + $0xc5] sm:$0xff] }
 0x1a5   : > { %v927_v10 = vpop.f32.mrb[56].mxu0  ;;  %v1435_v20 = vld [vmem:[#allocation2 + $0xc0] sm:$0xff]  ;;  %v1436_v21 = vld [vmem:[#allocation2 + $0xc8] sm:$0xff]  ;;  %v2894_v25 = vpack.c.bf16 %v2807_v19, %v2806_v17 }
 0x1a6   : > { %v928_v13 = vadd.f32 %v7846_v33, %v927_v10  ;;  %v6736_v14 = vpop.f32.mrb[57].mxu0  ;;  %4313 = vst.msk [vmem:[#allocation3 + $0xd0] sm:$0xff] %vm1304_vm4, %v4264_v9  ;;  %v1521_v26 = vpack.c.bf16 %v1436_v21, %v1435_v20  ;;  %v7437_v10 = vld [vmem:[%s7722_s23 + $0x160] sm:$0xff]  }
 0x1a7   : > { %v930_v18 = vpop.f32.mrb[58].mxu0  ;;  %2943 = vst.msk [vmem:[#allocation3 + $0xf8] sm:$0xff] %vm1304_vm4, %v2894_v25 }
 0x1a8   : > { %v1234_v22 = vmax.f32 %v928_v13, 0.0  ;;  %v931_v23 = vadd.f32 %v7846_v33, %v930_v18  ;;  %v6737_v24 = vpop.f32.mrb[59].mxu0  ;;  %1570 = vst.msk [vmem:[#allocation3 + $0x120] sm:$0xff] %vm1304_vm4, %v1521_v26 }
 0x1a9   : > { %v4176_v28 = vld [vmem:[#allocation2 + $0xca] sm:$0xff] }
 0x1aa   : > { %1333 = vst.msk [vmem:[#allocation2 + $0xe0] sm:$0xff] %vm1304_vm4, %v1234_v22  ;;  %v1235_v27 = vmax.f32 %v931_v23, 0.0  ;;  %6843 = vmatmul.mubr.msk.bf16.gmra.mrb[164].mxu0 %vm626_vm3, %v7434_v15  ;;  %v2808_v32 = vld [vmem:[#allocation2 + $0xcd] sm:$0xff] }
 0x1ab   : > { %v4177_v29 = vld [vmem:[#allocation2 + $0xd2] sm:$0xff]  ;;  %6846 = vmatprep.mubr.msk.bf16.mxu0 %vm7570_vm1, %v7569_v0 }
 0x1ac   : > { %v4265_v30 = vpack.c.bf16 %v4177_v29, %v4176_v28  ;;  %1334 = vst.msk [vmem:[#allocation2 + $0xe8] sm:$0xff] %vm1304_vm4, %v1235_v27  ;;  %v2809_v34 = vld [vmem:[#allocation2 + $0xd5] sm:$0xff]  ;;  %v7438_v28 = vld [vmem:[%s7722_s23 + $0x168] sm:$0xff]  }
 0x1ad   : > { %v935_v31 = vpop.f32.mrb[60].mxu0  ;;  %v2895_v38 = vpack.c.bf16 %v2809_v34, %v2808_v32  ;;  %v1437_v39 = vld [vmem:[#allocation2 + $0xd0] sm:$0xff]  ;;  %v1438_v40 = vld [vmem:[#allocation2 + $0xd8] sm:$0xff] }
 0x1ae   : > { %4314 = vst.msk [vmem:[#allocation3 + $0xe8] sm:$0xff] %vm1304_vm4, %v4265_v30  ;;  %v936_v35 = vadd.f32 %v7846_v33, %v935_v31  ;;  %v6740_v36 = vpop.f32.mrb[61].mxu0  ;;  %v1522_v42 = vpack.c.bf16 %v1438_v40, %v1437_v39 }
 0x1af   : > { %v938_v41 = vpop.f32.mrb[62].mxu0  ;;  %2944 = vst.msk [vmem:[#allocation3 + $0x110] sm:$0xff] %vm1304_vm4, %v2895_v38 }
 0x1b0   : > { %v1236_v43 = vmax.f32 %v936_v35, 0.0  ;;  %v939_v44 = vadd.f32 %v7846_v33, %v938_v41  ;;  %v6741_v45 = vpop.f32.mrb[63].mxu0  ;;  %1571 = vst.msk [vmem:[#allocation3 + $0x138] sm:$0xff] %vm1304_vm4, %v1522_v42 }
 0x1b1   : > { %v4178_v47 = vld [vmem:[#allocation2 + $0xda] sm:$0xff] }
 0x1b2   : > { %1335 = vst.msk [vmem:[#allocation2 + $0xf0] sm:$0xff] %vm1304_vm4, %v1236_v43  ;;  %v1237_v46 = vmax.f32 %v939_v44, 0.0  ;;  %6847 = vmatmul.mubr.msk.bf16.gmra.mrb[168].mxu0 %vm626_vm3, %v7435_v37  ;;  %v2810_v51 = vld [vmem:[#allocation2 + $0xdd] sm:$0xff] }
 0x1b3   : > { %v4179_v48 = vld [vmem:[#allocation2 + $0xe2] sm:$0xff]  ;;  %6850 = vmatprep.mubr.msk.bf16.mxu0 %vm7570_vm1, %v7569_v0 }
 0x1b4   : > { %v4266_v49 = vpack.c.bf16 %v4179_v48, %v4178_v47  ;;  %1336 = vst.msk [vmem:[#allocation2 + $0xf8] sm:$0xff] %vm1304_vm4, %v1237_v46  ;;  %v2811_v52 = vld [vmem:[#allocation2 + $0xe5] sm:$0xff]  ;;  %v7439_v47 = vld [vmem:[%s7722_s23 + $0x170] sm:$0xff]  }
 0x1b5   : > { %v943_v50 = vpop.f32.mrb[64].mxu0  ;;  %v2896_v56 = vpack.c.bf16 %v2811_v52, %v2810_v51  ;;  %v1439_v57 = vld [vmem:[#allocation2 + $0xe0] sm:$0xff]  ;;  %v1440_v58 = vld [vmem:[#allocation2 + $0xe8] sm:$0xff] }
 0x1b6   : > { %4315 = vst.msk [vmem:[#allocation3 + $0x100] sm:$0xff] %vm1304_vm4, %v4266_v49  ;;  %v944_v53 = vadd.f32 %v7846_v33, %v943_v50  ;;  %v6744_v54 = vpop.f32.mrb[65].mxu0  ;;  %v1523_v60 = vpack.c.bf16 %v1440_v58, %v1439_v57 }
 0x1b7   : > { %v946_v59 = vpop.f32.mrb[66].mxu0  ;;  %2945 = vst.msk [vmem:[#allocation3 + $0x128] sm:$0xff] %vm1304_vm4, %v2896_v56 }
 0x1b8   : > { %v1238_v61 = vmax.f32 %v944_v53, 0.0  ;;  %v947_v62 = vadd.f32 %v7846_v33, %v946_v59  ;;  %v6745_v63 = vpop.f32.mrb[67].mxu0  ;;  %1572 = vst.msk [vmem:[#allocation3 + $0x150] sm:$0xff] %vm1304_vm4, %v1523_v60 }
 0x1b9   : > { %v4180_v2 = vld [vmem:[#allocation2 + $0xea] sm:$0xff] }
 0x1ba   : > { %1337 = vst.msk [vmem:[#allocation2 + $0x100] sm:$0xff] %vm1304_vm4, %v1238_v61  ;;  %v1239_v1 = vmax.f32 %v947_v62, 0.0  ;;  %6851 = vmatmul.mubr.msk.bf16.gmra.mrb[172].mxu0 %vm626_vm3, %v7436_v55  ;;  %v2812_v6 = vld [vmem:[#allocation2 + $0xed] sm:$0xff] }
 0x1bb   : > { %v4181_v3 = vld [vmem:[#allocation2 + $0xf2] sm:$0xff]  ;;  %6854 = vmatprep.mubr.msk.bf16.mxu0 %vm7570_vm1, %v7569_v0 }
 0x1bc   : > { %v4267_v4 = vpack.c.bf16 %v4181_v3, %v4180_v2  ;;  %1338 = vst.msk [vmem:[#allocation2 + $0x108] sm:$0xff] %vm1304_vm4, %v1239_v1  ;;  %v2813_v7 = vld [vmem:[#allocation2 + $0xf5] sm:$0xff] }
 0x1bd   : > { %v951_v5 = vpop.f32.mrb[68].mxu0  ;;  %v2897_v11 = vpack.c.bf16 %v2813_v7, %v2812_v6  ;;  %v1441_v12 = vld [vmem:[#allocation2 + $0xf0] sm:$0xff]  ;;  %v1442_v13 = vld [vmem:[#allocation2 + $0xf8] sm:$0xff] }
 0x1be   : > { %4316 = vst.msk [vmem:[#allocation3 + $0x118] sm:$0xff] %vm1304_vm4, %v4267_v4  ;;  %v952_v8 = vadd.f32 %v7846_v33, %v951_v5  ;;  %v6748_v9 = vpop.f32.mrb[69].mxu0  ;;  %v1524_v15 = vpack.c.bf16 %v1442_v13, %v1441_v12  ;;  %v7440_v2 = vld [vmem:[%s7722_s23 + $0x178] sm:$0xff]  }
 0x1bf   : > { %v954_v14 = vpop.f32.mrb[70].mxu0  ;;  %2946 = vst.msk [vmem:[#allocation3 + $0x140] sm:$0xff] %vm1304_vm4, %v2897_v11 }
 0x1c0   : > { %v1240_v16 = vmax.f32 %v952_v8, 0.0  ;;  %v955_v17 = vadd.f32 %v7846_v33, %v954_v14  ;;  %v6749_v18 = vpop.f32.mrb[71].mxu0  ;;  %1573 = vst.msk [vmem:[#allocation3 + $0x168] sm:$0xff] %vm1304_vm4, %v1524_v15 }
 0x1c1   : > { %v4182_v20 = vld [vmem:[#allocation2 + $0xfa] sm:$0xff] }
 0x1c2   : > { %1339 = vst.msk [vmem:[#allocation2 + $0x110] sm:$0xff] %vm1304_vm4, %v1240_v16  ;;  %v1241_v19 = vmax.f32 %v955_v17, 0.0  ;;  %6855 = vmatmul.mubr.msk.bf16.gmra.mrb[176].mxu0 %vm626_vm3, %v7437_v10  ;;  %v2814_v24 = vld [vmem:[#allocation2 + $0xfd] sm:$0xff] }
 0x1c3   : > { %v4183_v21 = vld [vmem:[#allocation2 + $0x102] sm:$0xff]  ;;  %6858 = vmatprep.mubr.msk.bf16.mxu0 %vm7570_vm1, %v7569_v0 }
 0x1c4   : > { %v4268_v22 = vpack.c.bf16 %v4183_v21, %v4182_v20  ;;  %1340 = vst.msk [vmem:[#allocation2 + $0x118] sm:$0xff] %vm1304_vm4, %v1241_v19  ;;  %v2815_v25 = vld [vmem:[#allocation2 + $0x105] sm:$0xff] }
 0x1c5   : > { %v959_v23 = vpop.f32.mrb[72].mxu0  ;;  %v2898_v29 = vpack.c.bf16 %v2815_v25, %v2814_v24  ;;  %v1443_v30 = vld [vmem:[#allocation2 + $0x100] sm:$0xff]  ;;  %v1444_v31 = vld [vmem:[#allocation2 + $0x108] sm:$0xff] }
 0x1c6   : > { %4317 = vst.msk [vmem:[#allocation3 + $0x130] sm:$0xff] %vm1304_vm4, %v4268_v22  ;;  %v960_v26 = vadd.f32 %v7846_v33, %v959_v23  ;;  %v6752_v27 = vpop.f32.mrb[73].mxu0  ;;  %v1525_v34 = vpack.c.bf16 %v1444_v31, %v1443_v30  ;;  %v7441_v20 = vld [vmem:[%s7722_s23 + $0x180] sm:$0xff]  }
 0x1c7   : > { %v962_v32 = vpop.f32.mrb[74].mxu0  ;;  %2947 = vst.msk [vmem:[#allocation3 + $0x158] sm:$0xff] %vm1304_vm4, %v2898_v29 }
 0x1c8   : > { %v1242_v35 = vmax.f32 %v960_v26, 0.0  ;;  %v963_v36 = vadd.f32 %v7846_v33, %v962_v32  ;;  %v6753_v37 = vpop.f32.mrb[75].mxu0  ;;  %1574 = vst.msk [vmem:[#allocation3 + $0x180] sm:$0xff] %vm1304_vm4, %v1525_v34 }
 0x1c9   : > { %v4184_v39 = vld [vmem:[#allocation2 + $0x10a] sm:$0xff] }
 0x1ca   : > { %1341 = vst.msk [vmem:[#allocation2 + $0x120] sm:$0xff] %vm1304_vm4, %v1242_v35  ;;  %v1243_v38 = vmax.f32 %v963_v36, 0.0  ;;  %6859 = vmatmul.mubr.msk.bf16.gmra.mrb[180].mxu0 %vm626_vm3, %v7438_v28  ;;  %v2816_v43 = vld [vmem:[#allocation2 + $0x10d] sm:$0xff] }
 0x1cb   : > { %v4185_v40 = vld [vmem:[#allocation2 + $0x112] sm:$0xff]  ;;  %6862 = vmatprep.mubr.msk.bf16.mxu0 %vm7570_vm1, %v7569_v0 }
 0x1cc   : > { %v4269_v41 = vpack.c.bf16 %v4185_v40, %v4184_v39  ;;  %1342 = vst.msk [vmem:[#allocation2 + $0x128] sm:$0xff] %vm1304_vm4, %v1243_v38  ;;  %v2817_v44 = vld [vmem:[#allocation2 + $0x115] sm:$0xff] }
 0x1cd   : > { %v967_v42 = vpop.f32.mrb[76].mxu0  ;;  %v2899_v48 = vpack.c.bf16 %v2817_v44, %v2816_v43  ;;  %v1445_v49 = vld [vmem:[#allocation2 + $0x110] sm:$0xff]  ;;  %v1446_v50 = vld [vmem:[#allocation2 + $0x118] sm:$0xff] }
 0x1ce   : > { %4318 = vst.msk [vmem:[#allocation3 + $0x148] sm:$0xff] %vm1304_vm4, %v4269_v41  ;;  %v968_v45 = vadd.f32 %v7846_v33, %v967_v42  ;;  %v6756_v46 = vpop.f32.mrb[77].mxu0  ;;  %v1526_v52 = vpack.c.bf16 %v1446_v50, %v1445_v49 }
 0x1cf   : > { %v970_v51 = vpop.f32.mrb[78].mxu0  ;;  %2948 = vst.msk [vmem:[#allocation3 + $0x170] sm:$0xff] %vm1304_vm4, %v2899_v48 }
 0x1d0   : > { %v1244_v53 = vmax.f32 %v968_v45, 0.0  ;;  %v971_v54 = vadd.f32 %v7846_v33, %v970_v51  ;;  %v6757_v55 = vpop.f32.mrb[79].mxu0  ;;  %1575 = vst.msk [vmem:[#allocation3 + $0x198] sm:$0xff] %vm1304_vm4, %v1526_v52 }
 0x1d1   : > { %v4186_v57 = vld [vmem:[#allocation2 + $0x11a] sm:$0xff] }
 0x1d2   : > { %1343 = vst.msk [vmem:[#allocation2 + $0x130] sm:$0xff] %vm1304_vm4, %v1244_v53  ;;  %v1245_v56 = vmax.f32 %v971_v54, 0.0  ;;  %6863 = vmatmul.mubr.msk.bf16.gmra.mrb[184].mxu0 %vm626_vm3, %v7439_v47  ;;  %v2818_v61 = vld [vmem:[#allocation2 + $0x11d] sm:$0xff] }
 0x1d3   : > { %v4187_v58 = vld [vmem:[#allocation2 + $0x122] sm:$0xff]  ;;  %6866 = vmatprep.mubr.msk.bf16.mxu0 %vm7570_vm1, %v7569_v0 }
 0x1d4   : > { %v4270_v59 = vpack.c.bf16 %v4187_v58, %v4186_v57  ;;  %1344 = vst.msk [vmem:[#allocation2 + $0x138] sm:$0xff] %vm1304_vm4, %v1245_v56  ;;  %v2819_v62 = vld [vmem:[#allocation2 + $0x125] sm:$0xff] }
 0x1d5   : > { %v975_v60 = vpop.f32.mrb[80].mxu0  ;;  %v2900_v3 = vpack.c.bf16 %v2819_v62, %v2818_v61  ;;  %v1447_v4 = vld [vmem:[#allocation2 + $0x120] sm:$0xff]  ;;  %v1448_v5 = vld [vmem:[#allocation2 + $0x128] sm:$0xff] }
 0x1d6   : > { %4319 = vst.msk [vmem:[#allocation3 + $0x160] sm:$0xff] %vm1304_vm4, %v4270_v59  ;;  %v976_v63 = vadd.f32 %v7846_v33, %v975_v60  ;;  %v6760_v1 = vpop.f32.mrb[81].mxu0  ;;  %v1527_v7 = vpack.c.bf16 %v1448_v5, %v1447_v4 }
 0x1d7   : > { %v978_v6 = vpop.f32.mrb[82].mxu0  ;;  %2949 = vst.msk [vmem:[#allocation3 + $0x188] sm:$0xff] %vm1304_vm4, %v2900_v3 }
 0x1d8   : > { %v1246_v8 = vmax.f32 %v976_v63, 0.0  ;;  %v979_v9 = vadd.f32 %v7846_v33, %v978_v6  ;;  %v6761_v10 = vpop.f32.mrb[83].mxu0  ;;  %1576 = vst.msk [vmem:[#allocation3 + $0x1b0] sm:$0xff] %vm1304_vm4, %v1527_v7 }
 0x1d9   : > { %v4188_v12 = vld [vmem:[#allocation2 + $0x12a] sm:$0xff] }
 0x1da   : > { %1345 = vst.msk [vmem:[#allocation2 + $0x140] sm:$0xff] %vm1304_vm4, %v1246_v8  ;;  %v1247_v11 = vmax.f32 %v979_v9, 0.0  ;;  %6867 = vmatmul.mubr.msk.bf16.gmra.mrb[188].mxu0 %vm626_vm3, %v7440_v2  ;;  %v2820_v16 = vld [vmem:[#allocation2 + $0x12d] sm:$0xff] }
 0x1db   : > { %v4189_v13 = vld [vmem:[#allocation2 + $0x132] sm:$0xff]  ;;  %6870 = vmatprep.mubr.msk.bf16.mxu0 %vm7570_vm1, %v7569_v0 }
 0x1dc   : > { %v4271_v14 = vpack.c.bf16 %v4189_v13, %v4188_v12  ;;  %1346 = vst.msk [vmem:[#allocation2 + $0x148] sm:$0xff] %vm1304_vm4, %v1247_v11  ;;  %v2821_v17 = vld [vmem:[#allocation2 + $0x135] sm:$0xff] }
 0x1dd   : > { %v983_v15 = vpop.f32.mrb[84].mxu0  ;;  %v2901_v21 = vpack.c.bf16 %v2821_v17, %v2820_v16  ;;  %v1449_v22 = vld [vmem:[#allocation2 + $0x130] sm:$0xff]  ;;  %v1450_v23 = vld [vmem:[#allocation2 + $0x138] sm:$0xff] }
 0x1de   : > { %4320 = vst.msk [vmem:[#allocation3 + $0x178] sm:$0xff] %vm1304_vm4, %v4271_v14  ;;  %v984_v18 = vadd.f32 %v7846_v33, %v983_v15  ;;  %v6764_v19 = vpop.f32.mrb[85].mxu0  ;;  %v1528_v25 = vpack.c.bf16 %v1450_v23, %v1449_v22 }
 0x1df   : > { %v986_v24 = vpop.f32.mrb[86].mxu0  ;;  %2950 = vst.msk [vmem:[#allocation3 + $0x1a0] sm:$0xff] %vm1304_vm4, %v2901_v21 }
 0x1e0   : > { %v1248_v26 = vmax.f32 %v984_v18, 0.0  ;;  %v987_v27 = vadd.f32 %v7846_v33, %v986_v24  ;;  %v6765_v28 = vpop.f32.mrb[87].mxu0  ;;  %1577 = vst.msk [vmem:[#allocation3 + $0x1c8] sm:$0xff] %vm1304_vm4, %v1528_v25  ;;  %v8082_v33 = vld [vmem:[#allocation7] ss:$0 sm:$0xff] }
 0x1e1   : > { %v4190_v30 = vld [vmem:[#allocation2 + $0x13a] sm:$0xff] }
 0x1e2   : > { %1347 = vst.msk [vmem:[#allocation2 + $0x150] sm:$0xff] %vm1304_vm4, %v1248_v26  ;;  %v1249_v29 = vmax.f32 %v987_v27, 0.0  ;;  %6871 = vmatmul.mubr.msk.bf16.gmra.mrb[192].mxu0 %vm626_vm3, %v7441_v20  ;;  %v2822_v35 = vld [vmem:[#allocation2 + $0x13d] sm:$0xff] }
 0x1e3   : > { %v4191_v31 = vld [vmem:[#allocation2 + $0x142] sm:$0xff] }
 0x1e4   : > { %v4272_v32 = vpack.c.bf16 %v4191_v31, %v4190_v30  ;;  %1348 = vst.msk [vmem:[#allocation2 + $0x158] sm:$0xff] %vm1304_vm4, %v1249_v29  ;;  %v2823_v36 = vld [vmem:[#allocation2 + $0x145] sm:$0xff] }
 0x1e5   : > { %v991_v34 = vpop.f32.mrb[88].mxu0  ;;  %v2902_v39 = vpack.c.bf16 %v2823_v36, %v2822_v35  ;;  %v1451_v40 = vld [vmem:[#allocation2 + $0x140] sm:$0xff]  ;;  %v1452_v41 = vld [vmem:[#allocation2 + $0x148] sm:$0xff] }
 0x1e6   : > { %4321 = vst.msk [vmem:[#allocation3 + $0x190] sm:$0xff] %vm1304_vm4, %v4272_v32  ;;  %v992_v37 = vadd.f32 %v8082_v33, %v991_v34  ;;  %v6768_v38 = vpop.f32.mrb[89].mxu0  ;;  %v1529_v43 = vpack.c.bf16 %v1452_v41, %v1451_v40 }
 0x1e7   : > { %v994_v42 = vpop.f32.mrb[90].mxu0  ;;  %2951 = vst.msk [vmem:[#allocation3 + $0x1b8] sm:$0xff] %vm1304_vm4, %v2902_v39 }
 0x1e8   : > { %v1250_v44 = vmax.f32 %v992_v37, 0.0  ;;  %v995_v45 = vadd.f32 %v8082_v33, %v994_v42  ;;  %v6769_v46 = vpop.f32.mrb[91].mxu0  ;;  %1578 = vst.msk [vmem:[#allocation3 + $0x1e0] sm:$0xff] %vm1304_vm4, %v1529_v43 }
 0x1e9   : > { %v4192_v48 = vld [vmem:[#allocation2 + $0x14a] sm:$0xff] }
 0x1ea   : > { %1349 = vst.msk [vmem:[#allocation2 + $0x160] sm:$0xff] %vm1304_vm4, %v1250_v44  ;;  %v1251_v47 = vmax.f32 %v995_v45, 0.0  ;;  %v2824_v52 = vld [vmem:[#allocation2 + $0x14d] sm:$0xff] }
 0x1eb   : > { %v4193_v49 = vld [vmem:[#allocation2 + $0x152] sm:$0xff] }
 0x1ec   : > { %v4273_v50 = vpack.c.bf16 %v4193_v49, %v4192_v48  ;;  %1350 = vst.msk [vmem:[#allocation2 + $0x168] sm:$0xff] %vm1304_vm4, %v1251_v47  ;;  %v2825_v53 = vld [vmem:[#allocation2 + $0x155] sm:$0xff] }
 0x1ed   : > { %v999_v51 = vpop.f32.mrb[92].mxu0  ;;  %v2903_v56 = vpack.c.bf16 %v2825_v53, %v2824_v52  ;;  %v1453_v57 = vld [vmem:[#allocation2 + $0x150] sm:$0xff]  ;;  %v1454_v58 = vld [vmem:[#allocation2 + $0x158] sm:$0xff]  ;;  %v7442_v53 = vld [vmem:[%s9986_s3] sm:$0xff]  }
 0x1ee   : > { %4322 = vst.msk [vmem:[#allocation3 + $0x1a8] sm:$0xff] %vm1304_vm4, %v4273_v50  ;;  %v1000_v54 = vadd.f32 %v8082_v33, %v999_v51  ;;  %v6772_v55 = vpop.f32.mrb[93].mxu0  ;;  %v1530_v60 = vpack.c.bf16 %v1454_v58, %v1453_v57 }
 0x1ef   : > { %v1002_v59 = vpop.f32.mrb[94].mxu0  ;;  %2952 = vst.msk [vmem:[#allocation3 + $0x1d0] sm:$0xff] %vm1304_vm4, %v2903_v56 }
 0x1f0   : > { %v1252_v61 = vmax.f32 %v1000_v54, 0.0  ;;  %v1003_v62 = vadd.f32 %v8082_v33, %v1002_v59  ;;  %v6773_v63 = vpop.f32.mrb[95].mxu0  ;;  %1579 = vst.msk [vmem:[#allocation3 + $0x1f8] sm:$0xff] %vm1304_vm4, %v1530_v60  ;;  %v7574_v54 = vmov 0   ;;  %v7443_v59 = vld [vmem:[%s9986_s3 + $0x8] sm:$0xff]  }
 0x1f1   : > { %v4194_v2 = vld [vmem:[#allocation2 + $0x15a] sm:$0xff]  ;;  %7074 = vmatprep.subr.bf16.mxu1 %v7574_v54  ;;  %4799 = vmatprep.subr.bf16.mxu0 %v7574_v54 }
 0x1f2   : > { %1351 = vst.msk [vmem:[#allocation2 + $0x170] sm:$0xff] %vm1304_vm4, %v1252_v61  ;;  %v1253_v1 = vmax.f32 %v1003_v62, 0.0  ;;  %v2826_v6 = vld [vmem:[#allocation2 + $0x15d] sm:$0xff]  ;;  %7090 = vmatpush1.bf16.msra.mxu1 %v7442_v53  ;;  %4800 = vmatpush1.bf16.msra.mxu0 %v7442_v53 }
 0x1f3   : > { %v4195_v3 = vld [vmem:[#allocation2 + $0x162] sm:$0xff]  ;;  %7075 = vmatprep.subr.bf16.mxu1 %v7574_v54  ;;  %4801 = vmatprep.subr.bf16.mxu0 %v7574_v54 }
 0x1f4   : > { %v4274_v4 = vpack.c.bf16 %v4195_v3, %v4194_v2  ;;  %1352 = vst.msk [vmem:[#allocation2 + $0x178] sm:$0xff] %vm1304_vm4, %v1253_v1  ;;  %v2827_v7 = vld [vmem:[#allocation2 + $0x165] sm:$0xff] }
 0x1f5   : > { %v1007_v5 = vpop.f32.mrb[96].mxu0  ;;  %v2904_v10 = vpack.c.bf16 %v2827_v7, %v2826_v6  ;;  %v1455_v11 = vld [vmem:[#allocation2 + $0x160] sm:$0xff]  ;;  %v1456_v12 = vld [vmem:[#allocation2 + $0x168] sm:$0xff] }
 0x1f6   : > { %4323 = vst.msk [vmem:[#allocation3 + $0x1c0] sm:$0xff] %vm1304_vm4, %v4274_v4  ;;  %v1008_v8 = vadd.f32 %v8082_v33, %v1007_v5  ;;  %v6776_v9 = vpop.f32.mrb[97].mxu0  ;;  %v1531_v14 = vpack.c.bf16 %v1456_v12, %v1455_v11  ;;  %7091 = vmatpush1.bf16.msra.mxu1 %v7443_v59  ;;  %4802 = vmatpush1.bf16.msra.mxu0 %v7443_v59 }
 0x1f7   : > { %v1010_v13 = vpop.f32.mrb[98].mxu0  ;;  %2953 = vst.msk [vmem:[#allocation3 + $0x1e8] sm:$0xff] %vm1304_vm4, %v2904_v10  ;;  %7076 = vmatprep.subr.bf16.mxu1 %v7574_v54  ;;  %4803 = vmatprep.subr.bf16.mxu0 %v7574_v54  ;;  %v7444_v10 = vld [vmem:[%s9986_s3 + $0x10] sm:$0xff]  }
 0x1f8   : > { %v1254_v15 = vmax.f32 %v1008_v8, 0.0  ;;  %v1011_v16 = vadd.f32 %v8082_v33, %v1010_v13  ;;  %v6777_v17 = vpop.f32.mrb[99].mxu0  ;;  %1580 = vst.msk [vmem:[#allocation3 + $0x210] sm:$0xff] %vm1304_vm4, %v1531_v14 }
 0x1f9   : > { %v4196_v19 = vld [vmem:[#allocation2 + $0x16a] sm:$0xff] }
 0x1fa   : > { %1353 = vst.msk [vmem:[#allocation2 + $0x180] sm:$0xff] %vm1304_vm4, %v1254_v15  ;;  %v1255_v18 = vmax.f32 %v1011_v16, 0.0  ;;  %v2828_v23 = vld [vmem:[#allocation2 + $0x16d] sm:$0xff]  ;;  %7092 = vmatpush1.bf16.msra.mxu1 %v7444_v10  ;;  %4804 = vmatpush1.bf16.msra.mxu0 %v7444_v10  ;;  %v7445_v15 = vld [vmem:[%s9986_s3 + $0x18] sm:$0xff]  }
 0x1fb   : > { %v4197_v20 = vld [vmem:[#allocation2 + $0x172] sm:$0xff]  ;;  %7077 = vmatprep.subr.bf16.mxu1 %v7574_v54  ;;  %4805 = vmatprep.subr.bf16.mxu0 %v7574_v54 }
 0x1fc   : > { %v4275_v21 = vpack.c.bf16 %v4197_v20, %v4196_v19  ;;  %1354 = vst.msk [vmem:[#allocation2 + $0x188] sm:$0xff] %vm1304_vm4, %v1255_v18  ;;  %v2829_v24 = vld [vmem:[#allocation2 + $0x175] sm:$0xff] }
 0x1fd   : > { %v1015_v22 = vpop.f32.mrb[100].mxu0  ;;  %v2905_v27 = vpack.c.bf16 %v2829_v24, %v2828_v23  ;;  %v1457_v28 = vld [vmem:[#allocation2 + $0x170] sm:$0xff]  ;;  %v1458_v29 = vld [vmem:[#allocation2 + $0x178] sm:$0xff] }
 0x1fe   : > { %4324 = vst.msk [vmem:[#allocation3 + $0x1d8] sm:$0xff] %vm1304_vm4, %v4275_v21  ;;  %v1016_v25 = vadd.f32 %v8082_v33, %v1015_v22  ;;  %v6780_v26 = vpop.f32.mrb[101].mxu0  ;;  %v1532_v31 = vpack.c.bf16 %v1458_v29, %v1457_v28  ;;  %7093 = vmatpush1.bf16.msra.mxu1 %v7445_v15  ;;  %4806 = vmatpush1.bf16.msra.mxu0 %v7445_v15  ;;  %v7446_v29 = vld [vmem:[%s9986_s3 + $0x20] sm:$0xff]  }
 0x1ff   : > { %v1018_v30 = vpop.f32.mrb[102].mxu0  ;;  %2954 = vst.msk [vmem:[#allocation3 + $0x200] sm:$0xff] %vm1304_vm4, %v2905_v27  ;;  %7078 = vmatprep.subr.bf16.mxu1 %v7574_v54  ;;  %4807 = vmatprep.subr.bf16.mxu0 %v7574_v54 }
 0x200   : > { %v1256_v32 = vmax.f32 %v1016_v25, 0.0  ;;  %v1019_v34 = vadd.f32 %v8082_v33, %v1018_v30  ;;  %v6781_v35 = vpop.f32.mrb[103].mxu0  ;;  %1581 = vst.msk [vmem:[#allocation3 + $0x228] sm:$0xff] %vm1304_vm4, %v1532_v31 }
 0x201   : > { %v4198_v37 = vld [vmem:[#allocation2 + $0x17a] sm:$0xff]  ;;  %v7447_v35 = vld [vmem:[%s9986_s3 + $0x28] sm:$0xff]  }
 0x202   : > { %1355 = vst.msk [vmem:[#allocation2 + $0x190] sm:$0xff] %vm1304_vm4, %v1256_v32  ;;  %v1257_v36 = vmax.f32 %v1019_v34, 0.0  ;;  %v2830_v41 = vld [vmem:[#allocation2 + $0x17d] sm:$0xff]  ;;  %7094 = vmatpush1.bf16.msra.mxu1 %v7446_v29  ;;  %4808 = vmatpush1.bf16.msra.mxu0 %v7446_v29 }
 0x203   : > { %v4199_v38 = vld [vmem:[#allocation2 + $0x182] sm:$0xff]  ;;  %7079 = vmatprep.subr.bf16.mxu1 %v7574_v54  ;;  %4809 = vmatprep.subr.bf16.mxu0 %v7574_v54 }
 0x204   : > { %v4276_v39 = vpack.c.bf16 %v4199_v38, %v4198_v37  ;;  %1356 = vst.msk [vmem:[#allocation2 + $0x198] sm:$0xff] %vm1304_vm4, %v1257_v36  ;;  %v2831_v42 = vld [vmem:[#allocation2 + $0x185] sm:$0xff] }
 0x205   : > { %v1023_v40 = vpop.f32.mrb[104].mxu0  ;;  %v2906_v45 = vpack.c.bf16 %v2831_v42, %v2830_v41  ;;  %v1459_v46 = vld [vmem:[#allocation2 + $0x180] sm:$0xff]  ;;  %v1460_v47 = vld [vmem:[#allocation2 + $0x188] sm:$0xff] }
 0x206   : > { %4325 = vst.msk [vmem:[#allocation3 + $0x1f0] sm:$0xff] %vm1304_vm4, %v4276_v39  ;;  %v1024_v43 = vadd.f32 %v8082_v33, %v1023_v40  ;;  %v6784_v44 = vpop.f32.mrb[105].mxu0  ;;  %v1533_v49 = vpack.c.bf16 %v1460_v47, %v1459_v46  ;;  %7095 = vmatpush1.bf16.msra.mxu1 %v7447_v35  ;;  %4810 = vmatpush1.bf16.msra.mxu0 %v7447_v35  ;;  %v7452_v35 = vld [vmem:[%s9986_s3 + $0x50] sm:$0xff]  }
 0x207   : > { %v1026_v48 = vpop.f32.mrb[106].mxu0  ;;  %2955 = vst.msk [vmem:[#allocation3 + $0x218] sm:$0xff] %vm1304_vm4, %v2906_v45  ;;  %7080 = vmatprep.subr.bf16.mxu1 %v7574_v54  ;;  %4811 = vmatprep.subr.bf16.mxu0 %v7574_v54 }
 0x208   : > { %v1258_v50 = vmax.f32 %v1024_v43, 0.0  ;;  %v1027_v51 = vadd.f32 %v8082_v33, %v1026_v48  ;;  %v6785_v52 = vpop.f32.mrb[107].mxu0  ;;  %1582 = vst.msk [vmem:[#allocation3 + $0x240] sm:$0xff] %vm1304_vm4, %v1533_v49  ;;  %v7448_v49 = vld [vmem:[%s9986_s3 + $0x30] sm:$0xff]  }
 0x209   : > { %v4200_v56 = vld [vmem:[#allocation2 + $0x18a] sm:$0xff] }
 0x20a   : > { %1357 = vst.msk [vmem:[#allocation2 + $0x1a0] sm:$0xff] %vm1304_vm4, %v1258_v50  ;;  %v1259_v55 = vmax.f32 %v1027_v51, 0.0  ;;  %v2832_v61 = vld [vmem:[#allocation2 + $0x18d] sm:$0xff]  ;;  %7096 = vmatpush1.bf16.msra.mxu1 %v7448_v49  ;;  %4812 = vmatpush1.bf16.msra.mxu0 %v7448_v49 }
 0x20b   : > { %v4201_v57 = vld [vmem:[#allocation2 + $0x192] sm:$0xff]  ;;  %7081 = vmatprep.subr.bf16.mxu1 %v7574_v54  ;;  %4813 = vmatprep.subr.bf16.mxu0 %v7574_v54 }
 0x20c   : > { %v4277_v58 = vpack.c.bf16 %v4201_v57, %v4200_v56  ;;  %1358 = vst.msk [vmem:[#allocation2 + $0x1a8] sm:$0xff] %vm1304_vm4, %v1259_v55  ;;  %v2833_v1 = vld [vmem:[#allocation2 + $0x195] sm:$0xff] }
 0x20d   : > { %v1031_v60 = vpop.f32.mrb[108].mxu0  ;;  %v1461_v2 = vld [vmem:[#allocation2 + $0x190] sm:$0xff]  ;;  %v1462_v3 = vld [vmem:[#allocation2 + $0x198] sm:$0xff]  ;;  %v2907_v5 = vpack.c.bf16 %v2833_v1, %v2832_v61 }
 0x20e   : > { %4326 = vst.msk [vmem:[#allocation3 + $0x208] sm:$0xff] %vm1304_vm4, %v4277_v58  ;;  %v1032_v62 = vadd.f32 %v8082_v33, %v1031_v60  ;;  %v6788_v63 = vpop.f32.mrb[109].mxu0  ;;  %v1534_v6 = vpack.c.bf16 %v1462_v3, %v1461_v2  ;;  %v7449_v58 = vld [vmem:[%s9986_s3 + $0x38] sm:$0xff]  }
 0x20f   : > { %v1034_v4 = vpop.f32.mrb[110].mxu0  ;;  %2956 = vst.msk [vmem:[#allocation3 + $0x230] sm:$0xff] %vm1304_vm4, %v2907_v5  ;;  %7097 = vmatpush1.bf16.msra.mxu1 %v7449_v58  ;;  %4814 = vmatpush1.bf16.msra.mxu0 %v7449_v58 }
 0x210   : > { %v1260_v7 = vmax.f32 %v1032_v62, 0.0  ;;  %v1035_v8 = vadd.f32 %v8082_v33, %v1034_v4  ;;  %v6789_v9 = vpop.f32.mrb[111].mxu0  ;;  %1583 = vst.msk [vmem:[#allocation3 + $0x258] sm:$0xff] %vm1304_vm4, %v1534_v6  ;;  %7082 = vmatprep.subr.bf16.mxu1 %v7574_v54  ;;  %4815 = vmatprep.subr.bf16.mxu0 %v7574_v54 }
 0x211   : > { %v4202_v12 = vld [vmem:[#allocation2 + $0x19a] sm:$0xff] }
 0x212   : > { %1359 = vst.msk [vmem:[#allocation2 + $0x1b0] sm:$0xff] %vm1304_vm4, %v1260_v7  ;;  %v1261_v11 = vmax.f32 %v1035_v8, 0.0  ;;  %v2834_v17 = vld [vmem:[#allocation2 + $0x19d] sm:$0xff] }
 0x213   : > { %v4203_v13 = vld [vmem:[#allocation2 + $0x1a2] sm:$0xff] }
 0x214   : > { %v4278_v14 = vpack.c.bf16 %v4203_v13, %v4202_v12  ;;  %1360 = vst.msk [vmem:[#allocation2 + $0x1b8] sm:$0xff] %vm1304_vm4, %v1261_v11  ;;  %v2835_v20 = vld [vmem:[#allocation2 + $0x1a5] sm:$0xff] }
 0x215   : > { %v1039_v16 = vpop.f32.mrb[112].mxu0  ;;  %v1463_v21 = vld [vmem:[#allocation2 + $0x1a0] sm:$0xff]  ;;  %v1464_v22 = vld [vmem:[#allocation2 + $0x1a8] sm:$0xff]  ;;  %v2908_v24 = vpack.c.bf16 %v2835_v20, %v2834_v17 }
 0x216   : > { %4327 = vst.msk [vmem:[#allocation3 + $0x220] sm:$0xff] %vm1304_vm4, %v4278_v14  ;;  %v1040_v18 = vadd.f32 %v8082_v33, %v1039_v16  ;;  %v6792_v19 = vpop.f32.mrb[113].mxu0  ;;  %v1535_v25 = vpack.c.bf16 %v1464_v22, %v1463_v21  ;;  %v7450_v12 = vld [vmem:[%s9986_s3 + $0x40] sm:$0xff]  }
 0x217   : > { %v1042_v23 = vpop.f32.mrb[114].mxu0  ;;  %2957 = vst.msk [vmem:[#allocation3 + $0x248] sm:$0xff] %vm1304_vm4, %v2908_v24  ;;  %7098 = vmatpush1.bf16.msra.mxu1 %v7450_v12  ;;  %v7451_v19 = vld [vmem:[%s9986_s3 + $0x48] sm:$0xff]   ;;  %4816 = vmatpush1.bf16.msra.mxu0 %v7450_v12 }
 0x218   : > { %v1262_v26 = vmax.f32 %v1040_v18, 0.0  ;;  %v1043_v27 = vadd.f32 %v8082_v33, %v1042_v23  ;;  %v6793_v28 = vpop.f32.mrb[115].mxu0  ;;  %1584 = vst.msk [vmem:[#allocation3 + $0x270] sm:$0xff] %vm1304_vm4, %v1535_v25  ;;  %7083 = vmatprep.subr.bf16.mxu1 %v7574_v54  ;;  %4817 = vmatprep.subr.bf16.mxu0 %v7574_v54  ;;  %v7455_v12 = vld [vmem:[%s9986_s3 + $0x68] sm:$0xff]  }
 0x219   : > { %v4204_v31 = vld [vmem:[#allocation2 + $0x1aa] sm:$0xff] }
 0x21a   : > { %1361 = vst.msk [vmem:[#allocation2 + $0x1c0] sm:$0xff] %vm1304_vm4, %v1262_v26  ;;  %v1263_v30 = vmax.f32 %v1043_v27, 0.0  ;;  %v2836_v37 = vld [vmem:[#allocation2 + $0x1ad] sm:$0xff] }
 0x21b   : > { %v4205_v32 = vld [vmem:[#allocation2 + $0x1b2] sm:$0xff]  ;;  %7099 = vmatpush1.bf16.msra.mxu1 %v7451_v19  ;;  %4818 = vmatpush1.bf16.msra.mxu0 %v7451_v19 }
 0x21c   : > { %v4279_v34 = vpack.c.bf16 %v4205_v32, %v4204_v31  ;;  %1362 = vst.msk [vmem:[#allocation2 + $0x1c8] sm:$0xff] %vm1304_vm4, %v1263_v30  ;;  %v2837_v40 = vld [vmem:[#allocation2 + $0x1b5] sm:$0xff]  ;;  %7084 = vmatprep.subr.bf16.mxu1 %v7574_v54  ;;  %4819 = vmatprep.subr.bf16.mxu0 %v7574_v54 }
 0x21d   : > { %v1047_v36 = vpop.f32.mrb[116].mxu0  ;;  %v1465_v41 = vld [vmem:[#allocation2 + $0x1b0] sm:$0xff]  ;;  %v1466_v42 = vld [vmem:[#allocation2 + $0x1b8] sm:$0xff]  ;;  %v2909_v44 = vpack.c.bf16 %v2837_v40, %v2836_v37 }
 0x21e   : > { %4328 = vst.msk [vmem:[#allocation3 + $0x238] sm:$0xff] %vm1304_vm4, %v4279_v34  ;;  %v1048_v38 = vadd.f32 %v8082_v33, %v1047_v36  ;;  %v6796_v39 = vpop.f32.mrb[117].mxu0  ;;  %v1536_v45 = vpack.c.bf16 %v1466_v42, %v1465_v41 }
 0x21f   : > { %v1050_v43 = vpop.f32.mrb[118].mxu0  ;;  %2958 = vst.msk [vmem:[#allocation3 + $0x260] sm:$0xff] %vm1304_vm4, %v2909_v44  ;;  %7100 = vmatpush1.bf16.msra.mxu1 %v7452_v35  ;;  %4820 = vmatpush1.bf16.msra.mxu0 %v7452_v35 }
 0x220   : > { %v1264_v46 = vmax.f32 %v1048_v38, 0.0  ;;  %v1051_v47 = vadd.f32 %v8082_v33, %v1050_v43  ;;  %v6797_v48 = vpop.f32.mrb[119].mxu0  ;;  %1585 = vst.msk [vmem:[#allocation3 + $0x288] sm:$0xff] %vm1304_vm4, %v1536_v45  ;;  %7085 = vmatprep.subr.bf16.mxu1 %v7574_v54  ;;  %4821 = vmatprep.subr.bf16.mxu0 %v7574_v54 }
 0x221   : > { %v4206_v50 = vld [vmem:[#allocation2 + $0x1ba] sm:$0xff] }
 0x222   : > { %1363 = vst.msk [vmem:[#allocation2 + $0x1d0] sm:$0xff] %vm1304_vm4, %v1264_v46  ;;  %v1265_v51 = vmax.f32 %v1051_v47, 0.0  ;;  %v1467_v53 = vld [vmem:[#allocation2 + $0x1c0] sm:$0xff]  ;;  %v7453_v47 = vld [vmem:[%s9986_s3 + $0x58] sm:$0xff]  }
 0x223   : > { %v4207_v52 = vld [vmem:[#allocation2 + $0x1c2] sm:$0xff]  ;;  %7101 = vmatpush1.bf16.msra.mxu1 %v7453_v47  ;;  %4822 = vmatpush1.bf16.msra.mxu0 %v7453_v47  ;;  %v7457_v47 = vld [vmem:[%s9986_s3 + $0x78] sm:$0xff]  }
 0x224   : > { %v1468_v55 = vld [vmem:[#allocation2 + $0x1c8] sm:$0xff]  ;;  %v4280_v56 = vpack.c.bf16 %v4207_v52, %v4206_v50  ;;  %1364 = vst.msk [vmem:[#allocation2 + $0x1d8] sm:$0xff] %vm1304_vm4, %v1265_v51  ;;  %v2838_v62 = vld [vmem:[#allocation2 + $0x1bd] sm:$0xff]  ;;  %7086 = vmatprep.subr.bf16.mxu1 %v7574_v54  ;;  %4823 = vmatprep.subr.bf16.mxu0 %v7574_v54 }
 0x225   : > { %v1537_v57 = vpack.c.bf16 %v1468_v55, %v1467_v53  ;;  %v1055_v59 = vpop.f32.mrb[120].mxu0  ;;  %v2839_v63 = vld [vmem:[#allocation2 + $0x1c5] sm:$0xff] }
 0x226   : > { %4329 = vst.msk [vmem:[#allocation3 + $0x250] sm:$0xff] %vm1304_vm4, %v4280_v56  ;;  %v1056_v60 = vadd.f32 %v8082_v33, %v1055_v59  ;;  %v6800_v61 = vpop.f32.mrb[121].mxu0  ;;  %v2910_v2 = vpack.c.bf16 %v2839_v63, %v2838_v62  ;;  %v1663_v7 = vld [vmem:[#allocation2 + $0x1c1] sm:$0xff] }
 0x227   : > { %1586 = vst.msk [vmem:[#allocation3 + $0x2a0] sm:$0xff] %vm1304_vm4, %v1537_v57  ;;  %v1058_v1 = vpop.f32.mrb[122].mxu0  ;;  %v7454_v59 = vld [vmem:[%s9986_s3 + $0x60] sm:$0xff]  }
 0x228   : > { %v1266_v3 = vmax.f32 %v1056_v60, 0.0  ;;  %v1059_v4 = vadd.f32 %v8082_v33, %v1058_v1  ;;  %v6801_v5 = vpop.f32.mrb[123].mxu0  ;;  %2959 = vst.msk [vmem:[#allocation3 + $0x278] sm:$0xff] %vm1304_vm4, %v2910_v2  ;;  %7102 = vmatpush1.bf16.msra.mxu1 %v7454_v59  ;;  %4824 = vmatpush1.bf16.msra.mxu0 %v7454_v59 }
 0x229   : > { %v4208_v6 = vld [vmem:[#allocation2 + $0x1ca] sm:$0xff]  ;;  %7087 = vmatprep.subr.bf16.mxu1 %v7574_v54  ;;  %4825 = vmatprep.subr.bf16.mxu0 %v7574_v54 }
 0x22a   : > { %v1664_v8 = vld [vmem:[#allocation2 + $0x1c9] sm:$0xff]  ;;  %1365 = vst.msk [vmem:[#allocation2 + $0x1e0] sm:$0xff] %vm1304_vm4, %v1266_v3  ;;  %v1267_v9 = vmax.f32 %v1059_v4, 0.0  ;;  %v2126_v10 = vpack.c.bf16 %v4208_v6, %v4207_v52 }
 0x22b   : > { %v1733_v11 = vpack.c.bf16 %v1664_v8, %v1663_v7  ;;  %v8190_v13 = vld [vmem:[#allocation2 + $0x1d2] sm:$0xff] }
 0x22c   : > { %v1469_v14 = vld [vmem:[#allocation2 + $0x1d0] sm:$0xff]  ;;  %v1470_v15 = vld [vmem:[#allocation2 + $0x1d8] sm:$0xff]  ;;  %v4281_v16 = vpack.c.bf16 %v8190_v13, %v4208_v6  ;;  %1366 = vst.msk [vmem:[#allocation2 + $0x1e8] sm:$0xff] %vm1304_vm4, %v1267_v9  ;;  %2252 = vrot.lane.b32.xlu1 %v2126_v10, %s7572_s26  ;;  %7103 = vmatpush1.bf16.msra.mxu1 %v7455_v12 }
 0x22d   : > { %1859 = vrot.lane.b32.xlu0 %v1733_v11, %s7575_s27  ;;  %v1538_v17 = vpack.c.bf16 %v1470_v15, %v1469_v14  ;;  %v1063_v18 = vpop.f32.mrb[124].mxu0  ;;  %v2840_v23 = vld [vmem:[#allocation2 + $0x1cd] sm:$0xff]  ;;  %v2841_v24 = vld [vmem:[#allocation2 + $0x1d5] sm:$0xff]  ;;  %4826 = vmatpush1.bf16.msra.mxu0 %v7455_v12 }
 0x22e   : > { %4330 = vst.msk [vmem:[#allocation3 + $0x268] sm:$0xff] %vm1304_vm4, %v4281_v16  ;;  %v1064_v20 = vadd.f32 %v8082_v33, %v1063_v18  ;;  %v6804_v21 = vpop.f32.mrb[125].mxu0  ;;  %v2911_v28 = vpack.c.bf16 %v2841_v24, %v2840_v23  ;;  %v1665_v29 = vld [vmem:[#allocation2 + $0x1d1] sm:$0xff]  ;;  %7088 = vmatprep.subr.bf16.mxu1 %v7574_v54  ;;  %4827 = vmatprep.subr.bf16.mxu0 %v7574_v54 }
 0x22f   : > { %1587 = vst.msk [vmem:[#allocation3 + $0x2b8] sm:$0xff] %vm1304_vm4, %v1538_v17  ;;  %v1066_v22 = vpop.f32.mrb[126].mxu0 }
 0x230   : > { %v1268_v25 = vmax.f32 %v1064_v20, 0.0  ;;  %v1067_v26 = vadd.f32 %v8082_v33, %v1066_v22  ;;  %v6805_v27 = vpop.f32.mrb[127].mxu0  ;;  %2960 = vst.msk [vmem:[#allocation3 + $0x290] sm:$0xff] %vm1304_vm4, %v2911_v28 }
 0x231   : > { %v1666_v30 = vld [vmem:[#allocation2 + $0x1d9] sm:$0xff] }
 0x232   : > { %v4210_v31 = vld [vmem:[#allocation2 + $0x1da] sm:$0xff]  ;;  %1367 = vst.msk [vmem:[#allocation2 + $0x1f0] sm:$0xff] %vm1304_vm4, %v1268_v25  ;;  %v1269_v32 = vmax.f32 %v1067_v26, 0.0  ;;  %v1734_v34 = vpack.c.bf16 %v1666_v30, %v1665_v29 }
 0x233   : > { %v8212_v36 = vld [vmem:[#allocation2 + $0x1e2] sm:$0xff]  ;;  %v2127_v50 = vpack.c.bf16 %v4210_v31, %v8190_v13 }
 0x234   : > { %v3038_v37 = vld [vmem:[#allocation2 + $0x1de] sm:$0xff]  ;;  %v3039_v38 = vld [vmem:[#allocation2 + $0x1e6] sm:$0xff]  ;;  %v4282_v39 = vpack.c.bf16 %v8212_v36, %v4210_v31  ;;  %1368 = vst.msk [vmem:[#allocation2 + $0x1f8] sm:$0xff] %vm1304_vm4, %v1269_v32  ;;  %1861 = vrot.lane.b32.xlu1 %v1734_v34, %s7575_s27 }
 0x235   : > { %v3108_v40 = vpack.c.bf16 %v3039_v38, %v3038_v37  ;;  %v2842_v41 = vld [vmem:[#allocation2 + $0x1dd] sm:$0xff]  ;;  %v2843_v42 = vld [vmem:[#allocation2 + $0x1e5] sm:$0xff]  ;;  %v1071_v43 = vpop.f32.mrb[128].mxu0  ;;  %v7456_v38 = vld [vmem:[%s9986_s3 + $0x70] sm:$0xff]  }
 0x236   : > { %v2912_v44 = vpack.c.bf16 %v2843_v42, %v2842_v41  ;;  %v1471_v45 = vld [vmem:[#allocation2 + $0x1e0] sm:$0xff]  ;;  %v1472_v46 = vld [vmem:[#allocation2 + $0x1e8] sm:$0xff]  ;;  %4331 = vst.msk [vmem:[#allocation3 + $0x280] sm:$0xff] %vm1304_vm4, %v4282_v39  ;;  %v1072_v48 = vadd.f32 %v8082_v33, %v1071_v43  ;;  %v6808_v49 = vpop.f32.mrb[129].mxu0  ;;  %7104 = vmatpush1.bf16.msra.mxu1 %v7456_v38  ;;  %4828 = vmatpush1.bf16.msra.mxu0 %v7456_v38 }
 0x237   : > { %3234 = vrot.lane.b32.xlu0 %v3108_v40, %s7575_s27  ;;  %v1539_v51 = vpack.c.bf16 %v1472_v46, %v1471_v45  ;;  %v1074_v52 = vpop.f32.mrb[130].mxu0  ;;  %v2450_v53 = vld [vmem:[#allocation2 + $0x1e4] sm:$0xff]  ;;  %v2449_v58 = vld [vmem:[#allocation2 + $0x1dc] sm:$0xff]  ;;  %7089 = vmatprep.subr.bf16.mxu1 %v7574_v54 }
 0x238   : > { %2961 = vst.msk [vmem:[#allocation3 + $0x2a8] sm:$0xff] %vm1304_vm4, %v2912_v44  ;;  %v1270_v55 = vmax.f32 %v1072_v48, 0.0  ;;  %v1075_v56 = vadd.f32 %v8082_v33, %v1074_v52  ;;  %2254 = vrot.lane.b32.xlu1 %v2127_v50, %s7572_s26  ;;  %v6809_v57 = vpop.f32.mrb[131].mxu0  ;;  %v2519_v62 = vpack.c.bf16 %v2450_v53, %v2449_v58  ;;  %v1667_v10 = vld [vmem:[#allocation2 + $0x1e1] sm:$0xff]  ;;  %4829 = vmatprep.subr.bf16.mxu0 %v7574_v54 }
 0x239   : > { %1588 = vst.msk [vmem:[#allocation3 + $0x2d0] sm:$0xff] %vm1304_vm4, %v1539_v51  ;;  %v4212_v60 = vld [vmem:[#allocation2 + $0x1ea] sm:$0xff] }
 0x23a   : > { %1369 = vst.msk [vmem:[#allocation2 + $0x200] sm:$0xff] %vm1304_vm4, %v1270_v55  ;;  %v1271_v61 = vmax.f32 %v1075_v56, 0.0  ;;  %v3040_v63 = vld [vmem:[#allocation2 + $0x1ee] sm:$0xff]  ;;  %v2128_v24 = vpack.c.bf16 %v4212_v60, %v8212_v36  ;;  %7105 = vmatpush1.bf16.msra.mxu1 %v7457_v47  ;;  %4830 = vmatpush1.bf16.msra.mxu0 %v7457_v47 }
 0x23b   : > { %v1668_v1 = vld [vmem:[#allocation2 + $0x1e9] sm:$0xff]  ;;  %v8236_v2 = vld [vmem:[#allocation2 + $0x1f2] sm:$0xff]  ;;  %6874 = vmatprep.subr.bf16.mxu1 %v7569_v0 }
 0x23c   : > { %v3041_v3 = vld [vmem:[#allocation2 + $0x1f6] sm:$0xff]  ;;  %v4283_v5 = vpack.c.bf16 %v8236_v2, %v4212_v60  ;;  %1370 = vst.msk [vmem:[#allocation2 + $0x208] sm:$0xff] %vm1304_vm4, %v1271_v61  ;;  %2645 = vrot.lane.b32.xlu1 %v2519_v62, %s7573_s28  ;;  %v2844_v7 = vld [vmem:[#allocation2 + $0x1ed] sm:$0xff]  ;;  %v1735_v16 = vpack.c.bf16 %v1668_v1, %v1667_v10 }
 0x23d   : > { %v1473_v4 = vld [vmem:[#allocation2 + $0x1f0] sm:$0xff]  ;;  %v3109_v6 = vpack.c.bf16 %v3041_v3, %v3040_v63  ;;  %v1079_v9 = vpop.f32.mrb[132].mxu0  ;;  %v1474_v13 = vld [vmem:[#allocation2 + $0x1f8] sm:$0xff] }
 0x23e   : > { %v2845_v8 = vld [vmem:[#allocation2 + $0x1f5] sm:$0xff]  ;;  %4332 = vst.msk [vmem:[#allocation3 + $0x298] sm:$0xff] %vm1304_vm4, %v4283_v5  ;;  %v1080_v14 = vadd.f32 %v8082_v33, %v1079_v9  ;;  %v6812_v15 = vpop.f32.mrb[133].mxu0  ;;  %v1540_v17 = vpack.c.bf16 %v1474_v13, %v1473_v4  ;;  %v2451_v31 = vld [vmem:[#allocation2 + $0x1ec] sm:$0xff] }
 0x23f   : > { %v2913_v11 = vpack.c.bf16 %v2845_v8, %v2844_v7  ;;  %3236 = vrot.lane.b32.xlu0 %v3109_v6, %s7575_s27  ;;  %v1082_v18 = vpop.f32.mrb[134].mxu0  ;;  %v2452_v25 = vld [vmem:[#allocation2 + $0x1f4] sm:$0xff] }
 0x240   : > { %v1272_v19 = vmax.f32 %v1080_v14, 0.0  ;;  %v1083_v20 = vadd.f32 %v8082_v33, %v1082_v18  ;;  %1863 = vrot.lane.b32.xlu1 %v1735_v16, %s7575_s27  ;;  %v6813_v21 = vpop.f32.mrb[135].mxu0  ;;  %1589 = vst.msk [vmem:[#allocation3 + $0x2e8] sm:$0xff] %vm1304_vm4, %v1540_v17  ;;  %v2520_v42 = vpack.c.bf16 %v2452_v25, %v2451_v31  ;;  %v3430_v53 = vld [vmem:[#allocation2 + $0x1f8] sm:$0xff] }
 0x241   : > { %2962 = vst.msk [vmem:[#allocation3 + $0x2c0] sm:$0xff] %vm1304_vm4, %v2913_v11  ;;  %v8253_v22 = vld [vmem:[#allocation2 + $0x1fa] sm:$0xff]  ;;  %v1669_v62 = vld [vmem:[#allocation2 + $0x1f1] sm:$0xff] }
 0x242   : > { %1371 = vst.msk [vmem:[#allocation2 + $0x210] sm:$0xff] %vm1304_vm4, %v1272_v19  ;;  %v1273_v23 = vmax.f32 %v1083_v20, 0.0  ;;  %v8261_v27 = vld [vmem:[#allocation2 + $0x1f9] sm:$0xff]  ;;  %v2129_v20 = vpack.c.bf16 %v8253_v22, %v8236_v2 }
 0x243   : > { %v8259_v26 = vld [vmem:[#allocation2 + $0x202] sm:$0xff]  ;;  %v1736_v10 = vpack.c.bf16 %v8261_v27, %v1669_v62 }
 0x244   : > { %v8263_v28 = vld [vmem:[#allocation2 + $0x201] sm:$0xff]  ;;  %v4284_v29 = vpack.c.bf16 %v8259_v26, %v8253_v22  ;;  %1372 = vst.msk [vmem:[#allocation2 + $0x218] sm:$0xff] %vm1304_vm4, %v1273_v23  ;;  %2256 = vrot.lane.b32.xlu1 %v2128_v24, %s7572_s26 }
 0x245   : > { %v3892_v30 = vpack.c.bf16 %v8263_v28, %v8261_v27  ;;  %v2846_v32 = vld [vmem:[#allocation2 + $0x1fd] sm:$0xff]  ;;  %v2847_v34 = vld [vmem:[#allocation2 + $0x205] sm:$0xff]  ;;  %v1087_v35 = vpop.f32.mrb[136].mxu0 }
 0x246   : > { %v3043_v36 = vld [vmem:[#allocation2 + $0x206] sm:$0xff]  ;;  %v2914_v37 = vpack.c.bf16 %v2847_v34, %v2846_v32  ;;  %4333 = vst.msk [vmem:[#allocation3 + $0x2b0] sm:$0xff] %vm1304_vm4, %v4284_v29  ;;  %v1088_v40 = vadd.f32 %v8082_v33, %v1087_v35  ;;  %v6816_v41 = vpop.f32.mrb[137].mxu0  ;;  %v3042_v45 = vld [vmem:[#allocation2 + $0x1fe] sm:$0xff] }
 0x247   : > { %v1475_v39 = vld [vmem:[#allocation2 + $0x200] sm:$0xff]  ;;  %4018 = vrot.lane.b32.xlu0 %v3892_v30, %s7573_s28  ;;  %v1476_v43 = vld [vmem:[#allocation2 + $0x208] sm:$0xff]  ;;  %v1090_v44 = vpop.f32.mrb[138].mxu0  ;;  %v3110_v51 = vpack.c.bf16 %v3043_v36, %v3042_v45 }
 0x248   : > { %v3431_v46 = vld [vmem:[#allocation2 + $0x200] sm:$0xff]  ;;  %2963 = vst.msk [vmem:[#allocation3 + $0x2d8] sm:$0xff] %vm1304_vm4, %v2914_v37  ;;  %v1541_v48 = vpack.c.bf16 %v1476_v43, %v1475_v39  ;;  %v1274_v49 = vmax.f32 %v1088_v40, 0.0  ;;  %v1091_v50 = vadd.f32 %v8082_v33, %v1090_v44  ;;  %2647 = vrot.lane.b32.xlu1 %v2520_v42, %s7573_s28  ;;  %v6817_v52 = vpop.f32.mrb[139].mxu0  ;;  %v3432_v60 = vld [vmem:[#allocation2 + $0x208] sm:$0xff] }
 0x249   : > { %v3433_v55 = vld [vmem:[#allocation2 + $0x210] sm:$0xff]  ;;  %v3500_v57 = vpack.c.bf16 %v3431_v46, %v3430_v53  ;;  %v2454_v21 = vld [vmem:[#allocation2 + $0x204] sm:$0xff]  ;;  %v2453_v30 = vld [vmem:[#allocation2 + $0x1fc] sm:$0xff] }
 0x24a   : > { %1590 = vst.msk [vmem:[#allocation3 + $0x300] sm:$0xff] %vm1304_vm4, %v1541_v48  ;;  %1373 = vst.msk [vmem:[#allocation2 + $0x220] sm:$0xff] %vm1304_vm4, %v1274_v49  ;;  %v1275_v56 = vmax.f32 %v1091_v50, 0.0  ;;  %v8288_v58 = vld [vmem:[#allocation2 + $0x20a] sm:$0xff]  ;;  %v3501_v54 = vpack.c.bf16 %v3433_v55, %v3432_v60  ;;  %v2521_v39 = vpack.c.bf16 %v2454_v21, %v2453_v30 }
 0x24b   : > { %3238 = vrot.lane.b32.xlu0 %v3110_v51, %s7575_s27  ;;  %v8290_v59 = vld [vmem:[#allocation2 + $0x212] sm:$0xff]  ;;  %v3824_v13 = vld [vmem:[#allocation2 + $0x209] sm:$0xff] }
 0x24c   : > { %v4285_v61 = vpack.c.bf16 %v8290_v59, %v8288_v58  ;;  %1374 = vst.msk [vmem:[#allocation2 + $0x228] sm:$0xff] %vm1304_vm4, %v1275_v56  ;;  %3626 = vrot.lane.b32.xlu1 %v3500_v57, %s7572_s26  ;;  %v2848_v63 = vld [vmem:[#allocation2 + $0x20d] sm:$0xff]  ;;  %v2849_v1 = vld [vmem:[#allocation2 + $0x215] sm:$0xff]  ;;  %v1737_v49 = vpack.c.bf16 %v3824_v13, %v8263_v28 }
 0x24d   : > { %v1095_v3 = vpop.f32.mrb[140].mxu0  ;;  %v8297_v4 = vld [vmem:[#allocation2 + $0x211] sm:$0xff]  ;;  %v2915_v5 = vpack.c.bf16 %v2849_v1, %v2848_v63  ;;  %v2130_v63 = vpack.c.bf16 %v8288_v58, %v8259_v26 }
 0x24e   : > { %v1477_v6 = vld [vmem:[#allocation2 + $0x210] sm:$0xff]  ;;  %v1478_v7 = vld [vmem:[#allocation2 + $0x218] sm:$0xff]  ;;  %4334 = vst.msk [vmem:[#allocation3 + $0x2c8] sm:$0xff] %vm1304_vm4, %v4285_v61  ;;  %v1096_v8 = vadd.f32 %v8082_v33, %v1095_v3  ;;  %v6820_v9 = vpop.f32.mrb[141].mxu0  ;;  %v3893_v16 = vpack.c.bf16 %v8297_v4, %v3824_v13 }
 0x24f   : > { %3628 = vrot.lane.b32.xlu0 %v3501_v54, %s7572_s26  ;;  %v1542_v11 = vpack.c.bf16 %v1478_v7, %v1477_v6  ;;  %v1098_v12 = vpop.f32.mrb[142].mxu0  ;;  %2964 = vst.msk [vmem:[#allocation3 + $0x2f0] sm:$0xff] %vm1304_vm4, %v2915_v5  ;;  %v3045_v18 = vld [vmem:[#allocation2 + $0x216] sm:$0xff]  ;;  %v3044_v25 = vld [vmem:[#allocation2 + $0x20e] sm:$0xff] }
 0x250   : > { %v1276_v14 = vmax.f32 %v1096_v8, 0.0  ;;  %v1099_v15 = vadd.f32 %v8082_v33, %v1098_v12  ;;  %1865 = vrot.lane.b32.xlu1 %v1736_v10, %s7575_s27  ;;  %v6821_v17 = vpop.f32.mrb[143].mxu0  ;;  %v3111_v29 = vpack.c.bf16 %v3045_v18, %v3044_v25  ;;  %v3434_v42 = vld [vmem:[#allocation2 + $0x218] sm:$0xff] }
 0x251   : > { %1591 = vst.msk [vmem:[#allocation3 + $0x318] sm:$0xff] %vm1304_vm4, %v1542_v11  ;;  %v8312_v23 = vld [vmem:[#allocation2 + $0x21a] sm:$0xff]  ;;  %v2455_v11 = vld [vmem:[#allocation2 + $0x20c] sm:$0xff] }
 0x252   : > { %1375 = vst.msk [vmem:[#allocation2 + $0x230] sm:$0xff] %vm1304_vm4, %v1276_v14  ;;  %v1277_v19 = vmax.f32 %v1099_v15, 0.0  ;;  %v2850_v31 = vld [vmem:[#allocation2 + $0x21d] sm:$0xff]  ;;  %v2456_v7 = vld [vmem:[#allocation2 + $0x214] sm:$0xff] }
 0x253   : > { %4020 = vrot.lane.b32.xlu0 %v3893_v16, %s7573_s28  ;;  %v8314_v24 = vld [vmem:[#allocation2 + $0x222] sm:$0xff]  ;;  %v3826_v52 = vld [vmem:[#allocation2 + $0x219] sm:$0xff]  ;;  %v2522_v15 = vpack.c.bf16 %v2456_v7, %v2455_v11 }
 0x254   : > { %v4286_v27 = vpack.c.bf16 %v8314_v24, %v8312_v23  ;;  %1376 = vst.msk [vmem:[#allocation2 + $0x238] sm:$0xff] %vm1304_vm4, %v1277_v19  ;;  %2258 = vrot.lane.b32.xlu1 %v2129_v20, %s7572_s26  ;;  %v2851_v32 = vld [vmem:[#allocation2 + $0x225] sm:$0xff] }
 0x255   : > { %v1103_v34 = vpop.f32.mrb[144].mxu0  ;;  %v3435_v35 = vld [vmem:[#allocation2 + $0x220] sm:$0xff]  ;;  %v2916_v2 = vpack.c.bf16 %v2851_v32, %v2850_v31  ;;  %v1480_v36 = vld [vmem:[#allocation2 + $0x228] sm:$0xff]  ;;  %v1738_v31 = vpack.c.bf16 %v3826_v52, %v8297_v4 }
 0x256   : > { %v1479_v22 = vld [vmem:[#allocation2 + $0x220] sm:$0xff]  ;;  %4335 = vst.msk [vmem:[#allocation3 + $0x2e0] sm:$0xff] %vm1304_vm4, %v4286_v27  ;;  %v1104_v37 = vadd.f32 %v8082_v33, %v1103_v34  ;;  %v6824_v38 = vpop.f32.mrb[145].mxu0  ;;  %v3502_v45 = vpack.c.bf16 %v3435_v35, %v3434_v42  ;;  %v3436_v58 = vld [vmem:[#allocation2 + $0x228] sm:$0xff]  ;;  %v2131_v42 = vpack.c.bf16 %v8312_v23, %v8290_v59 }
 0x257   : > { %3240 = vrot.lane.b32.xlu0 %v3111_v29, %s7575_s27  ;;  %v1543_v40 = vpack.c.bf16 %v1480_v36, %v1479_v22  ;;  %v1106_v41 = vpop.f32.mrb[146].mxu0  ;;  %2965 = vst.msk [vmem:[#allocation3 + $0x308] sm:$0xff] %vm1304_vm4, %v2916_v2  ;;  %v8327_v47 = vld [vmem:[#allocation2 + $0x221] sm:$0xff]  ;;  %v8365_v32 = vld [vmem:[#allocation7] ss:$0 sm:$0xff] }
 0x258   : > { %v1278_v43 = vmax.f32 %v1104_v37, 0.0  ;;  %2649 = vrot.lane.b32.xlu1 %v2521_v39, %s7573_s28  ;;  %v1107_v44 = vadd.f32 %v8082_v33, %v1106_v41  ;;  %v6825_v46 = vpop.f32.mrb[147].mxu0  ;;  %v3894_v55 = vpack.c.bf16 %v8327_v47, %v3826_v52  ;;  %v3047_v60 = vld [vmem:[#allocation2 + $0x226] sm:$0xff]  ;;  %v3046_v6 = vld [vmem:[#allocation2 + $0x21e] sm:$0xff] }
 0x259   : > { %1592 = vst.msk [vmem:[#allocation3 + $0x330] sm:$0xff] %vm1304_vm4, %v1543_v40  ;;  %v8332_v50 = vld [vmem:[#allocation2 + $0x22a] sm:$0xff]  ;;  %v3112_v9 = vpack.c.bf16 %v3047_v60, %v3046_v6  ;;  %v2457_v46 = vld [vmem:[#allocation2 + $0x21c] sm:$0xff] }
 0x25a   : > { %1377 = vst.msk [vmem:[#allocation2 + $0x240] sm:$0xff] %vm1304_vm4, %v1278_v43  ;;  %v1279_v48 = vmax.f32 %v1107_v44, 0.0  ;;  %v2852_v56 = vld [vmem:[#allocation2 + $0x22d] sm:$0xff] }
 0x25b   : > { %3630 = vrot.lane.b32.xlu0 %v3502_v45, %s7572_s26  ;;  %v8334_v51 = vld [vmem:[#allocation2 + $0x232] sm:$0xff]  ;;  %v3828_v22 = vld [vmem:[#allocation2 + $0x229] sm:$0xff] }
 0x25c   : > { %v4287_v53 = vpack.c.bf16 %v8334_v51, %v8332_v50  ;;  %1378 = vst.msk [vmem:[#allocation2 + $0x248] sm:$0xff] %vm1304_vm4, %v1279_v48  ;;  %1867 = vrot.lane.b32.xlu1 %v1737_v49, %s7575_s27  ;;  %v2853_v57 = vld [vmem:[#allocation2 + $0x235] sm:$0xff]  ;;  %v2458_v48 = vld [vmem:[#allocation2 + $0x224] sm:$0xff]  ;;  %v1739_v11 = vpack.c.bf16 %v3828_v22, %v8327_v47 }
 0x25d   : > { %v1111_v61 = vpop.f32.mrb[148].mxu0  ;;  %v2917_v54 = vpack.c.bf16 %v2853_v57, %v2852_v56  ;;  %v1481_v28 = vld [vmem:[#allocation2 + $0x230] sm:$0xff]  ;;  %v1482_v62 = vld [vmem:[#allocation2 + $0x238] sm:$0xff] }
 0x25e   : > { %4336 = vst.msk [vmem:[#allocation3 + $0x2f8] sm:$0xff] %vm1304_vm4, %v4287_v53  ;;  %v1112_v1 = vadd.f32 %v8082_v33, %v1111_v61  ;;  %v6828_v3 = vpop.f32.mrb[149].mxu0  ;;  %v1544_v5 = vpack.c.bf16 %v1482_v62, %v1481_v28  ;;  %v3437_v14 = vld [vmem:[#allocation2 + $0x230] sm:$0xff]  ;;  %v3438_v53 = vld [vmem:[#allocation2 + $0x238] sm:$0xff]  ;;  %v2523_v61 = vpack.c.bf16 %v2458_v48, %v2457_v46 }
 0x25f   : > { %4022 = vrot.lane.b32.xlu0 %v3894_v55, %s7573_s28  ;;  %v1114_v8 = vpop.f32.mrb[150].mxu0  ;;  %2966 = vst.msk [vmem:[#allocation3 + $0x320] sm:$0xff] %vm1304_vm4, %v2917_v54  ;;  %v8360_v21 = vld [vmem:[#allocation2 + $0x231] sm:$0xff] }
 0x260   : > { %2260 = vrot.lane.b32.xlu1 %v2130_v63, %s7572_s26  ;;  %v1280_v10 = vmax.f32 %v1112_v1, 0.0  ;;  %v1115_v12 = vadd.f32 %v8082_v33, %v1114_v8  ;;  %v6829_v13 = vpop.f32.mrb[151].mxu0  ;;  %1593 = vst.msk [vmem:[#allocation3 + $0x348] sm:$0xff] %vm1304_vm4, %v1544_v5  ;;  %v3503_v33 = vpack.c.bf16 %v3437_v14, %v3436_v58  ;;  %v3895_v37 = vpack.c.bf16 %v8360_v21, %v3828_v22  ;;  %v3049_v41 = vld [vmem:[#allocation2 + $0x236] sm:$0xff]  ;;  %v3048_v45 = vld [vmem:[#allocation2 + $0x22e] sm:$0xff] }
 0x261   : > { %v8350_v26 = vld [vmem:[#allocation2 + $0x23a] sm:$0xff]  ;;  %v3113_v52 = vpack.c.bf16 %v3049_v41, %v3048_v45  ;;  %v2459_v22 = vld [vmem:[#allocation2 + $0x22c] sm:$0xff] }
 0x262   : > { %1379 = vst.msk [vmem:[#allocation2 + $0x250] sm:$0xff] %vm1304_vm4, %v1280_v10  ;;  %v1281_v16 = vmax.f32 %v1115_v12, 0.0  ;;  %v2854_v17 = vld [vmem:[#allocation2 + $0x23d] sm:$0xff] }
 0x263   : > { %3242 = vrot.lane.b32.xlu0 %v3112_v9, %s7575_s27  ;;  %v8354_v18 = vld [vmem:[#allocation2 + $0x242] sm:$0xff]  ;;  %v8394_v9 = vld [vmem:[#allocation2 + $0x239] sm:$0xff] }
 0x264   : > { %v4288_v19 = vpack.c.bf16 %v8354_v18, %v8350_v26  ;;  %2651 = vrot.lane.b32.xlu1 %v2522_v15, %s7573_s28  ;;  %1380 = vst.msk [vmem:[#allocation2 + $0x258] sm:$0xff] %vm1304_vm4, %v1281_v16  ;;  %v2855_v20 = vld [vmem:[#allocation2 + $0x245] sm:$0xff] }
 0x265   : > { %v1119_v25 = vpop.f32.mrb[152].mxu0  ;;  %v2918_v27 = vpack.c.bf16 %v2855_v20, %v2854_v17  ;;  %v1483_v29 = vld [vmem:[#allocation2 + $0x240] sm:$0xff]  ;;  %v1484_v30 = vld [vmem:[#allocation2 + $0x248] sm:$0xff] }
 0x266   : > { %4337 = vst.msk [vmem:[#allocation3 + $0x310] sm:$0xff] %vm1304_vm4, %v4288_v19  ;;  %v1120_v34 = vadd.f32 %v8365_v32, %v1119_v25  ;;  %v6832_v35 = vpop.f32.mrb[153].mxu0  ;;  %v1545_v2 = vpack.c.bf16 %v1484_v30, %v1483_v29  ;;  %v3439_v55 = vld [vmem:[#allocation2 + $0x240] sm:$0xff] }
 0x267   : > { %3632 = vrot.lane.b32.xlu0 %v3503_v33, %s7572_s26  ;;  %v1122_v36 = vpop.f32.mrb[154].mxu0  ;;  %2967 = vst.msk [vmem:[#allocation3 + $0x338] sm:$0xff] %vm1304_vm4, %v2918_v27  ;;  %v3504_v3 = vpack.c.bf16 %v3439_v55, %v3438_v53  ;;  %v8396_v10 = vld [vmem:[#allocation2 + $0x241] sm:$0xff]  ;;  %v2132_v27 = vpack.c.bf16 %v8332_v50, %v8314_v24 }
 0x268   : > { %1869 = vrot.lane.b32.xlu1 %v1738_v31, %s7575_s27  ;;  %v1282_v38 = vmax.f32 %v1120_v34, 0.0  ;;  %v1123_v39 = vadd.f32 %v8365_v32, %v1122_v36  ;;  %v6833_v40 = vpop.f32.mrb[155].mxu0  ;;  %1594 = vst.msk [vmem:[#allocation3 + $0x360] sm:$0xff] %vm1304_vm4, %v1545_v2  ;;  %v3896_v15 = vpack.c.bf16 %v8396_v10, %v8394_v9  ;;  %v3050_v16 = vld [vmem:[#allocation2 + $0x23e] sm:$0xff]  ;;  %v3051_v19 = vld [vmem:[#allocation2 + $0x246] sm:$0xff]  ;;  %v2460_v34 = vld [vmem:[#allocation2 + $0x234] sm:$0xff] }
 0x269   : > { %v8373_v4 = vld [vmem:[#allocation2 + $0x24a] sm:$0xff]  ;;  %v3114_v2 = vpack.c.bf16 %v3051_v19, %v3050_v16  ;;  %v2524_v40 = vpack.c.bf16 %v2460_v34, %v2459_v22 }
 0x26a   : > { %1381 = vst.msk [vmem:[#allocation2 + $0x260] sm:$0xff] %vm1304_vm4, %v1282_v38  ;;  %v1283_v43 = vmax.f32 %v1123_v39, 0.0  ;;  %v2856_v56 = vld [vmem:[#allocation2 + $0x24d] sm:$0xff] }
 0x26b   : > { %4024 = vrot.lane.b32.xlu0 %v3895_v37, %s7573_s28  ;;  %v8379_v44 = vld [vmem:[#allocation2 + $0x252] sm:$0xff]  ;;  %v3440_v24 = vld [vmem:[#allocation2 + $0x248] sm:$0xff] }
 0x26c   : > { %v4289_v49 = vpack.c.bf16 %v8379_v44, %v8373_v4  ;;  %2262 = vrot.lane.b32.xlu1 %v2131_v42, %s7572_s26  ;;  %1382 = vst.msk [vmem:[#allocation2 + $0x268] sm:$0xff] %vm1304_vm4, %v1283_v43  ;;  %v2857_v23 = vld [vmem:[#allocation2 + $0x255] sm:$0xff]  ;;  %v8427_v48 = vld [vmem:[#allocation2 + $0x249] sm:$0xff] }
 0x26d   : > { %v1127_v59 = vpop.f32.mrb[156].mxu0  ;;  %v1485_v57 = vld [vmem:[#allocation2 + $0x250] sm:$0xff]  ;;  %v1486_v60 = vld [vmem:[#allocation2 + $0x258] sm:$0xff]  ;;  %v2919_v62 = vpack.c.bf16 %v2857_v23, %v2856_v56  ;;  %v1740_v23 = vpack.c.bf16 %v8394_v9, %v8360_v21 }
 0x26e   : > { %4338 = vst.msk [vmem:[#allocation3 + $0x328] sm:$0xff] %vm1304_vm4, %v4289_v49  ;;  %v1128_v54 = vadd.f32 %v8365_v32, %v1127_v59  ;;  %v6836_v28 = vpop.f32.mrb[157].mxu0  ;;  %v1546_v63 = vpack.c.bf16 %v1486_v60, %v1485_v57  ;;  %v3441_v50 = vld [vmem:[#allocation2 + $0x250] sm:$0xff]  ;;  %v3442_v16 = vld [vmem:[#allocation2 + $0x258] sm:$0xff] }
 0x26f   : > { %3244 = vrot.lane.b32.xlu0 %v3113_v52, %s7575_s27  ;;  %v1130_v1 = vpop.f32.mrb[158].mxu0  ;;  %2968 = vst.msk [vmem:[#allocation3 + $0x350] sm:$0xff] %vm1304_vm4, %v2919_v62  ;;  %v3505_v46 = vpack.c.bf16 %v3441_v50, %v3440_v24  ;;  %v8430_v52 = vld [vmem:[#allocation2 + $0x251] sm:$0xff] }
 0x270   : > { %2653 = vrot.lane.b32.xlu1 %v2523_v61, %s7573_s28  ;;  %v1284_v5 = vmax.f32 %v1128_v54, 0.0  ;;  %v1131_v6 = vadd.f32 %v8365_v32, %v1130_v1  ;;  %v6837_v7 = vpop.f32.mrb[159].mxu0  ;;  %1595 = vst.msk [vmem:[#allocation3 + $0x378] sm:$0xff] %vm1304_vm4, %v1546_v63  ;;  %v3897_v28 = vpack.c.bf16 %v8430_v52, %v8427_v48  ;;  %v3053_v21 = vld [vmem:[#allocation2 + $0x256] sm:$0xff] }
 0x271   : > { %v8392_v8 = vld [vmem:[#allocation2 + $0x25a] sm:$0xff] }
 0x272   : > { %1383 = vst.msk [vmem:[#allocation2 + $0x270] sm:$0xff] %vm1304_vm4, %v1284_v5  ;;  %v1285_v12 = vmax.f32 %v1131_v6, 0.0  ;;  %v2858_v13 = vld [vmem:[#allocation2 + $0x25d] sm:$0xff]  ;;  %v2133_v6 = vpack.c.bf16 %v8350_v26, %v8334_v51 }
 0x273   : > { %3634 = vrot.lane.b32.xlu0 %v3504_v3, %s7572_s26  ;;  %v8401_v58 = vld [vmem:[#allocation2 + $0x262] sm:$0xff]  ;;  %v3052_v3 = vld [vmem:[#allocation2 + $0x24e] sm:$0xff]  ;;  %v8461_v22 = vld [vmem:[#allocation2 + $0x259] sm:$0xff] }
 0x274   : > { %v4290_v14 = vpack.c.bf16 %v8401_v58, %v8392_v8  ;;  %1871 = vrot.lane.b32.xlu1 %v1739_v11, %s7575_s27  ;;  %1384 = vst.msk [vmem:[#allocation2 + $0x278] sm:$0xff] %vm1304_vm4, %v1285_v12  ;;  %v2859_v17 = vld [vmem:[#allocation2 + $0x265] sm:$0xff]  ;;  %v2461_v7 = vld [vmem:[#allocation2 + $0x23c] sm:$0xff] }
 0x275   : > { %v1135_v47 = vpop.f32.mrb[160].mxu0  ;;  %v2920_v33 = vpack.c.bf16 %v2859_v17, %v2858_v13  ;;  %v1487_v20 = vld [vmem:[#allocation2 + $0x260] sm:$0xff]  ;;  %v1488_v25 = vld [vmem:[#allocation2 + $0x268] sm:$0xff] }
 0x276   : > { %4339 = vst.msk [vmem:[#allocation3 + $0x340] sm:$0xff] %vm1304_vm4, %v4290_v14  ;;  %v1136_v29 = vadd.f32 %v8365_v32, %v1135_v47  ;;  %v6840_v30 = vpop.f32.mrb[161].mxu0  ;;  %v1547_v31 = vpack.c.bf16 %v1488_v25, %v1487_v20  ;;  %v2462_v11 = vld [vmem:[#allocation2 + $0x244] sm:$0xff]  ;;  %v3115_v14 = vpack.c.bf16 %v3053_v21, %v3052_v3 }
 0x277   : > { %4026 = vrot.lane.b32.xlu0 %v3896_v15, %s7573_s28  ;;  %v1138_v35 = vpop.f32.mrb[162].mxu0  ;;  %2969 = vst.msk [vmem:[#allocation3 + $0x368] sm:$0xff] %vm1304_vm4, %v2920_v33  ;;  %v3443_v17 = vld [vmem:[#allocation2 + $0x260] sm:$0xff]  ;;  %v2525_v26 = vpack.c.bf16 %v2462_v11, %v2461_v7 }
 0x278   : > { %2264 = vrot.lane.b32.xlu1 %v2132_v27, %s7572_s26  ;;  %v1286_v36 = vmax.f32 %v1136_v29, 0.0  ;;  %v1139_v37 = vadd.f32 %v8365_v32, %v1138_v35  ;;  %v6841_v38 = vpop.f32.mrb[163].mxu0  ;;  %1596 = vst.msk [vmem:[#allocation3 + $0x390] sm:$0xff] %vm1304_vm4, %v1547_v31  ;;  %v3506_v31 = vpack.c.bf16 %v3443_v17, %v3442_v16 }
 0x279   : > { %v8418_v39 = vld [vmem:[#allocation2 + $0x26a] sm:$0xff]  ;;  %v1741_v38 = vpack.c.bf16 %v8427_v48, %v8396_v10 }
 0x27a   : > { %1385 = vst.msk [vmem:[#allocation2 + $0x280] sm:$0xff] %vm1304_vm4, %v1286_v36  ;;  %v1287_v41 = vmax.f32 %v1139_v37, 0.0  ;;  %v2860_v42 = vld [vmem:[#allocation2 + $0x26d] sm:$0xff]  ;;  %v8463_v36 = vld [vmem:[#allocation2 + $0x261] sm:$0xff] }
 0x27b   : > { %3246 = vrot.lane.b32.xlu0 %v3114_v2, %s7575_s27  ;;  %v8422_v43 = vld [vmem:[#allocation2 + $0x272] sm:$0xff]  ;;  %v3055_v48 = vld [vmem:[#allocation2 + $0x266] sm:$0xff] }
 0x27c   : > { %2655 = vrot.lane.b32.xlu1 %v2524_v40, %s7573_s28  ;;  %v4291_v45 = vpack.c.bf16 %v8422_v43, %v8418_v39  ;;  %1386 = vst.msk [vmem:[#allocation2 + $0x288] sm:$0xff] %vm1304_vm4, %v1287_v41  ;;  %v2861_v49 = vld [vmem:[#allocation2 + $0x275] sm:$0xff]  ;;  %v3898_v41 = vpack.c.bf16 %v8463_v36, %v8461_v22 }
 0x27d   : > { %v1143_v53 = vpop.f32.mrb[164].mxu0  ;;  %v2921_v55 = vpack.c.bf16 %v2861_v49, %v2860_v42  ;;  %v1489_v56 = vld [vmem:[#allocation2 + $0x270] sm:$0xff]  ;;  %v1490_v59 = vld [vmem:[#allocation2 + $0x278] sm:$0xff]  ;;  %v8477_v42 = vpop.permute.xlu0 %3662 }
 0x27e   : > { %4340 = vst.msk [vmem:[#allocation3 + $0x358] sm:$0xff] %vm1304_vm4, %v4291_v45  ;;  %v1144_v57 = vadd.f32 %v8365_v32, %v1143_v53  ;;  %v6844_v60 = vpop.f32.mrb[165].mxu0  ;;  %v1548_v61 = vpack.c.bf16 %v1490_v59, %v1489_v56  ;;  %v3054_v45 = vld [vmem:[#allocation2 + $0x25e] sm:$0xff]  ;;  %v2134_v59 = vpack.c.bf16 %v8373_v4, %v8354_v18  ;;  %v3444_v18 = vld [vmem:[#allocation2 + $0x268] sm:$0xff]  ;;  %v3445_v4 = vld [vmem:[#allocation2 + $0x270] sm:$0xff] }
 0x27f   : > { %3636 = vrot.lane.b32.xlu0 %v3505_v46, %s7572_s26  ;;  %v1146_v54 = vpop.f32.mrb[166].mxu0  ;;  %2970 = vst.msk [vmem:[#allocation3 + $0x380] sm:$0xff] %vm1304_vm4, %v2921_v55  ;;  %v8505_v16 = vld [vmem:[#allocation2 + $0x271] sm:$0xff] }
 0x280   : > { %1873 = vrot.lane.b32.xlu1 %v1740_v23, %s7575_s27  ;;  %v1288_v62 = vmax.f32 %v1144_v57, 0.0  ;;  %v1147_v63 = vadd.f32 %v8365_v32, %v1146_v54  ;;  %v6845_v1 = vpop.f32.mrb[167].mxu0  ;;  %1597 = vst.msk [vmem:[#allocation3 + $0x3a8] sm:$0xff] %vm1304_vm4, %v1548_v61  ;;  %v2463_v61 = vld [vmem:[#allocation2 + $0x24c] sm:$0xff]  ;;  %v2464_v54 = vld [vmem:[#allocation2 + $0x254] sm:$0xff] }
 0x281   : > { %v8443_v5 = vld [vmem:[#allocation2 + $0x27a] sm:$0xff]  ;;  %v8494_v7 = vpop.permute.xlu0 %4054 }
 0x282   : > { %1387 = vst.msk [vmem:[#allocation2 + $0x290] sm:$0xff] %vm1304_vm4, %v1288_v62  ;;  %v1289_v9 = vmax.f32 %v1147_v63, 0.0  ;;  %v2862_v13 = vld [vmem:[#allocation2 + $0x27d] sm:$0xff]  ;;  %v3116_v62 = vpack.c.bf16 %v3055_v48, %v3054_v45 }
 0x283   : > { %4028 = vrot.lane.b32.xlu0 %v3897_v28, %s7573_s28  ;;  %v8449_v12 = vld [vmem:[#allocation2 + $0x282] sm:$0xff] }
 0x284   : > { %2266 = vrot.lane.b32.xlu1 %v2133_v6, %s7572_s26  ;;  %v4292_v15 = vpack.c.bf16 %v8449_v12, %v8443_v5  ;;  %1388 = vst.msk [vmem:[#allocation2 + $0x298] sm:$0xff] %vm1304_vm4, %v1289_v9  ;;  %v2863_v51 = vld [vmem:[#allocation2 + $0x285] sm:$0xff]  ;;  %v2526_v6 = vpack.c.bf16 %v2464_v54, %v2463_v61  ;;  %v2465_v45 = vld [vmem:[#allocation2 + $0x25c] sm:$0xff] }
 0x285   : > { %v1151_v19 = vpop.f32.mrb[168].mxu0  ;;  %v2922_v20 = vpack.c.bf16 %v2863_v51, %v2862_v13  ;;  %v1491_v25 = vld [vmem:[#allocation2 + $0x280] sm:$0xff]  ;;  %v1492_v27 = vld [vmem:[#allocation2 + $0x288] sm:$0xff]  ;;  %v3507_v13 = vpack.c.bf16 %v3445_v4, %v3444_v18 }
 0x286   : > { %4341 = vst.msk [vmem:[#allocation3 + $0x370] sm:$0xff] %vm1304_vm4, %v4292_v15  ;;  %v1152_v47 = vadd.f32 %v8365_v32, %v1151_v19  ;;  %v6848_v33 = vpop.f32.mrb[169].mxu0  ;;  %v1549_v30 = vpack.c.bf16 %v1492_v27, %v1491_v25  ;;  %v8538_v4 = vld [vmem:[#allocation2 + $0x279] sm:$0xff] }
 0x287   : > { %3248 = vrot.lane.b32.xlu0 %v3115_v14, %s7575_s27  ;;  %v1154_v29 = vpop.f32.mrb[170].mxu0  ;;  %2971 = vst.msk [vmem:[#allocation3 + $0x398] sm:$0xff] %vm1304_vm4, %v2922_v20  ;;  %v8500_v14 = vld [vmem:[#allocation2 + $0x269] sm:$0xff] }
 0x288   : > { %2657 = vrot.lane.b32.xlu1 %v2525_v26, %s7573_s28  ;;  %v1290_v34 = vmax.f32 %v1152_v47, 0.0  ;;  %v1155_v35 = vadd.f32 %v8365_v32, %v1154_v29  ;;  %v6849_v2 = vpop.f32.mrb[171].mxu0  ;;  %1598 = vst.msk [vmem:[#allocation3 + $0x3c0] sm:$0xff] %vm1304_vm4, %v1549_v30  ;;  %v1742_v26 = vpack.c.bf16 %v8461_v22, %v8430_v52  ;;  %v3056_v22 = vld [vmem:[#allocation2 + $0x26e] sm:$0xff] }
 0x289   : > { %v8465_v37 = vld [vmem:[#allocation2 + $0x28a] sm:$0xff] }
 0x28a   : > { %1389 = vst.msk [vmem:[#allocation2 + $0x2a0] sm:$0xff] %vm1304_vm4, %v1290_v34  ;;  %v1291_v24 = vmax.f32 %v1155_v35, 0.0  ;;  %v2864_v50 = vld [vmem:[#allocation2 + $0x28d] sm:$0xff]  ;;  %v3899_v34 = vpack.c.bf16 %v8505_v16, %v8500_v14 }
 0x28b   : > { %3638 = vrot.lane.b32.xlu0 %v3506_v31, %s7572_s26  ;;  %v8472_v40 = vld [vmem:[#allocation2 + $0x292] sm:$0xff]  ;;  %v8513_v31 = vpop.permute.xlu0 %3664 }
 0x28c   : > { %1875 = vrot.lane.b32.xlu1 %v1741_v38, %s7575_s27  ;;  %v4293_v46 = vpack.c.bf16 %v8472_v40, %v8465_v37  ;;  %1390 = vst.msk [vmem:[#allocation2 + $0x2a8] sm:$0xff] %vm1304_vm4, %v1291_v24  ;;  %v2865_v10 = vld [vmem:[#allocation2 + $0x295] sm:$0xff] }
 0x28d   : > { %v1159_v49 = vpop.f32.mrb[172].mxu0  ;;  %v2923_v53 = vpack.c.bf16 %v2865_v10, %v2864_v50  ;;  %v1493_v55 = vld [vmem:[#allocation2 + $0x290] sm:$0xff]  ;;  %v1494_v56 = vld [vmem:[#allocation2 + $0x298] sm:$0xff]  ;;  %v2135_v50 = vpack.c.bf16 %v8392_v8, %v8379_v44 }
 0x28e   : > { %4342 = vst.msk [vmem:[#allocation3 + $0x388] sm:$0xff] %vm1304_vm4, %v4293_v46  ;;  %v1160_v23 = vadd.f32 %v8365_v32, %v1159_v49  ;;  %v6852_v57 = vpop.f32.mrb[173].mxu0  ;;  %v1550_v60 = vpack.c.bf16 %v1494_v56, %v1493_v55  ;;  %v3057_v38 = vld [vmem:[#allocation2 + $0x276] sm:$0xff]  ;;  %v2466_v46 = vld [vmem:[#allocation2 + $0x264] sm:$0xff] }
 0x28f   : > { %4030 = vrot.lane.b32.xlu0 %v3898_v41, %s7573_s28  ;;  %v1162_v28 = vpop.f32.mrb[174].mxu0  ;;  %2972 = vst.msk [vmem:[#allocation3 + $0x3b0] sm:$0xff] %vm1304_vm4, %v2923_v53  ;;  %v3117_v48 = vpack.c.bf16 %v3057_v38, %v3056_v22  ;;  %v3446_v53 = vld [vmem:[#allocation2 + $0x278] sm:$0xff]  ;;  %v3447_v55 = vld [vmem:[#allocation2 + $0x280] sm:$0xff]  ;;  %v2467_v22 = vld [vmem:[#allocation2 + $0x26c] sm:$0xff] }
 0x290   : > { %2268 = vrot.lane.b32.xlu1 %v2134_v59, %s7572_s26  ;;  %v1292_v63 = vmax.f32 %v1160_v23, 0.0  ;;  %v1163_v1 = vadd.f32 %v8365_v32, %v1162_v28  ;;  %v6853_v3 = vpop.f32.mrb[175].mxu0  ;;  %1599 = vst.msk [vmem:[#allocation3 + $0x3d8] sm:$0xff] %vm1304_vm4, %v1550_v60  ;;  %v2527_v23 = vpack.c.bf16 %v2466_v46, %v2465_v45  ;;  %v2468_v38 = vld [vmem:[#allocation2 + $0x274] sm:$0xff] }
 0x291   : > { %v8491_v21 = vld [vmem:[#allocation2 + $0x29a] sm:$0xff] }
 0x292   : > { %1391 = vst.msk [vmem:[#allocation2 + $0x2b0] sm:$0xff] %vm1304_vm4, %v1292_v63  ;;  %v1293_v9 = vmax.f32 %v1163_v1, 0.0  ;;  %v2866_v19 = vld [vmem:[#allocation2 + $0x29d] sm:$0xff]  ;;  %v3508_v1 = vpack.c.bf16 %v3447_v55, %v3446_v53  ;;  %v3449_v53 = vld [vmem:[#allocation2 + $0x290] sm:$0xff] }
 0x293   : > { %3250 = vrot.lane.b32.xlu0 %v3116_v62, %s7575_s27  ;;  %v8497_v11 = vld [vmem:[#allocation2 + $0x2a2] sm:$0xff] }
 0x294   : > { %2659 = vrot.lane.b32.xlu1 %v2526_v6, %s7573_s28  ;;  %v4294_v15 = vpack.c.bf16 %v8497_v11, %v8491_v21  ;;  %1392 = vst.msk [vmem:[#allocation2 + $0x2b8] sm:$0xff] %vm1304_vm4, %v1293_v9  ;;  %v2867_v51 = vld [vmem:[#allocation2 + $0x2a5] sm:$0xff] }
 0x295   : > { %v1167_v17 = vpop.f32.mrb[176].mxu0  ;;  %v2924_v20 = vpack.c.bf16 %v2867_v51, %v2866_v19  ;;  %v1495_v25 = vld [vmem:[#allocation2 + $0x2a0] sm:$0xff]  ;;  %v1496_v27 = vld [vmem:[#allocation2 + $0x2a8] sm:$0xff] }
 0x296   : > { %4343 = vst.msk [vmem:[#allocation3 + $0x3a0] sm:$0xff] %vm1304_vm4, %v4294_v15  ;;  %v1168_v47 = vadd.f32 %v8365_v32, %v1167_v17  ;;  %v6856_v33 = vpop.f32.mrb[177].mxu0  ;;  %v1551_v30 = vpack.c.bf16 %v1496_v27, %v1495_v25  ;;  %v8540_v6 = vld [vmem:[#allocation2 + $0x281] sm:$0xff]  ;;  %v1743_v17 = vpack.c.bf16 %v8500_v14, %v8463_v36 }
 0x297   : > { %3640 = vrot.lane.b32.xlu0 %v3507_v13, %s7572_s26  ;;  %v1170_v29 = vpop.f32.mrb[178].mxu0  ;;  %2973 = vst.msk [vmem:[#allocation3 + $0x3c8] sm:$0xff] %vm1304_vm4, %v2924_v20  ;;  %v3059_v33 = vld [vmem:[#allocation2 + $0x286] sm:$0xff] }
 0x298   : > { %1877 = vrot.lane.b32.xlu1 %v1742_v26, %s7575_s27  ;;  %v1294_v35 = vmax.f32 %v1168_v47, 0.0  ;;  %v1171_v52 = vadd.f32 %v8365_v32, %v1170_v29  ;;  %v6857_v2 = vpop.f32.mrb[179].mxu0  ;;  %1600 = vst.msk [vmem:[#allocation3 + $0x3f0] sm:$0xff] %vm1304_vm4, %v1551_v30  ;;  %v3900_v26 = vpack.c.bf16 %v8540_v6, %v8538_v4  ;;  %v3058_v47 = vld [vmem:[#allocation2 + $0x27e] sm:$0xff]  ;;  %v2136_v30 = vpack.c.bf16 %v8418_v39, %v8401_v58 }
 0x299   : > { %v8519_v24 = vld [vmem:[#allocation2 + $0x2aa] sm:$0xff]  ;;  %v3118_v46 = vpack.c.bf16 %v3059_v33, %v3058_v47 }
 0x29a   : > { %1393 = vst.msk [vmem:[#allocation2 + $0x2c0] sm:$0xff] %vm1304_vm4, %v1294_v35  ;;  %v1295_v41 = vmax.f32 %v1171_v52, 0.0  ;;  %v2868_v8 = vld [vmem:[#allocation2 + $0x2ad] sm:$0xff] }
 0x29b   : > { %4032 = vrot.lane.b32.xlu0 %v3899_v34, %s7573_s28  ;;  %v8526_v10 = vld [vmem:[#allocation2 + $0x2b2] sm:$0xff] }
 0x29c   : > { %2270 = vrot.lane.b32.xlu1 %v2135_v50, %s7572_s26  ;;  %v4295_v49 = vpack.c.bf16 %v8526_v10, %v8519_v24  ;;  %1394 = vst.msk [vmem:[#allocation2 + $0x2c8] sm:$0xff] %vm1304_vm4, %v1295_v41  ;;  %v2869_v60 = vld [vmem:[#allocation2 + $0x2b5] sm:$0xff] }
 0x29d   : > { %v1175_v44 = vpop.f32.mrb[180].mxu0  ;;  %v1497_v61 = vld [vmem:[#allocation2 + $0x2b0] sm:$0xff]  ;;  %v1498_v54 = vld [vmem:[#allocation2 + $0x2b8] sm:$0xff]  ;;  %v2925_v62 = vpack.c.bf16 %v2869_v60, %v2868_v8  ;;  %v2528_v8 = vpack.c.bf16 %v2468_v38, %v2467_v22  ;;  %v2470_v22 = vld [vmem:[#allocation2 + $0x284] sm:$0xff] }
 0x29e   : > { %v2253_v56 = vpop.permute.xlu1 %2252  ;;  %4344 = vst.msk [vmem:[#allocation3 + $0x3b8] sm:$0xff] %vm1304_vm4, %v4295_v49  ;;  %v1176_v57 = vadd.f32 %v8365_v32, %v1175_v44  ;;  %v6860_v28 = vpop.f32.mrb[181].mxu0  ;;  %v1552_v63 = vpack.c.bf16 %v1498_v54, %v1497_v61  ;;  %v3448_v49 = vld [vmem:[#allocation2 + $0x288] sm:$0xff] }
 0x29f   : > { %v1860_v59 = vpop.permute.xlu0 %1859  ;;  %3252 = vrot.lane.b32.xlu0 %v3117_v48, %s7575_s27  ;;  %v1178_v18 = vpop.f32.mrb[182].mxu0  ;;  %2974 = vst.msk [vmem:[#allocation3 + $0x3e0] sm:$0xff] %vm1304_vm4, %v2925_v62  ;;  %v8581_v54 = vld [vmem:[#allocation2 + $0x289] sm:$0xff]  ;;  %v8583_v28 = vld [vmem:[#allocation2 + $0x291] sm:$0xff] }
 0x2a0   : > { %1979 = vst.msk [vmem:[#allocation3 + $0x2a0] sm:$0xff] %vm1950_vm5, %v1860_v59  ;;  %2661 = vrot.lane.b32.xlu1 %v2527_v23, %s7573_s28  ;;  %v1296_v3 = vmax.f32 %v1176_v57, 0.0  ;;  %v1179_v13 = vadd.f32 %v8365_v32, %v1178_v18  ;;  %v6861_v15 = vpop.f32.mrb[183].mxu0  ;;  %v3509_v57 = vpack.c.bf16 %v3449_v53, %v3448_v49  ;;  %v1744_v18 = vpack.c.bf16 %v8538_v4, %v8505_v16 }
 0x2a1   : > { %2372 = vst.msk [vmem:[#allocation3 + $0x2a0] sm:$0xff] %vm2343_vm6, %v2253_v56  ;;  %v8542_v9 = vld [vmem:[#allocation2 + $0x2ba] sm:$0xff] }
 0x2a2   : > { %1601 = vst.msk [vmem:[#allocation3 + $0x408] sm:$0xff] %vm1304_vm4, %v1552_v63  ;;  %1395 = vst.msk [vmem:[#allocation2 + $0x2d0] sm:$0xff] %vm1304_vm4, %v1296_v3  ;;  %v1297_v51 = vmax.f32 %v1179_v13, 0.0  ;;  %v2870_v27 = vld [vmem:[#allocation2 + $0x2bd] sm:$0xff] }
 0x2a3   : > { %3642 = vrot.lane.b32.xlu0 %v3508_v1, %s7572_s26  ;;  %v8551_v19 = vld [vmem:[#allocation2 + $0x2c2] sm:$0xff] }
 0x2a4   : > { %1879 = vrot.lane.b32.xlu1 %v1743_v17, %s7575_s27  ;;  %v4296_v20 = vpack.c.bf16 %v8551_v19, %v8542_v9  ;;  %1396 = vst.msk [vmem:[#allocation2 + $0x2d8] sm:$0xff] %vm1304_vm4, %v1297_v51  ;;  %v2871_v36 = vld [vmem:[#allocation2 + $0x2c5] sm:$0xff] }
 0x2a5   : > { %v1183_v25 = vpop.f32.mrb[184].mxu0  ;;  %v1499_v14 = vld [vmem:[#allocation2 + $0x2c0] sm:$0xff]  ;;  %v2926_v52 = vpack.c.bf16 %v2871_v36, %v2870_v27  ;;  %v1500_v2 = vld [vmem:[#allocation2 + $0x2c8] sm:$0xff]  ;;  %v3061_v36 = vld [vmem:[#allocation2 + $0x296] sm:$0xff] }
 0x2a6   : > { %v1862_v29 = vpop.permute.xlu1 %1861  ;;  %4345 = vst.msk [vmem:[#allocation3 + $0x3d0] sm:$0xff] %vm1304_vm4, %v4296_v20  ;;  %v1184_v34 = vadd.f32 %v8365_v32, %v1183_v25  ;;  %v6864_v35 = vpop.f32.mrb[185].mxu0  ;;  %v1553_v41 = vpack.c.bf16 %v1500_v2, %v1499_v14  ;;  %v3901_v20 = vpack.c.bf16 %v8583_v28, %v8581_v54  ;;  %v3060_v27 = vld [vmem:[#allocation2 + $0x28e] sm:$0xff]  ;;  %v2469_v2 = vld [vmem:[#allocation2 + $0x27c] sm:$0xff] }
 0x2a7   : > { %4034 = vrot.lane.b32.xlu0 %v3900_v26, %s7573_s28  ;;  %1980 = vst.msk [vmem:[#allocation3 + $0x2b8] sm:$0xff] %vm1950_vm5, %v1862_v29  ;;  %v1186_v50 = vpop.f32.mrb[186].mxu0  ;;  %v2529_v53 = vpack.c.bf16 %v2470_v22, %v2469_v2  ;;  %v2472_v2 = vld [vmem:[#allocation2 + $0x294] sm:$0xff] }
 0x2a8   : > { %2272 = vrot.lane.b32.xlu1 %v2136_v30, %s7572_s26  ;;  %v1298_v48 = vmax.f32 %v1184_v34, 0.0  ;;  %v1187_v58 = vadd.f32 %v8365_v32, %v1186_v50  ;;  %v6865_v39 = vpop.f32.mrb[187].mxu0  ;;  %2975 = vst.msk [vmem:[#allocation3 + $0x3f8] sm:$0xff] %vm1304_vm4, %v2926_v52  ;;  %1602 = vst.msk [vmem:[#allocation3 + $0x420] sm:$0xff] %vm1304_vm4, %v1553_v41  ;;  %v2137_v30 = vpack.c.bf16 %v8443_v5, %v8422_v43  ;;  %v3450_v41 = vld [vmem:[#allocation2 + $0x298] sm:$0xff] }
 0x2a9   : > { %v3235_v45 = vpop.permute.xlu0 %3234  ;;  %v8569_v55 = vld [vmem:[#allocation2 + $0x2ca] sm:$0xff]  ;;  %v3119_v50 = vpack.c.bf16 %v3061_v36, %v3060_v27 }
 0x2aa   : > { %3353 = vst.msk [vmem:[#allocation3 + $0x2a8] sm:$0xff] %vm1950_vm5, %v3235_v45  ;;  %v2255_v44 = vpop.permute.xlu1 %2254  ;;  %v1299_v56 = vmax.f32 %v1187_v58, 0.0  ;;  %v2142_v59 = vpack.c.bf16 %v8569_v55, %v8551_v19  ;;  %v2872_v23 = vld [vmem:[#allocation2 + $0x2cd] sm:$0xff]  ;;  %v3451_v45 = vld [vmem:[#allocation2 + $0x2a0] sm:$0xff] }
 0x2ab   : > { %3254 = vrot.lane.b32.xlu0 %v3118_v46, %s7575_s27  ;;  %1397 = vst.msk [vmem:[#allocation2 + $0x2e0] sm:$0xff] %vm1304_vm4, %v1298_v48  ;;  %v8578_v60 = vld [vmem:[#allocation2 + $0x2d2] sm:$0xff] }
 0x2ac   : > { %2373 = vst.msk [vmem:[#allocation3 + $0x2b8] sm:$0xff] %vm2343_vm6, %v2255_v44  ;;  %2663 = vrot.lane.b32.xlu1 %v2528_v8, %s7573_s28  ;;  %v1501_v61 = vld [vmem:[#allocation2 + $0x2d0] sm:$0xff]  ;;  %v4297_v62 = vpack.c.bf16 %v8578_v60, %v8569_v55  ;;  %v1502_v51 = vld [vmem:[#allocation2 + $0x2d8] sm:$0xff] }
 0x2ad   : > { %1398 = vst.msk [vmem:[#allocation2 + $0x2e8] sm:$0xff] %vm1304_vm4, %v1299_v56  ;;  %v1191_v63 = vpop.f32.mrb[188].mxu0  ;;  %v2873_v1 = vld [vmem:[#allocation2 + $0x2d5] sm:$0xff]  ;;  %v1554_v47 = vpack.c.bf16 %v1502_v51, %v1501_v61  ;;  %v3510_v61 = vpack.c.bf16 %v3451_v45, %v3450_v41 }
 0x2ae   : > { %v2646_v3 = vpop.permute.xlu1 %2645  ;;  %v1192_v13 = vadd.f32 %v8365_v32, %v1191_v63  ;;  %v6868_v15 = vpop.f32.mrb[189].mxu0  ;;  %v2927_v17 = vpack.c.bf16 %v2873_v1, %v2872_v23  ;;  %4346 = vst.msk [vmem:[#allocation3 + $0x3e8] sm:$0xff] %vm1304_vm4, %v4297_v62  ;;  %v4249_v41 = vld [vmem:[#allocation2 + $0x312] sm:$0xff] }
 0x2af   : > { %3644 = vrot.lane.b32.xlu0 %v3509_v57, %s7572_s26  ;;  %2765 = vst.msk [vmem:[#allocation3 + $0x2a0] sm:$0xff] %vm2736_vm7, %v2646_v3  ;;  %v1194_v26 = vpop.f32.mrb[190].mxu0  ;;  %v8623_v3 = vld [vmem:[#allocation2 + $0x299] sm:$0xff] }
 0x2b0   : > { %1881 = vrot.lane.b32.xlu1 %v1744_v18, %s7575_s27  ;;  %v1300_v25 = vmax.f32 %v1192_v13, 0.0  ;;  %v1195_v16 = vadd.f32 %v8365_v32, %v1194_v26  ;;  %v6869_v4 = vpop.f32.mrb[191].mxu0  ;;  %2976 = vst.msk [vmem:[#allocation3 + $0x410] sm:$0xff] %vm1304_vm4, %v2927_v17  ;;  %1603 = vst.msk [vmem:[#allocation3 + $0x438] sm:$0xff] %vm1304_vm4, %v1554_v47  ;;  %v8625_v18 = vld [vmem:[#allocation2 + $0x2a1] sm:$0xff]  ;;  %v1745_v17 = vpack.c.bf16 %v8581_v54, %v8540_v6 }
 0x2b1   : > { %v3237_v33 = vpop.permute.xlu0 %3236 }
 0x2b2   : > { %3354 = vst.msk [vmem:[#allocation3 + $0x2c0] sm:$0xff] %vm1950_vm5, %v3237_v33  ;;  %v8599_v14 = vld [vmem:[#allocation2 + $0x2da] sm:$0xff]  ;;  %v1864_v29 = vpop.permute.xlu1 %1863  ;;  %v1301_v34 = vmax.f32 %v1195_v16, 0.0  ;;  %v3063_v16 = vld [vmem:[#allocation2 + $0x2a6] sm:$0xff] }
 0x2b3   : > { %4036 = vrot.lane.b32.xlu0 %v3901_v20, %s7573_s28  ;;  %1399 = vst.msk [vmem:[#allocation2 + $0x2f0] sm:$0xff] %vm1304_vm4, %v1300_v25  ;;  %v2143_v35 = vpack.c.bf16 %v8599_v14, %v8578_v60  ;;  %v2874_v52 = vld [vmem:[#allocation2 + $0x2dd] sm:$0xff]  ;;  %v3902_v20 = vpack.c.bf16 %v8625_v18, %v8623_v3 }
 0x2b4   : > { %1981 = vst.msk [vmem:[#allocation3 + $0x2d0] sm:$0xff] %vm1950_vm5, %v1864_v29  ;;  %v8609_v38 = vld [vmem:[#allocation2 + $0x2e2] sm:$0xff]  ;;  %2274 = vrot.lane.b32.xlu1 %v2137_v30, %s7572_s26  ;;  %v2138_v30 = vpack.c.bf16 %v8465_v37, %v8449_v12  ;;  %v3453_v37 = vld [vmem:[#allocation2 + $0x2b0] sm:$0xff] }
 0x2b5   : > { %v4298_v43 = vpack.c.bf16 %v8609_v38, %v8599_v14  ;;  %1400 = vst.msk [vmem:[#allocation2 + $0x2f8] sm:$0xff] %vm1304_vm4, %v1301_v34  ;;  %v2875_v5 = vld [vmem:[#allocation2 + $0x2e5] sm:$0xff]  ;;  %v1199_v46 = vpop.f32.mrb[192].mxu0 }
 0x2b6   : > { %v2928_v48 = vpack.c.bf16 %v2875_v5, %v2874_v52  ;;  %v1503_v58 = vld [vmem:[#allocation2 + $0x2e0] sm:$0xff]  ;;  %v1504_v39 = vld [vmem:[#allocation2 + $0x2e8] sm:$0xff]  ;;  %v2257_v49 = vpop.permute.xlu1 %2256  ;;  %v1200_v44 = vadd.f32 %v8365_v32, %v1199_v46  ;;  %v6872_v8 = vpop.f32.mrb[193].mxu0 }
 0x2b7   : > { %3256 = vrot.lane.b32.xlu0 %v3119_v50, %s7575_s27  ;;  %4347 = vst.msk [vmem:[#allocation3 + $0x400] sm:$0xff] %vm1304_vm4, %v4298_v43  ;;  %v1555_v56 = vpack.c.bf16 %v1504_v39, %v1503_v58  ;;  %v1202_v23 = vpop.f32.mrb[194].mxu0  ;;  %v3062_v25 = vld [vmem:[#allocation2 + $0x29e] sm:$0xff]  ;;  %v2471_v52 = vld [vmem:[#allocation2 + $0x28c] sm:$0xff] }
 0x2b8   : > { %2374 = vst.msk [vmem:[#allocation3 + $0x2d0] sm:$0xff] %vm2343_vm6, %v2257_v49  ;;  %2665 = vrot.lane.b32.xlu1 %v2529_v53, %s7573_s28  ;;  %v1302_v62 = vmax.f32 %v1200_v44, 0.0  ;;  %v1203_v63 = vadd.f32 %v8365_v32, %v1202_v23  ;;  %v6873_v1 = vpop.f32.mrb[195].mxu0  ;;  %v3120_v50 = vpack.c.bf16 %v3063_v16, %v3062_v25  ;;  %v3452_v12 = vld [vmem:[#allocation2 + $0x2a8] sm:$0xff]  ;;  %v2530_v45 = vpack.c.bf16 %v2472_v2, %v2471_v52 }
 0x2b9   : > { %2977 = vst.msk [vmem:[#allocation3 + $0x428] sm:$0xff] %vm1304_vm4, %v2928_v48  ;;  %v4019_v57 = vpop.permute.xlu0 %4018  ;;  %1604 = vst.msk [vmem:[#allocation3 + $0x450] sm:$0xff] %vm1304_vm4, %v1555_v56  ;;  %v3511_v49 = vpack.c.bf16 %v3453_v37, %v3452_v12  ;;  %v2881_v56 = vld [vmem:[#allocation2 + $0x315] sm:$0xff]  ;;  %v8672_v23 = vld [vmem:[#allocation2 + $0x2a9] sm:$0xff] }
 0x2ba   : > { %v8627_v13 = vld [vmem:[#allocation2 + $0x2ea] sm:$0xff]  ;;  %v2648_v15 = vpop.permute.xlu1 %2647  ;;  %1401 = vst.msk [vmem:[#allocation2 + $0x300] sm:$0xff] %vm1304_vm4, %v1302_v62  ;;  %v1303_v51 = vmax.f32 %v1203_v63, 0.0  ;;  %v1746_v63 = vpack.c.bf16 %v8623_v3, %v8583_v28 }
 0x2bb   : > { %3646 = vrot.lane.b32.xlu0 %v3510_v61, %s7572_s26  ;;  %v2144_v32 = vpack.c.bf16 %v8627_v13, %v8609_v38  ;;  %v2876_v26 = vld [vmem:[#allocation2 + $0x2ed] sm:$0xff]  ;;  %2766 = vst.msk [vmem:[#allocation3 + $0x2b8] sm:$0xff] %vm2736_vm7, %v2648_v15  ;;  %v7458_v61 = vld [vmem:[%s9986_s3 + $0x80] sm:$0xff]  }
 0x2bc   : > { %v8636_v47 = vld [vmem:[#allocation2 + $0x2f2] sm:$0xff]  ;;  %1883 = vrot.lane.b32.xlu1 %v1745_v17, %s7575_s27  ;;  %1402 = vst.msk [vmem:[#allocation2 + $0x308] sm:$0xff] %vm1304_vm4, %v1303_v51  ;;  %v3852_v55 = vld [vmem:[#allocation2 + $0x2e9] sm:$0xff]  ;;  %v2882_v38 = vld [vmem:[#allocation2 + $0x31d] sm:$0xff] }
 0x2bd   : > { %v3239_v33 = vpop.permute.xlu0 %3238  ;;  %v4299_v6 = vpack.c.bf16 %v8636_v47, %v8627_v13  ;;  %v2877_v54 = vld [vmem:[#allocation2 + $0x2f5] sm:$0xff]  ;;  %v2883_v13 = vld [vmem:[#allocation2 + $0x325] sm:$0xff] }
 0x2be   : > { %3355 = vst.msk [vmem:[#allocation3 + $0x2d8] sm:$0xff] %vm1950_vm5, %v3239_v33  ;;  %v2929_v4 = vpack.c.bf16 %v2877_v54, %v2876_v26  ;;  %v1505_v27 = vld [vmem:[#allocation2 + $0x2f0] sm:$0xff]  ;;  %v1506_v36 = vld [vmem:[#allocation2 + $0x2f8] sm:$0xff]  ;;  %v3627_v29 = vpop.permute.xlu1 %3626 }
 0x2bf   : > { %4038 = vrot.lane.b32.xlu0 %v3902_v20, %s7573_s28  ;;  %4348 = vst.msk [vmem:[#allocation3 + $0x418] sm:$0xff] %vm1304_vm4, %v4299_v6  ;;  %v1556_v34 = vpack.c.bf16 %v1506_v36, %v1505_v27  ;;  %v4438_v54 = vld [vmem:[#allocation3 + $0x2a0] sm:$0xff]  ;;  %v2139_v36 = vpack.c.bf16 %v8491_v21, %v8472_v40 }
 0x2c0   : > { %3745 = vst.msk [vmem:[#allocation3 + $0x2a8] sm:$0xff] %vm2343_vm6, %v3627_v29  ;;  %2276 = vrot.lane.b32.xlu1 %v2138_v30, %s7572_s26  ;;  %v3064_v16 = vld [vmem:[#allocation2 + $0x2ae] sm:$0xff]  ;;  %v2473_v29 = vld [vmem:[#allocation2 + $0x29c] sm:$0xff]  ;;  %v2474_v30 = vld [vmem:[#allocation2 + $0x2a4] sm:$0xff] }
 0x2c1   : > { %2978 = vst.msk [vmem:[#allocation3 + $0x440] sm:$0xff] %vm1304_vm4, %v2929_v4  ;;  %v3629_v22 = vpop.permute.xlu0 %3628  ;;  %1605 = vst.msk [vmem:[#allocation3 + $0x468] sm:$0xff] %vm1304_vm4, %v1556_v34  ;;  %v8655_v43 = vld [vmem:[#allocation2 + $0x2fa] sm:$0xff]  ;;  %v2531_v21 = vpack.c.bf16 %v2474_v30, %v2473_v29  ;;  %v2141_v30 = vpack.c.bf16 %v8542_v9, %v8526_v10 }
 0x2c2   : > { %4137 = vst.msk [vmem:[#allocation3 + $0x2a8] sm:$0xff] %vm2736_vm7, %v4019_v57  ;;  %v1866_v5 = vpop.permute.xlu1 %1865  ;;  %v2145_v46 = vpack.c.bf16 %v8655_v43, %v8636_v47  ;;  %v8674_v57 = vld [vmem:[#allocation2 + $0x2b1] sm:$0xff]  ;;  %v2878_v1 = vld [vmem:[#allocation2 + $0x2fd] sm:$0xff]  ;;  %v4441_v12 = vld [vmem:[#allocation3 + $0x2b8] sm:$0xff] }
 0x2c3   : > { %3746 = vst.msk [vmem:[#allocation3 + $0x2c0] sm:$0xff] %vm2343_vm6, %v3629_v22  ;;  %3258 = vrot.lane.b32.xlu0 %v3120_v50, %s7575_s27  ;;  %v8661_v48 = vld [vmem:[#allocation2 + $0x302] sm:$0xff]  ;;  %v8663_v58 = vld [vmem:[#allocation2 + $0x30a] sm:$0xff]  ;;  %v3903_v28 = vpack.c.bf16 %v8674_v57, %v8672_v23  ;;  %v3065_v4 = vld [vmem:[#allocation2 + $0x2b6] sm:$0xff] }
 0x2c4   : > { %1982 = vst.msk [vmem:[#allocation3 + $0x2e8] sm:$0xff] %vm1950_vm5, %v1866_v5  ;;  %2667 = vrot.lane.b32.xlu1 %v2530_v45, %s7573_s28  ;;  %v4300_v53 = vpack.c.bf16 %v8661_v48, %v8655_v43  ;;  %v4301_v44 = vpack.c.bf16 %v4249_v41, %v8663_v58  ;;  %v2146_v8 = vpack.c.bf16 %v8663_v58, %v8661_v48  ;;  %v2879_v15 = vld [vmem:[#allocation2 + $0x305] sm:$0xff]  ;;  %v2880_v17 = vld [vmem:[#allocation2 + $0x30d] sm:$0xff]  ;;  %v3454_v22 = vld [vmem:[#allocation2 + $0x2b8] sm:$0xff] }
 0x2c5   : > { %v4021_v39 = vpop.permute.xlu0 %4020  ;;  %v2930_v26 = vpack.c.bf16 %v2879_v15, %v2878_v1  ;;  %v2931_v33 = vpack.c.bf16 %v2881_v56, %v2880_v17  ;;  %v1507_v20 = vld [vmem:[#allocation2 + $0x300] sm:$0xff]  ;;  %v1508_v25 = vld [vmem:[#allocation2 + $0x308] sm:$0xff]  ;;  %v3121_v2 = vpack.c.bf16 %v3065_v4, %v3064_v16 }
 0x2c6   : > { %4138 = vst.msk [vmem:[#allocation3 + $0x2c0] sm:$0xff] %vm2736_vm7, %v4021_v39  ;;  %v2259_v62 = vpop.permute.xlu1 %2258  ;;  %v1557_v3 = vpack.c.bf16 %v1508_v25, %v1507_v20  ;;  %v3455_v50 = vld [vmem:[#allocation2 + $0x2c0] sm:$0xff]  ;;  %v3076_v43 = vld [vmem:[#allocation2 + $0x30e] sm:$0xff] }
 0x2c7   : > { %3648 = vrot.lane.b32.xlu0 %v3511_v49, %s7572_s26  ;;  %4349 = vst.msk [vmem:[#allocation3 + $0x430] sm:$0xff] %vm1304_vm4, %v4300_v53  ;;  %4350 = vst.msk [vmem:[#allocation3 + $0x448] sm:$0xff] %vm1304_vm4, %v4301_v44  ;;  %v3512_v37 = vpack.c.bf16 %v3455_v50, %v3454_v22  ;;  %v3846_v5 = vld [vmem:[#allocation2 + $0x2b9] sm:$0xff]  ;;  %v8703_v45 = vld [vmem:[#allocation2 + $0x2c1] sm:$0xff]  ;;  %v1747_v49 = vpack.c.bf16 %v8672_v23, %v8625_v18 }
 0x2c8   : > { %2375 = vst.msk [vmem:[#allocation3 + $0x2e8] sm:$0xff] %vm2343_vm6, %v2259_v62  ;;  %1885 = vrot.lane.b32.xlu1 %v1746_v63, %s7575_s27  ;;  %v3904_v44 = vpack.c.bf16 %v8703_v45, %v3846_v5  ;;  %v3066_v56 = vld [vmem:[#allocation2 + $0x2be] sm:$0xff]  ;;  %v2140_v63 = vpack.c.bf16 %v8519_v24, %v8497_v11  ;;  %v2475_v18 = vld [vmem:[#allocation2 + $0x2ac] sm:$0xff]  ;;  %v2476_v23 = vld [vmem:[#allocation2 + $0x2b4] sm:$0xff] }
 0x2c9   : > { %v4439_v51 = vld [vmem:[#allocation3 + $0x2a8] sm:$0xff]  ;;  %v3241_v6 = vpop.permute.xlu0 %3240  ;;  %2979 = vst.msk [vmem:[#allocation3 + $0x458] sm:$0xff] %vm1304_vm4, %v2930_v26  ;;  %2980 = vst.msk [vmem:[#allocation3 + $0x470] sm:$0xff] %vm1304_vm4, %v2931_v33  ;;  %v3456_v26 = vld [vmem:[#allocation2 + $0x2c8] sm:$0xff]  ;;  %v2532_v11 = vpack.c.bf16 %v2476_v23, %v2475_v18 }
 0x2ca   : > { %5055 = vmatprep.mubr.bf16.mxu1 %v4439_v51  ;;  %3356 = vst.msk [vmem:[#allocation3 + $0x2f0] sm:$0xff] %vm1950_vm5, %v3241_v6  ;;  %v2650_v27 = vpop.permute.xlu1 %2649  ;;  %v3457_v33 = vld [vmem:[#allocation2 + $0x2d0] sm:$0xff]  ;;  %v3458_v50 = vld [vmem:[#allocation2 + $0x2d8] sm:$0xff]  ;;  %v2000_v58 = vld [vmem:[#allocation2 + $0x2] sm:$0xff] }
 0x2cb   : > { %5056 = vmatmul.mubr.bf16.vlgmr.msra.gmra.mrb[0].mxu1 %v4438_v54  ;;  %4040 = vrot.lane.b32.xlu0 %v3903_v28, %s7573_s28  ;;  %1606 = vst.msk [vmem:[#allocation3 + $0x480] sm:$0xff] %vm1304_vm4, %v1557_v3  ;;  %v3513_v25 = vpack.c.bf16 %v3457_v33, %v3456_v26  ;;  %v3848_v6 = vld [vmem:[#allocation2 + $0x2c9] sm:$0xff]  ;;  %v8722_v54 = vld [vmem:[#allocation2 + $0x2d1] sm:$0xff]  ;;  %v1748_v3 = vpack.c.bf16 %v3846_v5, %v8674_v57  ;;  %v2477_v57 = vld [vmem:[#allocation2 + $0x2bc] sm:$0xff] }
 0x2cc   : > { %6875 = vmatpush3.bf16.msra.mxu1 %v7458_v61  ;;  %2767 = vst.msk [vmem:[#allocation3 + $0x2d0] sm:$0xff] %vm2736_vm7, %v2650_v27  ;;  %2278 = vrot.lane.b32.xlu1 %v2139_v36, %s7572_s26  ;;  %v3067_v61 = vld [vmem:[#allocation2 + $0x2c6] sm:$0xff]  ;;  %v3905_v4 = vpack.c.bf16 %v8722_v54, %v3848_v6  ;;  %v3068_v27 = vld [vmem:[#allocation2 + $0x2ce] sm:$0xff]  ;;  %v3069_v36 = vld [vmem:[#allocation2 + $0x2d6] sm:$0xff] }
 0x2cd   : > { %6876 = vmatprep.subr.bf16.mxu1 %v7569_v0  ;;  %v3631_v34 = vpop.permute.xlu0 %3630  ;;  %v4442_v52 = vld [vmem:[#allocation3 + $0x2c0] sm:$0xff]  ;;  %v3122_v17 = vpack.c.bf16 %v3067_v61, %v3066_v56  ;;  %v3123_v22 = vpack.c.bf16 %v3069_v36, %v3068_v27  ;;  %v3850_v5 = vld [vmem:[#allocation2 + $0x2d9] sm:$0xff]  ;;  %v2482_v36 = vld [vmem:[#allocation2 + $0x2e4] sm:$0xff] }
 0x2ce   : > { %3747 = vst.msk [vmem:[#allocation3 + $0x2d8] sm:$0xff] %vm2343_vm6, %v3631_v34  ;;  %5063 = vmatprep.mubr.bf16.mxu1 %v4442_v52  ;;  %v1868_v40 = vpop.permute.xlu1 %1867  ;;  %v2478_v34 = vld [vmem:[#allocation2 + $0x2c4] sm:$0xff]  ;;  %v2479_v18 = vld [vmem:[#allocation2 + $0x2cc] sm:$0xff]  ;;  %v2480_v23 = vld [vmem:[#allocation2 + $0x2d4] sm:$0xff] }
 0x2cf   : > { %3260 = vrot.lane.b32.xlu0 %v3121_v2, %s7575_s27  ;;  %1983 = vst.msk [vmem:[#allocation3 + $0x300] sm:$0xff] %vm1950_vm5, %v1868_v40  ;;  %v2533_v9 = vpack.c.bf16 %v2478_v34, %v2477_v57  ;;  %v3070_v61 = vld [vmem:[#allocation2 + $0x2de] sm:$0xff]  ;;  %v3461_v26 = vld [vmem:[#allocation2 + $0x2f0] sm:$0xff] }
 0x2d0   : > { %2669 = vrot.lane.b32.xlu1 %v2531_v21, %s7573_s28  ;;  %v3459_v21 = vld [vmem:[#allocation2 + $0x2e0] sm:$0xff]  ;;  %v3462_v34 = vld [vmem:[#allocation2 + $0x2f8] sm:$0xff] }
 0x2d1   : > { %v4023_v41 = vpop.permute.xlu0 %4022  ;;  %v2481_v27 = vld [vmem:[#allocation2 + $0x2dc] sm:$0xff] }
 0x2d2   : > { %4139 = vst.msk [vmem:[#allocation3 + $0x2d8] sm:$0xff] %vm2736_vm7, %v4023_v41  ;;  %v2261_v39 = vpop.permute.xlu1 %2260  ;;  %v7459_v41 = vld [vmem:[%s9986_s3 + $0x88] sm:$0xff]   ;;  %v3854_v14 = vld [vmem:[#allocation2 + $0x2f9] sm:$0xff] }
 0x2d3   : > { %5064 = vmatmul.mubr.bf16.gmra.mrb[4].mxu1 %v4441_v12  ;;  %3650 = vrot.lane.b32.xlu0 %v3512_v37, %s7572_s26  ;;  %2376 = vst.msk [vmem:[#allocation3 + $0x300] sm:$0xff] %vm2343_vm6, %v2261_v39  ;;  %v4444_v51 = vld [vmem:[#allocation3 + $0x2d0] sm:$0xff]  ;;  %v3514_v37 = vpack.c.bf16 %v3459_v21, %v3458_v50 }
 0x2d4   : > { %1887 = vrot.lane.b32.xlu1 %v1747_v49, %s7575_s27  ;;  %6877 = vmatpush3.bf16.msra.mxu1 %v7459_v41  ;;  %v8743_v39 = vld [vmem:[#allocation2 + $0x2e1] sm:$0xff] }
 0x2d5   : > { %v3243_v53 = vpop.permute.xlu0 %3242  ;;  %v3906_v56 = vpack.c.bf16 %v8743_v39, %v3850_v5  ;;  %v1751_v21 = vpack.c.bf16 %v3852_v55, %v8743_v39 }
 0x2d6   : > { %3357 = vst.msk [vmem:[#allocation3 + $0x308] sm:$0xff] %vm1950_vm5, %v3243_v53  ;;  %v2652_v62 = vpop.permute.xlu1 %2651  ;;  %v1749_v53 = vpack.c.bf16 %v3848_v6, %v8703_v45 }
 0x2d7   : > { %4042 = vrot.lane.b32.xlu0 %v3904_v44, %s7573_s28  ;;  %2768 = vst.msk [vmem:[#allocation3 + $0x2e8] sm:$0xff] %vm2736_vm7, %v2652_v62  ;;  %v3071_v62 = vld [vmem:[#allocation2 + $0x2e6] sm:$0xff] }
 0x2d8   : > { %2280 = vrot.lane.b32.xlu1 %v2140_v63, %s7572_s26 }
 0x2d9   : > { %v3633_v1 = vpop.permute.xlu0 %3632  ;;  %v4445_v15 = vld [vmem:[#allocation3 + $0x2d8] sm:$0xff] }
 0x2da   : > { %3748 = vst.msk [vmem:[#allocation3 + $0x2f0] sm:$0xff] %vm2343_vm6, %v3633_v1  ;;  %5071 = vmatprep.mubr.bf16.mxu1 %v4445_v15  ;;  %v1870_v20 = vpop.permute.xlu1 %1869  ;;  %v3124_v15 = vpack.c.bf16 %v3071_v62, %v3070_v61  ;;  %v8796_v61 = vld [vmem:[#allocation2 + $0x309] sm:$0xff]  ;;  %v3857_v62 = vld [vmem:[#allocation2 + $0x311] sm:$0xff] }
 0x2db   : > { %5072 = vmatmul.mubr.bf16.gmra.mrb[8].mxu1 %v4444_v51  ;;  %3262 = vrot.lane.b32.xlu0 %v3122_v17, %s7575_s27  ;;  %1984 = vst.msk [vmem:[#allocation3 + $0x318] sm:$0xff] %vm1950_vm5, %v1870_v20  ;;  %v3460_v51 = vld [vmem:[#allocation2 + $0x2e8] sm:$0xff]  ;;  %v2534_v20 = vpack.c.bf16 %v2480_v23, %v2479_v18 }
 0x2dc   : > { %2671 = vrot.lane.b32.xlu1 %v2532_v11, %s7573_s28  ;;  %v3515_v19 = vpack.c.bf16 %v3461_v26, %v3460_v51  ;;  %v3860_v23 = vld [vmem:[#allocation2 + $0x329] sm:$0xff] }
 0x2dd   : > { %v4025_v24 = vpop.permute.xlu0 %4024 }
 0x2de   : > { %4140 = vst.msk [vmem:[#allocation3 + $0x2f0] sm:$0xff] %vm2736_vm7, %v4025_v24  ;;  %v2263_v28 = vpop.permute.xlu1 %2262  ;;  %v4447_v40 = vld [vmem:[#allocation3 + $0x2e8] sm:$0xff] }
 0x2df   : > { %3652 = vrot.lane.b32.xlu0 %v3513_v25, %s7572_s26  ;;  %2377 = vst.msk [vmem:[#allocation3 + $0x318] sm:$0xff] %vm2343_vm6, %v2263_v28  ;;  %v1750_v25 = vpack.c.bf16 %v3850_v5, %v8722_v54  ;;  %v2483_v5 = vld [vmem:[#allocation2 + $0x2ec] sm:$0xff] }
 0x2e0   : > { %1889 = vrot.lane.b32.xlu1 %v1748_v3, %s7575_s27  ;;  %v3072_v3 = vld [vmem:[#allocation2 + $0x2ee] sm:$0xff] }
 0x2e1   : > { %v3245_v16 = vpop.permute.xlu0 %3244 }
 0x2e2   : > { %3358 = vst.msk [vmem:[#allocation3 + $0x320] sm:$0xff] %vm1950_vm5, %v3245_v16  ;;  %v2654_v29 = vpop.permute.xlu1 %2653  ;;  %v3073_v16 = vld [vmem:[#allocation2 + $0x2f6] sm:$0xff] }
 0x2e3   : > { %4044 = vrot.lane.b32.xlu0 %v3905_v4, %s7573_s28  ;;  %2769 = vst.msk [vmem:[#allocation3 + $0x300] sm:$0xff] %vm2736_vm7, %v2654_v29 }
 0x2e4   : > { %2282 = vrot.lane.b32.xlu1 %v2141_v30, %s7572_s26  ;;  %v3125_v30 = vpack.c.bf16 %v3073_v16, %v3072_v3 }
 0x2e5   : > { %v3635_v52 = vpop.permute.xlu0 %3634  ;;  %v4448_v2 = vld [vmem:[#allocation3 + $0x2f0] sm:$0xff] }
 0x2e6   : > { %3749 = vst.msk [vmem:[#allocation3 + $0x308] sm:$0xff] %vm2343_vm6, %v3635_v52  ;;  %5079 = vmatprep.mubr.bf16.mxu1 %v4448_v2  ;;  %v1872_v10 = vpop.permute.xlu1 %1871  ;;  %v3463_v52 = vld [vmem:[#allocation2 + $0x300] sm:$0xff] }
 0x2e7   : > { %5080 = vmatmul.mubr.bf16.gmra.mrb[12].mxu1 %v4447_v40  ;;  %3264 = vrot.lane.b32.xlu0 %v3123_v22, %s7575_s27  ;;  %1985 = vst.msk [vmem:[#allocation3 + $0x330] sm:$0xff] %vm1950_vm5, %v1872_v10  ;;  %v2535_v22 = vpack.c.bf16 %v2482_v36, %v2481_v27  ;;  %v3516_v60 = vpack.c.bf16 %v3463_v52, %v3462_v34  ;;  %v2490_v27 = vld [vmem:[#allocation2 + $0x324] sm:$0xff]  ;;  %v2488_v34 = vld [vmem:[#allocation2 + $0x314] sm:$0xff]  ;;  %v2487_v52 = vld [vmem:[#allocation2 + $0x30c] sm:$0xff] }
 0x2e8   : > { %2673 = vrot.lane.b32.xlu1 %v2533_v9, %s7573_s28  ;;  %v3464_v9 = vld [vmem:[#allocation2 + $0x308] sm:$0xff] }
 0x2e9   : > { %v4027_v12 = vpop.permute.xlu0 %4026 }
 0x2ea   : > { %4141 = vst.msk [vmem:[#allocation3 + $0x308] sm:$0xff] %vm2736_vm7, %v4027_v12  ;;  %v2265_v49 = vpop.permute.xlu1 %2264  ;;  %v4450_v17 = vld [vmem:[#allocation3 + $0x300] sm:$0xff] }
 0x2eb   : > { %3654 = vrot.lane.b32.xlu0 %v3514_v37, %s7572_s26  ;;  %2378 = vst.msk [vmem:[#allocation3 + $0x330] sm:$0xff] %vm2343_vm6, %v2265_v49  ;;  %v3465_v12 = vld [vmem:[#allocation2 + $0x310] sm:$0xff] }
 0x2ec   : > { %1891 = vrot.lane.b32.xlu1 %v1749_v53, %s7575_s27  ;;  %v2484_v49 = vld [vmem:[#allocation2 + $0x2f4] sm:$0xff] }
 0x2ed   : > { %v3247_v44 = vpop.permute.xlu0 %3246  ;;  %v2536_v18 = vpack.c.bf16 %v2484_v49, %v2483_v5 }
 0x2ee   : > { %3359 = vst.msk [vmem:[#allocation3 + $0x338] sm:$0xff] %vm1950_vm5, %v3247_v44  ;;  %v2656_v63 = vpop.permute.xlu1 %2655  ;;  %v3517_v44 = vpack.c.bf16 %v3465_v12, %v3464_v9 }
 0x2ef   : > { %4046 = vrot.lane.b32.xlu0 %v3906_v56, %s7573_s28  ;;  %2770 = vst.msk [vmem:[#allocation3 + $0x318] sm:$0xff] %vm2736_vm7, %v2656_v63 }
 0x2f0   : > { %2284 = vrot.lane.b32.xlu1 %v2142_v59, %s7572_s26  ;;  %v8762_v59 = vld [vmem:[#allocation2 + $0x2f1] sm:$0xff] }
 0x2f1   : > { %v3637_v1 = vpop.permute.xlu0 %3636  ;;  %v4451_v45 = vld [vmem:[#allocation3 + $0x308] sm:$0xff]  ;;  %v3907_v28 = vpack.c.bf16 %v8762_v59, %v3852_v55  ;;  %v1752_v51 = vpack.c.bf16 %v3854_v14, %v8762_v59  ;;  %v2486_v59 = vld [vmem:[#allocation2 + $0x304] sm:$0xff] }
 0x2f2   : > { %3750 = vst.msk [vmem:[#allocation3 + $0x320] sm:$0xff] %vm2343_vm6, %v3637_v1  ;;  %5087 = vmatprep.mubr.bf16.mxu1 %v4451_v45  ;;  %v1874_v33 = vpop.permute.xlu1 %1873  ;;  %v3861_v1 = vld [vmem:[#allocation2 + $0x331] sm:$0xff]  ;;  %v3909_v45 = vpack.c.bf16 %v3857_v62, %v8796_v61  ;;  %v3078_v55 = vld [vmem:[#allocation2 + $0x31e] sm:$0xff] }
 0x2f3   : > { %5088 = vmatmul.mubr.bf16.gmra.mrb[16].mxu1 %v4450_v17  ;;  %3266 = vrot.lane.b32.xlu0 %v3124_v15, %s7575_s27  ;;  %1986 = vst.msk [vmem:[#allocation3 + $0x348] sm:$0xff] %vm1950_vm5, %v1874_v33  ;;  %v2932_v15 = vpack.c.bf16 %v2883_v13, %v2882_v38  ;;  %v3911_v26 = vpack.c.bf16 %v3861_v1, %v3860_v23  ;;  %v2982_v62 = vld [vmem:[#allocation2 + $0x1e] sm:$0xff] }
 0x2f4   : > { %2675 = vrot.lane.b32.xlu1 %v2534_v20, %s7573_s28  ;;  %v3074_v20 = vld [vmem:[#allocation2 + $0x2fe] sm:$0xff] }
 0x2f5   : > { %v4029_v11 = vpop.permute.xlu0 %4028  ;;  %2981 = vst.msk [vmem:[#allocation3 + $0x488] sm:$0xff] %vm1304_vm4, %v2932_v15  ;;  %v3375_v23 = vld [vmem:[#allocation2 + $0x40] sm:$0xff]  ;;  %v3374_v13 = vld [vmem:[#allocation2 + $0x38] sm:$0xff] }
 0x2f6   : > { %4142 = vst.msk [vmem:[#allocation3 + $0x320] sm:$0xff] %vm2736_vm7, %v4029_v11  ;;  %v2267_v24 = vpop.permute.xlu1 %2266  ;;  %v4453_v57 = vld [vmem:[#allocation3 + $0x318] sm:$0xff] }
 0x2f7   : > { %3656 = vrot.lane.b32.xlu0 %v3515_v19, %s7572_s26  ;;  %2379 = vst.msk [vmem:[#allocation3 + $0x348] sm:$0xff] %vm2343_vm6, %v2267_v24  ;;  %v3075_v11 = vld [vmem:[#allocation2 + $0x306] sm:$0xff]  ;;  %v2485_v24 = vld [vmem:[#allocation2 + $0x2fc] sm:$0xff] }
 0x2f8   : > { %1893 = vrot.lane.b32.xlu1 %v1750_v25, %s7575_s27  ;;  %v3079_v25 = vld [vmem:[#allocation2 + $0x326] sm:$0xff]  ;;  %v3126_v3 = vpack.c.bf16 %v3075_v11, %v3074_v20 }
 0x2f9   : > { %v3249_v6 = vpop.permute.xlu0 %3248  ;;  %v2394_v20 = vld [vmem:[#allocation2 + $0x24] sm:$0xff] }
 0x2fa   : > { %3360 = vst.msk [vmem:[#allocation3 + $0x350] sm:$0xff] %vm1950_vm5, %v3249_v6  ;;  %v2658_v4 = vpop.permute.xlu1 %2657 }
 0x2fb   : > { %4048 = vrot.lane.b32.xlu0 %v3907_v28, %s7573_s28  ;;  %2771 = vst.msk [vmem:[#allocation3 + $0x330] sm:$0xff] %vm2736_vm7, %v2658_v4  ;;  %v2489_v4 = vld [vmem:[#allocation2 + $0x31c] sm:$0xff] }
 0x2fc   : > { %2286 = vrot.lane.b32.xlu1 %v2143_v35, %s7572_s26  ;;  %v8781_v35 = vld [vmem:[#allocation2 + $0x301] sm:$0xff]  ;;  %v2539_v47 = vpack.c.bf16 %v2490_v27, %v2489_v4  ;;  %v1609_v4 = vld [vmem:[#allocation2 + $0x11] sm:$0xff] }
 0x2fd   : > { %v3639_v29 = vpop.permute.xlu0 %3638  ;;  %v4454_v54 = vld [vmem:[#allocation3 + $0x320] sm:$0xff]  ;;  %v3908_v10 = vpack.c.bf16 %v8781_v35, %v3854_v14  ;;  %v1753_v49 = vpack.c.bf16 %v8796_v61, %v8781_v35  ;;  %v1607_v61 = vld [vmem:[#allocation2 + $0x1] sm:$0xff] }
 0x2fe   : > { %3751 = vst.msk [vmem:[#allocation3 + $0x338] sm:$0xff] %vm2343_vm6, %v3639_v29  ;;  %5095 = vmatprep.mubr.bf16.mxu1 %v4454_v54  ;;  %v1876_v2 = vpop.permute.xlu1 %1875  ;;  %v2537_v29 = vpack.c.bf16 %v2486_v59, %v2485_v24  ;;  %v3128_v54 = vpack.c.bf16 %v3079_v25, %v3078_v55  ;;  %v2393_v55 = vld [vmem:[#allocation2 + $0x1c] sm:$0xff]  ;;  %v3377_v27 = vld [vmem:[#allocation2 + $0x50] sm:$0xff] }
 0x2ff   : > { %5096 = vmatmul.mubr.bf16.gmra.mrb[20].mxu1 %v4453_v57  ;;  %3268 = vrot.lane.b32.xlu0 %v3125_v30, %s7575_s27  ;;  %1987 = vst.msk [vmem:[#allocation3 + $0x360] sm:$0xff] %vm1950_vm5, %v1876_v2  ;;  %v3470_v2 = vld [vmem:[#allocation2 + $0x338] sm:$0xff]  ;;  %v2491_v25 = vpack.c.bf16 %v2394_v20, %v2393_v55 }
 0x300   : > { %2677 = vrot.lane.b32.xlu1 %v2535_v22, %s7573_s28  ;;  %v3471_v22 = vld [vmem:[#allocation2 + $0x340] sm:$0xff]  ;;  %v2985_v24 = vld [vmem:[#allocation2 + $0x36] sm:$0xff] }
 0x301   : > { %v4031_v50 = vpop.permute.xlu0 %4030 }
 0x302   : > { %4143 = vst.msk [vmem:[#allocation3 + $0x338] sm:$0xff] %vm2736_vm7, %v4031_v50  ;;  %v2269_v40 = vpop.permute.xlu1 %2268  ;;  %v4456_v56 = vld [vmem:[#allocation3 + $0x330] sm:$0xff] }
 0x303   : > { %3658 = vrot.lane.b32.xlu0 %v3516_v60, %s7572_s26  ;;  %2380 = vst.msk [vmem:[#allocation3 + $0x360] sm:$0xff] %vm2343_vm6, %v2269_v40  ;;  %v2538_v40 = vpack.c.bf16 %v2488_v34, %v2487_v52  ;;  %v2002_v34 = vld [vmem:[#allocation2 + $0x12] sm:$0xff] }
 0x304   : > { %1895 = vrot.lane.b32.xlu1 %v1751_v21, %s7575_s27  ;;  %v3520_v21 = vpack.c.bf16 %v3471_v22, %v3470_v2  ;;  %v8863_v52 = vld [vmem:[#allocation2 + $0x51] sm:$0xff] }
 0x305   : > { %v3251_v41 = vpop.permute.xlu0 %3250 }
 0x306   : > { %3361 = vst.msk [vmem:[#allocation3 + $0x368] sm:$0xff] %vm1950_vm5, %v3251_v41  ;;  %v2660_v37 = vpop.permute.xlu1 %2659  ;;  %v3862_v41 = vld [vmem:[#allocation2 + $0x339] sm:$0xff] }
 0x307   : > { %4050 = vrot.lane.b32.xlu0 %v3908_v10, %s7573_s28  ;;  %2772 = vst.msk [vmem:[#allocation3 + $0x348] sm:$0xff] %vm2736_vm7, %v2660_v37  ;;  %v3863_v10 = vld [vmem:[#allocation2 + $0x341] sm:$0xff] }
 0x308   : > { %2288 = vrot.lane.b32.xlu1 %v2144_v32, %s7572_s26 }
 0x309   : > { %v3641_v53 = vpop.permute.xlu0 %3640  ;;  %v4457_v39 = vld [vmem:[#allocation3 + $0x338] sm:$0xff] }
 0x30a   : > { %3752 = vst.msk [vmem:[#allocation3 + $0x350] sm:$0xff] %vm2343_vm6, %v3641_v53  ;;  %5103 = vmatprep.mubr.bf16.mxu1 %v4457_v39  ;;  %v1878_v63 = vpop.permute.xlu1 %1877  ;;  %v3912_v53 = vpack.c.bf16 %v3863_v10, %v3862_v41  ;;  %v2987_v41 = vld [vmem:[#allocation2 + $0x46] sm:$0xff] }
 0x30b   : > { %5104 = vmatmul.mubr.bf16.gmra.mrb[24].mxu1 %v4456_v56  ;;  %3660 = vrot.lane.b32.xlu0 %v3517_v44, %s7572_s26  ;;  %1988 = vst.msk [vmem:[#allocation3 + $0x378] sm:$0xff] %vm1950_vm5, %v1878_v63  ;;  %v2983_v44 = vld [vmem:[#allocation2 + $0x26] sm:$0xff] }
 0x30c   : > { %2679 = vrot.lane.b32.xlu1 %v2536_v18, %s7573_s28  ;;  %v1608_v63 = vld [vmem:[#allocation2 + $0x9] sm:$0xff]  ;;  %v3080_v35 = vpack.c.bf16 %v2983_v44, %v2982_v62  ;;  %v3378_v62 = vld [vmem:[#allocation2 + $0x58] sm:$0xff] }
 0x30d   : > { %v4033_v32 = vpop.permute.xlu0 %4032  ;;  %v1705_v38 = vpack.c.bf16 %v1608_v63, %v1607_v61  ;;  %v2005_v63 = vld [vmem:[#allocation2 + $0x2a] sm:$0xff] }
 0x30e   : > { %4144 = vst.msk [vmem:[#allocation3 + $0x350] sm:$0xff] %vm2736_vm7, %v4033_v32  ;;  %v2271_v17 = vpop.permute.xlu1 %2270  ;;  %v4459_v16 = vld [vmem:[#allocation3 + $0x348] sm:$0xff]  ;;  %v2001_v32 = vld [vmem:[#allocation2 + $0xa] sm:$0xff] }
 0x30f   : > { %4052 = vrot.lane.b32.xlu0 %v3909_v45, %s7573_s28  ;;  %2381 = vst.msk [vmem:[#allocation3 + $0x378] sm:$0xff] %vm2343_vm6, %v2271_v17  ;;  %v3472_v17 = vpack.c.bf16 %v3375_v23, %v3374_v13 }
 0x310   : > { %1897 = vrot.lane.b32.xlu1 %v1752_v51, %s7575_s27 }
 0x311   : > { %v3253_v33 = vpop.permute.xlu0 %3252 }
 0x312   : > { %3362 = vst.msk [vmem:[#allocation3 + $0x380] sm:$0xff] %vm1950_vm5, %v3253_v33  ;;  %v2662_v19 = vpop.permute.xlu1 %2661  ;;  %v8849_v33 = vld [vmem:[#allocation2 + $0x39] sm:$0xff] }
 0x313   : > { %4056 = vrot.lane.b32.xlu0 %v3911_v26, %s7573_s28  ;;  %2773 = vst.msk [vmem:[#allocation3 + $0x360] sm:$0xff] %vm2736_vm7, %v2662_v19  ;;  %v2098_v26 = vpack.c.bf16 %v2001_v32, %v2000_v58  ;;  %v2397_v58 = vld [vmem:[#allocation2 + $0x3c] sm:$0xff] }
 0x314   : > { %2290 = vrot.lane.b32.xlu1 %v2145_v46, %s7572_s26  ;;  %v3077_v46 = vld [vmem:[#allocation2 + $0x316] sm:$0xff] }
 0x315   : > { %v3643_v6 = vpop.permute.xlu0 %3642  ;;  %v4460_v28 = vld [vmem:[#allocation3 + $0x350] sm:$0xff]  ;;  %v3127_v60 = vpack.c.bf16 %v3077_v46, %v3076_v43 }
 0x316   : > { %3753 = vst.msk [vmem:[#allocation3 + $0x368] sm:$0xff] %vm2343_vm6, %v3643_v6  ;;  %5111 = vmatprep.mubr.bf16.mxu1 %v4460_v28  ;;  %v1880_v36 = vpop.permute.xlu1 %1879  ;;  %v2984_v6 = vld [vmem:[#allocation2 + $0x2e] sm:$0xff]  ;;  %v1610_v28 = vld [vmem:[#allocation2 + $0x19] sm:$0xff] }
 0x317   : > { %5112 = vmatmul.mubr.bf16.gmra.mrb[28].mxu1 %v4459_v16  ;;  %3270 = vrot.lane.b32.xlu0 %v3126_v3, %s7575_s27  ;;  %1989 = vst.msk [vmem:[#allocation3 + $0x390] sm:$0xff] %vm1950_vm5, %v1880_v36  ;;  %v3081_v16 = vpack.c.bf16 %v2985_v24, %v2984_v6  ;;  %v1613_v24 = vld [vmem:[#allocation2 + $0x31] sm:$0xff] }
 0x318   : > { %2681 = vrot.lane.b32.xlu1 %v2537_v29, %s7573_s28  ;;  %v1706_v29 = vpack.c.bf16 %v1610_v28, %v1609_v4  ;;  %v1708_v6 = vpack.c.bf16 %v8849_v33, %v1613_v24  ;;  %v3380_v28 = vld [vmem:[#allocation2 + $0x68] sm:$0xff] }
 0x319   : > { %v4035_v30 = vpop.permute.xlu0 %4034 }
 0x31a   : > { %4145 = vst.msk [vmem:[#allocation3 + $0x368] sm:$0xff] %vm2736_vm7, %v4035_v30  ;;  %v2273_v57 = vpop.permute.xlu1 %2272  ;;  %v4462_v37 = vld [vmem:[#allocation3 + $0x360] sm:$0xff]  ;;  %v2003_v30 = vld [vmem:[#allocation2 + $0x1a] sm:$0xff] }
 0x31b   : > { %3274 = vrot.lane.b32.xlu0 %v3128_v54, %s7575_s27  ;;  %2382 = vst.msk [vmem:[#allocation3 + $0x390] sm:$0xff] %vm2343_vm6, %v2273_v57  ;;  %v3376_v54 = vld [vmem:[#allocation2 + $0x48] sm:$0xff]  ;;  %v2099_v22 = vpack.c.bf16 %v2003_v30, %v2002_v34 }
 0x31c   : > { %2685 = vrot.lane.b32.xlu1 %v2539_v47, %s7573_s28  ;;  %v3473_v46 = vpack.c.bf16 %v3377_v27, %v3376_v54  ;;  %v8900_v54 = vld [vmem:[#allocation2 + $0x71] sm:$0xff] }
 0x31d   : > { %v3255_v50 = vpop.permute.xlu0 %3254  ;;  %v2399_v34 = vld [vmem:[#allocation2 + $0x4c] sm:$0xff] }
 0x31e   : > { %3363 = vst.msk [vmem:[#allocation3 + $0x398] sm:$0xff] %vm1950_vm5, %v3255_v50  ;;  %v2664_v14 = vpop.permute.xlu1 %2663  ;;  %v8867_v50 = vld [vmem:[#allocation2 + $0x49] sm:$0xff] }
 0x31f   : > { %3272 = vrot.lane.b32.xlu0 %v3127_v60, %s7575_s27  ;;  %2774 = vst.msk [vmem:[#allocation3 + $0x378] sm:$0xff] %vm2736_vm7, %v2664_v14  ;;  %v2396_v60 = vld [vmem:[#allocation2 + $0x34] sm:$0xff] }
 0x320   : > { %2683 = vrot.lane.b32.xlu1 %v2538_v40, %s7573_s28  ;;  %v3865_v40 = vpack.c.bf16 %v8863_v52, %v8867_v50 }
 0x321   : > { %v3645_v9 = vpop.permute.xlu0 %3644  ;;  %v4463_v12 = vld [vmem:[#allocation3 + $0x368] sm:$0xff] }
 0x322   : > { %3754 = vst.msk [vmem:[#allocation3 + $0x380] sm:$0xff] %vm2343_vm6, %v3645_v9  ;;  %5119 = vmatprep.mubr.bf16.mxu1 %v4463_v12  ;;  %v1882_v5 = vpop.permute.xlu1 %1881  ;;  %v2986_v12 = vld [vmem:[#allocation2 + $0x3e] sm:$0xff] }
 0x323   : > { %5120 = vmatmul.mubr.bf16.gmra.mrb[32].mxu1 %v4462_v37  ;;  %3666 = vrot.lane.b32.xlu0 %v3520_v21, %s7572_s26  ;;  %1990 = vst.msk [vmem:[#allocation3 + $0x3a8] sm:$0xff] %vm1950_vm5, %v1882_v5  ;;  %v2395_v21 = vld [vmem:[#allocation2 + $0x2c] sm:$0xff] }
 0x324   : > { %1899 = vrot.lane.b32.xlu1 %v1753_v49, %s7575_s27  ;;  %v2492_v9 = vpack.c.bf16 %v2396_v60, %v2395_v21  ;;  %v1612_v37 = vld [vmem:[#allocation2 + $0x29] sm:$0xff]  ;;  %v3082_v49 = vpack.c.bf16 %v2987_v41, %v2986_v12  ;;  %v3383_v41 = vld [vmem:[#allocation2 + $0x80] sm:$0xff]  ;;  %v3382_v12 = vld [vmem:[#allocation2 + $0x78] sm:$0xff] }
 0x325   : > { %v4037_v39 = vpop.permute.xlu0 %4036 }
 0x326   : > { %4146 = vst.msk [vmem:[#allocation3 + $0x380] sm:$0xff] %vm2736_vm7, %v4037_v39  ;;  %v2275_v56 = vpop.permute.xlu1 %2274  ;;  %v4465_v48 = vld [vmem:[#allocation3 + $0x378] sm:$0xff]  ;;  %v3379_v39 = vld [vmem:[#allocation2 + $0x60] sm:$0xff] }
 0x327   : > { %4058 = vrot.lane.b32.xlu0 %v3912_v53, %s7573_s28  ;;  %2383 = vst.msk [vmem:[#allocation3 + $0x3a8] sm:$0xff] %vm2343_vm6, %v2275_v56  ;;  %v1611_v53 = vld [vmem:[#allocation2 + $0x21] sm:$0xff]  ;;  %v3474_v61 = vpack.c.bf16 %v3379_v39, %v3378_v62 }
 0x328   : > { %2292 = vrot.lane.b32.xlu1 %v2146_v8, %s7572_s26  ;;  %v8845_v8 = vld [vmem:[#allocation2 + $0x41] sm:$0xff]  ;;  %v1707_v56 = vpack.c.bf16 %v1612_v37, %v1611_v53  ;;  %v2009_v37 = vld [vmem:[#allocation2 + $0x4a] sm:$0xff]  ;;  %v3476_v53 = vpack.c.bf16 %v3383_v41, %v3382_v12 }
 0x329   : > { %v3257_v18 = vpop.permute.xlu0 %3256  ;;  %v3864_v19 = vpack.c.bf16 %v8845_v8, %v8849_v33  ;;  %v2012_v41 = vld [vmem:[#allocation2 + $0x62] sm:$0xff] }
 0x32a   : > { %3364 = vst.msk [vmem:[#allocation3 + $0x3b0] sm:$0xff] %vm1950_vm5, %v3257_v18  ;;  %v2666_v1 = vpop.permute.xlu1 %2665  ;;  %v2406_v12 = vld [vmem:[#allocation2 + $0x84] sm:$0xff] }
 0x32b   : > { %3178 = vrot.lane.b32.xlu0 %v3080_v35, %s7575_s27  ;;  %2775 = vst.msk [vmem:[#allocation3 + $0x390] sm:$0xff] %vm2736_vm7, %v2666_v1  ;;  %v2004_v1 = vld [vmem:[#allocation2 + $0x22] sm:$0xff] }
 0x32c   : > { %1803 = vrot.lane.b32.xlu1 %v1705_v38, %s7575_s27  ;;  %v8881_v38 = vld [vmem:[#allocation2 + $0x61] sm:$0xff]  ;;  %v2100_v32 = vpack.c.bf16 %v2005_v63, %v2004_v1 }
 0x32d   : > { %v3647_v45 = vpop.permute.xlu0 %3646  ;;  %v4466_v15 = vld [vmem:[#allocation3 + $0x380] sm:$0xff]  ;;  %v2402_v63 = vld [vmem:[#allocation2 + $0x64] sm:$0xff] }
 0x32e   : > { %3755 = vst.msk [vmem:[#allocation3 + $0x398] sm:$0xff] %vm2343_vm6, %v3647_v45  ;;  %5127 = vmatprep.mubr.bf16.mxu1 %v4466_v15  ;;  %v1884_v51 = vpop.permute.xlu1 %1883  ;;  %v8885_v45 = vld [vmem:[#allocation2 + $0x59] sm:$0xff]  ;;  %v2398_v15 = vld [vmem:[#allocation2 + $0x44] sm:$0xff] }
 0x32f   : > { %5128 = vmatmul.mubr.bf16.gmra.mrb[36].mxu1 %v4465_v48  ;;  %3570 = vrot.lane.b32.xlu0 %v3472_v17, %s7572_s26  ;;  %1991 = vst.msk [vmem:[#allocation3 + $0x3c0] sm:$0xff] %vm1950_vm5, %v1884_v51  ;;  %v3866_v48 = vpack.c.bf16 %v8881_v38, %v8885_v45  ;;  %v2989_v51 = vld [vmem:[#allocation2 + $0x56] sm:$0xff]  ;;  %v2493_v20 = vpack.c.bf16 %v2398_v15, %v2397_v58 }
 0x330   : > { %2196 = vrot.lane.b32.xlu1 %v2098_v26, %s7572_s26 }
 0x331   : > { %v4039_v11 = vpop.permute.xlu0 %4038 }
 0x332   : > { %4147 = vst.msk [vmem:[#allocation3 + $0x398] sm:$0xff] %vm2736_vm7, %v4039_v11  ;;  %v2277_v59 = vpop.permute.xlu1 %2276  ;;  %v4468_v57 = vld [vmem:[#allocation3 + $0x390] sm:$0xff]  ;;  %v2988_v11 = vld [vmem:[#allocation2 + $0x4e] sm:$0xff] }
 0x333   : > { %3962 = vrot.lane.b32.xlu0 %v3864_v19, %s7573_s28  ;;  %2384 = vst.msk [vmem:[#allocation3 + $0x3c0] sm:$0xff] %vm2343_vm6, %v2277_v59  ;;  %v3083_v55 = vpack.c.bf16 %v2989_v51, %v2988_v11  ;;  %v3381_v59 = vld [vmem:[#allocation2 + $0x70] sm:$0xff]  ;;  %v1710_v51 = vpack.c.bf16 %v8885_v45, %v8863_v52 }
 0x334   : > { %2589 = vrot.lane.b32.xlu1 %v2491_v25, %s7573_s28  ;;  %v3475_v27 = vpack.c.bf16 %v3381_v59, %v3380_v28  ;;  %v2010_v59 = vld [vmem:[#allocation2 + $0x52] sm:$0xff]  ;;  %v8944_v45 = vld [vmem:[#allocation2 + $0x89] sm:$0xff] }
 0x335   : > { %v3259_v3 = vpop.permute.xlu0 %3258  ;;  %v2404_v28 = vld [vmem:[#allocation2 + $0x74] sm:$0xff] }
 0x336   : > { %3365 = vst.msk [vmem:[#allocation3 + $0x3c8] sm:$0xff] %vm1950_vm5, %v3259_v3  ;;  %v2668_v36 = vpop.permute.xlu1 %2667  ;;  %v2007_v3 = vld [vmem:[#allocation2 + $0x3a] sm:$0xff] }
 0x337   : > { %3180 = vrot.lane.b32.xlu0 %v3081_v16, %s7575_s27  ;;  %2776 = vst.msk [vmem:[#allocation3 + $0x3a8] sm:$0xff] %vm2736_vm7, %v2668_v36 }
 0x338   : > { %1805 = vrot.lane.b32.xlu1 %v1706_v29, %s7575_s27  ;;  %v2006_v29 = vld [vmem:[#allocation2 + $0x32] sm:$0xff] }
 0x339   : > { %v3649_v47 = vpop.permute.xlu0 %3648  ;;  %v4469_v43 = vld [vmem:[#allocation3 + $0x398] sm:$0xff]  ;;  %v2101_v33 = vpack.c.bf16 %v2007_v3, %v2006_v29 }
 0x33a   : > { %3756 = vst.msk [vmem:[#allocation3 + $0x3b0] sm:$0xff] %vm2343_vm6, %v3649_v47  ;;  %5135 = vmatprep.mubr.bf16.mxu1 %v4469_v43  ;;  %v1886_v2 = vpop.permute.xlu1 %1885  ;;  %v8904_v47 = vld [vmem:[#allocation2 + $0x69] sm:$0xff]  ;;  %v2400_v43 = vld [vmem:[#allocation2 + $0x54] sm:$0xff] }
 0x33b   : > { %5136 = vmatmul.mubr.bf16.gmra.mrb[40].mxu1 %v4468_v57  ;;  %3572 = vrot.lane.b32.xlu0 %v3473_v46, %s7572_s26  ;;  %1992 = vst.msk [vmem:[#allocation3 + $0x3d8] sm:$0xff] %vm1950_vm5, %v1886_v2  ;;  %v3867_v57 = vpack.c.bf16 %v8900_v54, %v8904_v47  ;;  %v2991_v2 = vld [vmem:[#allocation2 + $0x66] sm:$0xff]  ;;  %v2494_v60 = vpack.c.bf16 %v2400_v43, %v2399_v34 }
 0x33c   : > { %2198 = vrot.lane.b32.xlu1 %v2099_v22, %s7572_s26  ;;  %v1711_v34 = vpack.c.bf16 %v8904_v47, %v8881_v38  ;;  %v8964_v47 = vld [vmem:[#allocation2 + $0x99] sm:$0xff] }
 0x33d   : > { %v4041_v14 = vpop.permute.xlu0 %4040 }
 0x33e   : > { %4148 = vst.msk [vmem:[#allocation3 + $0x3b0] sm:$0xff] %vm2736_vm7, %v4041_v14  ;;  %v2279_v10 = vpop.permute.xlu1 %2278  ;;  %v4471_v23 = vld [vmem:[#allocation3 + $0x3a8] sm:$0xff] }
 0x33f   : > { %3964 = vrot.lane.b32.xlu0 %v3865_v40, %s7573_s28  ;;  %2385 = vst.msk [vmem:[#allocation3 + $0x3d8] sm:$0xff] %vm2343_vm6, %v2279_v10  ;;  %v2990_v14 = vld [vmem:[#allocation2 + $0x5e] sm:$0xff] }
 0x340   : > { %2591 = vrot.lane.b32.xlu1 %v2492_v9, %s7573_s28  ;;  %v3084_v21 = vpack.c.bf16 %v2991_v2, %v2990_v14  ;;  %v1709_v9 = vpack.c.bf16 %v8867_v50, %v8845_v8  ;;  %v8924_v50 = vld [vmem:[#allocation2 + $0x79] sm:$0xff] }
 0x341   : > { %v3261_v5 = vpop.permute.xlu0 %3260  ;;  %v3386_v2 = vld [vmem:[#allocation2 + $0x98] sm:$0xff] }
 0x342   : > { %3366 = vst.msk [vmem:[#allocation3 + $0x3e0] sm:$0xff] %vm1950_vm5, %v3261_v5  ;;  %v2670_v44 = vpop.permute.xlu1 %2669 }
 0x343   : > { %3182 = vrot.lane.b32.xlu0 %v3082_v49, %s7575_s27  ;;  %2777 = vst.msk [vmem:[#allocation3 + $0x3c0] sm:$0xff] %vm2736_vm7, %v2670_v44  ;;  %v2008_v44 = vld [vmem:[#allocation2 + $0x42] sm:$0xff] }
 0x344   : > { %1807 = vrot.lane.b32.xlu1 %v1707_v56, %s7575_s27  ;;  %v8920_v56 = vld [vmem:[#allocation2 + $0x81] sm:$0xff]  ;;  %v2102_v8 = vpack.c.bf16 %v2009_v37, %v2008_v44 }
 0x345   : > { %v3651_v18 = vpop.permute.xlu0 %3650  ;;  %v4472_v35 = vld [vmem:[#allocation3 + $0x3b0] sm:$0xff] }
 0x346   : > { %3757 = vst.msk [vmem:[#allocation3 + $0x3c8] sm:$0xff] %vm2343_vm6, %v3651_v18  ;;  %5143 = vmatprep.mubr.bf16.mxu1 %v4472_v35  ;;  %v1888_v13 = vpop.permute.xlu1 %1887  ;;  %v3868_v35 = vpack.c.bf16 %v8920_v56, %v8924_v50 }
 0x347   : > { %5144 = vmatmul.mubr.bf16.gmra.mrb[44].mxu1 %v4471_v23  ;;  %3574 = vrot.lane.b32.xlu0 %v3474_v61, %s7572_s26  ;;  %1993 = vst.msk [vmem:[#allocation3 + $0x3f0] sm:$0xff] %vm1950_vm5, %v1888_v13  ;;  %v2401_v61 = vld [vmem:[#allocation2 + $0x5c] sm:$0xff] }
 0x348   : > { %2200 = vrot.lane.b32.xlu1 %v2100_v32, %s7572_s26  ;;  %v2993_v23 = vld [vmem:[#allocation2 + $0x76] sm:$0xff]  ;;  %v2495_v13 = vpack.c.bf16 %v2402_v63, %v2401_v61  ;;  %v2992_v32 = vld [vmem:[#allocation2 + $0x6e] sm:$0xff]  ;;  %v1712_v61 = vpack.c.bf16 %v8924_v50, %v8900_v54 }
 0x349   : > { %v4043_v17 = vpop.permute.xlu0 %4042  ;;  %v8984_v50 = vld [vmem:[#allocation2 + $0xa9] sm:$0xff] }
 0x34a   : > { %4149 = vst.msk [vmem:[#allocation3 + $0x3c8] sm:$0xff] %vm2736_vm7, %v4043_v17  ;;  %v2281_v26 = vpop.permute.xlu1 %2280  ;;  %v4474_v36 = vld [vmem:[#allocation3 + $0x3c0] sm:$0xff]  ;;  %v3085_v17 = vpack.c.bf16 %v2993_v23, %v2992_v32  ;;  %v3388_v23 = vld [vmem:[#allocation2 + $0xa8] sm:$0xff] }
 0x34b   : > { %3966 = vrot.lane.b32.xlu0 %v3866_v48, %s7573_s28  ;;  %2386 = vst.msk [vmem:[#allocation3 + $0x3f0] sm:$0xff] %vm2343_vm6, %v2281_v26  ;;  %v3385_v48 = vld [vmem:[#allocation2 + $0x90] sm:$0xff]  ;;  %v3384_v26 = vld [vmem:[#allocation2 + $0x88] sm:$0xff] }
 0x34c   : > { %2593 = vrot.lane.b32.xlu1 %v2493_v20, %s7573_s28  ;;  %v2011_v20 = vld [vmem:[#allocation2 + $0x5a] sm:$0xff] }
 0x34d   : > { %v3263_v19 = vpop.permute.xlu0 %3262  ;;  %v2103_v52 = vpack.c.bf16 %v2011_v20, %v2010_v59 }
 0x34e   : > { %3367 = vst.msk [vmem:[#allocation3 + $0x3f8] sm:$0xff] %vm1950_vm5, %v3263_v19  ;;  %v2672_v25 = vpop.permute.xlu1 %2671 }
 0x34f   : > { %3184 = vrot.lane.b32.xlu0 %v3083_v55, %s7575_s27  ;;  %2778 = vst.msk [vmem:[#allocation3 + $0x3d8] sm:$0xff] %vm2736_vm7, %v2672_v25  ;;  %v3477_v55 = vpack.c.bf16 %v3385_v48, %v3384_v26  ;;  %v8940_v25 = vld [vmem:[#allocation2 + $0x91] sm:$0xff] }
 0x350   : > { %1809 = vrot.lane.b32.xlu1 %v1708_v6, %s7575_s27  ;;  %v2014_v48 = vld [vmem:[#allocation2 + $0x72] sm:$0xff] }
 0x351   : > { %v3653_v16 = vpop.permute.xlu0 %3652  ;;  %v4475_v4 = vld [vmem:[#allocation3 + $0x3c8] sm:$0xff] }
 0x352   : > { %3758 = vst.msk [vmem:[#allocation3 + $0x3e0] sm:$0xff] %vm2343_vm6, %v3653_v16  ;;  %5151 = vmatprep.mubr.bf16.mxu1 %v4475_v4  ;;  %v1890_v30 = vpop.permute.xlu1 %1889  ;;  %v3869_v16 = vpack.c.bf16 %v8940_v25, %v8944_v45  ;;  %v2403_v4 = vld [vmem:[#allocation2 + $0x6c] sm:$0xff]  ;;  %v2408_v26 = vld [vmem:[#allocation2 + $0x94] sm:$0xff] }
 0x353   : > { %5152 = vmatmul.mubr.bf16.gmra.mrb[48].mxu1 %v4474_v36  ;;  %3576 = vrot.lane.b32.xlu0 %v3475_v27, %s7572_s26  ;;  %1994 = vst.msk [vmem:[#allocation3 + $0x408] sm:$0xff] %vm1950_vm5, %v1890_v30  ;;  %v2995_v27 = vld [vmem:[#allocation2 + $0x86] sm:$0xff]  ;;  %v2496_v29 = vpack.c.bf16 %v2404_v28, %v2403_v4  ;;  %v2994_v30 = vld [vmem:[#allocation2 + $0x7e] sm:$0xff] }
 0x354   : > { %2202 = vrot.lane.b32.xlu1 %v2101_v33, %s7572_s26  ;;  %v3086_v43 = vpack.c.bf16 %v2995_v27, %v2994_v30  ;;  %v3391_v4 = vld [vmem:[#allocation2 + $0xc0] sm:$0xff]  ;;  %v2017_v30 = vld [vmem:[#allocation2 + $0x8a] sm:$0xff] }
 0x355   : > { %v4045_v46 = vpop.permute.xlu0 %4044 }
 0x356   : > { %4150 = vst.msk [vmem:[#allocation3 + $0x3e0] sm:$0xff] %vm2736_vm7, %v4045_v46  ;;  %v2283_v22 = vpop.permute.xlu1 %2282  ;;  %v4477_v39 = vld [vmem:[#allocation3 + $0x3d8] sm:$0xff]  ;;  %v3387_v46 = vld [vmem:[#allocation2 + $0xa0] sm:$0xff] }
 0x357   : > { %3968 = vrot.lane.b32.xlu0 %v3867_v57, %s7573_s28  ;;  %2387 = vst.msk [vmem:[#allocation3 + $0x408] sm:$0xff] %vm2343_vm6, %v2283_v22  ;;  %v2013_v22 = vld [vmem:[#allocation2 + $0x6a] sm:$0xff] }
 0x358   : > { %2595 = vrot.lane.b32.xlu1 %v2494_v60, %s7573_s28  ;;  %v2104_v38 = vpack.c.bf16 %v2013_v22, %v2012_v41  ;;  %v2409_v22 = vld [vmem:[#allocation2 + $0x9c] sm:$0xff] }
 0x359   : > { %v3265_v40 = vpop.permute.xlu0 %3264 }
 0x35a   : > { %3368 = vst.msk [vmem:[#allocation3 + $0x410] sm:$0xff] %vm1950_vm5, %v3265_v40  ;;  %v2674_v10 = vpop.permute.xlu1 %2673  ;;  %v3478_v40 = vpack.c.bf16 %v3387_v46, %v3386_v2  ;;  %v9003_v46 = vld [vmem:[#allocation2 + $0xc1] sm:$0xff] }
 0x35b   : > { %3186 = vrot.lane.b32.xlu0 %v3084_v21, %s7575_s27  ;;  %2779 = vst.msk [vmem:[#allocation3 + $0x3f0] sm:$0xff] %vm2736_vm7, %v2674_v10  ;;  %v8960_v10 = vld [vmem:[#allocation2 + $0xa1] sm:$0xff] }
 0x35c   : > { %1811 = vrot.lane.b32.xlu1 %v1709_v9, %s7575_s27 }
 0x35d   : > { %v3655_v5 = vpop.permute.xlu0 %3654  ;;  %v4478_v49 = vld [vmem:[#allocation3 + $0x3e0] sm:$0xff] }
 0x35e   : > { %3759 = vst.msk [vmem:[#allocation3 + $0x3f8] sm:$0xff] %vm2343_vm6, %v3655_v5  ;;  %5159 = vmatprep.mubr.bf16.mxu1 %v4478_v49  ;;  %v1892_v62 = vpop.permute.xlu1 %1891  ;;  %v3870_v5 = vpack.c.bf16 %v8960_v10, %v8964_v47  ;;  %v2405_v49 = vld [vmem:[#allocation2 + $0x7c] sm:$0xff] }
 0x35f   : > { %5160 = vmatmul.mubr.bf16.gmra.mrb[52].mxu1 %v4477_v39  ;;  %3578 = vrot.lane.b32.xlu0 %v3476_v53, %s7572_s26  ;;  %1995 = vst.msk [vmem:[#allocation3 + $0x420] sm:$0xff] %vm1950_vm5, %v1892_v62  ;;  %v2997_v53 = vld [vmem:[#allocation2 + $0x96] sm:$0xff]  ;;  %v2497_v44 = vpack.c.bf16 %v2406_v12, %v2405_v49  ;;  %v2996_v62 = vld [vmem:[#allocation2 + $0x8e] sm:$0xff] }
 0x360   : > { %2204 = vrot.lane.b32.xlu1 %v2102_v8, %s7572_s26  ;;  %v3087_v63 = vpack.c.bf16 %v2997_v53, %v2996_v62  ;;  %v3392_v49 = vld [vmem:[#allocation2 + $0xc8] sm:$0xff]  ;;  %v2019_v53 = vld [vmem:[#allocation2 + $0x9a] sm:$0xff]  ;;  %v2018_v62 = vld [vmem:[#allocation2 + $0x92] sm:$0xff] }
 0x361   : > { %v4047_v18 = vpop.permute.xlu0 %4046 }
 0x362   : > { %4151 = vst.msk [vmem:[#allocation3 + $0x3f8] sm:$0xff] %vm2736_vm7, %v4047_v18  ;;  %v2285_v1 = vpop.permute.xlu1 %2284  ;;  %v4480_v24 = vld [vmem:[#allocation3 + $0x3f0] sm:$0xff]  ;;  %v3389_v18 = vld [vmem:[#allocation2 + $0xb0] sm:$0xff] }
 0x363   : > { %3970 = vrot.lane.b32.xlu0 %v3868_v35, %s7573_s28  ;;  %2388 = vst.msk [vmem:[#allocation3 + $0x420] sm:$0xff] %vm2343_vm6, %v2285_v1  ;;  %v2015_v1 = vld [vmem:[#allocation2 + $0x7a] sm:$0xff] }
 0x364   : > { %2597 = vrot.lane.b32.xlu1 %v2495_v13, %s7573_s28  ;;  %v2105_v54 = vpack.c.bf16 %v2015_v1, %v2014_v48  ;;  %v3002_v48 = vld [vmem:[#allocation2 + $0xbe] sm:$0xff] }
 0x365   : > { %v3267_v15 = vpop.permute.xlu0 %3266 }
 0x366   : > { %3369 = vst.msk [vmem:[#allocation3 + $0x428] sm:$0xff] %vm1950_vm5, %v3267_v15  ;;  %v2676_v58 = vpop.permute.xlu1 %2675  ;;  %v3479_v15 = vpack.c.bf16 %v3389_v18, %v3388_v23 }
 0x367   : > { %3188 = vrot.lane.b32.xlu0 %v3085_v17, %s7575_s27  ;;  %2780 = vst.msk [vmem:[#allocation3 + $0x408] sm:$0xff] %vm2736_vm7, %v2676_v58  ;;  %v8980_v58 = vld [vmem:[#allocation2 + $0xb1] sm:$0xff] }
 0x368   : > { %1813 = vrot.lane.b32.xlu1 %v1710_v51, %s7575_s27 }
 0x369   : > { %v3657_v11 = vpop.permute.xlu0 %3656  ;;  %v4481_v19 = vld [vmem:[#allocation3 + $0x3f8] sm:$0xff] }
 0x36a   : > { %3760 = vst.msk [vmem:[#allocation3 + $0x410] sm:$0xff] %vm2343_vm6, %v3657_v11  ;;  %5167 = vmatprep.mubr.bf16.mxu1 %v4481_v19  ;;  %v1894_v6 = vpop.permute.xlu1 %1893  ;;  %v3871_v11 = vpack.c.bf16 %v8980_v58, %v8984_v50  ;;  %v2407_v19 = vld [vmem:[#allocation2 + $0x8c] sm:$0xff] }
 0x36b   : > { %5168 = vmatmul.mubr.bf16.gmra.mrb[56].mxu1 %v4480_v24  ;;  %3580 = vrot.lane.b32.xlu0 %v3477_v55, %s7572_s26  ;;  %1996 = vst.msk [vmem:[#allocation3 + $0x438] sm:$0xff] %vm1950_vm5, %v1894_v6  ;;  %v2999_v55 = vld [vmem:[#allocation2 + $0xa6] sm:$0xff]  ;;  %v2498_v59 = vpack.c.bf16 %v2408_v26, %v2407_v19  ;;  %v2998_v6 = vld [vmem:[#allocation2 + $0x9e] sm:$0xff]  ;;  %v1715_v19 = vpack.c.bf16 %v8984_v50, %v8960_v10 }
 0x36c   : > { %2206 = vrot.lane.b32.xlu1 %v2103_v52, %s7572_s26 }
 0x36d   : > { %v4049_v3 = vpop.permute.xlu0 %4048 }
 0x36e   : > { %4152 = vst.msk [vmem:[#allocation3 + $0x410] sm:$0xff] %vm2736_vm7, %v4049_v3  ;;  %v2287_v36 = vpop.permute.xlu1 %2286  ;;  %v4483_v21 = vld [vmem:[#allocation3 + $0x408] sm:$0xff]  ;;  %v3088_v3 = vpack.c.bf16 %v2999_v55, %v2998_v6 }
 0x36f   : > { %3972 = vrot.lane.b32.xlu0 %v3869_v16, %s7573_s28  ;;  %2389 = vst.msk [vmem:[#allocation3 + $0x438] sm:$0xff] %vm2343_vm6, %v2287_v36  ;;  %v1713_v36 = vpack.c.bf16 %v8944_v45, %v8920_v56  ;;  %v9006_v45 = vld [vmem:[#allocation2 + $0xb9] sm:$0xff] }
 0x370   : > { %2599 = vrot.lane.b32.xlu1 %v2496_v29, %s7573_s28  ;;  %v3390_v29 = vld [vmem:[#allocation2 + $0xb8] sm:$0xff]  ;;  %v3872_v2 = vpack.c.bf16 %v9003_v46, %v9006_v45 }
 0x371   : > { %v3269_v33 = vpop.permute.xlu0 %3268 }
 0x372   : > { %3370 = vst.msk [vmem:[#allocation3 + $0x440] sm:$0xff] %vm1950_vm5, %v3269_v33  ;;  %v2678_v57 = vpop.permute.xlu1 %2677 }
 0x373   : > { %3190 = vrot.lane.b32.xlu0 %v3086_v43, %s7575_s27  ;;  %2781 = vst.msk [vmem:[#allocation3 + $0x420] sm:$0xff] %vm2736_vm7, %v2678_v57  ;;  %v3480_v43 = vpack.c.bf16 %v3391_v4, %v3390_v29  ;;  %v2414_v4 = vld [vmem:[#allocation2 + $0xc4] sm:$0xff]  ;;  %v2413_v29 = vld [vmem:[#allocation2 + $0xbc] sm:$0xff] }
 0x374   : > { %1815 = vrot.lane.b32.xlu1 %v1711_v34, %s7575_s27 }
 0x375   : > { %v3659_v60 = vpop.permute.xlu0 %3658  ;;  %v4484_v14 = vld [vmem:[#allocation3 + $0x410] sm:$0xff] }
 0x376   : > { %3761 = vst.msk [vmem:[#allocation3 + $0x428] sm:$0xff] %vm2343_vm6, %v3659_v60  ;;  %5175 = vmatprep.mubr.bf16.mxu1 %v4484_v14  ;;  %v1896_v9 = vpop.permute.xlu1 %1895  ;;  %v3001_v60 = vld [vmem:[#allocation2 + $0xb6] sm:$0xff] }
 0x377   : > { %5176 = vmatmul.mubr.bf16.gmra.mrb[60].mxu1 %v4483_v21  ;;  %3582 = vrot.lane.b32.xlu0 %v3478_v40, %s7572_s26  ;;  %1997 = vst.msk [vmem:[#allocation3 + $0x450] sm:$0xff] %vm1950_vm5, %v1896_v9  ;;  %v3000_v9 = vld [vmem:[#allocation2 + $0xae] sm:$0xff] }
 0x378   : > { %2208 = vrot.lane.b32.xlu1 %v2104_v38, %s7572_s26  ;;  %v3089_v12 = vpack.c.bf16 %v3001_v60, %v3000_v9 }
 0x379   : > { %v4051_v37 = vpop.permute.xlu0 %4050 }
 0x37a   : > { %4153 = vst.msk [vmem:[#allocation3 + $0x428] sm:$0xff] %vm2736_vm7, %v4051_v37  ;;  %v2289_v39 = vpop.permute.xlu1 %2288  ;;  %v4486_v17 = vld [vmem:[#allocation3 + $0x420] sm:$0xff] }
 0x37b   : > { %3974 = vrot.lane.b32.xlu0 %v3870_v5, %s7573_s28  ;;  %2390 = vst.msk [vmem:[#allocation3 + $0x450] sm:$0xff] %vm2343_vm6, %v2289_v39  ;;  %v1714_v5 = vpack.c.bf16 %v8964_v47, %v8940_v25  ;;  %v9029_v25 = vld [vmem:[#allocation2 + $0xc9] sm:$0xff]  ;;  %v2412_v47 = vld [vmem:[#allocation2 + $0xb4] sm:$0xff] }
 0x37c   : > { %2601 = vrot.lane.b32.xlu1 %v2497_v44, %s7573_s28 }
 0x37d   : > { %v3661_v8 = vpop.permute.xlu0 %3660 }
 0x37e   : > { %3762 = vst.msk [vmem:[#allocation3 + $0x440] sm:$0xff] %vm2343_vm6, %v3661_v8  ;;  %v2680_v35 = vpop.permute.xlu1 %2679  ;;  %v9025_v8 = vld [vmem:[#allocation2 + $0xd1] sm:$0xff] }
 0x37f   : > { %3192 = vrot.lane.b32.xlu0 %v3087_v63, %s7575_s27  ;;  %2782 = vst.msk [vmem:[#allocation3 + $0x438] sm:$0xff] %vm2736_vm7, %v2680_v35  ;;  %v3873_v1 = vpack.c.bf16 %v9025_v8, %v9029_v25 }
 0x380   : > { %1817 = vrot.lane.b32.xlu1 %v1712_v61, %s7575_s27  ;;  %v2107_v61 = vpack.c.bf16 %v2019_v53, %v2018_v62 }
 0x381   : > { %v4053_v13 = vpop.permute.xlu0 %4052  ;;  %v4487_v32 = vld [vmem:[#allocation3 + $0x428] sm:$0xff] }
 0x382   : > { %4154 = vst.msk [vmem:[#allocation3 + $0x440] sm:$0xff] %vm2736_vm7, %v4053_v13  ;;  %5183 = vmatprep.mubr.bf16.mxu1 %v4487_v32  ;;  %v1898_v51 = vpop.permute.xlu1 %1897  ;;  %v2411_v13 = vld [vmem:[#allocation2 + $0xac] sm:$0xff] }
 0x383   : > { %5184 = vmatmul.mubr.bf16.gmra.mrb[64].mxu1 %v4486_v17  ;;  %3584 = vrot.lane.b32.xlu0 %v3479_v15, %s7572_s26  ;;  %1998 = vst.msk [vmem:[#allocation3 + $0x468] sm:$0xff] %vm1950_vm5, %v1898_v51  ;;  %v3003_v32 = vld [vmem:[#allocation2 + $0xc6] sm:$0xff]  ;;  %v2500_v17 = vpack.c.bf16 %v2412_v47, %v2411_v13 }
 0x384   : > { %2210 = vrot.lane.b32.xlu1 %v2105_v54, %s7572_s26  ;;  %v3090_v54 = vpack.c.bf16 %v3003_v32, %v3002_v48  ;;  %v1717_v32 = vpack.c.bf16 %v9029_v25, %v9003_v46  ;;  %v2025_v48 = vld [vmem:[#allocation2 + $0xca] sm:$0xff] }
 0x385   : > { %v4057_v20 = vpop.permute.xlu0 %4056 }
 0x386   : > { %v2291_v24 = vpop.permute.xlu1 %2290  ;;  %v4489_v16 = vld [vmem:[#allocation3 + $0x438] sm:$0xff] }
 0x387   : > { %3976 = vrot.lane.b32.xlu0 %v3871_v11, %s7573_s28  ;;  %2391 = vst.msk [vmem:[#allocation3 + $0x468] sm:$0xff] %vm2343_vm6, %v2291_v24  ;;  %v3394_v24 = vld [vmem:[#allocation2 + $0xd8] sm:$0xff] }
 0x388   : > { %2603 = vrot.lane.b32.xlu1 %v2498_v59, %s7573_s28  ;;  %v2021_v59 = vld [vmem:[#allocation2 + $0xaa] sm:$0xff] }
 0x389   : > { %v3271_v52 = vpop.permute.xlu0 %3270  ;;  %v4490_v28 = vld [vmem:[#allocation3 + $0x440] sm:$0xff] }
 0x38a   : > { %3371 = vst.msk [vmem:[#allocation3 + $0x458] sm:$0xff] %vm1950_vm5, %v3271_v52  ;;  %5191 = vmatprep.mubr.bf16.mxu1 %v4490_v28  ;;  %v2682_v27 = vpop.permute.xlu1 %2681  ;;  %v2020_v28 = vld [vmem:[#allocation2 + $0xa2] sm:$0xff] }
 0x38b   : > { %3763 = vst.msk [vmem:[#allocation3 + $0x458] sm:$0xff] %vm2343_vm6, %v8477_v42  ;;  %5192 = vmatmul.mubr.bf16.gmra.mrb[68].mxu1 %v4489_v16  ;;  %3194 = vrot.lane.b32.xlu0 %v3088_v3, %s7575_s27  ;;  %v2016_v42 = vld [vmem:[#allocation2 + $0x82] sm:$0xff]  ;;  %v2108_v50 = vpack.c.bf16 %v2021_v59, %v2020_v28  ;;  %v9052_v16 = vld [vmem:[#allocation2 + $0xd9] sm:$0xff] }
 0x38c   : > { %4155 = vst.msk [vmem:[#allocation3 + $0x458] sm:$0xff] %vm2736_vm7, %v8494_v7  ;;  %2783 = vst.msk [vmem:[#allocation3 + $0x450] sm:$0xff] %vm2736_vm7, %v2682_v27  ;;  %1819 = vrot.lane.b32.xlu1 %v1713_v36, %s7575_s27  ;;  %v2106_v56 = vpack.c.bf16 %v2017_v30, %v2016_v42  ;;  %v2410_v7 = vld [vmem:[#allocation2 + $0xa4] sm:$0xff]  ;;  %v3005_v30 = vld [vmem:[#allocation2 + $0xd6] sm:$0xff] }
 0x38d   : > { %v3275_v33 = vpop.permute.xlu0 %3274  ;;  %v2499_v41 = vpack.c.bf16 %v2410_v7, %v2409_v22  ;;  %v9046_v3 = vld [vmem:[#allocation2 + $0xe1] sm:$0xff] }
 0x38e   : > { %3373 = vst.msk [vmem:[#allocation3 + $0x488] sm:$0xff] %vm1950_vm5, %v3275_v33  ;;  %v2686_v57 = vpop.permute.xlu1 %2685  ;;  %v3874_v36 = vpack.c.bf16 %v9046_v3, %v9052_v16  ;;  %v4356_v42 = vld [vmem:[#allocation3 + $0x10] sm:$0xff] }
 0x38f   : > { %3586 = vrot.lane.b32.xlu0 %v3480_v43, %s7572_s26  ;;  %v2501_v43 = vpack.c.bf16 %v2414_v4, %v2413_v29  ;;  %v2417_v59 = vld [vmem:[#allocation2 + $0xdc] sm:$0xff]  ;;  %v3401_v29 = vld [vmem:[#allocation2 + $0x110] sm:$0xff] }
 0x390   : > { %2212 = vrot.lane.b32.xlu1 %v2106_v56, %s7572_s26 }
 0x391   : > { %v3273_v34 = vpop.permute.xlu0 %3272 }
 0x392   : > { %3372 = vst.msk [vmem:[#allocation3 + $0x470] sm:$0xff] %vm1950_vm5, %v3273_v34  ;;  %v2684_v14 = vpop.permute.xlu1 %2683 }
 0x393   : > { %3764 = vst.msk [vmem:[#allocation3 + $0x470] sm:$0xff] %vm2343_vm6, %v8513_v31  ;;  %3978 = vrot.lane.b32.xlu0 %v3872_v2, %s7573_s28  ;;  %v4493_v40 = vld [vmem:[#allocation3 + $0x458] sm:$0xff]  ;;  %v4492_v21 = vld [vmem:[#allocation3 + $0x450] sm:$0xff]  ;;  %v3393_v31 = vld [vmem:[#allocation2 + $0xd0] sm:$0xff] }
 0x394   : > { %4156 = vst.msk [vmem:[#allocation3 + $0x470] sm:$0xff] %vm2736_vm7, %v4057_v20  ;;  %2784 = vst.msk [vmem:[#allocation3 + $0x468] sm:$0xff] %vm2736_vm7, %v2684_v14  ;;  %5199 = vmatprep.mubr.bf16.mxu1 %v4493_v40  ;;  %2605 = vrot.lane.b32.xlu1 %v2499_v41, %s7573_s28  ;;  %v3481_v44 = vpack.c.bf16 %v3393_v31, %v3392_v49  ;;  %v3395_v20 = vld [vmem:[#allocation2 + $0xe0] sm:$0xff]  ;;  %v3397_v2 = vld [vmem:[#allocation2 + $0xf0] sm:$0xff]  ;;  %v1716_v14 = vpack.c.bf16 %v9006_v45, %v8980_v58 }
 0x395   : > { %v3667_v38 = vpop.permute.xlu0 %3666  ;;  %5200 = vmatmul.mubr.bf16.gmra.mrb[72].mxu1 %v4492_v21  ;;  %v3482_v52 = vpack.c.bf16 %v3395_v20, %v3394_v24  ;;  %v3396_v40 = vld [vmem:[#allocation2 + $0xe8] sm:$0xff]  ;;  %v2023_v21 = vld [vmem:[#allocation2 + $0xba] sm:$0xff] }
 0x396   : > { %3765 = vst.msk [vmem:[#allocation3 + $0x488] sm:$0xff] %vm2343_vm6, %v3667_v38  ;;  %v1900_v37 = vpop.permute.xlu1 %1899  ;;  %v3483_v9 = vpack.c.bf16 %v3397_v2, %v3396_v40  ;;  %v2022_v38 = vld [vmem:[#allocation2 + $0xb2] sm:$0xff]  ;;  %v9075_v45 = vld [vmem:[#allocation2 + $0xe9] sm:$0xff]  ;;  %v9095_v20 = vld [vmem:[#allocation2 + $0x101] sm:$0xff] }
 0x397   : > { %3196 = vrot.lane.b32.xlu0 %v3089_v12, %s7575_s27  ;;  %1999 = vst.msk [vmem:[#allocation3 + $0x480] sm:$0xff] %vm1950_vm5, %v1900_v37  ;;  %v9071_v12 = vld [vmem:[#allocation2 + $0xf1] sm:$0xff]  ;;  %v2109_v37 = vpack.c.bf16 %v2023_v21, %v2022_v38 }
 0x398   : > { %1821 = vrot.lane.b32.xlu1 %v1714_v5, %s7575_s27  ;;  %v4359_v58 = vld [vmem:[#allocation3 + $0x28] sm:$0xff]  ;;  %v3875_v53 = vpack.c.bf16 %v9071_v12, %v9075_v45 }
 0x399   : > { %v4059_v39 = vpop.permute.xlu0 %4058  ;;  %v2416_v5 = vld [vmem:[#allocation2 + $0xd4] sm:$0xff] }
 0x39a   : > { %4157 = vst.msk [vmem:[#allocation3 + $0x488] sm:$0xff] %vm2736_vm7, %v4059_v39  ;;  %v2293_v63 = vpop.permute.xlu1 %2292  ;;  %v2415_v39 = vld [vmem:[#allocation2 + $0xcc] sm:$0xff] }
 0x39b   : > { %3588 = vrot.lane.b32.xlu0 %v3481_v44, %s7572_s26  ;;  %v4496_v18 = vld [vmem:[#allocation3 + $0x470] sm:$0xff]  ;;  %v4495_v35 = vld [vmem:[#allocation3 + $0x468] sm:$0xff]  ;;  %2392 = vst.msk [vmem:[#allocation3 + $0x480] sm:$0xff] %vm2343_vm6, %v2293_v63  ;;  %v2502_v63 = vpack.c.bf16 %v2416_v5, %v2415_v39 }
 0x39c   : > { %5207 = vmatprep.mubr.bf16.mxu1 %v4496_v18  ;;  %2785 = vst.msk [vmem:[#allocation3 + $0x480] sm:$0xff] %vm2736_vm7, %v2686_v57  ;;  %2214 = vrot.lane.b32.xlu1 %v2107_v61, %s7572_s26  ;;  %v3004_v57 = vld [vmem:[#allocation2 + $0xce] sm:$0xff]  ;;  %v3007_v44 = vld [vmem:[#allocation2 + $0xe6] sm:$0xff]  ;;  %v3006_v18 = vld [vmem:[#allocation2 + $0xde] sm:$0xff] }
 0x39d   : > { %v3179_v23 = vpop.permute.xlu0 %3178  ;;  %5208 = vmatmul.mubr.bf16.gmra.mrb[76].mxu1 %v4495_v35  ;;  %v3091_v34 = vpack.c.bf16 %v3005_v30, %v3004_v57  ;;  %v3092_v47 = vpack.c.bf16 %v3007_v44, %v3006_v18  ;;  %v2027_v57 = vld [vmem:[#allocation2 + $0xda] sm:$0xff]  ;;  %v9120_v2 = vld [vmem:[#allocation2 + $0x111] sm:$0xff] }
 0x39e   : > { %3325 = vst.msk [vmem:[#allocation3 + $0x8] sm:$0xff] %vm1950_vm5, %v3179_v23  ;;  %v1804_v15 = vpop.permute.xlu1 %1803  ;;  %v3399_v23 = vld [vmem:[#allocation2 + $0x100] sm:$0xff]  ;;  %v3402_v18 = vld [vmem:[#allocation2 + $0x118] sm:$0xff] }
 0x39f   : > { %3980 = vrot.lane.b32.xlu0 %v3873_v1, %s7573_s28  ;;  %1951 = vst.msk [vmem:[#allocation3] sm:$0xff] %vm1950_vm5, %v1804_v15  ;;  %v4362_v15 = vld [vmem:[#allocation3 + $0x40] sm:$0xff] }
 0x3a0   : > { %2607 = vrot.lane.b32.xlu1 %v2500_v17, %s7573_s28  ;;  %v3398_v17 = vld [vmem:[#allocation2 + $0xf8] sm:$0xff] }
 0x3a1   : > { %v3571_v51 = vpop.permute.xlu0 %3570  ;;  %v4499_v26 = vld [vmem:[#allocation3 + $0x488] sm:$0xff] }
 0x3a2   : > { %3717 = vst.msk [vmem:[#allocation3 + $0x8] sm:$0xff] %vm2343_vm6, %v3571_v51  ;;  %5215 = vmatprep.mubr.bf16.mxu1 %v4499_v26  ;;  %v2197_v11 = vpop.permute.xlu1 %2196  ;;  %v2024_v26 = vld [vmem:[#allocation2 + $0xc2] sm:$0xff] }
 0x3a3   : > { %3198 = vrot.lane.b32.xlu0 %v3090_v54, %s7575_s27  ;;  %2344 = vst.msk [vmem:[#allocation3] sm:$0xff] %vm2343_vm6, %v2197_v11  ;;  %v4498_v55 = vld [vmem:[#allocation3 + $0x480] sm:$0xff]  ;;  %v3484_v54 = vpack.c.bf16 %v3399_v23, %v3398_v17  ;;  %v2110_v25 = vpack.c.bf16 %v2025_v48, %v2024_v26  ;;  %v9101_v11 = vld [vmem:[#allocation2 + $0xf9] sm:$0xff]  ;;  %v2028_v23 = vld [vmem:[#allocation2 + $0xe2] sm:$0xff] }
 0x3a4   : > { %1823 = vrot.lane.b32.xlu1 %v1715_v19, %s7575_s27  ;;  %v2418_v19 = vld [vmem:[#allocation2 + $0xe4] sm:$0xff]  ;;  %v3876_v24 = vpack.c.bf16 %v9095_v20, %v9101_v11  ;;  %v2421_v48 = vld [vmem:[#allocation2 + $0xfc] sm:$0xff] }
 0x3a5   : > { %v3963_v6 = vpop.permute.xlu0 %3962  ;;  %5216 = vmatmul.mubr.bf16.gmra.mrb[80].mxu1 %v4498_v55  ;;  %v2503_v28 = vpack.c.bf16 %v2418_v19, %v2417_v59  ;;  %v3405_v59 = vld [vmem:[#allocation2 + $0x130] sm:$0xff] }
 0x3a6   : > { %4109 = vst.msk [vmem:[#allocation3 + $0x8] sm:$0xff] %vm2736_vm7, %v3963_v6  ;;  %6878 = vmatprep.mubr.msk.bf16.mxu1 %vm7570_vm1, %v7569_v0  ;;  %v2590_v10 = vpop.permute.xlu1 %2589  ;;  %v3009_v6 = vld [vmem:[#allocation2 + $0xf6] sm:$0xff] }
 0x3a7   : > { %3590 = vrot.lane.b32.xlu0 %v3482_v52, %s7572_s26  ;;  %2737 = vst.msk [vmem:[#allocation3] sm:$0xff] %vm2736_vm7, %v2590_v10  ;;  %v4365_v10 = vld [vmem:[#allocation3 + $0x58] sm:$0xff] }
 0x3a8   : > { %2216 = vrot.lane.b32.xlu1 %v2108_v50, %s7572_s26  ;;  %v3008_v50 = vld [vmem:[#allocation2 + $0xee] sm:$0xff] }
 0x3a9   : > { %v3181_v27 = vpop.permute.xlu0 %3180 }
 0x3aa   : > { %3326 = vst.msk [vmem:[#allocation3 + $0x20] sm:$0xff] %vm1950_vm5, %v3181_v27  ;;  %v1806_v33 = vpop.permute.xlu1 %1805 }
 0x3ab   : > { %3982 = vrot.lane.b32.xlu0 %v3874_v36, %s7573_s28  ;;  %1952 = vst.msk [vmem:[#allocation3 + $0x18] sm:$0xff] %vm1950_vm5, %v1806_v33  ;;  %v3093_v36 = vpack.c.bf16 %v3009_v6, %v3008_v50  ;;  %v2031_v50 = vld [vmem:[#allocation2 + $0xfa] sm:$0xff] }
 0x3ac   : > { %2609 = vrot.lane.b32.xlu1 %v2501_v43, %s7573_s28  ;;  %v1718_v43 = vpack.c.bf16 %v9052_v16, %v9025_v8  ;;  %v4368_v8 = vld [vmem:[#allocation3 + $0x70] sm:$0xff]  ;;  %v9124_v16 = vld [vmem:[#allocation2 + $0x109] sm:$0xff] }
 0x3ad   : > { %v3573_v56 = vpop.permute.xlu0 %3572  ;;  %6879 = vmatmul.mubr.msk.bf16.vlgmr.msra.gmra.mrb[84].mxu1 %vm1304_vm4, %v4356_v42  ;;  %v4355_v7 = vld [vmem:[#allocation3 + $0x8] sm:$0xff]  ;;  %v3400_v42 = vld [vmem:[#allocation2 + $0x108] sm:$0xff]  ;;  %v3877_v21 = vpack.c.bf16 %v9120_v2, %v9124_v16 }
 0x3ae   : > { %3718 = vst.msk [vmem:[#allocation3 + $0x20] sm:$0xff] %vm2343_vm6, %v3573_v56  ;;  %4831 = vmatprep.mubr.bf16.mxu0 %v4355_v7  ;;  %6882 = vmatprep.mubr.msk.bf16.mxu1 %vm7570_vm1, %v7569_v0  ;;  %v2199_v22 = vpop.permute.xlu1 %2198  ;;  %v4354_v60 = vld [vmem:[#allocation3] sm:$0xff]  ;;  %v3485_v7 = vpack.c.bf16 %v3401_v29, %v3400_v42 }
 0x3af   : > { %3200 = vrot.lane.b32.xlu0 %v3091_v34, %s7575_s27  ;;  %2345 = vst.msk [vmem:[#allocation3 + $0x18] sm:$0xff] %vm2343_vm6, %v2199_v22  ;;  %4832 = vmatmul.mubr.bf16.vlgmr.msra.gmra.mrb[196].mxu0 %v4354_v60  ;;  %v2026_v34 = vld [vmem:[#allocation2 + $0xd2] sm:$0xff] }
 0x3b0   : > { %1825 = vrot.lane.b32.xlu1 %v1716_v14, %s7575_s27  ;;  %v2111_v60 = vpack.c.bf16 %v2027_v57, %v2026_v34  ;;  %v2420_v14 = vld [vmem:[#allocation2 + $0xf4] sm:$0xff] }
 0x3b1   : > { %v3965_v41 = vpop.permute.xlu0 %3964  ;;  %v9169_v29 = vld [vmem:[#allocation2 + $0x131] sm:$0xff] }
 0x3b2   : > { %4110 = vst.msk [vmem:[#allocation3 + $0x20] sm:$0xff] %vm2736_vm7, %v3965_v41  ;;  %v2592_v31 = vpop.permute.xlu1 %2591  ;;  %v2419_v41 = vld [vmem:[#allocation2 + $0xec] sm:$0xff] }
 0x3b3   : > { %3592 = vrot.lane.b32.xlu0 %v3483_v9, %s7572_s26  ;;  %2738 = vst.msk [vmem:[#allocation3 + $0x18] sm:$0xff] %vm2736_vm7, %v2592_v31  ;;  %v3011_v9 = vld [vmem:[#allocation2 + $0x106] sm:$0xff]  ;;  %v2504_v31 = vpack.c.bf16 %v2420_v14, %v2419_v41 }
 0x3b4   : > { %2218 = vrot.lane.b32.xlu1 %v2109_v37, %s7572_s26  ;;  %v3010_v37 = vld [vmem:[#allocation2 + $0xfe] sm:$0xff] }
 0x3b5   : > { %v3183_v49 = vpop.permute.xlu0 %3182  ;;  %6883 = vmatmul.mubr.msk.bf16.gmra.mrb[88].mxu1 %vm1304_vm4, %v4359_v58 }
 0x3b6   : > { %3327 = vst.msk [vmem:[#allocation3 + $0x38] sm:$0xff] %vm1950_vm5, %v3183_v49  ;;  %6886 = vmatprep.mubr.msk.bf16.mxu1 %vm7570_vm1, %v7569_v0  ;;  %v1808_v62 = vpop.permute.xlu1 %1807  ;;  %v3094_v49 = vpack.c.bf16 %v3011_v9, %v3010_v37  ;;  %v3406_v37 = vld [vmem:[#allocation2 + $0x138] sm:$0xff] }
 0x3b7   : > { %3984 = vrot.lane.b32.xlu0 %v3875_v53, %s7573_s28  ;;  %1953 = vst.msk [vmem:[#allocation3 + $0x30] sm:$0xff] %vm1950_vm5, %v1808_v62  ;;  %v3403_v53 = vld [vmem:[#allocation2 + $0x120] sm:$0xff]  ;;  %v1719_v62 = vpack.c.bf16 %v9075_v45, %v9046_v3 }
 0x3b8   : > { %2611 = vrot.lane.b32.xlu1 %v2502_v63, %s7573_s28  ;;  %v4371_v63 = vld [vmem:[#allocation3 + $0x88] sm:$0xff] }
 0x3b9   : > { %v3575_v35 = vpop.permute.xlu0 %3574  ;;  %v4358_v61 = vld [vmem:[#allocation3 + $0x20] sm:$0xff] }
 0x3ba   : > { %3719 = vst.msk [vmem:[#allocation3 + $0x38] sm:$0xff] %vm2343_vm6, %v3575_v35  ;;  %4839 = vmatprep.mubr.bf16.mxu0 %v4358_v61  ;;  %v2201_v1 = vpop.permute.xlu1 %2200  ;;  %v4357_v13 = vld [vmem:[#allocation3 + $0x18] sm:$0xff] }
 0x3bb   : > { %3202 = vrot.lane.b32.xlu0 %v3092_v47, %s7575_s27  ;;  %2346 = vst.msk [vmem:[#allocation3 + $0x30] sm:$0xff] %vm2343_vm6, %v2201_v1  ;;  %4840 = vmatmul.mubr.bf16.gmra.mrb[200].mxu0 %v4357_v13  ;;  %v2029_v35 = vld [vmem:[#allocation2 + $0xea] sm:$0xff]  ;;  %v3486_v47 = vpack.c.bf16 %v3403_v53, %v3402_v18  ;;  %v9144_v1 = vld [vmem:[#allocation2 + $0x121] sm:$0xff]  ;;  %v9150_v13 = vld [vmem:[#allocation2 + $0x119] sm:$0xff] }
 0x3bc   : > { %1827 = vrot.lane.b32.xlu1 %v1717_v32, %s7575_s27  ;;  %v2112_v45 = vpack.c.bf16 %v2029_v35, %v2028_v23  ;;  %v2422_v32 = vld [vmem:[#allocation2 + $0x104] sm:$0xff]  ;;  %v3878_v17 = vpack.c.bf16 %v9144_v1, %v9150_v13  ;;  %v2425_v35 = vld [vmem:[#allocation2 + $0x11c] sm:$0xff] }
 0x3bd   : > { %v3967_v51 = vpop.permute.xlu0 %3966  ;;  %6887 = vmatmul.mubr.msk.bf16.gmra.mrb[92].mxu1 %vm1304_vm4, %v4362_v15  ;;  %v2505_v26 = vpack.c.bf16 %v2422_v32, %v2421_v48  ;;  %v2032_v53 = vld [vmem:[#allocation2 + $0x102] sm:$0xff]  ;;  %v3409_v48 = vld [vmem:[#allocation2 + $0x150] sm:$0xff] }
 0x3be   : > { %4111 = vst.msk [vmem:[#allocation3 + $0x38] sm:$0xff] %vm2736_vm7, %v3967_v51  ;;  %6890 = vmatprep.mubr.msk.bf16.mxu1 %vm7570_vm1, %v7569_v0  ;;  %v2594_v46 = vpop.permute.xlu1 %2593  ;;  %v3013_v51 = vld [vmem:[#allocation2 + $0x116] sm:$0xff] }
 0x3bf   : > { %3594 = vrot.lane.b32.xlu0 %v3484_v54, %s7572_s26  ;;  %2739 = vst.msk [vmem:[#allocation3 + $0x30] sm:$0xff] %vm2736_vm7, %v2594_v46  ;;  %v4374_v46 = vld [vmem:[#allocation3 + $0xa0] sm:$0xff] }
 0x3c0   : > { %2220 = vrot.lane.b32.xlu1 %v2110_v25, %s7572_s26  ;;  %v3012_v25 = vld [vmem:[#allocation2 + $0x10e] sm:$0xff] }
 0x3c1   : > { %v3185_v55 = vpop.permute.xlu0 %3184 }
 0x3c2   : > { %3328 = vst.msk [vmem:[#allocation3 + $0x50] sm:$0xff] %vm1950_vm5, %v3185_v55  ;;  %v1810_v52 = vpop.permute.xlu1 %1809 }
 0x3c3   : > { %3986 = vrot.lane.b32.xlu0 %v3876_v24, %s7573_s28  ;;  %1954 = vst.msk [vmem:[#allocation3 + $0x48] sm:$0xff] %vm1950_vm5, %v1810_v52  ;;  %v3095_v24 = vpack.c.bf16 %v3013_v51, %v3012_v25  ;;  %v2035_v25 = vld [vmem:[#allocation2 + $0x11a] sm:$0xff] }
 0x3c4   : > { %2613 = vrot.lane.b32.xlu1 %v2503_v28, %s7573_s28  ;;  %v1720_v28 = vpack.c.bf16 %v9101_v11, %v9071_v12  ;;  %v4377_v12 = vld [vmem:[#allocation3 + $0xb8] sm:$0xff] }
 0x3c5   : > { %v3577_v4 = vpop.permute.xlu0 %3576  ;;  %6891 = vmatmul.mubr.msk.bf16.gmra.mrb[96].mxu1 %vm1304_vm4, %v4365_v10  ;;  %v4361_v27 = vld [vmem:[#allocation3 + $0x38] sm:$0xff] }
 0x3c6   : > { %3720 = vst.msk [vmem:[#allocation3 + $0x50] sm:$0xff] %vm2343_vm6, %v3577_v4  ;;  %4847 = vmatprep.mubr.bf16.mxu0 %v4361_v27  ;;  %6894 = vmatprep.mubr.msk.bf16.mxu1 %vm7570_vm1, %v7569_v0  ;;  %v2203_v30 = vpop.permute.xlu1 %2202  ;;  %v4360_v33 = vld [vmem:[#allocation3 + $0x30] sm:$0xff]  ;;  %v3404_v10 = vld [vmem:[#allocation2 + $0x128] sm:$0xff] }
 0x3c7   : > { %3204 = vrot.lane.b32.xlu0 %v3093_v36, %s7575_s27  ;;  %2347 = vst.msk [vmem:[#allocation3 + $0x48] sm:$0xff] %vm2343_vm6, %v2203_v30  ;;  %4848 = vmatmul.mubr.bf16.gmra.mrb[204].mxu0 %v4360_v33  ;;  %v3487_v27 = vpack.c.bf16 %v3405_v59, %v3404_v10  ;;  %v2030_v36 = vld [vmem:[#allocation2 + $0xf2] sm:$0xff]  ;;  %v9173_v11 = vld [vmem:[#allocation2 + $0x129] sm:$0xff] }
 0x3c8   : > { %1829 = vrot.lane.b32.xlu1 %v1718_v43, %s7575_s27  ;;  %v2113_v33 = vpack.c.bf16 %v2031_v50, %v2030_v36  ;;  %v2424_v43 = vld [vmem:[#allocation2 + $0x114] sm:$0xff]  ;;  %v3879_v57 = vpack.c.bf16 %v9169_v29, %v9173_v11 }
 0x3c9   : > { %v3969_v56 = vpop.permute.xlu0 %3968  ;;  %v9218_v59 = vld [vmem:[#allocation2 + $0x151] sm:$0xff] }
 0x3ca   : > { %4112 = vst.msk [vmem:[#allocation3 + $0x50] sm:$0xff] %vm2736_vm7, %v3969_v56  ;;  %v2596_v22 = vpop.permute.xlu1 %2595  ;;  %v2423_v56 = vld [vmem:[#allocation2 + $0x10c] sm:$0xff] }
 0x3cb   : > { %3596 = vrot.lane.b32.xlu0 %v3485_v7, %s7572_s26  ;;  %2740 = vst.msk [vmem:[#allocation3 + $0x48] sm:$0xff] %vm2736_vm7, %v2596_v22  ;;  %v3015_v7 = vld [vmem:[#allocation2 + $0x126] sm:$0xff]  ;;  %v2506_v22 = vpack.c.bf16 %v2424_v43, %v2423_v56 }
 0x3cc   : > { %2222 = vrot.lane.b32.xlu1 %v2111_v60, %s7572_s26  ;;  %v3014_v60 = vld [vmem:[#allocation2 + $0x11e] sm:$0xff] }
 0x3cd   : > { %v3187_v40 = vpop.permute.xlu0 %3186  ;;  %6895 = vmatmul.mubr.msk.bf16.gmra.mrb[100].mxu1 %vm1304_vm4, %v4368_v8 }
 0x3ce   : > { %3329 = vst.msk [vmem:[#allocation3 + $0x68] sm:$0xff] %vm1950_vm5, %v3187_v40  ;;  %6898 = vmatprep.mubr.msk.bf16.mxu1 %vm7570_vm1, %v7569_v0  ;;  %v1812_v38 = vpop.permute.xlu1 %1811  ;;  %v3096_v40 = vpack.c.bf16 %v3015_v7, %v3014_v60  ;;  %v3410_v60 = vld [vmem:[#allocation2 + $0x158] sm:$0xff] }
 0x3cf   : > { %3988 = vrot.lane.b32.xlu0 %v3877_v21, %s7573_s28  ;;  %1955 = vst.msk [vmem:[#allocation3 + $0x60] sm:$0xff] %vm1950_vm5, %v1812_v38  ;;  %v3407_v21 = vld [vmem:[#allocation2 + $0x140] sm:$0xff]  ;;  %v1721_v38 = vpack.c.bf16 %v9124_v16, %v9095_v20 }
 0x3d0   : > { %2615 = vrot.lane.b32.xlu1 %v2504_v31, %s7573_s28  ;;  %v4380_v31 = vld [vmem:[#allocation3 + $0xd0] sm:$0xff] }
 0x3d1   : > { %v3579_v58 = vpop.permute.xlu0 %3578  ;;  %v4364_v5 = vld [vmem:[#allocation3 + $0x50] sm:$0xff] }
 0x3d2   : > { %3721 = vst.msk [vmem:[#allocation3 + $0x68] sm:$0xff] %vm2343_vm6, %v3579_v58  ;;  %4855 = vmatprep.mubr.bf16.mxu0 %v4364_v5  ;;  %v2205_v39 = vpop.permute.xlu1 %2204  ;;  %v4363_v44 = vld [vmem:[#allocation3 + $0x48] sm:$0xff]  ;;  %v2033_v58 = vld [vmem:[#allocation2 + $0x10a] sm:$0xff] }
 0x3d3   : > { %3206 = vrot.lane.b32.xlu0 %v3094_v49, %s7575_s27  ;;  %2348 = vst.msk [vmem:[#allocation3 + $0x60] sm:$0xff] %vm2343_vm6, %v2205_v39  ;;  %4856 = vmatmul.mubr.bf16.gmra.mrb[208].mxu0 %v4363_v44  ;;  %v3488_v49 = vpack.c.bf16 %v3407_v21, %v3406_v37  ;;  %v9193_v39 = vld [vmem:[#allocation2 + $0x141] sm:$0xff]  ;;  %v2114_v16 = vpack.c.bf16 %v2033_v58, %v2032_v53  ;;  %v9199_v44 = vld [vmem:[#allocation2 + $0x139] sm:$0xff] }
 0x3d4   : > { %1831 = vrot.lane.b32.xlu1 %v1719_v62, %s7575_s27  ;;  %v2426_v62 = vld [vmem:[#allocation2 + $0x124] sm:$0xff]  ;;  %v3880_v18 = vpack.c.bf16 %v9193_v39, %v9199_v44  ;;  %v2429_v58 = vld [vmem:[#allocation2 + $0x13c] sm:$0xff] }
 0x3d5   : > { %v3971_v61 = vpop.permute.xlu0 %3970  ;;  %6899 = vmatmul.mubr.msk.bf16.gmra.mrb[104].mxu1 %vm1304_vm4, %v4371_v63  ;;  %v2507_v23 = vpack.c.bf16 %v2426_v62, %v2425_v35  ;;  %v2036_v21 = vld [vmem:[#allocation2 + $0x122] sm:$0xff]  ;;  %v3413_v35 = vld [vmem:[#allocation2 + $0x170] sm:$0xff] }
 0x3d6   : > { %4113 = vst.msk [vmem:[#allocation3 + $0x68] sm:$0xff] %vm2736_vm7, %v3971_v61  ;;  %6902 = vmatprep.mubr.msk.bf16.mxu1 %vm7570_vm1, %v7569_v0  ;;  %v2598_v3 = vpop.permute.xlu1 %2597  ;;  %v3017_v61 = vld [vmem:[#allocation2 + $0x136] sm:$0xff] }
 0x3d7   : > { %3598 = vrot.lane.b32.xlu0 %v3486_v47, %s7572_s26  ;;  %2741 = vst.msk [vmem:[#allocation3 + $0x60] sm:$0xff] %vm2736_vm7, %v2598_v3  ;;  %v4383_v3 = vld [vmem:[#allocation3 + $0xe8] sm:$0xff] }
 0x3d8   : > { %2224 = vrot.lane.b32.xlu1 %v2112_v45, %s7572_s26  ;;  %v3016_v45 = vld [vmem:[#allocation2 + $0x12e] sm:$0xff] }
 0x3d9   : > { %v3189_v15 = vpop.permute.xlu0 %3188 }
 0x3da   : > { %3330 = vst.msk [vmem:[#allocation3 + $0x80] sm:$0xff] %vm1950_vm5, %v3189_v15  ;;  %v1814_v54 = vpop.permute.xlu1 %1813 }
 0x3db   : > { %3990 = vrot.lane.b32.xlu0 %v3878_v17, %s7573_s28  ;;  %1956 = vst.msk [vmem:[#allocation3 + $0x78] sm:$0xff] %vm1950_vm5, %v1814_v54  ;;  %v3097_v17 = vpack.c.bf16 %v3017_v61, %v3016_v45  ;;  %v2039_v45 = vld [vmem:[#allocation2 + $0x13a] sm:$0xff] }
 0x3dc   : > { %2617 = vrot.lane.b32.xlu1 %v2505_v26, %s7573_s28  ;;  %v1722_v26 = vpack.c.bf16 %v9150_v13, %v9120_v2  ;;  %v4386_v2 = vld [vmem:[#allocation3 + $0x100] sm:$0xff] }
 0x3dd   : > { %v3581_v19 = vpop.permute.xlu0 %3580  ;;  %6903 = vmatmul.mubr.msk.bf16.gmra.mrb[108].mxu1 %vm1304_vm4, %v4374_v46  ;;  %v4367_v55 = vld [vmem:[#allocation3 + $0x68] sm:$0xff]  ;;  %v3408_v46 = vld [vmem:[#allocation2 + $0x148] sm:$0xff] }
 0x3de   : > { %3722 = vst.msk [vmem:[#allocation3 + $0x80] sm:$0xff] %vm2343_vm6, %v3581_v19  ;;  %4863 = vmatprep.mubr.bf16.mxu0 %v4367_v55  ;;  %6906 = vmatprep.mubr.msk.bf16.mxu1 %vm7570_vm1, %v7569_v0  ;;  %v2207_v6 = vpop.permute.xlu1 %2206  ;;  %v4366_v52 = vld [vmem:[#allocation3 + $0x60] sm:$0xff]  ;;  %v3489_v55 = vpack.c.bf16 %v3409_v48, %v3408_v46 }
 0x3df   : > { %3208 = vrot.lane.b32.xlu0 %v3095_v24, %s7575_s27  ;;  %2349 = vst.msk [vmem:[#allocation3 + $0x78] sm:$0xff] %vm2343_vm6, %v2207_v6  ;;  %4864 = vmatmul.mubr.bf16.gmra.mrb[212].mxu0 %v4366_v52  ;;  %v2034_v24 = vld [vmem:[#allocation2 + $0x112] sm:$0xff]  ;;  %v9222_v13 = vld [vmem:[#allocation2 + $0x149] sm:$0xff] }
 0x3e0   : > { %1833 = vrot.lane.b32.xlu1 %v1720_v28, %s7575_s27  ;;  %v2115_v52 = vpack.c.bf16 %v2035_v25, %v2034_v24  ;;  %v2428_v28 = vld [vmem:[#allocation2 + $0x134] sm:$0xff]  ;;  %v3881_v50 = vpack.c.bf16 %v9218_v59, %v9222_v13 }
 0x3e1   : > { %v3973_v4 = vpop.permute.xlu0 %3972  ;;  %v9267_v48 = vld [vmem:[#allocation2 + $0x171] sm:$0xff] }
 0x3e2   : > { %4114 = vst.msk [vmem:[#allocation3 + $0x80] sm:$0xff] %vm2736_vm7, %v3973_v4  ;;  %v2600_v30 = vpop.permute.xlu1 %2599  ;;  %v2427_v4 = vld [vmem:[#allocation2 + $0x12c] sm:$0xff] }
 0x3e3   : > { %3600 = vrot.lane.b32.xlu0 %v3487_v27, %s7572_s26  ;;  %2742 = vst.msk [vmem:[#allocation3 + $0x78] sm:$0xff] %vm2736_vm7, %v2600_v30  ;;  %v3019_v27 = vld [vmem:[#allocation2 + $0x146] sm:$0xff]  ;;  %v2508_v30 = vpack.c.bf16 %v2428_v28, %v2427_v4 }
 0x3e4   : > { %2226 = vrot.lane.b32.xlu1 %v2113_v33, %s7572_s26  ;;  %v3018_v33 = vld [vmem:[#allocation2 + $0x13e] sm:$0xff] }
 0x3e5   : > { %v3191_v42 = vpop.permute.xlu0 %3190  ;;  %6907 = vmatmul.mubr.msk.bf16.gmra.mrb[112].mxu1 %vm1304_vm4, %v4377_v12 }
 0x3e6   : > { %3331 = vst.msk [vmem:[#allocation3 + $0x98] sm:$0xff] %vm1950_vm5, %v3191_v42  ;;  %6910 = vmatprep.mubr.msk.bf16.mxu1 %vm7570_vm1, %v7569_v0  ;;  %v1816_v34 = vpop.permute.xlu1 %1815  ;;  %v3098_v42 = vpack.c.bf16 %v3019_v27, %v3018_v33  ;;  %v3414_v33 = vld [vmem:[#allocation2 + $0x178] sm:$0xff] }
 0x3e7   : > { %3992 = vrot.lane.b32.xlu0 %v3879_v57, %s7573_s28  ;;  %1957 = vst.msk [vmem:[#allocation3 + $0x90] sm:$0xff] %vm1950_vm5, %v1816_v34  ;;  %v3411_v57 = vld [vmem:[#allocation2 + $0x160] sm:$0xff]  ;;  %v1723_v34 = vpack.c.bf16 %v9173_v11, %v9144_v1 }
 0x3e8   : > { %2619 = vrot.lane.b32.xlu1 %v2506_v22, %s7573_s28  ;;  %v4389_v22 = vld [vmem:[#allocation3 + $0x118] sm:$0xff] }
 0x3e9   : > { %v3583_v8 = vpop.permute.xlu0 %3582  ;;  %v4370_v14 = vld [vmem:[#allocation3 + $0x80] sm:$0xff] }
 0x3ea   : > { %3723 = vst.msk [vmem:[#allocation3 + $0x98] sm:$0xff] %vm2343_vm6, %v3583_v8  ;;  %4871 = vmatprep.mubr.bf16.mxu0 %v4370_v14  ;;  %v2209_v41 = vpop.permute.xlu1 %2208  ;;  %v4369_v9 = vld [vmem:[#allocation3 + $0x78] sm:$0xff] }
 0x3eb   : > { %3210 = vrot.lane.b32.xlu0 %v3096_v40, %s7575_s27  ;;  %2350 = vst.msk [vmem:[#allocation3 + $0x90] sm:$0xff] %vm2343_vm6, %v2209_v41  ;;  %4872 = vmatmul.mubr.bf16.gmra.mrb[216].mxu0 %v4369_v9  ;;  %v2037_v8 = vld [vmem:[#allocation2 + $0x12a] sm:$0xff]  ;;  %v3490_v40 = vpack.c.bf16 %v3411_v57, %v3410_v60  ;;  %v9242_v41 = vld [vmem:[#allocation2 + $0x161] sm:$0xff]  ;;  %v9248_v9 = vld [vmem:[#allocation2 + $0x159] sm:$0xff] }
 0x3ec   : > { %1835 = vrot.lane.b32.xlu1 %v1721_v38, %s7575_s27  ;;  %v2116_v11 = vpack.c.bf16 %v2037_v8, %v2036_v21  ;;  %v2430_v38 = vld [vmem:[#allocation2 + $0x144] sm:$0xff]  ;;  %v3882_v37 = vpack.c.bf16 %v9242_v41, %v9248_v9  ;;  %v2433_v8 = vld [vmem:[#allocation2 + $0x15c] sm:$0xff] }
 0x3ed   : > { %v3975_v5 = vpop.permute.xlu0 %3974  ;;  %6911 = vmatmul.mubr.msk.bf16.gmra.mrb[116].mxu1 %vm1304_vm4, %v4380_v31  ;;  %v2509_v53 = vpack.c.bf16 %v2430_v38, %v2429_v58  ;;  %v2040_v57 = vld [vmem:[#allocation2 + $0x142] sm:$0xff]  ;;  %v3417_v58 = vld [vmem:[#allocation2 + $0x190] sm:$0xff] }
 0x3ee   : > { %4115 = vst.msk [vmem:[#allocation3 + $0x98] sm:$0xff] %vm2736_vm7, %v3975_v5  ;;  %6914 = vmatprep.mubr.msk.bf16.mxu1 %vm7570_vm1, %v7569_v0  ;;  %v2602_v20 = vpop.permute.xlu1 %2601  ;;  %v3021_v5 = vld [vmem:[#allocation2 + $0x156] sm:$0xff] }
 0x3ef   : > { %3602 = vrot.lane.b32.xlu0 %v3488_v49, %s7572_s26  ;;  %2743 = vst.msk [vmem:[#allocation3 + $0x90] sm:$0xff] %vm2736_vm7, %v2602_v20  ;;  %v4392_v20 = vld [vmem:[#allocation3 + $0x130] sm:$0xff] }
 0x3f0   : > { %2228 = vrot.lane.b32.xlu1 %v2114_v16, %s7572_s26  ;;  %v3020_v16 = vld [vmem:[#allocation2 + $0x14e] sm:$0xff] }
 0x3f1   : > { %v3193_v63 = vpop.permute.xlu0 %3192 }
 0x3f2   : > { %3332 = vst.msk [vmem:[#allocation3 + $0xb0] sm:$0xff] %vm1950_vm5, %v3193_v63  ;;  %v1818_v47 = vpop.permute.xlu1 %1817 }
 0x3f3   : > { %3994 = vrot.lane.b32.xlu0 %v3880_v18, %s7573_s28  ;;  %1958 = vst.msk [vmem:[#allocation3 + $0xa8] sm:$0xff] %vm1950_vm5, %v1818_v47  ;;  %v3099_v18 = vpack.c.bf16 %v3021_v5, %v3020_v16  ;;  %v2043_v16 = vld [vmem:[#allocation2 + $0x15a] sm:$0xff] }
 0x3f4   : > { %2621 = vrot.lane.b32.xlu1 %v2507_v23, %s7573_s28  ;;  %v1724_v23 = vpack.c.bf16 %v9199_v44, %v9169_v29  ;;  %v4395_v29 = vld [vmem:[#allocation3 + $0x148] sm:$0xff]  ;;  %v9271_v44 = vld [vmem:[#allocation2 + $0x169] sm:$0xff] }
 0x3f5   : > { %v3585_v32 = vpop.permute.xlu0 %3584  ;;  %6915 = vmatmul.mubr.msk.bf16.gmra.mrb[120].mxu1 %vm1304_vm4, %v4383_v3  ;;  %v4373_v15 = vld [vmem:[#allocation3 + $0x98] sm:$0xff]  ;;  %v3883_v25 = vpack.c.bf16 %v9267_v48, %v9271_v44 }
 0x3f6   : > { %3724 = vst.msk [vmem:[#allocation3 + $0xb0] sm:$0xff] %vm2343_vm6, %v3585_v32  ;;  %4879 = vmatprep.mubr.bf16.mxu0 %v4373_v15  ;;  %6918 = vmatprep.mubr.msk.bf16.mxu1 %vm7570_vm1, %v7569_v0  ;;  %v2211_v51 = vpop.permute.xlu1 %2210  ;;  %v4372_v54 = vld [vmem:[#allocation3 + $0x90] sm:$0xff]  ;;  %v3412_v3 = vld [vmem:[#allocation2 + $0x168] sm:$0xff] }
 0x3f7   : > { %3212 = vrot.lane.b32.xlu0 %v3097_v17, %s7575_s27  ;;  %2351 = vst.msk [vmem:[#allocation3 + $0xa8] sm:$0xff] %vm2343_vm6, %v2211_v51  ;;  %4880 = vmatmul.mubr.bf16.gmra.mrb[220].mxu0 %v4372_v54  ;;  %v3491_v15 = vpack.c.bf16 %v3413_v35, %v3412_v3  ;;  %v2038_v17 = vld [vmem:[#allocation2 + $0x132] sm:$0xff] }
 0x3f8   : > { %1837 = vrot.lane.b32.xlu1 %v1722_v26, %s7575_s27  ;;  %v2117_v54 = vpack.c.bf16 %v2039_v45, %v2038_v17  ;;  %v2432_v26 = vld [vmem:[#allocation2 + $0x154] sm:$0xff] }
 0x3f9   : > { %v3977_v19 = vpop.permute.xlu0 %3976  ;;  %v9316_v35 = vld [vmem:[#allocation2 + $0x191] sm:$0xff] }
 0x3fa   : > { %4116 = vst.msk [vmem:[#allocation3 + $0xb0] sm:$0xff] %vm2736_vm7, %v3977_v19  ;;  %v2604_v6 = vpop.permute.xlu1 %2603  ;;  %v2431_v19 = vld [vmem:[#allocation2 + $0x14c] sm:$0xff] }
 0x3fb   : > { %3604 = vrot.lane.b32.xlu0 %v3489_v55, %s7572_s26  ;;  %2744 = vst.msk [vmem:[#allocation3 + $0xa8] sm:$0xff] %vm2736_vm7, %v2604_v6  ;;  %v3023_v55 = vld [vmem:[#allocation2 + $0x166] sm:$0xff]  ;;  %v2510_v6 = vpack.c.bf16 %v2432_v26, %v2431_v19 }
 0x3fc   : > { %2230 = vrot.lane.b32.xlu1 %v2115_v52, %s7572_s26  ;;  %v3022_v52 = vld [vmem:[#allocation2 + $0x15e] sm:$0xff] }
 0x3fd   : > { %v3195_v10 = vpop.permute.xlu0 %3194  ;;  %6919 = vmatmul.mubr.msk.bf16.gmra.mrb[124].mxu1 %vm1304_vm4, %v4386_v2 }
 0x3fe   : > { %3333 = vst.msk [vmem:[#allocation3 + $0xc8] sm:$0xff] %vm1950_vm5, %v3195_v10  ;;  %6922 = vmatprep.mubr.msk.bf16.mxu1 %vm7570_vm1, %v7569_v0  ;;  %v1820_v36 = vpop.permute.xlu1 %1819  ;;  %v3100_v10 = vpack.c.bf16 %v3023_v55, %v3022_v52  ;;  %v3418_v52 = vld [vmem:[#allocation2 + $0x198] sm:$0xff] }
 0x3ff   : > { %3996 = vrot.lane.b32.xlu0 %v3881_v50, %s7573_s28  ;;  %1959 = vst.msk [vmem:[#allocation3 + $0xc0] sm:$0xff] %vm1950_vm5, %v1820_v36  ;;  %v3415_v50 = vld [vmem:[#allocation2 + $0x180] sm:$0xff]  ;;  %v1725_v36 = vpack.c.bf16 %v9222_v13, %v9193_v39 }
 0x400   : > { %2623 = vrot.lane.b32.xlu1 %v2508_v30, %s7573_s28  ;;  %v4398_v30 = vld [vmem:[#allocation3 + $0x160] sm:$0xff] }
 0x401   : > { %v3587_v12 = vpop.permute.xlu0 %3586  ;;  %v4376_v43 = vld [vmem:[#allocation3 + $0xb0] sm:$0xff] }
 0x402   : > { %3725 = vst.msk [vmem:[#allocation3 + $0xc8] sm:$0xff] %vm2343_vm6, %v3587_v12  ;;  %4887 = vmatprep.mubr.bf16.mxu0 %v4376_v43  ;;  %v2213_v56 = vpop.permute.xlu1 %2212  ;;  %v4375_v7 = vld [vmem:[#allocation3 + $0xa8] sm:$0xff]  ;;  %v2041_v12 = vld [vmem:[#allocation2 + $0x14a] sm:$0xff] }
 0x403   : > { %3214 = vrot.lane.b32.xlu0 %v3098_v42, %s7575_s27  ;;  %2352 = vst.msk [vmem:[#allocation3 + $0xc0] sm:$0xff] %vm2343_vm6, %v2213_v56  ;;  %4888 = vmatmul.mubr.bf16.gmra.mrb[224].mxu0 %v4375_v7  ;;  %v3492_v42 = vpack.c.bf16 %v3415_v50, %v3414_v33  ;;  %v9291_v56 = vld [vmem:[#allocation2 + $0x181] sm:$0xff]  ;;  %v2118_v13 = vpack.c.bf16 %v2041_v12, %v2040_v57  ;;  %v9297_v7 = vld [vmem:[#allocation2 + $0x179] sm:$0xff] }
 0x404   : > { %1839 = vrot.lane.b32.xlu1 %v1723_v34, %s7575_s27  ;;  %v2434_v34 = vld [vmem:[#allocation2 + $0x164] sm:$0xff]  ;;  %v3884_v60 = vpack.c.bf16 %v9291_v56, %v9297_v7  ;;  %v2437_v12 = vld [vmem:[#allocation2 + $0x17c] sm:$0xff] }
 0x405   : > { %v3979_v14 = vpop.permute.xlu0 %3978  ;;  %6923 = vmatmul.mubr.msk.bf16.gmra.mrb[128].mxu1 %vm1304_vm4, %v4389_v22  ;;  %v2511_v21 = vpack.c.bf16 %v2434_v34, %v2433_v8  ;;  %v2044_v50 = vld [vmem:[#allocation2 + $0x162] sm:$0xff]  ;;  %v3421_v8 = vld [vmem:[#allocation2 + $0x1b0] sm:$0xff] }
 0x406   : > { %4117 = vst.msk [vmem:[#allocation3 + $0xc8] sm:$0xff] %vm2736_vm7, %v3979_v14  ;;  %6926 = vmatprep.mubr.msk.bf16.mxu1 %vm7570_vm1, %v7569_v0  ;;  %v2606_v1 = vpop.permute.xlu1 %2605  ;;  %v3025_v14 = vld [vmem:[#allocation2 + $0x176] sm:$0xff] }
 0x407   : > { %3606 = vrot.lane.b32.xlu0 %v3490_v40, %s7572_s26  ;;  %2745 = vst.msk [vmem:[#allocation3 + $0xc0] sm:$0xff] %vm2736_vm7, %v2606_v1  ;;  %v4401_v1 = vld [vmem:[#allocation3 + $0x178] sm:$0xff] }
 0x408   : > { %2232 = vrot.lane.b32.xlu1 %v2116_v11, %s7572_s26  ;;  %v3024_v11 = vld [vmem:[#allocation2 + $0x16e] sm:$0xff] }
 0x409   : > { %v3197_v31 = vpop.permute.xlu0 %3196 }
 0x40a   : > { %3334 = vst.msk [vmem:[#allocation3 + $0xe0] sm:$0xff] %vm1950_vm5, %v3197_v31  ;;  %v1822_v49 = vpop.permute.xlu1 %1821 }
 0x40b   : > { %3998 = vrot.lane.b32.xlu0 %v3882_v37, %s7573_s28  ;;  %1960 = vst.msk [vmem:[#allocation3 + $0xd8] sm:$0xff] %vm1950_vm5, %v1822_v49  ;;  %v3101_v37 = vpack.c.bf16 %v3025_v14, %v3024_v11  ;;  %v2047_v11 = vld [vmem:[#allocation2 + $0x17a] sm:$0xff] }
 0x40c   : > { %2625 = vrot.lane.b32.xlu1 %v2509_v53, %s7573_s28  ;;  %v1726_v53 = vpack.c.bf16 %v9248_v9, %v9218_v59  ;;  %v4404_v59 = vld [vmem:[#allocation3 + $0x190] sm:$0xff]  ;;  %v9320_v9 = vld [vmem:[#allocation2 + $0x189] sm:$0xff] }
 0x40d   : > { %v3589_v62 = vpop.permute.xlu0 %3588  ;;  %6927 = vmatmul.mubr.msk.bf16.gmra.mrb[132].mxu1 %vm1304_vm4, %v4392_v20  ;;  %v4379_v63 = vld [vmem:[#allocation3 + $0xc8] sm:$0xff]  ;;  %v3416_v20 = vld [vmem:[#allocation2 + $0x188] sm:$0xff]  ;;  %v3885_v45 = vpack.c.bf16 %v9316_v35, %v9320_v9 }
 0x40e   : > { %3726 = vst.msk [vmem:[#allocation3 + $0xe0] sm:$0xff] %vm2343_vm6, %v3589_v62  ;;  %4895 = vmatprep.mubr.bf16.mxu0 %v4379_v63  ;;  %6930 = vmatprep.mubr.msk.bf16.mxu1 %vm7570_vm1, %v7569_v0  ;;  %v2215_v61 = vpop.permute.xlu1 %2214  ;;  %v4378_v47 = vld [vmem:[#allocation3 + $0xc0] sm:$0xff]  ;;  %v3493_v63 = vpack.c.bf16 %v3417_v58, %v3416_v20 }
 0x40f   : > { %3216 = vrot.lane.b32.xlu0 %v3099_v18, %s7575_s27  ;;  %2353 = vst.msk [vmem:[#allocation3 + $0xd8] sm:$0xff] %vm2343_vm6, %v2215_v61  ;;  %4896 = vmatmul.mubr.bf16.gmra.mrb[228].mxu0 %v4378_v47  ;;  %v2042_v18 = vld [vmem:[#allocation2 + $0x152] sm:$0xff] }
 0x410   : > { %1841 = vrot.lane.b32.xlu1 %v1724_v23, %s7575_s27  ;;  %v2119_v47 = vpack.c.bf16 %v2043_v16, %v2042_v18  ;;  %v2436_v23 = vld [vmem:[#allocation2 + $0x174] sm:$0xff] }
 0x411   : > { %v3981_v32 = vpop.permute.xlu0 %3980  ;;  %v9365_v58 = vld [vmem:[#allocation2 + $0x1b1] sm:$0xff] }
 0x412   : > { %4118 = vst.msk [vmem:[#allocation3 + $0xe0] sm:$0xff] %vm2736_vm7, %v3981_v32  ;;  %v2608_v51 = vpop.permute.xlu1 %2607  ;;  %v2435_v32 = vld [vmem:[#allocation2 + $0x16c] sm:$0xff] }
 0x413   : > { %3608 = vrot.lane.b32.xlu0 %v3491_v15, %s7572_s26  ;;  %2746 = vst.msk [vmem:[#allocation3 + $0xd8] sm:$0xff] %vm2736_vm7, %v2608_v51  ;;  %v3027_v15 = vld [vmem:[#allocation2 + $0x186] sm:$0xff]  ;;  %v2512_v51 = vpack.c.bf16 %v2436_v23, %v2435_v32 }
 0x414   : > { %2234 = vrot.lane.b32.xlu1 %v2117_v54, %s7572_s26  ;;  %v3026_v54 = vld [vmem:[#allocation2 + $0x17e] sm:$0xff] }
 0x415   : > { %v3199_v46 = vpop.permute.xlu0 %3198  ;;  %6931 = vmatmul.mubr.msk.bf16.gmra.mrb[136].mxu1 %vm1304_vm4, %v4395_v29 }
 0x416   : > { %3335 = vst.msk [vmem:[#allocation3 + $0xf8] sm:$0xff] %vm1950_vm5, %v3199_v46  ;;  %6934 = vmatprep.mubr.msk.bf16.mxu1 %vm7570_vm1, %v7569_v0  ;;  %v1824_v24 = vpop.permute.xlu1 %1823  ;;  %v3102_v46 = vpack.c.bf16 %v3027_v15, %v3026_v54  ;;  %v3422_v54 = vld [vmem:[#allocation2 + $0x1b8] sm:$0xff] }
 0x417   : > { %4000 = vrot.lane.b32.xlu0 %v3883_v25, %s7573_s28  ;;  %1961 = vst.msk [vmem:[#allocation3 + $0xf0] sm:$0xff] %vm1950_vm5, %v1824_v24  ;;  %v3419_v25 = vld [vmem:[#allocation2 + $0x1a0] sm:$0xff]  ;;  %v1727_v24 = vpack.c.bf16 %v9271_v44, %v9242_v41 }
 0x418   : > { %2627 = vrot.lane.b32.xlu1 %v2510_v6, %s7573_s28  ;;  %v4407_v6 = vld [vmem:[#allocation3 + $0x1a8] sm:$0xff] }
 0x419   : > { %v3591_v2 = vpop.permute.xlu0 %3590  ;;  %v4382_v28 = vld [vmem:[#allocation3 + $0xe0] sm:$0xff] }
 0x41a   : > { %3727 = vst.msk [vmem:[#allocation3 + $0xf8] sm:$0xff] %vm2343_vm6, %v3591_v2  ;;  %4903 = vmatprep.mubr.bf16.mxu0 %v4382_v28  ;;  %v2217_v4 = vpop.permute.xlu1 %2216  ;;  %v4381_v27 = vld [vmem:[#allocation3 + $0xd8] sm:$0xff] }
 0x41b   : > { %3218 = vrot.lane.b32.xlu0 %v3100_v10, %s7575_s27  ;;  %2354 = vst.msk [vmem:[#allocation3 + $0xf0] sm:$0xff] %vm2343_vm6, %v2217_v4  ;;  %4904 = vmatmul.mubr.bf16.gmra.mrb[232].mxu0 %v4381_v27  ;;  %v2045_v2 = vld [vmem:[#allocation2 + $0x16a] sm:$0xff]  ;;  %v3494_v10 = vpack.c.bf16 %v3419_v25, %v3418_v52  ;;  %v9340_v4 = vld [vmem:[#allocation2 + $0x1a1] sm:$0xff]  ;;  %v9346_v27 = vld [vmem:[#allocation2 + $0x199] sm:$0xff] }
 0x41c   : > { %1843 = vrot.lane.b32.xlu1 %v1725_v36, %s7575_s27  ;;  %v2120_v44 = vpack.c.bf16 %v2045_v2, %v2044_v50  ;;  %v2438_v36 = vld [vmem:[#allocation2 + $0x184] sm:$0xff]  ;;  %v3886_v33 = vpack.c.bf16 %v9340_v4, %v9346_v27  ;;  %v2441_v2 = vld [vmem:[#allocation2 + $0x19c] sm:$0xff] }
 0x41d   : > { %v3983_v43 = vpop.permute.xlu0 %3982  ;;  %6935 = vmatmul.mubr.msk.bf16.gmra.mrb[140].mxu1 %vm1304_vm4, %v4398_v30  ;;  %v2513_v57 = vpack.c.bf16 %v2438_v36, %v2437_v12  ;;  %v2048_v25 = vld [vmem:[#allocation2 + $0x182] sm:$0xff]  ;;  %v3425_v12 = vld [vmem:[#allocation2 + $0x1d0] sm:$0xff] }
 0x41e   : > { %4119 = vst.msk [vmem:[#allocation3 + $0xf8] sm:$0xff] %vm2736_vm7, %v3983_v43  ;;  %6938 = vmatprep.mubr.msk.bf16.mxu1 %vm7570_vm1, %v7569_v0  ;;  %v2610_v39 = vpop.permute.xlu1 %2609  ;;  %v3029_v43 = vld [vmem:[#allocation2 + $0x196] sm:$0xff] }
 0x41f   : > { %3610 = vrot.lane.b32.xlu0 %v3492_v42, %s7572_s26  ;;  %2747 = vst.msk [vmem:[#allocation3 + $0xf0] sm:$0xff] %vm2736_vm7, %v2610_v39  ;;  %v4410_v39 = vld [vmem:[#allocation3 + $0x1c0] sm:$0xff] }
 0x420   : > { %2236 = vrot.lane.b32.xlu1 %v2118_v13, %s7572_s26  ;;  %v3028_v13 = vld [vmem:[#allocation2 + $0x18e] sm:$0xff] }
 0x421   : > { %v3201_v22 = vpop.permute.xlu0 %3200 }
 0x422   : > { %3336 = vst.msk [vmem:[#allocation3 + $0x110] sm:$0xff] %vm1950_vm5, %v3201_v22  ;;  %v1826_v40 = vpop.permute.xlu1 %1825 }
 0x423   : > { %4002 = vrot.lane.b32.xlu0 %v3884_v60, %s7573_s28  ;;  %1962 = vst.msk [vmem:[#allocation3 + $0x108] sm:$0xff] %vm1950_vm5, %v1826_v40  ;;  %v3103_v60 = vpack.c.bf16 %v3029_v43, %v3028_v13  ;;  %v2051_v13 = vld [vmem:[#allocation2 + $0x19a] sm:$0xff] }
 0x424   : > { %2629 = vrot.lane.b32.xlu1 %v2511_v21, %s7573_s28  ;;  %v1728_v21 = vpack.c.bf16 %v9297_v7, %v9267_v48  ;;  %v4413_v48 = vld [vmem:[#allocation3 + $0x1d8] sm:$0xff] }
 0x425   : > { %v3593_v38 = vpop.permute.xlu0 %3592  ;;  %6939 = vmatmul.mubr.msk.bf16.gmra.mrb[144].mxu1 %vm1304_vm4, %v4401_v1  ;;  %v4385_v31 = vld [vmem:[#allocation3 + $0xf8] sm:$0xff] }
 0x426   : > { %3728 = vst.msk [vmem:[#allocation3 + $0x110] sm:$0xff] %vm2343_vm6, %v3593_v38  ;;  %4911 = vmatprep.mubr.bf16.mxu0 %v4385_v31  ;;  %6942 = vmatprep.mubr.msk.bf16.mxu1 %vm7570_vm1, %v7569_v0  ;;  %v2219_v5 = vpop.permute.xlu1 %2218  ;;  %v4384_v49 = vld [vmem:[#allocation3 + $0xf0] sm:$0xff]  ;;  %v3420_v1 = vld [vmem:[#allocation2 + $0x1a8] sm:$0xff] }
 0x427   : > { %3220 = vrot.lane.b32.xlu0 %v3101_v37, %s7575_s27  ;;  %2355 = vst.msk [vmem:[#allocation3 + $0x108] sm:$0xff] %vm2343_vm6, %v2219_v5  ;;  %4912 = vmatmul.mubr.bf16.gmra.mrb[236].mxu0 %v4384_v49  ;;  %v3495_v31 = vpack.c.bf16 %v3421_v8, %v3420_v1  ;;  %v2046_v37 = vld [vmem:[#allocation2 + $0x172] sm:$0xff]  ;;  %v9369_v7 = vld [vmem:[#allocation2 + $0x1a9] sm:$0xff] }
 0x428   : > { %1845 = vrot.lane.b32.xlu1 %v1726_v53, %s7575_s27  ;;  %v2121_v49 = vpack.c.bf16 %v2047_v11, %v2046_v37  ;;  %v2440_v53 = vld [vmem:[#allocation2 + $0x194] sm:$0xff]  ;;  %v3887_v16 = vpack.c.bf16 %v9365_v58, %v9369_v7 }
 0x429   : > { %v3985_v62 = vpop.permute.xlu0 %3984  ;;  %v3817_v8 = vld [vmem:[#allocation2 + $0x1d1] sm:$0xff] }
 0x42a   : > { %4120 = vst.msk [vmem:[#allocation3 + $0x110] sm:$0xff] %vm2736_vm7, %v3985_v62  ;;  %v2612_v61 = vpop.permute.xlu1 %2611  ;;  %v2439_v62 = vld [vmem:[#allocation2 + $0x18c] sm:$0xff] }
 0x42b   : > { %3612 = vrot.lane.b32.xlu0 %v3493_v63, %s7572_s26  ;;  %2748 = vst.msk [vmem:[#allocation3 + $0x108] sm:$0xff] %vm2736_vm7, %v2612_v61  ;;  %v3031_v63 = vld [vmem:[#allocation2 + $0x1a6] sm:$0xff]  ;;  %v2514_v61 = vpack.c.bf16 %v2440_v53, %v2439_v62 }
 0x42c   : > { %2238 = vrot.lane.b32.xlu1 %v2119_v47, %s7572_s26  ;;  %v3030_v47 = vld [vmem:[#allocation2 + $0x19e] sm:$0xff] }
 0x42d   : > { %v3203_v3 = vpop.permute.xlu0 %3202  ;;  %6943 = vmatmul.mubr.msk.bf16.gmra.mrb[148].mxu1 %vm1304_vm4, %v4404_v59 }
 0x42e   : > { %3337 = vst.msk [vmem:[#allocation3 + $0x128] sm:$0xff] %vm1950_vm5, %v3203_v3  ;;  %6946 = vmatprep.mubr.msk.bf16.mxu1 %vm7570_vm1, %v7569_v0  ;;  %v1828_v17 = vpop.permute.xlu1 %1827  ;;  %v3104_v3 = vpack.c.bf16 %v3031_v63, %v3030_v47  ;;  %v3426_v47 = vld [vmem:[#allocation2 + $0x1d8] sm:$0xff] }
 0x42f   : > { %4004 = vrot.lane.b32.xlu0 %v3885_v45, %s7573_s28  ;;  %1963 = vst.msk [vmem:[#allocation3 + $0x120] sm:$0xff] %vm1950_vm5, %v1828_v17  ;;  %v3423_v45 = vld [vmem:[#allocation2 + $0x1c0] sm:$0xff]  ;;  %v1729_v17 = vpack.c.bf16 %v9320_v9, %v9291_v56 }
 0x430   : > { %2631 = vrot.lane.b32.xlu1 %v2512_v51, %s7573_s28  ;;  %v4416_v51 = vld [vmem:[#allocation3 + $0x1f0] sm:$0xff] }
 0x431   : > { %v3595_v29 = vpop.permute.xlu0 %3594  ;;  %v4388_v26 = vld [vmem:[#allocation3 + $0x110] sm:$0xff] }
 0x432   : > { %3729 = vst.msk [vmem:[#allocation3 + $0x128] sm:$0xff] %vm2343_vm6, %v3595_v29  ;;  %4919 = vmatprep.mubr.bf16.mxu0 %v4388_v26  ;;  %v2221_v19 = vpop.permute.xlu1 %2220  ;;  %v4387_v55 = vld [vmem:[#allocation3 + $0x108] sm:$0xff]  ;;  %v2049_v29 = vld [vmem:[#allocation2 + $0x18a] sm:$0xff] }
 0x433   : > { %3222 = vrot.lane.b32.xlu0 %v3102_v46, %s7575_s27  ;;  %2356 = vst.msk [vmem:[#allocation3 + $0x120] sm:$0xff] %vm2343_vm6, %v2221_v19  ;;  %4920 = vmatmul.mubr.bf16.gmra.mrb[240].mxu0 %v4387_v55  ;;  %v3496_v46 = vpack.c.bf16 %v3423_v45, %v3422_v54  ;;  %v3815_v19 = vld [vmem:[#allocation2 + $0x1c1] sm:$0xff]  ;;  %v2122_v9 = vpack.c.bf16 %v2049_v29, %v2048_v25  ;;  %v9393_v55 = vld [vmem:[#allocation2 + $0x1b9] sm:$0xff] }
 0x434   : > { %1847 = vrot.lane.b32.xlu1 %v1727_v24, %s7575_s27  ;;  %v2442_v24 = vld [vmem:[#allocation2 + $0x1a4] sm:$0xff]  ;;  %v3888_v52 = vpack.c.bf16 %v3815_v19, %v9393_v55  ;;  %v2445_v29 = vld [vmem:[#allocation2 + $0x1bc] sm:$0xff] }
 0x435   : > { %v3987_v28 = vpop.permute.xlu0 %3986  ;;  %6947 = vmatmul.mubr.msk.bf16.gmra.mrb[152].mxu1 %vm1304_vm4, %v4407_v6  ;;  %v2515_v50 = vpack.c.bf16 %v2442_v24, %v2441_v2  ;;  %v2052_v45 = vld [vmem:[#allocation2 + $0x1a2] sm:$0xff] }
 0x436   : > { %4121 = vst.msk [vmem:[#allocation3 + $0x128] sm:$0xff] %vm2736_vm7, %v3987_v28  ;;  %6950 = vmatprep.mubr.msk.bf16.mxu1 %vm7570_vm1, %v7569_v0  ;;  %v2614_v41 = vpop.permute.xlu1 %2613  ;;  %v3033_v28 = vld [vmem:[#allocation2 + $0x1b6] sm:$0xff]  ;;  %v4428_v19 = vld [vmem:[#allocation3 + $0x250] sm:$0xff] }
 0x437   : > { %3614 = vrot.lane.b32.xlu0 %v3494_v10, %s7572_s26  ;;  %2749 = vst.msk [vmem:[#allocation3 + $0x120] sm:$0xff] %vm2736_vm7, %v2614_v41  ;;  %v4419_v41 = vld [vmem:[#allocation3 + $0x208] sm:$0xff] }
 0x438   : > { %2240 = vrot.lane.b32.xlu1 %v2120_v44, %s7572_s26  ;;  %v3032_v44 = vld [vmem:[#allocation2 + $0x1ae] sm:$0xff] }
 0x439   : > { %v3205_v30 = vpop.permute.xlu0 %3204 }
 0x43a   : > { %3338 = vst.msk [vmem:[#allocation3 + $0x140] sm:$0xff] %vm1950_vm5, %v3205_v30  ;;  %v1830_v42 = vpop.permute.xlu1 %1829 }
 0x43b   : > { %4006 = vrot.lane.b32.xlu0 %v3886_v33, %s7573_s28  ;;  %1964 = vst.msk [vmem:[#allocation3 + $0x138] sm:$0xff] %vm1950_vm5, %v1830_v42  ;;  %v3105_v33 = vpack.c.bf16 %v3033_v28, %v3032_v44 }
 0x43c   : > { %2633 = vrot.lane.b32.xlu1 %v2513_v57, %s7573_s28  ;;  %v1730_v57 = vpack.c.bf16 %v9346_v27, %v9316_v35  ;;  %v4422_v35 = vld [vmem:[#allocation3 + $0x220] sm:$0xff] }
 0x43d   : > { %v3597_v34 = vpop.permute.xlu0 %3596  ;;  %6951 = vmatmul.mubr.msk.bf16.gmra.mrb[156].mxu1 %vm1304_vm4, %v4410_v39  ;;  %v4391_v22 = vld [vmem:[#allocation3 + $0x128] sm:$0xff]  ;;  %v3424_v39 = vld [vmem:[#allocation2 + $0x1c8] sm:$0xff] }
 0x43e   : > { %3730 = vst.msk [vmem:[#allocation3 + $0x140] sm:$0xff] %vm2343_vm6, %v3597_v34  ;;  %4927 = vmatprep.mubr.bf16.mxu0 %v4391_v22  ;;  %6954 = vmatprep.mubr.msk.bf16.mxu1 %vm7570_vm1, %v7569_v0  ;;  %v2223_v14 = vpop.permute.xlu1 %2222  ;;  %v4390_v40 = vld [vmem:[#allocation3 + $0x120] sm:$0xff]  ;;  %v3497_v22 = vpack.c.bf16 %v3425_v12, %v3424_v39 }
 0x43f   : > { %3224 = vrot.lane.b32.xlu0 %v3103_v60, %s7575_s27  ;;  %2357 = vst.msk [vmem:[#allocation3 + $0x138] sm:$0xff] %vm2343_vm6, %v2223_v14  ;;  %4928 = vmatmul.mubr.bf16.gmra.mrb[244].mxu0 %v4390_v40  ;;  %v2050_v60 = vld [vmem:[#allocation2 + $0x192] sm:$0xff]  ;;  %v3816_v27 = vld [vmem:[#allocation2 + $0x1c9] sm:$0xff] }
 0x440   : > { %1849 = vrot.lane.b32.xlu1 %v1728_v21, %s7575_s27  ;;  %v2123_v40 = vpack.c.bf16 %v2051_v13, %v2050_v60  ;;  %v2444_v21 = vld [vmem:[#allocation2 + $0x1b4] sm:$0xff]  ;;  %v3889_v11 = vpack.c.bf16 %v3817_v8, %v3816_v27  ;;  %v2447_v13 = vld [vmem:[#allocation2 + $0x1cc] sm:$0xff] }
 0x441   : > { %v3989_v38 = vpop.permute.xlu0 %3988 }
 0x442   : > { %4122 = vst.msk [vmem:[#allocation3 + $0x140] sm:$0xff] %vm2736_vm7, %v3989_v38  ;;  %v2616_v5 = vpop.permute.xlu1 %2615  ;;  %v2443_v38 = vld [vmem:[#allocation2 + $0x1ac] sm:$0xff] }
 0x443   : > { %3616 = vrot.lane.b32.xlu0 %v3495_v31, %s7572_s26  ;;  %2750 = vst.msk [vmem:[#allocation3 + $0x138] sm:$0xff] %vm2736_vm7, %v2616_v5  ;;  %v3035_v31 = vld [vmem:[#allocation2 + $0x1c6] sm:$0xff]  ;;  %v2516_v5 = vpack.c.bf16 %v2444_v21, %v2443_v38 }
 0x444   : > { %2242 = vrot.lane.b32.xlu1 %v2121_v49, %s7572_s26  ;;  %v3034_v49 = vld [vmem:[#allocation2 + $0x1be] sm:$0xff] }
 0x445   : > { %v3207_v20 = vpop.permute.xlu0 %3206  ;;  %6955 = vmatmul.mubr.msk.bf16.gmra.mrb[160].mxu1 %vm1304_vm4, %v4413_v48 }
 0x446   : > { %3339 = vst.msk [vmem:[#allocation3 + $0x158] sm:$0xff] %vm1950_vm5, %v3207_v20  ;;  %6958 = vmatprep.mubr.msk.bf16.mxu1 %vm7570_vm1, %v7569_v0  ;;  %v1832_v18 = vpop.permute.xlu1 %1831  ;;  %v3106_v20 = vpack.c.bf16 %v3035_v31, %v3034_v49  ;;  %v9465_v31 = vld [vmem:[#allocation9] ss:$0 sm:$0xff] }
 0x447   : > { %4008 = vrot.lane.b32.xlu0 %v3887_v16, %s7573_s28  ;;  %1965 = vst.msk [vmem:[#allocation3 + $0x150] sm:$0xff] %vm1950_vm5, %v1832_v18  ;;  %v3427_v16 = vld [vmem:[#allocation2 + $0x1e0] sm:$0xff]  ;;  %v1731_v18 = vpack.c.bf16 %v9369_v7, %v9340_v4 }
 0x448   : > { %2635 = vrot.lane.b32.xlu1 %v2514_v61, %s7573_s28  ;;  %v4425_v61 = vld [vmem:[#allocation3 + $0x238] sm:$0xff] }
 0x449   : > { %v3599_v59 = vpop.permute.xlu0 %3598  ;;  %v4394_v23 = vld [vmem:[#allocation3 + $0x140] sm:$0xff] }
 0x44a   : > { %3731 = vst.msk [vmem:[#allocation3 + $0x158] sm:$0xff] %vm2343_vm6, %v3599_v59  ;;  %4935 = vmatprep.mubr.bf16.mxu0 %v4394_v23  ;;  %v2225_v32 = vpop.permute.xlu1 %2224  ;;  %v4393_v15 = vld [vmem:[#allocation3 + $0x138] sm:$0xff] }
 0x44b   : > { %3226 = vrot.lane.b32.xlu0 %v3104_v3, %s7575_s27  ;;  %2358 = vst.msk [vmem:[#allocation3 + $0x150] sm:$0xff] %vm2343_vm6, %v2225_v32  ;;  %4936 = vmatmul.mubr.bf16.gmra.mrb[248].mxu0 %v4393_v15  ;;  %v2053_v59 = vld [vmem:[#allocation2 + $0x1aa] sm:$0xff]  ;;  %v3498_v3 = vpack.c.bf16 %v3427_v16, %v3426_v47  ;;  %v3819_v32 = vld [vmem:[#allocation2 + $0x1e1] sm:$0xff]  ;;  %v3818_v15 = vld [vmem:[#allocation2 + $0x1d9] sm:$0xff] }
 0x44c   : > { %1851 = vrot.lane.b32.xlu1 %v1729_v17, %s7575_s27  ;;  %v2124_v7 = vpack.c.bf16 %v2053_v59, %v2052_v45  ;;  %v2446_v17 = vld [vmem:[#allocation2 + $0x1c4] sm:$0xff]  ;;  %v3890_v54 = vpack.c.bf16 %v3819_v32, %v3818_v15 }
 0x44d   : > { %v3991_v26 = vpop.permute.xlu0 %3990  ;;  %6959 = vmatmul.mubr.msk.bf16.gmra.mrb[164].mxu1 %vm1304_vm4, %v4416_v51  ;;  %v2517_v25 = vpack.c.bf16 %v2446_v17, %v2445_v29  ;;  %v4437_v16 = vld [vmem:[#allocation3 + $0x298] sm:$0xff] }
 0x44e   : > { %4123 = vst.msk [vmem:[#allocation3 + $0x158] sm:$0xff] %vm2736_vm7, %v3991_v26  ;;  %6962 = vmatprep.mubr.msk.bf16.mxu1 %vm7570_vm1, %v7569_v0  ;;  %v2618_v56 = vpop.permute.xlu1 %2617  ;;  %v3037_v26 = vld [vmem:[#allocation2 + $0x1d6] sm:$0xff] }
 0x44f   : > { %3618 = vrot.lane.b32.xlu0 %v3496_v46, %s7572_s26  ;;  %2751 = vst.msk [vmem:[#allocation3 + $0x150] sm:$0xff] %vm2736_vm7, %v2618_v56  ;;  %v3036_v56 = vld [vmem:[#allocation2 + $0x1ce] sm:$0xff] }
 0x450   : > { %2244 = vrot.lane.b32.xlu1 %v2122_v9, %s7572_s26 }
 0x451   : > { %v3209_v6 = vpop.permute.xlu0 %3208 }
 0x452   : > { %3340 = vst.msk [vmem:[#allocation3 + $0x170] sm:$0xff] %vm1950_vm5, %v3209_v6  ;;  %v1834_v10 = vpop.permute.xlu1 %1833  ;;  %v3107_v6 = vpack.c.bf16 %v3037_v26, %v3036_v56  ;;  %v4440_v26 = vld [vmem:[#allocation3 + $0x2b0] sm:$0xff] }
 0x453   : > { %4010 = vrot.lane.b32.xlu0 %v3888_v52, %s7573_s28  ;;  %1966 = vst.msk [vmem:[#allocation3 + $0x168] sm:$0xff] %vm1950_vm5, %v1834_v10  ;;  %v3429_v52 = vld [vmem:[#allocation2 + $0x1f0] sm:$0xff]  ;;  %v1732_v10 = vpack.c.bf16 %v9393_v55, %v9365_v58  ;;  %v4431_v58 = vld [vmem:[#allocation3 + $0x268] sm:$0xff] }
 0x454   : > { %2637 = vrot.lane.b32.xlu1 %v2515_v50, %s7573_s28  ;;  %v3428_v50 = vld [vmem:[#allocation2 + $0x1e8] sm:$0xff] }
 0x455   : > { %v3601_v36 = vpop.permute.xlu0 %3600  ;;  %6963 = vmatmul.mubr.msk.bf16.gmra.mrb[168].mxu1 %vm1304_vm4, %v4419_v41  ;;  %v4397_v30 = vld [vmem:[#allocation3 + $0x158] sm:$0xff]  ;;  %v2055_v41 = vld [vmem:[#allocation2 + $0x1ba] sm:$0xff] }
 0x456   : > { %3732 = vst.msk [vmem:[#allocation3 + $0x170] sm:$0xff] %vm2343_vm6, %v3601_v36  ;;  %4943 = vmatprep.mubr.bf16.mxu0 %v4397_v30  ;;  %6966 = vmatprep.mubr.msk.bf16.mxu1 %vm7570_vm1, %v7569_v0  ;;  %v2227_v43 = vpop.permute.xlu1 %2226  ;;  %v4396_v42 = vld [vmem:[#allocation3 + $0x150] sm:$0xff]  ;;  %v3499_v36 = vpack.c.bf16 %v3429_v52, %v3428_v50  ;;  %v2054_v30 = vld [vmem:[#allocation2 + $0x1b2] sm:$0xff]  ;;  %v3820_v55 = vld [vmem:[#allocation2 + $0x1e9] sm:$0xff] }
 0x457   : > { %3228 = vrot.lane.b32.xlu0 %v3105_v33, %s7575_s27  ;;  %2359 = vst.msk [vmem:[#allocation3 + $0x168] sm:$0xff] %vm2343_vm6, %v2227_v43  ;;  %4944 = vmatmul.mubr.bf16.gmra.mrb[252].mxu0 %v4396_v42  ;;  %v3821_v33 = vld [vmem:[#allocation2 + $0x1f1] sm:$0xff]  ;;  %v2125_v43 = vpack.c.bf16 %v2055_v41, %v2054_v30 }
 0x458   : > { %1853 = vrot.lane.b32.xlu1 %v1730_v57, %s7575_s27  ;;  %v2448_v42 = vld [vmem:[#allocation2 + $0x1d4] sm:$0xff]  ;;  %v3891_v39 = vpack.c.bf16 %v3821_v33, %v3820_v55 }
 0x459   : > { %v3993_v34 = vpop.permute.xlu0 %3992 }
 0x45a   : > { %4124 = vst.msk [vmem:[#allocation3 + $0x170] sm:$0xff] %vm2736_vm7, %v3993_v34  ;;  %v2620_v14 = vpop.permute.xlu1 %2619 }
 0x45b   : > { %3620 = vrot.lane.b32.xlu0 %v3497_v22, %s7572_s26  ;;  %2752 = vst.msk [vmem:[#allocation3 + $0x168] sm:$0xff] %vm2736_vm7, %v2620_v14  ;;  %v2518_v22 = vpack.c.bf16 %v2448_v42, %v2447_v13  ;;  %v4250_v13 = vld [vmem:[#allocation2 + $0x31a] sm:$0xff] }
 0x45c   : > { %2246 = vrot.lane.b32.xlu1 %v2123_v40, %s7572_s26 }
 0x45d   : > { %v3211_v1 = vpop.permute.xlu0 %3210  ;;  %6967 = vmatmul.mubr.msk.bf16.gmra.mrb[172].mxu1 %vm1304_vm4, %v4422_v35  ;;  %v4434_v35 = vld [vmem:[#allocation3 + $0x280] sm:$0xff] }
 0x45e   : > { %3341 = vst.msk [vmem:[#allocation3 + $0x188] sm:$0xff] %vm1950_vm5, %v3211_v1  ;;  %6970 = vmatprep.mubr.msk.bf16.mxu1 %vm7570_vm1, %v7569_v0  ;;  %v1836_v37 = vpop.permute.xlu1 %1835 }
 0x45f   : > { %4012 = vrot.lane.b32.xlu0 %v3889_v11, %s7573_s28  ;;  %1967 = vst.msk [vmem:[#allocation3 + $0x180] sm:$0xff] %vm1950_vm5, %v1836_v37 }
 0x460   : > { %2639 = vrot.lane.b32.xlu1 %v2516_v5, %s7573_s28 }
 0x461   : > { %v3603_v48 = vpop.permute.xlu0 %3602  ;;  %v4400_v53 = vld [vmem:[#allocation3 + $0x170] sm:$0xff] }
 0x462   : > { %3733 = vst.msk [vmem:[#allocation3 + $0x188] sm:$0xff] %vm2343_vm6, %v3603_v48  ;;  %4951 = vmatprep.mubr.bf16.mxu0 %v4400_v53  ;;  %v2229_v62 = vpop.permute.xlu1 %2228  ;;  %v4399_v63 = vld [vmem:[#allocation3 + $0x168] sm:$0xff] }
 0x463   : > { %3230 = vrot.lane.b32.xlu0 %v3106_v20, %s7575_s27  ;;  %2360 = vst.msk [vmem:[#allocation3 + $0x180] sm:$0xff] %vm2343_vm6, %v2229_v62  ;;  %4952 = vmatmul.mubr.bf16.gmra.mrb[0].mxu0 %v4399_v63 }
 0x464   : > { %1855 = vrot.lane.b32.xlu1 %v1731_v18, %s7575_s27 }
 0x465   : > { %v3995_v23 = vpop.permute.xlu0 %3994  ;;  %6971 = vmatmul.mubr.msk.bf16.gmra.mrb[176].mxu1 %vm1304_vm4, %v4425_v61 }
 0x466   : > { %4125 = vst.msk [vmem:[#allocation3 + $0x188] sm:$0xff] %vm2736_vm7, %v3995_v23  ;;  %6974 = vmatprep.mubr.msk.bf16.mxu1 %vm7570_vm1, %v7569_v0  ;;  %v2622_v4 = vpop.permute.xlu1 %2621 }
 0x467   : > { %3622 = vrot.lane.b32.xlu0 %v3498_v3, %s7572_s26  ;;  %2753 = vst.msk [vmem:[#allocation3 + $0x180] sm:$0xff] %vm2736_vm7, %v2622_v4 }
 0x468   : > { %2248 = vrot.lane.b32.xlu1 %v2124_v7, %s7572_s26 }
 0x469   : > { %v3213_v51 = vpop.permute.xlu0 %3212 }
 0x46a   : > { %3342 = vst.msk [vmem:[#allocation3 + $0x1a0] sm:$0xff] %vm1950_vm5, %v3213_v51  ;;  %v1838_v46 = vpop.permute.xlu1 %1837 }
 0x46b   : > { %4014 = vrot.lane.b32.xlu0 %v3890_v54, %s7573_s28  ;;  %1968 = vst.msk [vmem:[#allocation3 + $0x198] sm:$0xff] %vm1950_vm5, %v1838_v46 }
 0x46c   : > { %2641 = vrot.lane.b32.xlu1 %v2517_v25, %s7573_s28 }
 0x46d   : > { %v3605_v9 = vpop.permute.xlu0 %3604  ;;  %6975 = vmatmul.mubr.msk.bf16.gmra.mrb[180].mxu1 %vm1304_vm4, %v4428_v19  ;;  %v4403_v24 = vld [vmem:[#allocation3 + $0x188] sm:$0xff] }
 0x46e   : > { %3734 = vst.msk [vmem:[#allocation3 + $0x1a0] sm:$0xff] %vm2343_vm6, %v3605_v9  ;;  %4959 = vmatprep.mubr.bf16.mxu0 %v4403_v24  ;;  %6978 = vmatprep.mubr.msk.bf16.mxu1 %vm7570_vm1, %v7569_v0  ;;  %v2231_v2 = vpop.permute.xlu1 %2230  ;;  %v4402_v28 = vld [vmem:[#allocation3 + $0x180] sm:$0xff] }
 0x46f   : > { %3232 = vrot.lane.b32.xlu0 %v3107_v6, %s7575_s27  ;;  %2361 = vst.msk [vmem:[#allocation3 + $0x198] sm:$0xff] %vm2343_vm6, %v2231_v2  ;;  %4960 = vmatmul.mubr.bf16.gmra.mrb[4].mxu0 %v4402_v28 }
 0x470   : > { %1857 = vrot.lane.b32.xlu1 %v1732_v10, %s7575_s27 }
 0x471   : > { %v3997_v44 = vpop.permute.xlu0 %3996 }
 0x472   : > { %4126 = vst.msk [vmem:[#allocation3 + $0x1a0] sm:$0xff] %vm2736_vm7, %v3997_v44  ;;  %v2624_v12 = vpop.permute.xlu1 %2623 }
 0x473   : > { %3624 = vrot.lane.b32.xlu0 %v3499_v36, %s7572_s26  ;;  %2754 = vst.msk [vmem:[#allocation3 + $0x198] sm:$0xff] %vm2736_vm7, %v2624_v12 }
 0x474   : > { %2250 = vrot.lane.b32.xlu1 %v2125_v43, %s7572_s26 }
 0x475   : > { %v3215_v57 = vpop.permute.xlu0 %3214  ;;  %6979 = vmatmul.mubr.msk.bf16.gmra.mrb[184].mxu1 %vm1304_vm4, %v4431_v58  ;;  %v4443_v58 = vld [vmem:[#allocation3 + $0x2c8] sm:$0xff] }
 0x476   : > { %3343 = vst.msk [vmem:[#allocation3 + $0x1b8] sm:$0xff] %vm1950_vm5, %v3215_v57  ;;  %6982 = vmatprep.mubr.msk.bf16.mxu1 %vm7570_vm1, %v7569_v0  ;;  %v1840_v34 = vpop.permute.xlu1 %1839 }
 0x477   : > { %4016 = vrot.lane.b32.xlu0 %v3891_v39, %s7573_s28  ;;  %1969 = vst.msk [vmem:[#allocation3 + $0x1b0] sm:$0xff] %vm1950_vm5, %v1840_v34  ;;  %v4251_v34 = vld [vmem:[#allocation2 + $0x322] sm:$0xff] }
 0x478   : > { %2643 = vrot.lane.b32.xlu1 %v2518_v22, %s7573_s28  ;;  %s262_s28 = smul.u32 9, %s7612_s21 }
 0x479   : > { %v3607_v60 = vpop.permute.xlu0 %3606  ;;  %v4406_v8 = vld [vmem:[#allocation3 + $0x1a0] sm:$0xff] }
 0x47a   : > { %3735 = vst.msk [vmem:[#allocation3 + $0x1b8] sm:$0xff] %vm2343_vm6, %v3607_v60  ;;  %4967 = vmatprep.mubr.bf16.mxu0 %v4406_v8  ;;  %v2233_v14 = vpop.permute.xlu1 %2232  ;;  %v4405_v40 = vld [vmem:[#allocation3 + $0x198] sm:$0xff]  ;;  %v4302_v8 = vpack.c.bf16 %v4251_v34, %v4250_v13  ;;  %p263_p3 = scmp.lt.s32.totalorder %s262_s28, 17 }
 0x47b   : > { %2362 = vst.msk [vmem:[#allocation3 + $0x1b0] sm:$0xff] %vm2343_vm6, %v2233_v14  ;;  %4968 = vmatmul.mubr.bf16.gmra.mrb[8].mxu0 %v4405_v40 }
 0x47c   : > { %4351 = vst.msk [vmem:[#allocation3 + $0x460] sm:$0xff] %vm1304_vm4, %v4302_v8  ;;  %s10002_s28 = smov (!%p263_p3, %s262_s28), 17 }
 0x47d   : > { %v3999_v27 = vpop.permute.xlu0 %3998  ;;  %6983 = vmatmul.mubr.msk.bf16.gmra.mrb[188].mxu1 %vm1304_vm4, %v4434_v35  ;;  %s6368_s21 = sshll.u32 %s10002_s28, 2 }
 0x47e   : > { %4127 = vst.msk [vmem:[#allocation3 + $0x1b8] sm:$0xff] %vm2736_vm7, %v3999_v27  ;;  %6986 = vmatprep.mubr.msk.bf16.mxu1 %vm7570_vm1, %v7569_v0  ;;  %v2626_v21 = vpop.permute.xlu1 %2625  ;;  %s9547_s27 = scalar_lea.vmem %s9988_s5, %s6368_s21 }
 0x47f   : > { %2755 = vst.msk [vmem:[#allocation3 + $0x1b0] sm:$0xff] %vm2736_vm7, %v2626_v21 }
 0x480   : > { %v5258_v1 = vpop.f32.mrb[84].mxu1 }
 0x481   : > { %v3217_v11 = vpop.permute.xlu0 %3216  ;;  %v6880_v38 = vpop.f32.mrb[85].mxu1 }
 0x482   : > { %3344 = vst.msk [vmem:[#allocation3 + $0x1d0] sm:$0xff] %vm1950_vm5, %v3217_v11  ;;  %v5261_v37 = vpop.f32.mrb[86].mxu1  ;;  %v1842_v5 = vpop.permute.xlu1 %1841  ;;  %v4446_v11 = vld [vmem:[#allocation3 + $0x2e0] sm:$0xff] }
 0x483   : > { %v4833_v49 = vpop.f32.mrb[196].mxu0  ;;  %1970 = vst.msk [vmem:[#allocation3 + $0x1c8] sm:$0xff] %vm1950_vm5, %v1842_v5  ;;  %v6881_v53 = vpop.f32.mrb[87].mxu1 }
 0x484   : > { %v4834_v48 = vadd.f32 %v9465_v31, %v4833_v49  ;;  %v4835_v20 = vpop.f32.mrb[197].mxu0 }
 0x485   : > { %v3609_v62 = vpop.permute.xlu0 %3608  ;;  %v4836_v63 = vpop.f32.mrb[198].mxu0  ;;  %6987 = vmatmul.mubr.msk.bf16.gmra.mrb[192].mxu1 %vm1304_vm4, %v4437_v16  ;;  %v4409_v18 = vld [vmem:[#allocation3 + $0x1b8] sm:$0xff] }
 0x486   : > { %v5259_v61 = vadd.f32 %v5258_v1, %v4834_v48  ;;  %3736 = vst.msk [vmem:[#allocation3 + $0x1d0] sm:$0xff] %vm2343_vm6, %v3609_v62  ;;  %v4837_v47 = vadd.f32 %v9465_v31, %v4836_v63  ;;  %v4838_v59 = vpop.f32.mrb[199].mxu0  ;;  %4975 = vmatprep.mubr.bf16.mxu0 %v4409_v18  ;;  %6990 = vmatprep.mubr.msk.bf16.mxu1 %vm7570_vm1, %v7569_v0  ;;  %v2235_v23 = vpop.permute.xlu1 %2234  ;;  %v4408_v3 = vld [vmem:[#allocation3 + $0x1b0] sm:$0xff] }
 0x487   : > { %2363 = vst.msk [vmem:[#allocation3 + $0x1c8] sm:$0xff] %vm2343_vm6, %v2235_v23  ;;  %4976 = vmatmul.mubr.bf16.gmra.mrb[12].mxu0 %v4408_v3 }
 0x488   : > { %v5649_v45 = vmax.f32 %v5259_v61, 0.0  ;;  %v5262_v32 = vadd.f32 %v5261_v37, %v4837_v47  ;;  %v5266_v4 = vpop.f32.mrb[88].mxu1  ;;  %v4252_v61 = vld [vmem:[#allocation2 + $0x32a] sm:$0xff]  ;;  %v4253_v47 = vld [vmem:[#allocation2 + $0x332] sm:$0xff] }
 0x489   : > { %v4001_v7 = vpop.permute.xlu0 %4000  ;;  %v6884_v15 = vpop.f32.mrb[89].mxu1  ;;  %v4303_v3 = vpack.c.bf16 %v4253_v47, %v4252_v61 }
 0x48a   : > { %5748 = vst.msk [vmem:[#allocation4] sm:$0xff] %vm5747_vm8, %v5649_v45  ;;  %v5650_v17 = vmax.f32 %v5262_v32, 0.0  ;;  %v5269_v51 = vpop.f32.mrb[90].mxu1  ;;  %v2628_v54 = vpop.permute.xlu1 %2627  ;;  %v4449_v15 = vld [vmem:[#allocation3 + $0x2f8] sm:$0xff] }
 0x48b   : > { %4128 = vst.msk [vmem:[#allocation3 + $0x1d0] sm:$0xff] %vm2736_vm7, %v4001_v7  ;;  %v6885_v29 = vpop.f32.mrb[91].mxu1  ;;  %2756 = vst.msk [vmem:[#allocation3 + $0x1c8] sm:$0xff] %vm2736_vm7, %v2628_v54 }
 0x48c   : > { %5749 = vst.msk [vmem:[#allocation4 + $0x8] sm:$0xff] %vm5747_vm8, %v5650_v17 }
 0x48d   : > { %v3219_v46 = vpop.permute.xlu0 %3218  ;;  %6991 = vmatmul.mubr.msk.bf16.gmra.mrb[0].mxu1 %vm1304_vm4, %v4440_v26  ;;  %4352 = vst.msk [vmem:[#allocation3 + $0x478] sm:$0xff] %vm1304_vm4, %v4303_v3 }
 0x48e   : > { %3345 = vst.msk [vmem:[#allocation3 + $0x1e8] sm:$0xff] %vm1950_vm5, %v3219_v46  ;;  %6994 = vmatprep.mubr.msk.bf16.mxu1 %vm7570_vm1, %v7569_v0  ;;  %v1844_v25 = vpop.permute.xlu1 %1843  ;;  %v4841_v19 = vpop.f32.mrb[200].mxu0 }
 0x48f   : > { %1971 = vst.msk [vmem:[#allocation3 + $0x1e0] sm:$0xff] %vm1950_vm5, %v1844_v25  ;;  %v4842_v56 = vadd.f32 %v9465_v31, %v4841_v19  ;;  %v4843_v9 = vpop.f32.mrb[201].mxu0  ;;  %v4254_v25 = vld [vmem:[#allocation2 + $0x33a] sm:$0xff]  ;;  %v4255_v19 = vld [vmem:[#allocation2 + $0x342] sm:$0xff] }
 0x490   : > { %v5274_v24 = vpop.f32.mrb[92].mxu1  ;;  %v4844_v52 = vpop.f32.mrb[202].mxu0 }
 0x491   : > { %v3611_v6 = vpop.permute.xlu0 %3610  ;;  %v5267_v28 = vadd.f32 %v5266_v4, %v4842_v56  ;;  %v4845_v10 = vadd.f32 %v9465_v31, %v4844_v52  ;;  %v6888_v50 = vpop.f32.mrb[93].mxu1 }
 0x492   : > { %v4412_v2 = vld [vmem:[#allocation3 + $0x1d0] sm:$0xff]  ;;  %3737 = vst.msk [vmem:[#allocation3 + $0x1e8] sm:$0xff] %vm2343_vm6, %v3611_v6  ;;  %v4846_v41 = vpop.f32.mrb[203].mxu0  ;;  %v5277_v44 = vpop.f32.mrb[94].mxu1  ;;  %v4411_v30 = vld [vmem:[#allocation3 + $0x1c8] sm:$0xff]  ;;  %v4304_v6 = vpack.c.bf16 %v4255_v19, %v4254_v25 }
 0x493   : > { %4983 = vmatprep.mubr.bf16.mxu0 %v4412_v2  ;;  %v2237_v36 = vpop.permute.xlu1 %2236  ;;  %v5651_v33 = vmax.f32 %v5267_v28, 0.0  ;;  %v5270_v12 = vadd.f32 %v5269_v51, %v4845_v10  ;;  %v6889_v43 = vpop.f32.mrb[95].mxu1  ;;  %v5846_v52 = vld [vmem:[#allocation4] ss:$2 sm:$0xff]  ;;  %v5850_v2 = vld [vmem:[#allocation4 + $0x1] ss:$2 sm:$0xff] }
 0x494   : > { %2364 = vst.msk [vmem:[#allocation3 + $0x1e0] sm:$0xff] %vm2343_vm6, %v2237_v36  ;;  %4984 = vmatmul.mubr.bf16.gmra.mrb[16].mxu0 %v4411_v30 }
 0x495   : > { %v4003_v55 = vpop.permute.xlu0 %4002  ;;  %6995 = vmatmul.mubr.msk.bf16.gmra.mrb[4].mxu1 %vm1304_vm4, %v4443_v58  ;;  %5750 = vst.msk [vmem:[#allocation4 + $0x10] sm:$0xff] %vm5747_vm8, %v5651_v33  ;;  %v5652_v42 = vmax.f32 %v5270_v12, 0.0 }
 0x496   : > { %4129 = vst.msk [vmem:[#allocation3 + $0x1e8] sm:$0xff] %vm2736_vm7, %v4003_v55  ;;  %6998 = vmatprep.mubr.msk.bf16.mxu1 %vm7570_vm1, %v7569_v0 }
 0x497   : > { %v2630_v57 = vpop.permute.xlu1 %2629  ;;  %5751 = vst.msk [vmem:[#allocation4 + $0x18] sm:$0xff] %vm5747_vm8, %v5652_v42  ;;  %v4452_v42 = vld [vmem:[#allocation3 + $0x310] sm:$0xff] }
 0x498   : > { %2757 = vst.msk [vmem:[#allocation3 + $0x1e0] sm:$0xff] %vm2736_vm7, %v2630_v57  ;;  %v9496_v39 = vpop.f32.mrb[96].mxu1  ;;  %v5861_v57 = vmax.f32 %v5846_v52, %v5850_v2 }
 0x499   : > { %v3221_v22 = vpop.permute.xlu0 %3220  ;;  %v6892_v60 = vpop.f32.mrb[97].mxu1  ;;  %4353 = vst.msk [vmem:[#allocation3 + $0x490] sm:$0xff] %vm1304_vm4, %v4304_v6 }
 0x49a   : > { %3346 = vst.msk [vmem:[#allocation3 + $0x200] sm:$0xff] %vm1950_vm5, %v3221_v22  ;;  %v9499_v14 = vpop.f32.mrb[98].mxu1  ;;  %v4849_v35 = vpop.f32.mrb[204].mxu0 }
 0x49b   : > { %v1846_v40 = vpop.permute.xlu1 %1845  ;;  %v4850_v27 = vadd.f32 %v9465_v31, %v4849_v35  ;;  %v6893_v21 = vpop.f32.mrb[99].mxu1 }
 0x49c   : > { %1972 = vst.msk [vmem:[#allocation3 + $0x1f8] sm:$0xff] %vm1950_vm5, %v1846_v40  ;;  %v4851_v1 = vpop.f32.mrb[205].mxu0 }
 0x49d   : > { %v3613_v38 = vpop.permute.xlu0 %3612  ;;  %v4852_v37 = vpop.f32.mrb[206].mxu0  ;;  %6999 = vmatmul.mubr.msk.bf16.gmra.mrb[8].mxu1 %vm1304_vm4, %v4446_v11  ;;  %v4415_v5 = vld [vmem:[#allocation3 + $0x1e8] sm:$0xff]  ;;  %v5275_v49 = vadd.f32 %v5274_v24, %v4850_v27 }
 0x49e   : > { %3738 = vst.msk [vmem:[#allocation3 + $0x200] sm:$0xff] %vm2343_vm6, %v3613_v38  ;;  %v4853_v48 = vadd.f32 %v9465_v31, %v4852_v37  ;;  %v4854_v53 = vpop.f32.mrb[207].mxu0  ;;  %4991 = vmatprep.mubr.bf16.mxu0 %v4415_v5  ;;  %7002 = vmatprep.mubr.msk.bf16.mxu1 %vm7570_vm1, %v7569_v0  ;;  %v4455_v5 = vld [vmem:[#allocation3 + $0x328] sm:$0xff] }
 0x49f   : > { %v2239_v20 = vpop.permute.xlu1 %2238  ;;  %v4414_v16 = vld [vmem:[#allocation3 + $0x1e0] sm:$0xff]  ;;  %v5653_v62 = vmax.f32 %v5275_v49, 0.0 }
 0x4a0   : > { %v5278_v63 = vadd.f32 %v5277_v44, %v4853_v48  ;;  %2365 = vst.msk [vmem:[#allocation3 + $0x1f8] sm:$0xff] %vm2343_vm6, %v2239_v20  ;;  %4992 = vmatmul.mubr.bf16.gmra.mrb[20].mxu0 %v4414_v16  ;;  %v9510_v18 = vpop.f32.mrb[100].mxu1 }
 0x4a1   : > { %v4005_v59 = vpop.permute.xlu0 %4004  ;;  %v6896_v23 = vpop.f32.mrb[101].mxu1  ;;  %5752 = vst.msk [vmem:[#allocation4 + $0x20] sm:$0xff] %vm5747_vm8, %v5653_v62 }
 0x4a2   : > { %v5654_v45 = vmax.f32 %v5278_v63, 0.0  ;;  %4130 = vst.msk [vmem:[#allocation3 + $0x200] sm:$0xff] %vm2736_vm7, %v4005_v59  ;;  %v9515_v32 = vpop.f32.mrb[102].mxu1 }
 0x4a3   : > { %v2632_v4 = vpop.permute.xlu1 %2631  ;;  %v6897_v7 = vpop.f32.mrb[103].mxu1 }
 0x4a4   : > { %5753 = vst.msk [vmem:[#allocation4 + $0x28] sm:$0xff] %vm5747_vm8, %v5654_v45 }
 0x4a5   : > { %2758 = vst.msk [vmem:[#allocation3 + $0x1f8] sm:$0xff] %vm2736_vm7, %v2632_v4  ;;  %v3223_v17 = vpop.permute.xlu0 %3222  ;;  %7003 = vmatmul.mubr.msk.bf16.gmra.mrb[12].mxu1 %vm1304_vm4, %v4449_v15 }
 0x4a6   : > { %3347 = vst.msk [vmem:[#allocation3 + $0x218] sm:$0xff] %vm1950_vm5, %v3223_v17  ;;  %7006 = vmatprep.mubr.msk.bf16.mxu1 %vm7570_vm1, %v7569_v0  ;;  %v4857_v54 = vpop.f32.mrb[208].mxu0 }
 0x4a7   : > { %v1848_v51 = vpop.permute.xlu1 %1847  ;;  %v4858_v29 = vadd.f32 %v9465_v31, %v4857_v54  ;;  %v4859_v26 = vpop.f32.mrb[209].mxu0 }
 0x4a8   : > { %1973 = vst.msk [vmem:[#allocation3 + $0x210] sm:$0xff] %vm1950_vm5, %v1848_v51  ;;  %v9526_v46 = vpop.f32.mrb[104].mxu1  ;;  %v4860_v9 = vpop.f32.mrb[210].mxu0 }
 0x4a9   : > { %v3615_v56 = vpop.permute.xlu0 %3614  ;;  %v4418_v24 = vld [vmem:[#allocation3 + $0x200] sm:$0xff]  ;;  %v5283_v28 = vadd.f32 %v9496_v39, %v4858_v29  ;;  %v4861_v10 = vadd.f32 %v9465_v31, %v4860_v9  ;;  %v6900_v50 = vpop.f32.mrb[105].mxu1 }
 0x4aa   : > { %3739 = vst.msk [vmem:[#allocation3 + $0x218] sm:$0xff] %vm2343_vm6, %v3615_v56  ;;  %v4862_v41 = vpop.f32.mrb[211].mxu0  ;;  %4999 = vmatprep.mubr.bf16.mxu0 %v4418_v24  ;;  %v9533_v44 = vpop.f32.mrb[106].mxu1 }
 0x4ab   : > { %v2241_v36 = vpop.permute.xlu1 %2240  ;;  %v5854_v33 = vld [vmem:[#allocation4 + $0x1c] ss:$2 sm:$0xff]  ;;  %v5858_v12 = vld [vmem:[#allocation4 + $0x1d] ss:$2 sm:$0xff]  ;;  %v5655_v43 = vmax.f32 %v5283_v28, 0.0  ;;  %v5286_v58 = vadd.f32 %v9499_v14, %v4861_v10  ;;  %v6901_v55 = vpop.f32.mrb[107].mxu1 }
 0x4ac   : > { %v4417_v30 = vld [vmem:[#allocation3 + $0x1f8] sm:$0xff]  ;;  %2366 = vst.msk [vmem:[#allocation3 + $0x210] sm:$0xff] %vm2343_vm6, %v2241_v36  ;;  %v5863_v39 = vmax.f32 %v5854_v33, %v5858_v12 }
 0x4ad   : > { %5000 = vmatmul.mubr.bf16.gmra.mrb[24].mxu0 %v4417_v30  ;;  %v4007_v13 = vpop.permute.xlu0 %4006  ;;  %7007 = vmatmul.mubr.msk.bf16.gmra.mrb[16].mxu1 %vm1304_vm4, %v4452_v42  ;;  %5754 = vst.msk [vmem:[#allocation4 + $0x30] sm:$0xff] %vm5747_vm8, %v5655_v43  ;;  %v5656_v34 = vmax.f32 %v5286_v58, 0.0  ;;  %v4461_v33 = vld [vmem:[#allocation3 + $0x358] sm:$0xff] }
 0x4ae   : > { %4131 = vst.msk [vmem:[#allocation3 + $0x218] sm:$0xff] %vm2736_vm7, %v4007_v13  ;;  %7010 = vmatprep.mubr.msk.bf16.mxu1 %vm7570_vm1, %v7569_v0  ;;  %v5865_v22 = vmax.f32 %v5861_v57, %v5863_v39 }
 0x4af   : > { %v2634_v60 = vpop.permute.xlu1 %2633  ;;  %5755 = vst.msk [vmem:[#allocation4 + $0x38] sm:$0xff] %vm5747_vm8, %v5656_v34 }
 0x4b0   : > { %2759 = vst.msk [vmem:[#allocation3 + $0x210] sm:$0xff] %vm2736_vm7, %v2634_v60  ;;  %v9551_v8 = vpop.f32.mrb[108].mxu1  ;;  %v6557_v14 = vpack.c.bf16 %v5865_v22, %v5865_v22  ;;  %v4464_v60 = vld [vmem:[#allocation3 + $0x370] sm:$0xff] }
 0x4b1   : > { %v3225_v40 = vpop.permute.xlu0 %3224  ;;  %v6904_v35 = vpop.f32.mrb[109].mxu1 }
 0x4b2   : > { %3348 = vst.msk [vmem:[#allocation3 + $0x230] sm:$0xff] %vm1950_vm5, %v3225_v40  ;;  %v9554_v27 = vpop.f32.mrb[110].mxu1  ;;  %v4865_v1 = vpop.f32.mrb[212].mxu0 }
 0x4b3   : > { %6171 = vst.msk [vmem:[%s9547_s27] sm:$0xf] %vm6170_vm9, %v6557_v14  ;;  %v1850_v21 = vpop.permute.xlu1 %1849  ;;  %v4866_v11 = vadd.f32 %v9465_v31, %v4865_v1  ;;  %v6905_v38 = vpop.f32.mrb[111].mxu1 }
 0x4b4   : > { %1974 = vst.msk [vmem:[#allocation3 + $0x228] sm:$0xff] %vm1950_vm5, %v1850_v21  ;;  %v4867_v37 = vpop.f32.mrb[213].mxu0 }
 0x4b5   : > { %v3617_v49 = vpop.permute.xlu0 %3616  ;;  %v4868_v48 = vpop.f32.mrb[214].mxu0  ;;  %7011 = vmatmul.mubr.msk.bf16.gmra.mrb[20].mxu1 %vm1304_vm4, %v4455_v5  ;;  %v4421_v53 = vld [vmem:[#allocation3 + $0x218] sm:$0xff]  ;;  %v5291_v20 = vadd.f32 %v9510_v18, %v4866_v11 }
 0x4b6   : > { %3740 = vst.msk [vmem:[#allocation3 + $0x230] sm:$0xff] %vm2343_vm6, %v3617_v49  ;;  %v4869_v16 = vadd.f32 %v9465_v31, %v4868_v48  ;;  %v4870_v62 = vpop.f32.mrb[215].mxu0  ;;  %5007 = vmatprep.mubr.bf16.mxu0 %v4421_v53  ;;  %7014 = vmatprep.mubr.msk.bf16.mxu1 %vm7570_vm1, %v7569_v0 }
 0x4b7   : > { %v2243_v63 = vpop.permute.xlu1 %2242  ;;  %v4420_v61 = vld [vmem:[#allocation3 + $0x210] sm:$0xff]  ;;  %v5657_v47 = vmax.f32 %v5291_v20, 0.0 }
 0x4b8   : > { %v5294_v59 = vadd.f32 %v9515_v32, %v4869_v16  ;;  %2367 = vst.msk [vmem:[#allocation3 + $0x228] sm:$0xff] %vm2343_vm6, %v2243_v63  ;;  %5008 = vmatmul.mubr.bf16.gmra.mrb[28].mxu0 %v4420_v61  ;;  %v9568_v23 = vpop.f32.mrb[112].mxu1  ;;  %v4458_v32 = vld [vmem:[#allocation3 + $0x340] sm:$0xff] }
 0x4b9   : > { %v4009_v18 = vpop.permute.xlu0 %4008  ;;  %v6908_v3 = vpop.f32.mrb[113].mxu1  ;;  %5756 = vst.msk [vmem:[#allocation4 + $0x40] sm:$0xff] %vm5747_vm8, %v5657_v47  ;;  %v5856_v47 = vld [vmem:[#allocation4 + $0x2c] ss:$2 sm:$0xf] }
 0x4ba   : > { %v5658_v45 = vmax.f32 %v5294_v59, 0.0  ;;  %4132 = vst.msk [vmem:[#allocation3 + $0x230] sm:$0xff] %vm2736_vm7, %v4009_v18  ;;  %v9572_v4 = vpop.f32.mrb[114].mxu1  ;;  %v5860_v59 = vld [vmem:[#allocation4 + $0x2d] ss:$2 sm:$0xf] }
 0x4bb   : > { %v2636_v7 = vpop.permute.xlu1 %2635  ;;  %v6909_v15 = vpop.f32.mrb[115].mxu1 }
 0x4bc   : > { %5757 = vst.msk [vmem:[#allocation4 + $0x48] sm:$0xff] %vm5747_vm8, %v5658_v45  ;;  %v5848_v45 = vld [vmem:[#allocation4 + $0x10] ss:$2 sm:$0xf] }
 0x4bd   : > { %2760 = vst.msk [vmem:[#allocation3 + $0x228] sm:$0xff] %vm2736_vm7, %v2636_v7  ;;  %v3227_v17 = vpop.permute.xlu0 %3226  ;;  %7015 = vmatmul.mubr.msk.bf16.gmra.mrb[24].mxu1 %vm1304_vm4, %v4458_v32  ;;  %v5852_v7 = vld [vmem:[#allocation4 + $0x11] ss:$2 sm:$0xf] }
 0x4be   : > { %3349 = vst.msk [vmem:[#allocation3 + $0x248] sm:$0xff] %vm1950_vm5, %v3227_v17  ;;  %7018 = vmatprep.mubr.msk.bf16.mxu1 %vm7570_vm1, %v7569_v0  ;;  %v4873_v54 = vpop.f32.mrb[216].mxu0 }
 0x4bf   : > { %v1852_v51 = vpop.permute.xlu1 %1851  ;;  %v4874_v29 = vadd.f32 %v9465_v31, %v4873_v54  ;;  %v4875_v26 = vpop.f32.mrb[217].mxu0 }
 0x4c0   : > { %1975 = vst.msk [vmem:[#allocation3 + $0x240] sm:$0xff] %vm1950_vm5, %v1852_v51  ;;  %v9582_v25 = vpop.f32.mrb[116].mxu1  ;;  %v4876_v56 = vpop.f32.mrb[218].mxu0  ;;  %v5868_v15 = vld [vmem:[#allocation4 + $0x38] ss:$2 sm:$0xff] }
 0x4c1   : > { %v3619_v19 = vpop.permute.xlu0 %3618  ;;  %v4424_v9 = vld [vmem:[#allocation3 + $0x230] sm:$0xff]  ;;  %v5299_v24 = vadd.f32 %v9526_v46, %v4874_v29  ;;  %v4877_v6 = vadd.f32 %v9465_v31, %v4876_v56  ;;  %v6912_v52 = vpop.f32.mrb[117].mxu1 }
 0x4c2   : > { %3741 = vst.msk [vmem:[#allocation3 + $0x248] sm:$0xff] %vm2343_vm6, %v3619_v19  ;;  %v4878_v2 = vpop.f32.mrb[219].mxu0  ;;  %5015 = vmatprep.mubr.bf16.mxu0 %v4424_v9  ;;  %v9587_v28 = vpop.f32.mrb[118].mxu1  ;;  %v5872_v32 = vld [vmem:[#allocation4 + $0x39] ss:$2 sm:$0xff]  ;;  %v5864_v9 = vmax.f32 %v5856_v47, %v5860_v59 }
 0x4c3   : > { %v2245_v10 = vpop.permute.xlu1 %2244  ;;  %v5659_v41 = vmax.f32 %v5299_v24, 0.0  ;;  %v5302_v36 = vadd.f32 %v9533_v44, %v4877_v6  ;;  %v6913_v30 = vpop.f32.mrb[119].mxu1  ;;  %v5870_v29 = vld [vmem:[#allocation4 + $0x48] ss:$2 sm:$0xf]  ;;  %v4473_v59 = vld [vmem:[#allocation3 + $0x3b8] sm:$0xff] }
 0x4c4   : > { %v4423_v50 = vld [vmem:[#allocation3 + $0x228] sm:$0xff]  ;;  %2368 = vst.msk [vmem:[#allocation3 + $0x240] sm:$0xff] %vm2343_vm6, %v2245_v10  ;;  %v5874_v30 = vld [vmem:[#allocation4 + $0x49] ss:$2 sm:$0xf] }
 0x4c5   : > { %5016 = vmatmul.mubr.bf16.gmra.mrb[32].mxu0 %v4423_v50  ;;  %v4011_v46 = vpop.permute.xlu0 %4010  ;;  %7019 = vmatmul.mubr.msk.bf16.gmra.mrb[28].mxu1 %vm1304_vm4, %v4461_v33  ;;  %5758 = vst.msk [vmem:[#allocation4 + $0x50] sm:$0xff] %vm5747_vm8, %v5659_v41  ;;  %v5660_v12 = vmax.f32 %v5302_v36, 0.0  ;;  %v5883_v41 = vmax.f32 %v5868_v15, %v5872_v32 }
 0x4c6   : > { %4133 = vst.msk [vmem:[#allocation3 + $0x248] sm:$0xff] %vm2736_vm7, %v4011_v46  ;;  %7022 = vmatprep.mubr.msk.bf16.mxu1 %vm7570_vm1, %v7569_v0 }
 0x4c7   : > { %v2638_v43 = vpop.permute.xlu1 %2637  ;;  %5759 = vst.msk [vmem:[#allocation4 + $0x58] sm:$0xff] %vm5747_vm8, %v5660_v12 }
 0x4c8   : > { %2761 = vst.msk [vmem:[#allocation3 + $0x240] sm:$0xff] %vm2736_vm7, %v2638_v43  ;;  %v9598_v44 = vpop.f32.mrb[120].mxu1 }
 0x4c9   : > { %v3229_v58 = vpop.permute.xlu0 %3228  ;;  %v6916_v55 = vpop.f32.mrb[121].mxu1 }
 0x4ca   : > { %3350 = vst.msk [vmem:[#allocation3 + $0x260] sm:$0xff] %vm1950_vm5, %v3229_v58  ;;  %v9601_v42 = vpop.f32.mrb[122].mxu1  ;;  %v4881_v39 = vpop.f32.mrb[220].mxu0 }
 0x4cb   : > { %v1854_v57 = vpop.permute.xlu1 %1853  ;;  %v4882_v13 = vadd.f32 %v9465_v31, %v4881_v39  ;;  %v6917_v34 = vpop.f32.mrb[123].mxu1  ;;  %v5862_v39 = vmax.f32 %v5848_v45, %v5852_v7 }
 0x4cc   : > { %1976 = vst.msk [vmem:[#allocation3 + $0x258] sm:$0xff] %vm1950_vm5, %v1854_v57  ;;  %v4883_v22 = vpop.f32.mrb[221].mxu0  ;;  %v4470_v57 = vld [vmem:[#allocation3 + $0x3a0] sm:$0xff] }
 0x4cd   : > { %v3621_v14 = vpop.permute.xlu0 %3620  ;;  %v4884_v40 = vpop.f32.mrb[222].mxu0  ;;  %7023 = vmatmul.mubr.msk.bf16.gmra.mrb[32].mxu1 %vm1304_vm4, %v4464_v60  ;;  %v4427_v35 = vld [vmem:[#allocation3 + $0x248] sm:$0xff]  ;;  %v5307_v21 = vadd.f32 %v9551_v8, %v4882_v13  ;;  %v5884_v60 = vmax.f32 %v5870_v29, %v5874_v30 }
 0x4ce   : > { %3742 = vst.msk [vmem:[#allocation3 + $0x260] sm:$0xff] %vm2343_vm6, %v3621_v14  ;;  %v4885_v1 = vadd.f32 %v9465_v31, %v4884_v40  ;;  %v4886_v11 = vpop.f32.mrb[223].mxu0  ;;  %5023 = vmatprep.mubr.bf16.mxu0 %v4427_v35  ;;  %7026 = vmatprep.mubr.msk.bf16.mxu1 %vm7570_vm1, %v7569_v0 }
 0x4cf   : > { %v2247_v38 = vpop.permute.xlu1 %2246  ;;  %v4426_v37 = vld [vmem:[#allocation3 + $0x240] sm:$0xff]  ;;  %v5661_v5 = vmax.f32 %v5307_v21, 0.0 }
 0x4d0   : > { %v5310_v49 = vadd.f32 %v9554_v27, %v4885_v1  ;;  %2369 = vst.msk [vmem:[#allocation3 + $0x258] sm:$0xff] %vm2343_vm6, %v2247_v38  ;;  %5024 = vmatmul.mubr.bf16.gmra.mrb[36].mxu0 %v4426_v37  ;;  %v9613_v48 = vpop.f32.mrb[124].mxu1  ;;  %v4467_v27 = vld [vmem:[#allocation3 + $0x388] sm:$0xff] }
 0x4d1   : > { %v4013_v8 = vpop.permute.xlu0 %4012  ;;  %v6920_v53 = vpop.f32.mrb[125].mxu1  ;;  %5760 = vst.msk [vmem:[#allocation4 + $0x60] sm:$0xff] %vm5747_vm8, %v5661_v5 }
 0x4d2   : > { %v5662_v20 = vmax.f32 %v5310_v49, 0.0  ;;  %4134 = vst.msk [vmem:[#allocation3 + $0x260] sm:$0xff] %vm2736_vm7, %v4013_v8  ;;  %v9617_v16 = vpop.f32.mrb[126].mxu1 }
 0x4d3   : > { %v2640_v62 = vpop.permute.xlu1 %2639  ;;  %v6921_v63 = vpop.f32.mrb[127].mxu1 }
 0x4d4   : > { %5761 = vst.msk [vmem:[#allocation4 + $0x68] sm:$0xff] %vm5747_vm8, %v5662_v20 }
 0x4d5   : > { %2762 = vst.msk [vmem:[#allocation3 + $0x258] sm:$0xff] %vm2736_vm7, %v2640_v62  ;;  %v3231_v61 = vpop.permute.xlu0 %3230  ;;  %7027 = vmatmul.mubr.msk.bf16.gmra.mrb[36].mxu1 %vm1304_vm4, %v4467_v27 }
 0x4d6   : > { %3351 = vst.msk [vmem:[#allocation3 + $0x278] sm:$0xff] %vm1950_vm5, %v3231_v61  ;;  %7030 = vmatprep.mubr.msk.bf16.mxu1 %vm7570_vm1, %v7569_v0  ;;  %v4889_v3 = vpop.f32.mrb[224].mxu0 }
 0x4d7   : > { %v1856_v18 = vpop.permute.xlu1 %1855  ;;  %v4890_v17 = vadd.f32 %v9465_v31, %v4889_v3  ;;  %v4891_v51 = vpop.f32.mrb[225].mxu0 }
 0x4d8   : > { %1977 = vst.msk [vmem:[#allocation3 + $0x270] sm:$0xff] %vm1950_vm5, %v1856_v18  ;;  %v9627_v54 = vpop.f32.mrb[128].mxu1  ;;  %v4892_v19 = vpop.f32.mrb[226].mxu0  ;;  %v5876_v24 = vld [vmem:[#allocation4 + $0x54] ss:$2 sm:$0xff] }
 0x4d9   : > { %v3623_v26 = vpop.permute.xlu0 %3622  ;;  %v4430_v56 = vld [vmem:[#allocation3 + $0x260] sm:$0xff]  ;;  %v5880_v6 = vld [vmem:[#allocation4 + $0x55] ss:$2 sm:$0xff]  ;;  %v5315_v52 = vadd.f32 %v9568_v23, %v4890_v17  ;;  %v4893_v2 = vadd.f32 %v9465_v31, %v4892_v19  ;;  %v6924_v10 = vpop.f32.mrb[129].mxu1 }
 0x4da   : > { %3743 = vst.msk [vmem:[#allocation3 + $0x278] sm:$0xff] %vm2343_vm6, %v3623_v26  ;;  %v4894_v50 = vpop.f32.mrb[227].mxu0  ;;  %5031 = vmatprep.mubr.bf16.mxu0 %v4430_v56  ;;  %v5885_v36 = vmax.f32 %v5876_v24, %v5880_v6  ;;  %v9632_v33 = vpop.f32.mrb[130].mxu1 }
 0x4db   : > { %v2249_v46 = vpop.permute.xlu1 %2248  ;;  %v5878_v43 = vld [vmem:[#allocation4 + $0x64] ss:$2 sm:$0xf]  ;;  %v5663_v58 = vmax.f32 %v5315_v52, 0.0  ;;  %v5318_v55 = vadd.f32 %v9572_v4, %v4893_v2  ;;  %v6925_v23 = vpop.f32.mrb[131].mxu1  ;;  %v5866_v4 = vmax.f32 %v5862_v39, %v5864_v9 }
 0x4dc   : > { %v4429_v12 = vld [vmem:[#allocation3 + $0x258] sm:$0xff]  ;;  %2370 = vst.msk [vmem:[#allocation3 + $0x270] sm:$0xff] %vm2343_vm6, %v2249_v46  ;;  %v5887_v13 = vmax.f32 %v5883_v41, %v5885_v36 }
 0x4dd   : > { %5032 = vmatmul.mubr.bf16.gmra.mrb[40].mxu0 %v4429_v12  ;;  %v5882_v34 = vld [vmem:[#allocation4 + $0x65] ss:$2 sm:$0xf]  ;;  %v4015_v22 = vpop.permute.xlu0 %4014  ;;  %7031 = vmatmul.mubr.msk.bf16.gmra.mrb[40].mxu1 %vm1304_vm4, %v4470_v57  ;;  %5762 = vst.msk [vmem:[#allocation4 + $0x70] sm:$0xff] %vm5747_vm8, %v5663_v58  ;;  %v5664_v40 = vmax.f32 %v5318_v55, 0.0 }
 0x4de   : > { %v5886_v14 = vmax.f32 %v5878_v43, %v5882_v34  ;;  %4135 = vst.msk [vmem:[#allocation3 + $0x278] sm:$0xff] %vm2736_vm7, %v4015_v22  ;;  %7034 = vmatprep.mubr.msk.bf16.mxu1 %vm7570_vm1, %v7569_v0  ;;  %v6111_v35 = vrot.slane %v5887_v13, 4  ;;  %v4479_v22 = vld [vmem:[#allocation3 + $0x3e8] sm:$0xff] }
 0x4df   : > { %v2642_v21 = vpop.permute.xlu1 %2641  ;;  %5763 = vst.msk [vmem:[#allocation4 + $0x78] sm:$0xff] %vm5747_vm8, %v5664_v40 }
 0x4e0   : > { %v5888_v1 = vmax.f32 %v5884_v60, %v5886_v14  ;;  %2763 = vst.msk [vmem:[#allocation3 + $0x270] sm:$0xff] %vm2736_vm7, %v2642_v21  ;;  %v9643_v11 = vpop.f32.mrb[132].mxu1  ;;  %v6130_v38 = vsel %vm774_vm0, %v5866_v4, %v6111_v35 }
 0x4e1   : > { %v3233_v37 = vpop.permute.xlu0 %3232  ;;  %v6928_v5 = vpop.f32.mrb[133].mxu1  ;;  %v6558_v49 = vpack.c.bf16 %v6130_v38, %v6130_v38 }
 0x4e2   : > { %v6112_v8 = vrot.slane %v5888_v1, 4  ;;  %3352 = vst.msk [vmem:[#allocation3 + $0x290] sm:$0xff] %vm1950_vm5, %v3233_v37  ;;  %v9647_v53 = vpop.f32.mrb[134].mxu1  ;;  %v4897_v62 = vpop.f32.mrb[228].mxu0  ;;  %v4482_v1 = vld [vmem:[#allocation3 + $0x400] sm:$0xff] }
 0x4e3   : > { %v1858_v20 = vpop.permute.xlu1 %1857  ;;  %6172 = vst.msk [vmem:[%s9547_s27 + $0x4] sm:$0xf] %vm6170_vm9, %v6558_v49  ;;  %v4898_v27 = vadd.f32 %v9465_v31, %v4897_v62  ;;  %v6929_v61 = vpop.f32.mrb[135].mxu1 }
 0x4e4   : > { %v6113_v63 = vsel %vm774_vm0, %v6111_v35, %v6112_v8  ;;  %1978 = vst.msk [vmem:[#allocation3 + $0x288] sm:$0xff] %vm1950_vm5, %v1858_v20  ;;  %v4899_v47 = vpop.f32.mrb[229].mxu0 }
 0x4e5   : > { %v6559_v18 = vpack.c.bf16 %v6113_v63, %v6113_v63  ;;  %v3625_v3 = vpop.permute.xlu0 %3624  ;;  %v4900_v45 = vpop.f32.mrb[230].mxu0  ;;  %7035 = vmatmul.mubr.msk.bf16.gmra.mrb[44].mxu1 %vm1304_vm4, %v4473_v59  ;;  %v4433_v7 = vld [vmem:[#allocation3 + $0x278] sm:$0xff]  ;;  %v5323_v15 = vadd.f32 %v9582_v25, %v4898_v27 }
 0x4e6   : > { %3744 = vst.msk [vmem:[#allocation3 + $0x290] sm:$0xff] %vm2343_vm6, %v3625_v3  ;;  %v4901_v32 = vadd.f32 %v9465_v31, %v4900_v45  ;;  %v4902_v17 = vpop.f32.mrb[231].mxu0  ;;  %5039 = vmatprep.mubr.bf16.mxu0 %v4433_v7  ;;  %7038 = vmatprep.mubr.msk.bf16.mxu1 %vm7570_vm1, %v7569_v0  ;;  %v5890_v37 = vld [vmem:[#allocation4 + $0x70] ss:$2 sm:$0xff]  ;;  %v5894_v5 = vld [vmem:[#allocation4 + $0x71] ss:$2 sm:$0xff] }
 0x4e7   : > { %6173 = vst.msk [vmem:[%s9547_s27 + $0x8] sm:$0xf] %vm6170_vm9, %v6559_v18  ;;  %v2251_v51 = vpop.permute.xlu1 %2250  ;;  %v4432_v29 = vld [vmem:[#allocation3 + $0x270] sm:$0xff]  ;;  %v5665_v26 = vmax.f32 %v5323_v15, 0.0  ;;  %v5905_v59 = vmax.f32 %v5890_v37, %v5894_v5 }
 0x4e8   : > { %v5326_v19 = vadd.f32 %v9587_v28, %v4901_v32  ;;  %2371 = vst.msk [vmem:[#allocation3 + $0x288] sm:$0xff] %vm2343_vm6, %v2251_v51  ;;  %5040 = vmatmul.mubr.bf16.gmra.mrb[44].mxu0 %v4432_v29  ;;  %v9664_v25 = vpop.f32.mrb[136].mxu1  ;;  %v4476_v28 = vld [vmem:[#allocation3 + $0x3d0] sm:$0xff]  ;;  %v4485_v32 = vld [vmem:[#allocation3 + $0x418] sm:$0xff] }
 0x4e9   : > { %v4017_v56 = vpop.permute.xlu0 %4016  ;;  %v6932_v9 = vpop.f32.mrb[137].mxu1  ;;  %5764 = vst.msk [vmem:[#allocation4 + $0x80] sm:$0xff] %vm5747_vm8, %v5665_v26 }
 0x4ea   : > { %v5666_v24 = vmax.f32 %v5326_v19, 0.0  ;;  %4136 = vst.msk [vmem:[#allocation3 + $0x290] sm:$0xff] %vm2736_vm7, %v4017_v56  ;;  %v9668_v6 = vpop.f32.mrb[138].mxu1 }
 0x4eb   : > { %v2644_v52 = vpop.permute.xlu1 %2643  ;;  %v6933_v2 = vpop.f32.mrb[139].mxu1 }
 0x4ec   : > { %5765 = vst.msk [vmem:[#allocation4 + $0x88] sm:$0xff] %vm5747_vm8, %v5666_v24 }
 0x4ed   : > { %2764 = vst.msk [vmem:[#allocation3 + $0x288] sm:$0xff] %vm2736_vm7, %v2644_v52  ;;  %7039 = vmatmul.mubr.msk.bf16.gmra.mrb[48].mxu1 %vm1304_vm4, %v4476_v28 }
 0x4ee   : > { %7042 = vmatprep.mubr.msk.bf16.mxu1 %vm7570_vm1, %v7569_v0  ;;  %v4905_v10 = vpop.f32.mrb[232].mxu0 }
 0x4ef   : > { %v4906_v50 = vadd.f32 %v9465_v31, %v4905_v10  ;;  %v4907_v41 = vpop.f32.mrb[233].mxu0 }
 0x4f0   : > { %v9676_v36 = vpop.f32.mrb[140].mxu1  ;;  %v4908_v30 = vpop.f32.mrb[234].mxu0  ;;  %v4488_v41 = vld [vmem:[#allocation3 + $0x430] sm:$0xff] }
 0x4f1   : > { %v6936_v46 = vpop.f32.mrb[141].mxu1  ;;  %v4436_v12 = vld [vmem:[#allocation3 + $0x290] sm:$0xff]  ;;  %v5331_v43 = vadd.f32 %v9598_v44, %v4906_v50  ;;  %v4909_v58 = vadd.f32 %v9465_v31, %v4908_v30  ;;  %v4910_v55 = vpop.f32.mrb[235].mxu0 }
 0x4f2   : > { %5047 = vmatprep.mubr.bf16.mxu0 %v4436_v12  ;;  %v9680_v23 = vpop.f32.mrb[142].mxu1 }
 0x4f3   : > { %v6937_v57 = vpop.f32.mrb[143].mxu1  ;;  %v5667_v13 = vmax.f32 %v5331_v43, 0.0  ;;  %v5334_v34 = vadd.f32 %v9601_v42, %v4909_v58 }
 0x4f4   : > { %v4435_v39 = vld [vmem:[#allocation3 + $0x288] sm:$0xff] }
 0x4f5   : > { %5048 = vmatmul.mubr.bf16.gmra.mrb[48].mxu0 %v4435_v39  ;;  %7043 = vmatmul.mubr.msk.bf16.gmra.mrb[52].mxu1 %vm1304_vm4, %v4479_v22  ;;  %5766 = vst.msk [vmem:[#allocation4 + $0x90] sm:$0xff] %vm5747_vm8, %v5667_v13  ;;  %v5668_v60 = vmax.f32 %v5334_v34, 0.0  ;;  %v4491_v57 = vld [vmem:[#allocation3 + $0x448] sm:$0xff] }
 0x4f6   : > { %7046 = vmatprep.mubr.msk.bf16.mxu1 %vm7570_vm1, %v7569_v0 }
 0x4f7   : > { %5767 = vst.msk [vmem:[#allocation4 + $0x98] sm:$0xff] %vm5747_vm8, %v5668_v60 }
 0x4f8   : > { %v9688_v44 = vpop.f32.mrb[144].mxu1 }
 0x4f9   : > { %v6940_v14 = vpop.f32.mrb[145].mxu1 }
 0x4fa   : > { %v9690_v40 = vpop.f32.mrb[146].mxu1  ;;  %v4913_v4 = vpop.f32.mrb[236].mxu0 }
 0x4fb   : > { %v6941_v35 = vpop.f32.mrb[147].mxu1  ;;  %v4914_v42 = vadd.f32 %v9465_v31, %v4913_v4  ;;  %v4915_v21 = vpop.f32.mrb[237].mxu0 }
 0x4fc   : > { %v4916_v38 = vpop.f32.mrb[238].mxu0 }
 0x4fd   : > { %7047 = vmatmul.mubr.msk.bf16.gmra.mrb[56].mxu1 %vm1304_vm4, %v4482_v1  ;;  %v5339_v49 = vadd.f32 %v9613_v48, %v4914_v42  ;;  %v4917_v8 = vadd.f32 %v9465_v31, %v4916_v38  ;;  %v4918_v20 = vpop.f32.mrb[239].mxu0  ;;  %v4494_v1 = vld [vmem:[#allocation3 + $0x460] sm:$0xff] }
 0x4fe   : > { %7050 = vmatprep.mubr.msk.bf16.mxu1 %vm7570_vm1, %v7569_v0  ;;  %v5898_v62 = vld [vmem:[#allocation4 + $0x8c] ss:$2 sm:$0xff]  ;;  %v5902_v63 = vld [vmem:[#allocation4 + $0x8d] ss:$2 sm:$0xff] }
 0x4ff   : > { %v5669_v27 = vmax.f32 %v5339_v49, 0.0  ;;  %v5342_v61 = vadd.f32 %v9617_v16, %v4917_v8  ;;  %v5907_v18 = vmax.f32 %v5898_v62, %v5902_v63  ;;  %v9747_v62 = vld [vmem:[#allocation9] ss:$0 sm:$0xff] }
 0x500   : > { %v9699_v47 = vpop.f32.mrb[148].mxu1 }
 0x501   : > { %v6944_v3 = vpop.f32.mrb[149].mxu1  ;;  %5768 = vst.msk [vmem:[#allocation4 + $0xa0] sm:$0xff] %vm5747_vm8, %v5669_v27  ;;  %v5670_v48 = vmax.f32 %v5342_v61, 0.0  ;;  %v5909_v7 = vmax.f32 %v5905_v59, %v5907_v18  ;;  %v4497_v59 = vld [vmem:[#allocation3 + $0x478] sm:$0xff] }
 0x502   : > { %v9702_v45 = vpop.f32.mrb[150].mxu1 }
 0x503   : > { %v6945_v15 = vpop.f32.mrb[151].mxu1  ;;  %5769 = vst.msk [vmem:[#allocation4 + $0xa8] sm:$0xff] %vm5747_vm8, %v5670_v48  ;;  %v6560_v17 = vpack.c.bf16 %v5909_v7, %v5909_v7 }
 0x505   : > { %7051 = vmatmul.mubr.msk.bf16.gmra.mrb[60].mxu1 %vm1304_vm4, %v4485_v32  ;;  %6174 = vst.msk [vmem:[%s9547_s27 + $0xc] sm:$0xf] %vm6170_vm9, %v6560_v17 }
 0x506   : > { %7054 = vmatprep.mubr.msk.bf16.mxu1 %vm7570_vm1, %v7569_v0  ;;  %v4921_v16 = vpop.f32.mrb[240].mxu0 }
 0x507   : > { %v4922_v51 = vadd.f32 %v9465_v31, %v4921_v16  ;;  %v4923_v29 = vpop.f32.mrb[241].mxu0  ;;  %v4500_v16 = vld [vmem:[#allocation3 + $0x490] sm:$0xff] }
 0x508   : > { %v9711_v26 = vpop.f32.mrb[152].mxu1  ;;  %v4924_v19 = vpop.f32.mrb[242].mxu0  ;;  %v5900_v7 = vld [vmem:[#allocation4 + $0x9c] ss:$2 sm:$0xf] }
 0x509   : > { %v6948_v56 = vpop.f32.mrb[153].mxu1  ;;  %v5347_v9 = vadd.f32 %v9627_v54, %v4922_v51  ;;  %v4925_v24 = vadd.f32 %v9465_v31, %v4924_v19  ;;  %v4926_v52 = vpop.f32.mrb[243].mxu0  ;;  %v5904_v32 = vld [vmem:[#allocation4 + $0x9d] ss:$2 sm:$0xf] }
 0x50a   : > { %v9715_v2 = vpop.f32.mrb[154].mxu1  ;;  %v5892_v51 = vld [vmem:[#allocation4 + $0x80] ss:$2 sm:$0xf] }
 0x50b   : > { %v6949_v28 = vpop.f32.mrb[155].mxu1  ;;  %v5671_v10 = vmax.f32 %v5347_v9, 0.0  ;;  %v5350_v50 = vadd.f32 %v9632_v33, %v4925_v24 }
 0x50d   : > { %7055 = vmatmul.mubr.msk.bf16.gmra.mrb[64].mxu1 %vm1304_vm4, %v4488_v41  ;;  %5770 = vst.msk [vmem:[#allocation4 + $0xb0] sm:$0xff] %vm5747_vm8, %v5671_v10  ;;  %v5672_v30 = vmax.f32 %v5350_v50, 0.0  ;;  %v5908_v50 = vmax.f32 %v5900_v7, %v5904_v32 }
 0x50e   : > { %7058 = vmatprep.mubr.msk.bf16.mxu1 %vm7570_vm1, %v7569_v0 }
 0x50f   : > { %5771 = vst.msk [vmem:[#allocation4 + $0xb8] sm:$0xff] %vm5747_vm8, %v5672_v30 }
 0x510   : > { %v9723_v54 = vpop.f32.mrb[156].mxu1 }
 0x511   : > { %v6952_v46 = vpop.f32.mrb[157].mxu1 }
 0x512   : > { %v9725_v12 = vpop.f32.mrb[158].mxu1  ;;  %v4929_v43 = vpop.f32.mrb[244].mxu0 }
 0x513   : > { %v6953_v58 = vpop.f32.mrb[159].mxu1  ;;  %v4930_v33 = vadd.f32 %v9465_v31, %v4929_v43  ;;  %v4931_v55 = vpop.f32.mrb[245].mxu0 }
 0x514   : > { %v4932_v39 = vpop.f32.mrb[246].mxu0  ;;  %v5912_v29 = vld [vmem:[#allocation4 + $0xa8] ss:$2 sm:$0xff]  ;;  %v5916_v19 = vld [vmem:[#allocation4 + $0xa9] ss:$2 sm:$0xff] }
 0x515   : > { %7059 = vmatmul.mubr.msk.bf16.gmra.mrb[68].mxu1 %vm1304_vm4, %v4491_v57  ;;  %v5355_v13 = vadd.f32 %v9643_v11, %v4930_v33  ;;  %v4933_v34 = vadd.f32 %v9465_v31, %v4932_v39  ;;  %v4934_v22 = vpop.f32.mrb[247].mxu0  ;;  %v5927_v33 = vmax.f32 %v5912_v29, %v5916_v19 }
 0x516   : > { %7062 = vmatprep.mubr.msk.bf16.mxu1 %vm7570_vm1, %v7569_v0  ;;  %v5914_v24 = vld [vmem:[#allocation4 + $0xb8] ss:$2 sm:$0xf]  ;;  %v5918_v28 = vld [vmem:[#allocation4 + $0xb9] ss:$2 sm:$0xf] }
 0x517   : > { %v5673_v60 = vmax.f32 %v5355_v13, 0.0  ;;  %v5358_v14 = vadd.f32 %v9647_v53, %v4933_v34  ;;  %v5928_v34 = vmax.f32 %v5914_v24, %v5918_v28 }
 0x518   : > { %v9734_v4 = vpop.f32.mrb[160].mxu1 }
 0x519   : > { %v6956_v35 = vpop.f32.mrb[161].mxu1  ;;  %5772 = vst.msk [vmem:[#allocation4 + $0xc0] sm:$0xff] %vm5747_vm8, %v5673_v60  ;;  %v5674_v42 = vmax.f32 %v5358_v14, 0.0 }
 0x51a   : > { %v9737_v21 = vpop.f32.mrb[162].mxu1 }
 0x51b   : > { %v6957_v38 = vpop.f32.mrb[163].mxu1  ;;  %5773 = vst.msk [vmem:[#allocation4 + $0xc8] sm:$0xff] %vm5747_vm8, %v5674_v42 }
 0x51d   : > { %7063 = vmatmul.mubr.msk.bf16.gmra.mrb[72].mxu1 %vm1304_vm4, %v4494_v1 }
 0x51e   : > { %7066 = vmatprep.mubr.msk.bf16.mxu1 %vm7570_vm1, %v7569_v0  ;;  %v4937_v11 = vpop.f32.mrb[248].mxu0 }
 0x51f   : > { %v4938_v53 = vadd.f32 %v9465_v31, %v4937_v11  ;;  %v4939_v37 = vpop.f32.mrb[249].mxu0 }
 0x520   : > { %v9744_v5 = vpop.f32.mrb[164].mxu1  ;;  %v4940_v49 = vpop.f32.mrb[250].mxu0 }
 0x521   : > { %v6960_v8 = vpop.f32.mrb[165].mxu1  ;;  %v5363_v20 = vadd.f32 %v9664_v25, %v4938_v53  ;;  %v4941_v63 = vadd.f32 %v9747_v62, %v4940_v49  ;;  %v4942_v27 = vpop.f32.mrb[251].mxu0 }
 0x522   : > { %v9750_v61 = vpop.f32.mrb[166].mxu1 }
 0x523   : > { %v6961_v18 = vpop.f32.mrb[167].mxu1  ;;  %v5675_v3 = vmax.f32 %v5363_v20, 0.0  ;;  %v5366_v48 = vadd.f32 %v9668_v6, %v4941_v63  ;;  %v5896_v6 = vld [vmem:[#allocation4 + $0x81] ss:$2 sm:$0xf] }
 0x524   : > { %v5906_v57 = vmax.f32 %v5892_v51, %v5896_v6 }
 0x525   : > { %7067 = vmatmul.mubr.msk.bf16.gmra.mrb[76].mxu1 %vm1304_vm4, %v4497_v59  ;;  %5774 = vst.msk [vmem:[#allocation4 + $0xd0] sm:$0xff] %vm5747_vm8, %v5675_v3  ;;  %v5676_v31 = vmax.f32 %v5366_v48, 0.0 }
 0x526   : > { %7070 = vmatprep.mubr.msk.bf16.mxu1 %vm7570_vm1, %v7569_v0  ;;  %v5910_v11 = vmax.f32 %v5906_v57, %v5908_v50 }
 0x527   : > { %5775 = vst.msk [vmem:[#allocation4 + $0xd8] sm:$0xff] %vm5747_vm8, %v5676_v31 }
 0x528   : > { %v9758_v25 = vpop.f32.mrb[168].mxu1 }
 0x529   : > { %v6964_v15 = vpop.f32.mrb[169].mxu1 }
 0x52a   : > { %v9760_v17 = vpop.f32.mrb[170].mxu1  ;;  %v4945_v56 = vpop.f32.mrb[252].mxu0 }
 0x52b   : > { %v6965_v9 = vpop.f32.mrb[171].mxu1  ;;  %v4946_v52 = vadd.f32 %v9747_v62, %v4945_v56  ;;  %v4947_v0 = vpop.f32.mrb[253].mxu0 }
 0x52c   : > { %v4948_v10 = vpop.f32.mrb[254].mxu0  ;;  %v5920_v41 = vld [vmem:[#allocation4 + $0xc4] ss:$2 sm:$0xff]  ;;  %v5924_v30 = vld [vmem:[#allocation4 + $0xc5] ss:$2 sm:$0xff] }
 0x52d   : > { %7071 = vmatmul.mubr.msk.bf16.gmra.mrb[80].mxu1 %vm1304_vm4, %v4500_v16  ;;  %v5371_v46 = vadd.f32 %v9676_v36, %v4946_v52  ;;  %v4949_v43 = vadd.f32 %v9747_v62, %v4948_v10  ;;  %v4950_v58 = vpop.f32.mrb[255].mxu0  ;;  %v5929_v55 = vmax.f32 %v5920_v41, %v5924_v30 }
 0x52e   : > { %v5922_v39 = vld [vmem:[#allocation4 + $0xd4] ss:$2 sm:$0xf]  ;;  %v5926_v13 = vld [vmem:[#allocation4 + $0xd5] ss:$2 sm:$0xf] }
 0x52f   : > { %v5677_v22 = vmax.f32 %v5371_v46, 0.0  ;;  %v5374_v60 = vadd.f32 %v9680_v23, %v4949_v43  ;;  %v5931_v35 = vmax.f32 %v5927_v33, %v5929_v55  ;;  %v5930_v42 = vmax.f32 %v5922_v39, %v5926_v13 }
 0x530   : > { %v9767_v14 = vpop.f32.mrb[172].mxu1 }
 0x531   : > { %v6968_v1 = vpop.f32.mrb[173].mxu1  ;;  %5776 = vst.msk [vmem:[#allocation4 + $0xe0] sm:$0xff] %vm5747_vm8, %v5677_v22  ;;  %v5678_v36 = vmax.f32 %v5374_v60, 0.0  ;;  %v6118_v53 = vrot.slane %v5931_v35, 4  ;;  %v5932_v37 = vmax.f32 %v5928_v34, %v5930_v42 }
 0x532   : > { %v9770_v38 = vpop.f32.mrb[174].mxu1 }
 0x533   : > { %v6969_v49 = vpop.f32.mrb[175].mxu1  ;;  %5777 = vst.msk [vmem:[#allocation4 + $0xe8] sm:$0xff] %vm5747_vm8, %v5678_v36  ;;  %v6131_v23 = vsel %vm774_vm0, %v5910_v11, %v6118_v53  ;;  %v6119_v8 = vrot.slane %v5932_v37, 4 }
 0x534   : > { %v6561_v20 = vpack.c.bf16 %v6131_v23, %v6131_v23 }
 0x535   : > { %v6120_v63 = vsel %vm774_vm0, %v6118_v53, %v6119_v8 }
 0x536   : > { %v4953_v27 = vpop.f32.mrb[0].mxu0  ;;  %6175 = vst.msk [vmem:[%s9547_s27 + $0x10] sm:$0xf] %vm6170_vm9, %v6561_v20  ;;  %v6562_v59 = vpack.c.bf16 %v6120_v63, %v6120_v63 }
 0x537   : > { %v4954_v18 = vadd.f32 %v9747_v62, %v4953_v27  ;;  %v4955_v3 = vpop.f32.mrb[1].mxu0 }
 0x538   : > { %v9778_v48 = vpop.f32.mrb[176].mxu1  ;;  %v4956_v31 = vpop.f32.mrb[2].mxu0  ;;  %6176 = vst.msk [vmem:[%s9547_s27 + $0x14] sm:$0xf] %vm6170_vm9, %v6562_v59 }
 0x539   : > { %v6972_v7 = vpop.f32.mrb[177].mxu1  ;;  %v5379_v15 = vadd.f32 %v9688_v44, %v4954_v18  ;;  %v4957_v32 = vadd.f32 %v9747_v62, %v4956_v31  ;;  %v4958_v16 = vpop.f32.mrb[3].mxu0 }
 0x53a   : > { %v9784_v51 = vpop.f32.mrb[178].mxu1  ;;  %v5938_v42 = vld [vmem:[#allocation4 + $0xe1] ss:$2 sm:$0xff] }
 0x53b   : > { %v6973_v6 = vpop.f32.mrb[179].mxu1  ;;  %v5679_v29 = vmax.f32 %v5379_v15, 0.0  ;;  %v5382_v19 = vadd.f32 %v9690_v40, %v4957_v32 }
 0x53d   : > { %5778 = vst.msk [vmem:[#allocation4 + $0xf0] sm:$0xff] %vm5747_vm8, %v5679_v29  ;;  %v5680_v56 = vmax.f32 %v5382_v19, 0.0 }
 0x53f   : > { %5779 = vst.msk [vmem:[#allocation4 + $0xf8] sm:$0xff] %vm5747_vm8, %v5680_v56 }
 0x540   : > { %v9789_v9 = vpop.f32.mrb[180].mxu1 }
 0x541   : > { %v6976_v24 = vpop.f32.mrb[181].mxu1 }
 0x542   : > { %v9791_v52 = vpop.f32.mrb[182].mxu1  ;;  %v4961_v44 = vpop.f32.mrb[4].mxu0 }
 0x543   : > { %v6977_v0 = vpop.f32.mrb[183].mxu1  ;;  %v4962_v28 = vadd.f32 %v9747_v62, %v4961_v44  ;;  %v4963_v10 = vpop.f32.mrb[5].mxu0 }
 0x544   : > { %v4964_v50 = vpop.f32.mrb[6].mxu0 }
 0x545   : > { %v5387_v41 = vadd.f32 %v9699_v47, %v4962_v28  ;;  %v4965_v40 = vadd.f32 %v9747_v62, %v4964_v50  ;;  %v4966_v30 = vpop.f32.mrb[7].mxu0 }
 0x547   : > { %v5681_v46 = vmax.f32 %v5387_v41, 0.0  ;;  %v5390_v43 = vadd.f32 %v9702_v45, %v4965_v40  ;;  %v5934_v45 = vld [vmem:[#allocation4 + $0xe0] ss:$2 sm:$0xff] }
 0x548   : > { %v9797_v58 = vpop.f32.mrb[184].mxu1  ;;  %v5949_v63 = vmax.f32 %v5934_v45, %v5938_v42 }
 0x549   : > { %v6980_v33 = vpop.f32.mrb[185].mxu1  ;;  %5780 = vst.msk [vmem:[#allocation4 + $0x100] sm:$0xff] %vm5747_vm8, %v5681_v46  ;;  %v5682_v55 = vmax.f32 %v5390_v43, 0.0 }
 0x54a   : > { %v9800_v57 = vpop.f32.mrb[186].mxu1 }
 0x54b   : > { %v6981_v39 = vpop.f32.mrb[187].mxu1  ;;  %5781 = vst.msk [vmem:[#allocation4 + $0x108] sm:$0xff] %vm5747_vm8, %v5682_v55 }
 0x54e   : > { %v4969_v13 = vpop.f32.mrb[8].mxu0 }
 0x54f   : > { %v4970_v47 = vadd.f32 %v9747_v62, %v4969_v13  ;;  %v4971_v34 = vpop.f32.mrb[9].mxu0 }
 0x550   : > { %v9804_v22 = vpop.f32.mrb[188].mxu1  ;;  %v4972_v60 = vpop.f32.mrb[10].mxu0 }
 0x551   : > { %v6984_v35 = vpop.f32.mrb[189].mxu1  ;;  %v5395_v1 = vadd.f32 %v9711_v26, %v4970_v47  ;;  %v4973_v36 = vadd.f32 %v9747_v62, %v4972_v60  ;;  %v4974_v11 = vpop.f32.mrb[11].mxu0 }
 0x552   : > { %v9808_v53 = vpop.f32.mrb[190].mxu1  ;;  %v5942_v49 = vld [vmem:[#allocation4 + $0xfc] ss:$2 sm:$0xff]  ;;  %v5946_v23 = vld [vmem:[#allocation4 + $0xfd] ss:$2 sm:$0xff] }
 0x553   : > { %v6985_v37 = vpop.f32.mrb[191].mxu1  ;;  %v5683_v8 = vmax.f32 %v5395_v1, 0.0  ;;  %v5398_v20 = vadd.f32 %v9715_v2, %v4973_v36  ;;  %v5951_v27 = vmax.f32 %v5942_v49, %v5946_v23 }
 0x555   : > { %5782 = vst.msk [vmem:[#allocation4 + $0x110] sm:$0xff] %vm5747_vm8, %v5683_v8  ;;  %v5684_v59 = vmax.f32 %v5398_v20, 0.0  ;;  %v5953_v18 = vmax.f32 %v5949_v63, %v5951_v27 }
 0x557   : > { %5783 = vst.msk [vmem:[#allocation4 + $0x118] sm:$0xff] %vm5747_vm8, %v5684_v59  ;;  %v6563_v3 = vpack.c.bf16 %v5953_v18, %v5953_v18 }
 0x558   : > { %v9813_v26 = vpop.f32.mrb[192].mxu1 }
 0x559   : > { %v6988_v31 = vpop.f32.mrb[193].mxu1  ;;  %6177 = vst.msk [vmem:[%s9547_s27 + $0x18] sm:$0xf] %vm6170_vm9, %v6563_v3 }
 0x55a   : > { %v9815_v7 = vpop.f32.mrb[194].mxu1  ;;  %v4977_v15 = vpop.f32.mrb[12].mxu0 }
 0x55b   : > { %v6989_v32 = vpop.f32.mrb[195].mxu1  ;;  %v4978_v2 = vadd.f32 %v9747_v62, %v4977_v15  ;;  %v4979_v16 = vpop.f32.mrb[13].mxu0 }
 0x55c   : > { %v4980_v6 = vpop.f32.mrb[14].mxu0 }
 0x55d   : > { %v5403_v29 = vadd.f32 %v9723_v54, %v4978_v2  ;;  %v4981_v19 = vadd.f32 %v9747_v62, %v4980_v6  ;;  %v4982_v56 = vpop.f32.mrb[15].mxu0 }
 0x55f   : > { %v5685_v24 = vmax.f32 %v5403_v29, 0.0  ;;  %v5406_v44 = vadd.f32 %v9725_v12, %v4981_v19 }
 0x560   : > { %v5482_v0 = vpop.f32.mrb[0].mxu1 }
 0x561   : > { %v7218_v28 = vadd.f32 %v9747_v62, %v5482_v0  ;;  %v6992_v10 = vpop.f32.mrb[1].mxu1  ;;  %5784 = vst.msk [vmem:[#allocation4 + $0x120] sm:$0xff] %vm5747_vm8, %v5685_v24  ;;  %v5686_v50 = vmax.f32 %v5406_v44, 0.0 }
 0x562   : > { %v5485_v41 = vpop.f32.mrb[2].mxu1 }
 0x563   : > { %v5705_v40 = vmax.f32 %v7218_v28, 0.0  ;;  %v7219_v30 = vadd.f32 %v9747_v62, %v5485_v41  ;;  %v6993_v46 = vpop.f32.mrb[3].mxu1  ;;  %5785 = vst.msk [vmem:[#allocation4 + $0x128] sm:$0xff] %vm5747_vm8, %v5686_v50 }
 0x564   : > { %v5936_v46 = vld [vmem:[#allocation4 + $0xf0] ss:$2 sm:$0xf] }
 0x565   : > { %5804 = vst.msk [vmem:[#allocation4 + $0x1c0] sm:$0xff] %vm5747_vm8, %v5705_v40  ;;  %v5706_v54 = vmax.f32 %v7219_v30, 0.0  ;;  %v5944_v40 = vld [vmem:[#allocation4 + $0x10c] ss:$2 sm:$0xf] }
 0x566   : > { %v5948_v30 = vld [vmem:[#allocation4 + $0x10d] ss:$2 sm:$0xf] }
 0x567   : > { %5805 = vst.msk [vmem:[#allocation4 + $0x1c8] sm:$0xff] %vm5747_vm8, %v5706_v54  ;;  %v4985_v12 = vpop.f32.mrb[16].mxu0 }
 0x568   : > { %v4986_v43 = vadd.f32 %v9747_v62, %v4985_v12  ;;  %v4987_v33 = vpop.f32.mrb[17].mxu0  ;;  %v5490_v55 = vpop.f32.mrb[4].mxu1  ;;  %v5956_v54 = vld [vmem:[#allocation4 + $0x118] ss:$2 sm:$0xff]  ;;  %v5960_v12 = vld [vmem:[#allocation4 + $0x119] ss:$2 sm:$0xff] }
 0x569   : > { %v7220_v39 = vadd.f32 %v9747_v62, %v5490_v55  ;;  %v4988_v13 = vpop.f32.mrb[18].mxu0  ;;  %v6996_v47 = vpop.f32.mrb[5].mxu1 }
 0x56a   : > { %v5411_v34 = vadd.f32 %v9734_v4, %v4986_v43  ;;  %v4989_v60 = vadd.f32 %v9747_v62, %v4988_v13  ;;  %v4990_v35 = vpop.f32.mrb[19].mxu0  ;;  %v5493_v45 = vpop.f32.mrb[6].mxu1 }
 0x56b   : > { %v5707_v42 = vmax.f32 %v7220_v39, 0.0  ;;  %v7221_v1 = vadd.f32 %v9747_v62, %v5493_v45  ;;  %v6997_v36 = vpop.f32.mrb[7].mxu1  ;;  %v5940_v39 = vld [vmem:[#allocation4 + $0xf1] ss:$2 sm:$0xf] }
 0x56c   : > { %v5687_v11 = vmax.f32 %v5411_v34, 0.0  ;;  %v5414_v37 = vadd.f32 %v9737_v21, %v4989_v60  ;;  %v5952_v60 = vmax.f32 %v5944_v40, %v5948_v30 }
 0x56d   : > { %5806 = vst.msk [vmem:[#allocation4 + $0x1d0] sm:$0xff] %vm5747_vm8, %v5707_v42  ;;  %v5708_v49 = vmax.f32 %v7221_v1, 0.0 }
 0x56e   : > { %5786 = vst.msk [vmem:[#allocation4 + $0x130] sm:$0xff] %vm5747_vm8, %v5687_v11  ;;  %v5688_v23 = vmax.f32 %v5414_v37, 0.0  ;;  %v5971_v37 = vmax.f32 %v5956_v54, %v5960_v12 }
 0x56f   : > { %5807 = vst.msk [vmem:[#allocation4 + $0x1d8] sm:$0xff] %vm5747_vm8, %v5708_v49 }
 0x570   : > { %5787 = vst.msk [vmem:[#allocation4 + $0x138] sm:$0xff] %vm5747_vm8, %v5688_v23  ;;  %v5498_v4 = vpop.f32.mrb[8].mxu1  ;;  %v5958_v23 = vld [vmem:[#allocation4 + $0x128] ss:$2 sm:$0xf] }
 0x571   : > { %v7222_v8 = vadd.f32 %v9747_v62, %v5498_v4  ;;  %v7000_v20 = vpop.f32.mrb[9].mxu1 }
 0x572   : > { %v5501_v63 = vpop.f32.mrb[10].mxu1 }
 0x573   : > { %v5709_v27 = vmax.f32 %v7222_v8, 0.0  ;;  %v7223_v59 = vadd.f32 %v9747_v62, %v5501_v63  ;;  %v4993_v18 = vpop.f32.mrb[20].mxu0  ;;  %v7001_v21 = vpop.f32.mrb[11].mxu1  ;;  %v5962_v63 = vld [vmem:[#allocation4 + $0x129] ss:$2 sm:$0xf] }
 0x574   : > { %v4994_v3 = vadd.f32 %v9747_v62, %v4993_v18  ;;  %v4995_v31 = vpop.f32.mrb[21].mxu0  ;;  %v5950_v18 = vmax.f32 %v5936_v46, %v5940_v39 }
 0x575   : > { %5808 = vst.msk [vmem:[#allocation4 + $0x1e0] sm:$0xff] %vm5747_vm8, %v5709_v27  ;;  %v5710_v15 = vmax.f32 %v7223_v59, 0.0  ;;  %v4996_v32 = vpop.f32.mrb[22].mxu0 }
 0x576   : > { %v5419_v2 = vadd.f32 %v9744_v5, %v4994_v3  ;;  %v4997_v16 = vadd.f32 %v9747_v62, %v4996_v32  ;;  %v4998_v6 = vpop.f32.mrb[23].mxu0 }
 0x577   : > { %5809 = vst.msk [vmem:[#allocation4 + $0x1e8] sm:$0xff] %vm5747_vm8, %v5710_v15  ;;  %v5954_v15 = vmax.f32 %v5950_v18, %v5952_v60 }
 0x578   : > { %v5689_v29 = vmax.f32 %v5419_v2, 0.0  ;;  %v5422_v19 = vadd.f32 %v9750_v61, %v4997_v16  ;;  %v5506_v56 = vpop.f32.mrb[12].mxu1  ;;  %v5972_v16 = vmax.f32 %v5958_v23, %v5962_v63 }
 0x579   : > { %v7224_v24 = vadd.f32 %v9747_v62, %v5506_v56  ;;  %v7004_v44 = vpop.f32.mrb[13].mxu1 }
 0x57a   : > { %5788 = vst.msk [vmem:[#allocation4 + $0x140] sm:$0xff] %vm5747_vm8, %v5689_v29  ;;  %v5690_v0 = vmax.f32 %v5422_v19, 0.0  ;;  %v5509_v28 = vpop.f32.mrb[14].mxu1 }
 0x57b   : > { %v5711_v10 = vmax.f32 %v7224_v24, 0.0  ;;  %v7225_v50 = vadd.f32 %v9747_v62, %v5509_v28  ;;  %v7005_v5 = vpop.f32.mrb[15].mxu1 }
 0x57c   : > { %5789 = vst.msk [vmem:[#allocation4 + $0x148] sm:$0xff] %vm5747_vm8, %v5690_v0 }
 0x57d   : > { %5810 = vst.msk [vmem:[#allocation4 + $0x1f0] sm:$0xff] %vm5747_vm8, %v5711_v10  ;;  %v5712_v41 = vmax.f32 %v7225_v50, 0.0 }
 0x57f   : > { %5811 = vst.msk [vmem:[#allocation4 + $0x1f8] sm:$0xff] %vm5747_vm8, %v5712_v41 }
 0x580   : > { %v5001_v61 = vpop.f32.mrb[24].mxu0  ;;  %v5514_v55 = vpop.f32.mrb[16].mxu1 }
 0x581   : > { %v5002_v43 = vadd.f32 %v9747_v62, %v5001_v61  ;;  %v5003_v33 = vpop.f32.mrb[25].mxu0  ;;  %v7226_v13 = vadd.f32 %v9747_v62, %v5514_v55  ;;  %v7008_v34 = vpop.f32.mrb[17].mxu1  ;;  %v5964_v35 = vld [vmem:[#allocation4 + $0x134] ss:$2 sm:$0xff]  ;;  %v5968_v45 = vld [vmem:[#allocation4 + $0x135] ss:$2 sm:$0xff] }
 0x582   : > { %v5004_v47 = vpop.f32.mrb[26].mxu0  ;;  %v5517_v11 = vpop.f32.mrb[18].mxu1  ;;  %v5973_v49 = vmax.f32 %v5964_v35, %v5968_v45 }
 0x583   : > { %v5427_v42 = vadd.f32 %v9758_v25, %v5002_v43  ;;  %v5005_v1 = vadd.f32 %v9747_v62, %v5004_v47  ;;  %v5006_v36 = vpop.f32.mrb[27].mxu0  ;;  %v5713_v4 = vmax.f32 %v7226_v13, 0.0  ;;  %v7227_v8 = vadd.f32 %v9747_v62, %v5517_v11  ;;  %v7009_v20 = vpop.f32.mrb[19].mxu1  ;;  %v5966_v3 = vld [vmem:[#allocation4 + $0x144] ss:$2 sm:$0xf] }
 0x584   : > { %v5975_v21 = vmax.f32 %v5971_v37, %v5973_v49  ;;  %v5970_v2 = vld [vmem:[#allocation4 + $0x145] ss:$2 sm:$0xf] }
 0x585   : > { %v5691_v27 = vmax.f32 %v5427_v42, 0.0  ;;  %v5430_v59 = vadd.f32 %v9760_v17, %v5005_v1  ;;  %5812 = vst.msk [vmem:[#allocation4 + $0x200] sm:$0xff] %vm5747_vm8, %v5713_v4  ;;  %v5714_v25 = vmax.f32 %v7227_v8, 0.0  ;;  %v5974_v6 = vmax.f32 %v5966_v3, %v5970_v2 }
 0x586   : > { %v6125_v32 = vrot.slane %v5975_v21, 4 }
 0x587   : > { %5790 = vst.msk [vmem:[#allocation4 + $0x150] sm:$0xff] %vm5747_vm8, %v5691_v27  ;;  %v5692_v31 = vmax.f32 %v5430_v59, 0.0  ;;  %5813 = vst.msk [vmem:[#allocation4 + $0x208] sm:$0xff] %vm5747_vm8, %v5714_v25  ;;  %v5976_v44 = vmax.f32 %v5972_v16, %v5974_v6 }
 0x588   : > { %v5522_v17 = vpop.f32.mrb[20].mxu1  ;;  %v6132_v29 = vsel %vm774_vm0, %v5954_v15, %v6125_v32 }
 0x589   : > { %5791 = vst.msk [vmem:[#allocation4 + $0x158] sm:$0xff] %vm5747_vm8, %v5692_v31  ;;  %v7228_v19 = vadd.f32 %v9747_v62, %v5522_v17  ;;  %v7012_v56 = vpop.f32.mrb[21].mxu1  ;;  %v6564_v24 = vpack.c.bf16 %v6132_v29, %v6132_v29  ;;  %v6126_v41 = vrot.slane %v5976_v44, 4 }
 0x58a   : > { %v5525_v0 = vpop.f32.mrb[22].mxu1 }
 0x58b   : > { %v5715_v28 = vmax.f32 %v7228_v19, 0.0  ;;  %v7229_v10 = vadd.f32 %v9747_v62, %v5525_v0  ;;  %v5009_v50 = vpop.f32.mrb[28].mxu0  ;;  %v7013_v5 = vpop.f32.mrb[23].mxu1  ;;  %6178 = vst.msk [vmem:[%s9547_s27 + $0x1c] sm:$0xf] %vm6170_vm9, %v6564_v24  ;;  %v6127_v54 = vsel %vm774_vm0, %v6125_v32, %v6126_v41 }
 0x58c   : > { %v5010_v40 = vadd.f32 %v9747_v62, %v5009_v50  ;;  %v5011_v30 = vpop.f32.mrb[29].mxu0  ;;  %v6565_v55 = vpack.c.bf16 %v6127_v54, %v6127_v54 }
 0x58d   : > { %5814 = vst.msk [vmem:[#allocation4 + $0x210] sm:$0xff] %vm5747_vm8, %v5715_v28  ;;  %v5716_v61 = vmax.f32 %v7229_v10, 0.0  ;;  %v5012_v46 = vpop.f32.mrb[30].mxu0 }
 0x58e   : > { %v5435_v12 = vadd.f32 %v9767_v14, %v5010_v40  ;;  %v5013_v43 = vadd.f32 %v9747_v62, %v5012_v46  ;;  %v5014_v33 = vpop.f32.mrb[31].mxu0  ;;  %6179 = vst.msk [vmem:[%s9547_s27 + $0x20] sm:$0xf] %vm6170_vm9, %v6565_v55 }
 0x58f   : > { %5815 = vst.msk [vmem:[#allocation4 + $0x218] sm:$0xff] %vm5747_vm8, %v5716_v61 }
 0x590   : > { %v5693_v39 = vmax.f32 %v5435_v12, 0.0  ;;  %v5438_v13 = vadd.f32 %v9770_v38, %v5013_v43  ;;  %v5530_v47 = vpop.f32.mrb[24].mxu1  ;;  %v5978_v28 = vld [vmem:[#allocation4 + $0x150] ss:$2 sm:$0xff]  ;;  %v5982_v10 = vld [vmem:[#allocation4 + $0x151] ss:$2 sm:$0xff] }
 0x591   : > { %v7230_v34 = vadd.f32 %v9747_v62, %v5530_v47  ;;  %v7016_v60 = vpop.f32.mrb[25].mxu1  ;;  %v5993_v12 = vmax.f32 %v5978_v28, %v5982_v10 }
 0x592   : > { %5792 = vst.msk [vmem:[#allocation4 + $0x160] sm:$0xff] %vm5747_vm8, %v5693_v39  ;;  %v5694_v35 = vmax.f32 %v5438_v13, 0.0  ;;  %v5533_v45 = vpop.f32.mrb[26].mxu1 }
 0x593   : > { %v5717_v14 = vmax.f32 %v7230_v34, 0.0  ;;  %v7231_v42 = vadd.f32 %v9747_v62, %v5533_v45  ;;  %v7017_v1 = vpop.f32.mrb[27].mxu1 }
 0x594   : > { %5793 = vst.msk [vmem:[#allocation4 + $0x168] sm:$0xff] %vm5747_vm8, %v5694_v35 }
 0x595   : > { %5816 = vst.msk [vmem:[#allocation4 + $0x220] sm:$0xff] %vm5747_vm8, %v5717_v14  ;;  %v5718_v36 = vmax.f32 %v7231_v42, 0.0 }
 0x597   : > { %5817 = vst.msk [vmem:[#allocation4 + $0x228] sm:$0xff] %vm5747_vm8, %v5718_v36 }
 0x598   : > { %v5017_v38 = vpop.f32.mrb[32].mxu0  ;;  %v5538_v49 = vpop.f32.mrb[28].mxu1 }
 0x599   : > { %v5018_v11 = vadd.f32 %v9747_v62, %v5017_v38  ;;  %v5019_v37 = vpop.f32.mrb[33].mxu0  ;;  %v7232_v23 = vadd.f32 %v9747_v62, %v5538_v49  ;;  %v7020_v8 = vpop.f32.mrb[29].mxu1 }
 0x59a   : > { %v5020_v4 = vpop.f32.mrb[34].mxu0  ;;  %v5541_v59 = vpop.f32.mrb[30].mxu1 }
 0x59b   : > { %v5443_v20 = vadd.f32 %v9778_v48, %v5018_v11  ;;  %v5021_v63 = vadd.f32 %v9747_v62, %v5020_v4  ;;  %v5022_v27 = vpop.f32.mrb[35].mxu0  ;;  %v5719_v18 = vmax.f32 %v7232_v23, 0.0  ;;  %v7233_v21 = vadd.f32 %v9747_v62, %v5541_v59  ;;  %v7021_v3 = vpop.f32.mrb[31].mxu1 }
 0x59d   : > { %v5695_v25 = vmax.f32 %v5443_v20, 0.0  ;;  %v5446_v31 = vadd.f32 %v9784_v51, %v5021_v63  ;;  %5818 = vst.msk [vmem:[#allocation4 + $0x230] sm:$0xff] %vm5747_vm8, %v5719_v18  ;;  %v5720_v15 = vmax.f32 %v7233_v21, 0.0 }
 0x59f   : > { %5794 = vst.msk [vmem:[#allocation4 + $0x170] sm:$0xff] %vm5747_vm8, %v5695_v25  ;;  %v5696_v32 = vmax.f32 %v5446_v31, 0.0  ;;  %5819 = vst.msk [vmem:[#allocation4 + $0x238] sm:$0xff] %vm5747_vm8, %v5720_v15 }
 0x5a0   : > { %v5546_v48 = vpop.f32.mrb[32].mxu1 }
 0x5a1   : > { %5795 = vst.msk [vmem:[#allocation4 + $0x178] sm:$0xff] %vm5747_vm8, %v5696_v32  ;;  %v7234_v2 = vadd.f32 %v9747_v62, %v5546_v48  ;;  %v7024_v16 = vpop.f32.mrb[33].mxu1 }
 0x5a2   : > { %v5549_v6 = vpop.f32.mrb[34].mxu1 }
 0x5a3   : > { %v5721_v17 = vmax.f32 %v7234_v2, 0.0  ;;  %v7235_v29 = vadd.f32 %v9747_v62, %v5549_v6  ;;  %v5025_v19 = vpop.f32.mrb[36].mxu0  ;;  %v7025_v51 = vpop.f32.mrb[35].mxu1 }
 0x5a4   : > { %v5026_v56 = vadd.f32 %v9747_v62, %v5025_v19  ;;  %v5027_v24 = vpop.f32.mrb[37].mxu0 }
 0x5a5   : > { %5820 = vst.msk [vmem:[#allocation4 + $0x240] sm:$0xff] %vm5747_vm8, %v5721_v17  ;;  %v5722_v44 = vmax.f32 %v7235_v29, 0.0  ;;  %v5028_v0 = vpop.f32.mrb[38].mxu0 }
 0x5a6   : > { %v5451_v50 = vadd.f32 %v9789_v9, %v5026_v56  ;;  %v5029_v5 = vadd.f32 %v9747_v62, %v5028_v0  ;;  %v5030_v41 = vpop.f32.mrb[39].mxu0 }
 0x5a7   : > { %5821 = vst.msk [vmem:[#allocation4 + $0x248] sm:$0xff] %vm5747_vm8, %v5722_v44 }
 0x5a8   : > { %v5986_v40 = vld [vmem:[#allocation4 + $0x16c] ss:$2 sm:$0xff]  ;;  %v5990_v30 = vld [vmem:[#allocation4 + $0x16d] ss:$2 sm:$0xff]  ;;  %v5697_v61 = vmax.f32 %v5451_v50, 0.0  ;;  %v5454_v46 = vadd.f32 %v9791_v52, %v5029_v5  ;;  %v5554_v54 = vpop.f32.mrb[36].mxu1 }
 0x5a9   : > { %v5995_v43 = vmax.f32 %v5986_v40, %v5990_v30  ;;  %v7236_v33 = vadd.f32 %v9747_v62, %v5554_v54  ;;  %v7028_v55 = vpop.f32.mrb[37].mxu1 }
 0x5aa   : > { %5796 = vst.msk [vmem:[#allocation4 + $0x180] sm:$0xff] %vm5747_vm8, %v5697_v61  ;;  %v5698_v39 = vmax.f32 %v5454_v46, 0.0  ;;  %v5557_v9 = vpop.f32.mrb[38].mxu1 }
 0x5ab   : > { %v5997_v13 = vmax.f32 %v5993_v12, %v5995_v43  ;;  %v5723_v47 = vmax.f32 %v7236_v33, 0.0  ;;  %v7237_v34 = vadd.f32 %v9747_v62, %v5557_v9  ;;  %v7029_v60 = vpop.f32.mrb[39].mxu1 }
 0x5ac   : > { %5797 = vst.msk [vmem:[#allocation4 + $0x188] sm:$0xff] %vm5747_vm8, %v5698_v39 }
 0x5ad   : > { %v6566_v35 = vpack.c.bf16 %v5997_v13, %v5997_v13  ;;  %5822 = vst.msk [vmem:[#allocation4 + $0x250] sm:$0xff] %vm5747_vm8, %v5723_v47  ;;  %v5724_v52 = vmax.f32 %v7237_v34, 0.0 }
 0x5af   : > { %6232 = vrot.lane.b32.xlu0 %v6566_v35, %s7572_s26  ;;  %5823 = vst.msk [vmem:[#allocation4 + $0x258] sm:$0xff] %vm5747_vm8, %v5724_v52 }
 0x5b0   : > { %v5033_v45 = vpop.f32.mrb[40].mxu0  ;;  %v5562_v1 = vpop.f32.mrb[40].mxu1 }
 0x5b1   : > { %v5034_v14 = vadd.f32 %v9747_v62, %v5033_v45  ;;  %v5035_v42 = vpop.f32.mrb[41].mxu0  ;;  %v7238_v36 = vadd.f32 %v9747_v62, %v5562_v1  ;;  %v7032_v11 = vpop.f32.mrb[41].mxu1  ;;  %v6054_v1 = vld [vmem:[#allocation4 + $0x224] ss:$2 sm:$0xf] }
 0x5b2   : > { %v5036_v38 = vpop.f32.mrb[42].mxu0  ;;  %v5565_v4 = vpop.f32.mrb[42].mxu1  ;;  %v6056_v42 = vld [vmem:[#allocation4 + $0x215] ss:$2 sm:$0xff]  ;;  %v6044_v11 = vld [vmem:[#allocation4 + $0x1f8] ss:$2 sm:$0xff] }
 0x5b3   : > { %v5459_v37 = vadd.f32 %v9797_v58, %v5034_v14  ;;  %v5037_v49 = vadd.f32 %v9747_v62, %v5036_v38  ;;  %v5038_v23 = vpop.f32.mrb[43].mxu0  ;;  %v5725_v8 = vmax.f32 %v7238_v36, 0.0  ;;  %v7239_v20 = vadd.f32 %v9747_v62, %v5565_v4  ;;  %v7033_v63 = vpop.f32.mrb[43].mxu1  ;;  %v6058_v36 = vld [vmem:[#allocation4 + $0x225] ss:$2 sm:$0xf] }
 0x5b4   : > { %v5988_v38 = vld [vmem:[#allocation4 + $0x17c] ss:$2 sm:$0xf]  ;;  %v9944_v23 = vld [vmem:[#allocation4 + $0x1c1] ss:$2 sm:$0xff] }
 0x5b5   : > { %v5699_v27 = vmax.f32 %v5459_v37, 0.0  ;;  %v5462_v59 = vadd.f32 %v9800_v57, %v5037_v49  ;;  %5824 = vst.msk [vmem:[#allocation4 + $0x260] sm:$0xff] %vm5747_vm8, %v5725_v8  ;;  %v5726_v18 = vmax.f32 %v7239_v20, 0.0  ;;  %v9942_v49 = vld [vmem:[#allocation4 + $0x1c0] ss:$2 sm:$0xff] }
 0x5b6   : > { %v6048_v4 = vld [vmem:[#allocation4 + $0x1f9] ss:$2 sm:$0xff]  ;;  %v6046_v8 = vld [vmem:[#allocation4 + $0x208] ss:$2 sm:$0xf] }
 0x5b7   : > { %5798 = vst.msk [vmem:[#allocation4 + $0x190] sm:$0xff] %vm5747_vm8, %v5699_v27  ;;  %v5700_v21 = vmax.f32 %v5462_v59, 0.0  ;;  %5825 = vst.msk [vmem:[#allocation4 + $0x268] sm:$0xff] %vm5747_vm8, %v5726_v18  ;;  %v6050_v20 = vld [vmem:[#allocation4 + $0x209] ss:$2 sm:$0xf] }
 0x5b8   : > { %v5570_v58 = vpop.f32.mrb[44].mxu1  ;;  %v5980_v27 = vld [vmem:[#allocation4 + $0x160] ss:$2 sm:$0xf] }
 0x5b9   : > { %5799 = vst.msk [vmem:[#allocation4 + $0x198] sm:$0xff] %vm5747_vm8, %v5700_v21  ;;  %v7240_v3 = vadd.f32 %v9747_v62, %v5570_v58  ;;  %v7036_v25 = vpop.f32.mrb[45].mxu1  ;;  %v5984_v59 = vld [vmem:[#allocation4 + $0x161] ss:$2 sm:$0xf] }
 0x5ba   : > { %v5573_v31 = vpop.f32.mrb[46].mxu1 }
 0x5bb   : > { %v5727_v15 = vmax.f32 %v7240_v3, 0.0  ;;  %v7241_v32 = vadd.f32 %v9747_v62, %v5573_v31  ;;  %v5041_v48 = vpop.f32.mrb[44].mxu0  ;;  %v7037_v57 = vpop.f32.mrb[47].mxu1  ;;  %v6030_v31 = vld [vmem:[#allocation4 + $0x1dc] ss:$2 sm:$0xff] }
 0x5bc   : > { %v5042_v2 = vadd.f32 %v9747_v62, %v5041_v48  ;;  %v5043_v16 = vpop.f32.mrb[45].mxu0 }
 0x5bd   : > { %5826 = vst.msk [vmem:[#allocation4 + $0x270] sm:$0xff] %vm5747_vm8, %v5727_v15  ;;  %v5728_v6 = vmax.f32 %v7241_v32, 0.0  ;;  %v5044_v17 = vpop.f32.mrb[46].mxu0  ;;  %v6032_v15 = vld [vmem:[#allocation4 + $0x1ec] ss:$2 sm:$0xf]  ;;  %v6062_v16 = vmax.f32 %v6054_v1, %v6058_v36 }
 0x5be   : > { %v5467_v29 = vadd.f32 %v9804_v22, %v5042_v2  ;;  %v5045_v19 = vadd.f32 %v9747_v62, %v5044_v17  ;;  %v5046_v51 = vpop.f32.mrb[47].mxu0  ;;  %v6000_v18 = vld [vmem:[#allocation4 + $0x188] ss:$2 sm:$0xff]  ;;  %v6004_v21 = vld [vmem:[#allocation4 + $0x189] ss:$2 sm:$0xff]  ;;  %v6059_v2 = vmax.f32 %v6044_v11, %v6048_v4 }
 0x5bf   : > { %5827 = vst.msk [vmem:[#allocation4 + $0x278] sm:$0xff] %vm5747_vm8, %v5728_v6  ;;  %v6036_v32 = vld [vmem:[#allocation4 + $0x1ed] ss:$2 sm:$0xf]  ;;  %v6015_v17 = vmax.f32 %v6000_v18, %v6004_v21 }
 0x5c0   : > { %v5701_v56 = vmax.f32 %v5467_v29, 0.0  ;;  %v5470_v24 = vadd.f32 %v9808_v53, %v5045_v19  ;;  %v5578_v44 = vpop.f32.mrb[48].mxu1  ;;  %v6002_v3 = vld [vmem:[#allocation4 + $0x198] ss:$2 sm:$0xf] }
 0x5c1   : > { %v7242_v0 = vadd.f32 %v9747_v62, %v5578_v44  ;;  %v7040_v28 = vpop.f32.mrb[49].mxu1  ;;  %v6006_v25 = vld [vmem:[#allocation4 + $0x199] ss:$2 sm:$0xf] }
 0x5c2   : > { %5800 = vst.msk [vmem:[#allocation4 + $0x1a0] sm:$0xff] %vm5747_vm8, %v5701_v56  ;;  %v5702_v10 = vmax.f32 %v5470_v24, 0.0  ;;  %v5581_v50 = vpop.f32.mrb[50].mxu1  ;;  %v6034_v19 = vld [vmem:[#allocation4 + $0x1dd] ss:$2 sm:$0xff] }
 0x5c3   : > { %v5729_v5 = vmax.f32 %v7242_v0, 0.0  ;;  %v7243_v41 = vadd.f32 %v9747_v62, %v5581_v50  ;;  %v7041_v22 = vpop.f32.mrb[51].mxu1  ;;  %v6024_v51 = vld [vmem:[#allocation4 + $0x1d0] ss:$2 sm:$0xf] }
 0x5c4   : > { %5801 = vst.msk [vmem:[#allocation4 + $0x1a8] sm:$0xff] %vm5747_vm8, %v5702_v10  ;;  %v6028_v56 = vld [vmem:[#allocation4 + $0x1d1] ss:$2 sm:$0xf]  ;;  %v6037_v10 = vmax.f32 %v9942_v49, %v9944_v23  ;;  %v5994_v22 = vmax.f32 %v5980_v27, %v5984_v59 }
 0x5c5   : > { %5828 = vst.msk [vmem:[#allocation4 + $0x280] sm:$0xff] %vm5747_vm8, %v5729_v5  ;;  %v5730_v40 = vmax.f32 %v7243_v41, 0.0  ;;  %v6060_v5 = vmax.f32 %v6046_v8, %v6050_v20  ;;  %v6080_v4 = vld [vmem:[#allocation4 + $0x25d] ss:$2 sm:$0xf] }
 0x5c6   : > { %v6070_v27 = vld [vmem:[#allocation4 + $0x231] ss:$2 sm:$0xff] }
 0x5c7   : > { %5829 = vst.msk [vmem:[#allocation4 + $0x288] sm:$0xff] %vm5747_vm8, %v5730_v40 }
 0x5c8   : > { %v5049_v53 = vpop.f32.mrb[48].mxu0  ;;  %v5586_v46 = vpop.f32.mrb[52].mxu1 }
 0x5c9   : > { %v5050_v30 = vadd.f32 %v9747_v62, %v5049_v53  ;;  %v5051_v61 = vpop.f32.mrb[49].mxu0  ;;  %v7244_v54 = vadd.f32 %v9747_v62, %v5586_v46  ;;  %v7044_v43 = vpop.f32.mrb[53].mxu1  ;;  %v6016_v53 = vmax.f32 %v6002_v3, %v6006_v25  ;;  %v6068_v3 = vld [vmem:[#allocation4 + $0x240] ss:$2 sm:$0xf] }
 0x5ca   : > { %v5052_v12 = vpop.f32.mrb[50].mxu0  ;;  %v5589_v9 = vpop.f32.mrb[54].mxu1  ;;  %v6088_v61 = vld [vmem:[#allocation4 + $0x268] ss:$2 sm:$0xff]  ;;  %v6040_v43 = vmax.f32 %v6032_v15, %v6036_v32 }
 0x5cb   : > { %v5475_v33 = vadd.f32 %v9813_v26, %v5050_v30  ;;  %v5053_v55 = vadd.f32 %v9747_v62, %v5052_v12  ;;  %v5054_v39 = vpop.f32.mrb[51].mxu0  ;;  %v5731_v13 = vmax.f32 %v7244_v54, 0.0  ;;  %v7245_v47 = vadd.f32 %v9747_v62, %v5589_v9  ;;  %v7045_v34 = vpop.f32.mrb[55].mxu1  ;;  %v6052_v26 = vld [vmem:[#allocation4 + $0x214] ss:$2 sm:$0xff] }
 0x5cc   : > { %v6061_v58 = vmax.f32 %v6052_v26, %v6056_v42  ;;  %v6039_v12 = vmax.f32 %v6030_v31, %v6034_v19  ;;  %v6038_v26 = vmax.f32 %v6024_v51, %v6028_v56  ;;  %v6094_v42 = vld [vmem:[#allocation4 + $0x279] ss:$2 sm:$0xf]  ;;  %v6072_v25 = vld [vmem:[#allocation4 + $0x241] ss:$2 sm:$0xf] }
 0x5cd   : > { %v5703_v60 = vmax.f32 %v5475_v33, 0.0  ;;  %v5478_v35 = vadd.f32 %v9815_v7, %v5053_v55  ;;  %5830 = vst.msk [vmem:[#allocation4 + $0x290] sm:$0xff] %vm5747_vm8, %v5731_v13  ;;  %v5732_v52 = vmax.f32 %v7245_v47, 0.0  ;;  %v5992_v7 = vld [vmem:[#allocation4 + $0x17d] ss:$2 sm:$0xf]  ;;  %v6064_v33 = vmax.f32 %v6060_v5, %v6062_v16 }
 0x5ce   : > { %v5996_v6 = vmax.f32 %v5988_v38, %v5992_v7  ;;  %v6063_v50 = vmax.f32 %v6059_v2, %v6061_v58  ;;  %v6092_v55 = vld [vmem:[#allocation4 + $0x269] ss:$2 sm:$0xff]  ;;  %v6076_v38 = vld [vmem:[#allocation4 + $0x25c] ss:$2 sm:$0xf]  ;;  %v6041_v49 = vmax.f32 %v6037_v10, %v6039_v12  ;;  %v6042_v23 = vmax.f32 %v6038_v26, %v6040_v43 }
 0x5cf   : > { %5802 = vst.msk [vmem:[#allocation4 + $0x1b0] sm:$0xff] %vm5747_vm8, %v5703_v60  ;;  %v5704_v45 = vmax.f32 %v5478_v35, 0.0  ;;  %5831 = vst.msk [vmem:[#allocation4 + $0x298] sm:$0xff] %vm5747_vm8, %v5732_v52  ;;  %v6074_v60 = vld [vmem:[#allocation4 + $0x24c] ss:$2 sm:$0xff]  ;;  %v6103_v11 = vmax.f32 %v6088_v61, %v6092_v55  ;;  %v6190_v20 = vrot.slane %v6064_v33, 4  ;;  %v6084_v32 = vmax.f32 %v6076_v38, %v6080_v4 }
 0x5d0   : > { %v5594_v14 = vpop.f32.mrb[56].mxu1  ;;  %v5998_v13 = vmax.f32 %v5994_v22, %v5996_v6  ;;  %v6090_v52 = vld [vmem:[#allocation4 + $0x278] ss:$2 sm:$0xf]  ;;  %v6569_v2 = vpack.c.bf16 %v6041_v49, %v6041_v49 }
 0x5d1   : > { %5803 = vst.msk [vmem:[#allocation4 + $0x1b8] sm:$0xff] %vm5747_vm8, %v5704_v45  ;;  %v7048_v62 = vpop.f32.mrb[57].mxu1  ;;  %v6189_v14 = vrot.slane %v6063_v50, 4  ;;  %v6104_v18 = vmax.f32 %v6090_v52, %v6094_v42 }
 0x5d2   : > { %v5597_v37 = vpop.f32.mrb[58].mxu1  ;;  %v6078_v62 = vld [vmem:[#allocation4 + $0x24d] ss:$2 sm:$0xff] }
 0x5d3   : > { %v7049_v63 = vpop.f32.mrb[59].mxu1  ;;  %v6083_v58 = vmax.f32 %v6074_v60, %v6078_v62  ;;  %v6202_v15 = vsel %vm774_vm0, %v6042_v23, %v6189_v14 }
 0x5d4   : > { %v6096_v24 = vld [vmem:[#allocation4 + $0x284] ss:$2 sm:$0xff]  ;;  %v6100_v44 = vld [vmem:[#allocation4 + $0x285] ss:$2 sm:$0xff]  ;;  %v6570_v56 = vpack.c.bf16 %v6202_v15, %v6202_v15 }
 0x5d5   : > { %v6105_v35 = vmax.f32 %v6096_v24, %v6100_v44  ;;  %v6066_v63 = vld [vmem:[#allocation4 + $0x230] ss:$2 sm:$0xff] }
 0x5d6   : > { %v6008_v48 = vld [vmem:[#allocation4 + $0x1a4] ss:$2 sm:$0xff]  ;;  %v6012_v57 = vld [vmem:[#allocation4 + $0x1a5] ss:$2 sm:$0xff]  ;;  %v6081_v16 = vmax.f32 %v6066_v63, %v6070_v27 }
 0x5d7   : > { %v6017_v29 = vmax.f32 %v6008_v48, %v6012_v57  ;;  %v6098_v46 = vld [vmem:[#allocation4 + $0x294] ss:$2 sm:$0xf]  ;;  %v6102_v39 = vld [vmem:[#allocation4 + $0x295] ss:$2 sm:$0xf]  ;;  %v6107_v59 = vmax.f32 %v6103_v11, %v6105_v35 }
 0x5d8   : > { %v6010_v0 = vld [vmem:[#allocation4 + $0x1b4] ss:$2 sm:$0xf]  ;;  %v6014_v28 = vld [vmem:[#allocation4 + $0x1b5] ss:$2 sm:$0xf]  ;;  %v6106_v37 = vmax.f32 %v6098_v46, %v6102_v39  ;;  %v6085_v24 = vmax.f32 %v6081_v16, %v6083_v58 }
 0x5d9   : > { %v5602_v41 = vpop.f32.mrb[60].mxu1  ;;  %v6019_v40 = vmax.f32 %v6015_v17, %v6017_v29  ;;  %v6018_v30 = vmax.f32 %v6010_v0, %v6014_v28  ;;  %v6191_v17 = vsel %vm774_vm0, %v6189_v14, %v6190_v20  ;;  %v6082_v29 = vmax.f32 %v6068_v3, %v6072_v25 }
 0x5da   : > { %v7052_v54 = vpop.f32.mrb[61].mxu1  ;;  %v6108_v48 = vmax.f32 %v6104_v18, %v6106_v37  ;;  %v6196_v19 = vrot.slane %v6107_v59, 4  ;;  %v6571_v28 = vpack.c.bf16 %v6191_v17, %v6191_v17  ;;  %v6572_v50 = vpack.c.bf16 %v6085_v24, %v6085_v24 }
 0x5db   : > { %v5605_v9 = vpop.f32.mrb[62].mxu1  ;;  %v6182_v47 = vrot.slane %v6019_v40, 4  ;;  %v6020_v34 = vmax.f32 %v6016_v53, %v6018_v30  ;;  %v6086_v44 = vmax.f32 %v6082_v29, %v6084_v32 }
 0x5dc   : > { %v7053_v45 = vpop.f32.mrb[63].mxu1  ;;  %v6197_v0 = vrot.slane %v6108_v48, 4 }
 0x5dd   : > { %v6201_v1 = vsel %vm774_vm0, %v5998_v13, %v6182_v47  ;;  %v6183_v36 = vrot.slane %v6020_v34, 4  ;;  %v6203_v10 = vsel %vm774_vm0, %v6086_v44, %v6196_v19 }
 0x5de   : > { %v6567_v7 = vpack.c.bf16 %v6201_v1, %v6201_v1  ;;  %v6198_v41 = vsel %vm774_vm0, %v6196_v19, %v6197_v0  ;;  %v6573_v40 = vpack.c.bf16 %v6203_v10, %v6203_v10 }
 0x5df   : > { %v6184_v8 = vsel %vm774_vm0, %v6182_v47, %v6183_v36  ;;  %v6574_v61 = vpack.c.bf16 %v6198_v41, %v6198_v41 }
 0x5e0   : > { %6234 = vrot.lane.b32.xlu1 %v6567_v7, %s7572_s26  ;;  %v6568_v21 = vpack.c.bf16 %v6184_v8, %v6184_v8  ;;  %v5610_v31 = vpop.f32.mrb[64].mxu1 }
 0x5e1   : > { %v7056_v57 = vpop.f32.mrb[65].mxu1 }
 0x5e2   : > { %6236 = vrot.lane.b32.xlu0 %v6568_v21, %s7572_s26  ;;  %v5613_v6 = vpop.f32.mrb[66].mxu1 }
 0x5e3   : > { %v7057_v51 = vpop.f32.mrb[67].mxu1 }
 0x5e4   : > { %6238 = vrot.lane.b32.xlu1 %v6569_v2, %s7572_s26 }
 0x5e6   : > { %6240 = vrot.lane.b32.xlu0 %v6570_v56, %s7572_s26 }
 0x5e8   : > { %6242 = vrot.lane.b32.xlu1 %v6571_v28, %s7572_s26  ;;  %v5618_v5 = vpop.f32.mrb[68].mxu1 }
 0x5e9   : > { %v7060_v22 = vpop.f32.mrb[69].mxu1 }
 0x5ea   : > { %6244 = vrot.lane.b32.xlu0 %v6572_v50, %s7572_s26  ;;  %v5621_v53 = vpop.f32.mrb[70].mxu1 }
 0x5eb   : > { %v7061_v30 = vpop.f32.mrb[71].mxu1 }
 0x5ec   : > { %6246 = vrot.lane.b32.xlu1 %v6573_v40, %s7572_s26 }
 0x5ee   : > { %6248 = vrot.lane.b32.xlu0 %v6574_v61, %s7572_s26 }
 0x5f0   : > { %v5626_v46 = vpop.f32.mrb[72].mxu1 }
 0x5f1   : > { %v7064_v54 = vpop.f32.mrb[73].mxu1 }
 0x5f2   : > { %v5629_v12 = vpop.f32.mrb[74].mxu1 }
 0x5f3   : > { %v7065_v43 = vpop.f32.mrb[75].mxu1 }
 0x5f8   : > { %v5634_v33 = vpop.f32.mrb[76].mxu1 }
 0x5f9   : > { %v7068_v55 = vpop.f32.mrb[77].mxu1 }
 0x5fa   : > { %v5637_v39 = vpop.f32.mrb[78].mxu1 }
 0x5fb   : > { %v7069_v9 = vpop.f32.mrb[79].mxu1 }
 0x600   : > { %v5642_v13 = vpop.f32.mrb[80].mxu1 }
 0x601   : > { %v7072_v47 = vpop.f32.mrb[81].mxu1 }
 0x602   : > { %v5645_v34 = vpop.f32.mrb[82].mxu1 }
 0x603   : > { %v7073_v60 = vpop.f32.mrb[83].mxu1 }
 0x621   : > { %v6233_v35 = vpop.permute.xlu0 %6232 }
 0x622   : > { %6260 = vst.msk [vmem:[%s9547_s27] sm:$0xf] %vm6259_vm10, %v6233_v35 }
 0x652   : > { %v6235_v52 = vpop.permute.xlu1 %6234 }
 0x653   : > { %6261 = vst.msk [vmem:[%s9547_s27 + $0x4] sm:$0xf] %vm6259_vm10, %v6235_v52 }
 0x654   : > { %v6237_v45 = vpop.permute.xlu0 %6236 }
 0x655   : > { %6262 = vst.msk [vmem:[%s9547_s27 + $0x8] sm:$0xf] %vm6259_vm10, %v6237_v45 }
 0x656   : > { %v6239_v26 = vpop.permute.xlu1 %6238 }
 0x657   : > { %6263 = vst.msk [vmem:[%s9547_s27 + $0xc] sm:$0xf] %vm6259_vm10, %v6239_v26 }
 0x658   : > { %v6241_v14 = vpop.permute.xlu0 %6240 }
 0x659   : > { %6264 = vst.msk [vmem:[%s9547_s27 + $0x10] sm:$0xf] %vm6259_vm10, %v6241_v14 }
 0x65a   : > { %v6243_v42 = vpop.permute.xlu1 %6242 }
 0x65b   : > { %6265 = vst.msk [vmem:[%s9547_s27 + $0x14] sm:$0xf] %vm6259_vm10, %v6243_v42 }
 0x65c   : > { %v6245_v1 = vpop.permute.xlu0 %6244 }
 0x65d   : > { %6266 = vst.msk [vmem:[%s9547_s27 + $0x18] sm:$0xf] %vm6259_vm10, %v6245_v1 }
 0x65e   : > { %v6247_v36 = vpop.permute.xlu1 %6246 }
 0x65f   : > { %6267 = vst.msk [vmem:[%s9547_s27 + $0x1c] sm:$0xf] %vm6259_vm10, %v6247_v36 }
 0x660   : > { %v6249_v62 = vpop.permute.xlu0 %6248 }
 0x661   : > { %6268 = vst.msk [vmem:[%s9547_s27 + $0x20] sm:$0xf] %vm6259_vm10, %v6249_v62 }
 0x662 PF: > { %s17_s18 = sadd.s32 1, %s7562_s18  }
 0x663   : > { %p14_p10 = scmp.ge.s32.totalorder %s17_s18, 4  }
 0x665   :  { %16 = sbr.rel (!%p14_p10) target bundleno = 2 (0x2), region = 178 }
 0x66c   :  { %6291 = vsyncpa [#allocation6], 1 }
 0x66d   :  { %6293 = vsyncpa [#allocation6 + $0x1], 1 }
 0x66e   :  { %6294 = vsyncpa [#allocation8], 1 }

</bundles_post_ra>
